<compile_context>
chip_gen: v7x
topology: tpu7x:2x2x1
jax: 0.10.0
libtpu: 0.0.40
codegen_flags: <defaults>
</compile_context>

<pallas_src>
import functools

import jax
import jax.numpy as jnp
from jax.experimental import pallas as pl
from jax.experimental.pallas import tpu as pltpu


BN_EPS = 1e-5
VMEM_LIMIT_BYTES = 32 * 1024 * 1024   # explicit scoped-VMEM limit (all gens)


# ----------------------------------------------------------------------------
# Pallas kernel 1: single-shot conv-as-GEMM + training-mode BatchNorm + ReLU
#   K (= Cin*kh*kw) always fits in one tile for this model (256 / 512 / 288),
#   so there is no K grid loop, no zero-init and no accumulator RMW.
# ----------------------------------------------------------------------------
def conv_gemm_bn_relu_kernel(x_ref, w_ref, gb_ref, o_ref, *, eps):
    y = jnp.dot(x_ref[...], w_ref[...], preferred_element_type=jnp.float32)
    # Training-mode BN over M (= batch * spatial).  The conv bias is constant
    # per channel and cancelled by the mean subtraction -> never added.
    mean = jnp.mean(y, axis=0, keepdims=True)
    d = y - mean
    var = jnp.mean(d * d, axis=0, keepdims=True)          # biased (PyTorch)
    scale = gb_ref[0:1, :] * jax.lax.rsqrt(var + eps)
    y = d * scale + gb_ref[1:2, :]
    o_ref[...] = jnp.maximum(y, 0.0).astype(o_ref.dtype)  # bf16 activation out


# ----------------------------------------------------------------------------
# Pallas kernel 2: fused dense head
#   h = relu(BN4(x @ w4));  out = h @ w5 + b5        (single pallas_call)
#   K = 6400 is tiled (2 steps) only to keep the w4 HBM stream double-buffered.
# ----------------------------------------------------------------------------
def dense_head_kernel(x_ref, w4_ref, gb4_ref, w5_ref, b5_ref, o_ref,
                      h_acc, *, eps):
    k = pl.program_id(0)
    partial = jnp.dot(x_ref[...], w4_ref[...],
                      preferred_element_type=jnp.float32)

    @pl.when(k == 0)
    def _first():
        h_acc[...] = partial           # direct assign: no zeros store / RMW

    @pl.when(k > 0)
    def _accum():
        h_acc[...] += partial

    @pl.when(k == pl.num_programs(0) - 1)
    def _finish():
        h = h_acc[...]
        mean = jnp.mean(h, axis=0, keepdims=True)
        d = h - mean
        var = jnp.mean(d * d, axis=0, keepdims=True)
        h = d * (gb4_ref[0:1, :] * jax.lax.rsqrt(var + eps)) + gb4_ref[1:2, :]
        h = jnp.maximum(h, 0.0)
        o_ref[...] = (jnp.dot(h.astype(jnp.bfloat16), w5_ref[...],
                              preferred_element_type=jnp.float32)
                      + b5_ref[...]).astype(o_ref.dtype)


# ----------------------------------------------------------------------------
# Wrappers
# ----------------------------------------------------------------------------
def _pick_tk(K, cap):
    """Full K if it fits under `cap`, else the largest multiple-of-128 divisor
    of K that is <= cap (fallback: full K)."""
    if K <= cap:
        return K
    for tk in range(cap - cap % 128, 0, -128):
        if K % tk == 0:
            return tk
    return K


def conv_gemm_bn_relu(x, w, gb, *, eps=BN_EPS):
    """x: [M, K] bf16 patches, w: [K, N] bf16, gb: [2, N] f32 -> [M, N] bf16."""
    M, K = x.shape
    K2, N = w.shape
    assert K == K2
    assert K <= 2048, "conv K tile assumed single-shot for this model"

    cost = pl.CostEstimate(
        flops=2 * M * K * N,
        transcendentals=0,
        bytes_accessed=M * K * 2 + K * N * 2 + M * N * 2 + 2 * N * 4)

    return pl.pallas_call(
        functools.partial(conv_gemm_bn_relu_kernel, eps=eps),
        out_shape=jax.ShapeDtypeStruct((M, N), jnp.bfloat16),
        grid_spec=pltpu.PrefetchScalarGridSpec(
            num_scalar_prefetch=0,
            grid=(1,),
            in_specs=[
                pl.BlockSpec((M, K), lambda k: (0, 0)),   # bf16 patches
                pl.BlockSpec((K, N), lambda k: (0, 0)),   # bf16 weight [K, Cout]
                pl.BlockSpec((2, N), lambda k: (0, 0)),   # packed gamma/beta
            ],
            out_specs=pl.BlockSpec((M, N), lambda k: (0, 0)),
        ),
        compiler_params=pltpu.CompilerParams(
            dimension_semantics=("arbitrary",),
            vmem_limit_bytes=VMEM_LIMIT_BYTES),
        cost_estimate=cost,
    )(x, w, gb)


def dense_head(x, w4, gb4, w5, b5, *, eps=BN_EPS):
    """x: [M, 6400] bf16, w4: [6400, 512] bf16, w5: [512, N] bf16 -> [M, N] f32."""
    M, K = x.shape
    K2, H = w4.shape
    H2, N = w5.shape
    assert K == K2 and H == H2
    tk = _pick_tk(K, cap=3200)      # >=2 grid steps keeps w4 double-buffered
    nk = K // tk

    cost = pl.CostEstimate(
        flops=2 * M * K * H + 2 * M * H * N,
        transcendentals=0,
        bytes_accessed=M * K * 2 + K * H * 2 + H * N * 2 + M * N * 4
                       + (2 * H + N) * 4)

    return pl.pallas_call(
        functools.partial(dense_head_kernel, eps=eps),
        out_shape=jax.ShapeDtypeStruct((M, N), jnp.float32),
        grid_spec=pltpu.PrefetchScalarGridSpec(
            num_scalar_prefetch=0,
            grid=(nk,),
            in_specs=[
                pl.BlockSpec((M, tk), lambda k: (0, k)),   # bf16 flat features
                pl.BlockSpec((tk, H), lambda k: (k, 0)),   # dense1 weight
                pl.BlockSpec((2, H), lambda k: (0, 0)),    # packed gamma4/beta4
                pl.BlockSpec((H, N), lambda k: (0, 0)),    # head weight
                pl.BlockSpec((1, N), lambda k: (0, 0)),    # head bias
            ],
            out_specs=pl.BlockSpec((M, N), lambda k: (0, 0)),
            scratch_shapes=[pltpu.VMEM((M, H), jnp.float32)],
        ),
        compiler_params=pltpu.CompilerParams(
            dimension_semantics=("arbitrary",),
            vmem_limit_bytes=VMEM_LIMIT_BYTES),
        cost_estimate=cost,
    )(x, w4, gb4, w5, b5)


# ----------------------------------------------------------------------------
# Glue: patch extraction with a single XLA op (no Python-loop im2col).
# Feature order of conv_general_dilated_patches is Cin-major then (kh, kw),
# matching torch_weight.reshape(Cout, -1).
# ----------------------------------------------------------------------------
def extract_patches(x, kh, kw, stride, pad, *, input_format):
    patches = jax.lax.conv_general_dilated_patches(
        x, filter_shape=(kh, kw), window_strides=(stride, stride),
        padding=((pad, pad), (pad, pad)),
        dimension_numbers=(input_format, 'HWIO', 'NHWC'))
    B, Ho, Wo, K = patches.shape
    return patches.reshape(B * Ho * Wo, K), Ho, Wo


# ----------------------------------------------------------------------------
# Parameters (deterministic synthetic init, PyTorch-layout shapes)
# ----------------------------------------------------------------------------
def init_params(key, num_channels, latent_dim):
    ks = jax.random.split(key, 20)

    def normal(k, shape, scale):
        return jax.random.normal(k, shape, jnp.float32) * scale

    p = {}
    # conv1: Conv2d(num_channels, 32, 8, 4, 0)
    p["w1"] = normal(ks[0], (32, num_channels, 8, 8), (num_channels * 64) ** -0.5)
    p["b1"] = normal(ks[1], (32,), 0.01)          # cancelled by BN1 (training)
    p["g1"] = 1.0 + normal(ks[2], (32,), 0.1)
    p["be1"] = normal(ks[3], (32,), 0.1)
    # conv2: Conv2d(32, 32, 4, 2, 1)
    p["w2"] = normal(ks[4], (32, 32, 4, 4), (32 * 16) ** -0.5)
    p["b2"] = normal(ks[5], (32,), 0.01)          # cancelled by BN2
    p["g2"] = 1.0 + normal(ks[6], (32,), 0.1)
    p["be2"] = normal(ks[7], (32,), 0.1)
    # conv3: Conv2d(32, 64, 3, 1, 1)
    p["w3"] = normal(ks[8], (64, 32, 3, 3), (32 * 9) ** -0.5)
    p["b3"] = normal(ks[9], (64,), 0.01)          # cancelled by BN3
    p["g3"] = 1.0 + normal(ks[10], (64,), 0.1)
    p["be3"] = normal(ks[11], (64,), 0.1)
    # dense1: Linear(6400, 512)
    p["w4"] = normal(ks[12], (512, 6400), 6400 ** -0.5)
    p["b4"] = normal(ks[13], (512,), 0.01)        # cancelled by BN4
    p["g4"] = 1.0 + normal(ks[14], (512,), 0.1)
    p["be4"] = normal(ks[15], (512,), 0.1)
    # dense_means_logVar: Linear(512, latent_dim * 2)
    p["w5"] = normal(ks[16], (latent_dim * 2, 512), 512 ** -0.5)
    p["b5"] = normal(ks[17], (latent_dim * 2,), 0.01)
    return p


def prepare_params(p):
    """One-time (outside-jit) conversion to kernel layouts:
       * conv weights -> [K, Cout] bf16 (K order = Cin-major, matching patches)
       * dense1 weight -> [6400, 512] bf16, columns pre-permuted from torch's
         (C=64,H=10,W=10) flatten order to the NHWC (H,W,C) flatten order
       * head weight -> [512, 2*latent] bf16
       * gamma/beta packed into one (2, N) f32 operand per BN layer.
       Conv / dense1 biases are dropped (exactly cancelled by training-mode BN
       mean subtraction); only the head bias survives."""
    cp = {}
    cp["w1"] = p["w1"].reshape(32, -1).T.astype(jnp.bfloat16)
    cp["gb1"] = jnp.stack([p["g1"], p["be1"]], axis=0)
    cp["w2"] = p["w2"].reshape(32, -1).T.astype(jnp.bfloat16)
    cp["gb2"] = jnp.stack([p["g2"], p["be2"]], axis=0)
    cp["w3"] = p["w3"].reshape(64, -1).T.astype(jnp.bfloat16)
    cp["gb3"] = jnp.stack([p["g3"], p["be3"]], axis=0)
    cp["w4"] = (p["w4"].reshape(512, 64, 10, 10)
                        .transpose(2, 3, 1, 0)
                        .reshape(6400, 512).astype(jnp.bfloat16))
    cp["gb4"] = jnp.stack([p["g4"], p["be4"]], axis=0)
    cp["w5"] = p["w5"].T.astype(jnp.bfloat16)
    cp["b5"] = p["b5"].reshape(1, -1)
    return cp


# ----------------------------------------------------------------------------
# Forward pass (semantics of EncoderLikeDQNWBN.forward, training-mode BN)
# ----------------------------------------------------------------------------
@jax.jit
def encoder_forward(x, cp):
    """x: [B, num_channels, 84, 84] f32 (NCHW, as in PyTorch)."""
    B = x.shape[0]
    x = x.astype(jnp.bfloat16)                  # bf16 activations end-to-end

    # conv1 + BN1 + ReLU   (NCHW input -> NHWC patches, no explicit transpose)
    col, Ho, Wo = extract_patches(x, 8, 8, 4, 0, input_format='NCHW')
    h = conv_gemm_bn_relu(col, cp["w1"], cp["gb1"])
    h = h.reshape(B, Ho, Wo, 32)                # NHWC, bf16

    # conv2 + BN2 + ReLU
    col, Ho, Wo = extract_patches(h, 4, 4, 2, 1, input_format='NHWC')
    h = conv_gemm_bn_relu(col, cp["w2"], cp["gb2"])
    h = h.reshape(B, Ho, Wo, 32)

    # conv3 + BN3 + ReLU
    col, Ho, Wo = extract_patches(h, 3, 3, 1, 1, input_format='NHWC')
    h = conv_gemm_bn_relu(col, cp["w3"], cp["gb3"])

    # Flatten in NHWC (h, w, c) order; w4 was pre-permuted so the semantics of
    # nn.Flatten on NCHW are preserved exactly.
    h = h.reshape(B, Ho * Wo * 64)              # [B, 6400] bf16

    # dense1 + BN4 + ReLU + dense_means_logVar, fused into one pallas_call.
    return dense_head(h, cp["w4"], cp["gb4"], cp["w5"], cp["b5"])


if __name__ == "__main__":
    # Linear(6400, 512) pins the 84x84 DQN input geometry.
    batch, num_channels, latent_dim = 2, 4, 32
    key = jax.random.PRNGKey(0)
    k_x, k_p = jax.random.split(key)

    x = jax.random.normal(k_x, (batch, num_channels, 84, 84), jnp.float32)
    params = init_params(k_p, num_channels, latent_dim)
    kernel_params = prepare_params(params)   # one-time layout / bf16 prep

    out = encoder_forward(x, kernel_params)
    jax.block_until_ready(out)
    assert out.shape == (batch, latent_dim * 2)
    assert out.dtype == jnp.float32
    print("KERNEL_OK")
</pallas_src>

<mosaic_0001>
module attributes {stable_mosaic.version = 11 : i64} {
  func.func @conv_gemm_bn_relu_kernel(%arg0: i32, %arg1: memref<800x256xbf16, #tpu.memory_space<vmem>>, %arg2: memref<256x32xbf16, #tpu.memory_space<vmem>>, %arg3: memref<2x32xf32, #tpu.memory_space<vmem>>, %arg4: memref<800x32xbf16, #tpu.memory_space<vmem>>) attributes {dimension_semantics = [#tpu.dimension_semantics<arbitrary>], iteration_bounds = array<i64: 1>, scalar_prefetch = 0 : i64, scratch_operands = 0 : i64, tpu.core_type = #tpu.core_type<tc>, window_params = [{pipeline_mode = #tpu.pipeline_mode<synchronous>, transform_indices = @transform_0, window_bounds = array<i64: 800, 256>}, {pipeline_mode = #tpu.pipeline_mode<synchronous>, transform_indices = @transform_1, window_bounds = array<i64: 256, 32>}, {pipeline_mode = #tpu.pipeline_mode<synchronous>, transform_indices = @transform_2, window_bounds = array<i64: 2, 32>}, {pipeline_mode = #tpu.pipeline_mode<synchronous>, transform_indices = @transform_3, window_bounds = array<i64: 800, 32>}]} {
    %c0 = arith.constant 0 : index
    %c0_0 = arith.constant 0 : index
    %0 = vector.load %arg1[%c0, %c0_0] : memref<800x256xbf16, #tpu.memory_space<vmem>>, vector<800x256xbf16>
    %c0_1 = arith.constant 0 : index
    %c0_2 = arith.constant 0 : index
    %1 = vector.load %arg2[%c0_1, %c0_2] : memref<256x32xbf16, #tpu.memory_space<vmem>>, vector<256x32xbf16>
    %cst = arith.constant dense<0.000000e+00> : vector<800x32xf32>
    %2 = tpu.matmul %0, %1, %cst {dimension_numbers = #tpu.dot_dimension_numbers<[1], [0], [0], [1], [0, 0, 1, 1], [], []>} : vector<800x256xbf16>, vector<256x32xbf16>, vector<800x32xf32> -> vector<800x32xf32>
    %cst_3 = arith.constant dense<0.000000e+00> : vector<32xf32>
    %3 = vector.multi_reduction <add>, %2, %cst_3 [0] : vector<800x32xf32> to vector<32xf32>
    %4 = vector.shape_cast %3 : vector<32xf32> to vector<1x32xf32>
    %cst_4 = arith.constant 8.000000e+02 : f32
    %5 = vector.broadcast %cst_4 : f32 to vector<1x32xf32>
    %6 = arith.divf %4, %5 : vector<1x32xf32>
    %7 = vector.broadcast %6 : vector<1x32xf32> to vector<800x32xf32>
    %8 = arith.subf %2, %7 : vector<800x32xf32>
    %9 = arith.mulf %8, %8 : vector<800x32xf32>
    %cst_5 = arith.constant dense<0.000000e+00> : vector<32xf32>
    %10 = vector.multi_reduction <add>, %9, %cst_5 [0] : vector<800x32xf32> to vector<32xf32>
    %11 = vector.shape_cast %10 : vector<32xf32> to vector<1x32xf32>
    %cst_6 = arith.constant 8.000000e+02 : f32
    %12 = vector.broadcast %cst_6 : f32 to vector<1x32xf32>
    %13 = arith.divf %11, %12 : vector<1x32xf32>
    %c0_7 = arith.constant 0 : index
    %c0_8 = arith.constant 0 : index
    %14 = vector.load %arg3[%c0_7, %c0_8] : memref<2x32xf32, #tpu.memory_space<vmem>>, vector<1x32xf32>
    %cst_9 = arith.constant 9.99999974E-6 : f32
    %15 = vector.broadcast %cst_9 : f32 to vector<1x32xf32>
    %16 = arith.addf %13, %15 : vector<1x32xf32>
    %17 = math.rsqrt %16 : vector<1x32xf32>
    %18 = arith.mulf %14, %17 : vector<1x32xf32>
    %19 = vector.broadcast %18 : vector<1x32xf32> to vector<800x32xf32>
    %20 = arith.mulf %8, %19 : vector<800x32xf32>
    %c1 = arith.constant 1 : index
    %c0_10 = arith.constant 0 : index
    %21 = vector.load %arg3[%c1, %c0_10] : memref<2x32xf32, #tpu.memory_space<vmem>>, vector<1x32xf32>
    %22 = vector.broadcast %21 : vector<1x32xf32> to vector<800x32xf32>
    %23 = arith.addf %20, %22 : vector<800x32xf32>
    %cst_11 = arith.constant 0.000000e+00 : f32
    %24 = vector.broadcast %cst_11 : f32 to vector<800x32xf32>
    %25 = arith.maximumf %23, %24 : vector<800x32xf32>
    %26 = arith.truncf %25 : vector<800x32xf32> to vector<800x32xbf16>
    %c0_12 = arith.constant 0 : index
    %c0_13 = arith.constant 0 : index
    %27 = vector.load %arg4[%c0_12, %c0_13] : memref<800x32xbf16, #tpu.memory_space<vmem>>, vector<800x32xbf16>
    tpu.vector_store %arg4[%c0_12, %c0_13], %26 {strides = array<i32>} : memref<800x32xbf16, #tpu.memory_space<vmem>>, vector<800x32xbf16>,
    return
  }
  func.func @transform_0(%arg0: i32) -> (i32, i32) {
    %c0_i32 = arith.constant 0 : i32
    %c0_i32_0 = arith.constant 0 : i32
    %c0_i32_1 = arith.constant 0 : i32
    return %c0_i32, %c0_i32_0 : i32, i32
  }
  func.func @transform_1(%arg0: i32) -> (i32, i32) {
    %c0_i32 = arith.constant 0 : i32
    %c0_i32_0 = arith.constant 0 : i32
    %c0_i32_1 = arith.constant 0 : i32
    return %c0_i32, %c0_i32_0 : i32, i32
  }
  func.func @transform_2(%arg0: i32) -> (i32, i32) {
    %c0_i32 = arith.constant 0 : i32
    %c0_i32_0 = arith.constant 0 : i32
    %c0_i32_1 = arith.constant 0 : i32
    return %c0_i32, %c0_i32_0 : i32, i32
  }
  func.func @transform_3(%arg0: i32) -> (i32, i32) {
    %c0_i32 = arith.constant 0 : i32
    %c0_i32_0 = arith.constant 0 : i32
    %c0_i32_1 = arith.constant 0 : i32
    return %c0_i32, %c0_i32_0 : i32, i32
  }
}

module attributes {stable_mosaic.version = 11 : i64} {
  func.func @conv_gemm_bn_relu_kernel(%arg0: i32, %arg1: memref<200x512xbf16, #tpu.memory_space<vmem>>, %arg2: memref<512x32xbf16, #tpu.memory_space<vmem>>, %arg3: memref<2x32xf32, #tpu.memory_space<vmem>>, %arg4: memref<200x32xbf16, #tpu.memory_space<vmem>>) attributes {dimension_semantics = [#tpu.dimension_semantics<arbitrary>], iteration_bounds = array<i64: 1>, scalar_prefetch = 0 : i64, scratch_operands = 0 : i64, tpu.core_type = #tpu.core_type<tc>, window_params = [{pipeline_mode = #tpu.pipeline_mode<synchronous>, transform_indices = @transform_0, window_bounds = array<i64: 200, 512>}, {pipeline_mode = #tpu.pipeline_mode<synchronous>, transform_indices = @transform_1, window_bounds = array<i64: 512, 32>}, {pipeline_mode = #tpu.pipeline_mode<synchronous>, transform_indices = @transform_2, window_bounds = array<i64: 2, 32>}, {pipeline_mode = #tpu.pipeline_mode<synchronous>, transform_indices = @transform_3, window_bounds = array<i64: 200, 32>}]} {
    %c0 = arith.constant 0 : index
    %c0_0 = arith.constant 0 : index
    %0 = vector.load %arg1[%c0, %c0_0] : memref<200x512xbf16, #tpu.memory_space<vmem>>, vector<200x512xbf16>
    %c0_1 = arith.constant 0 : index
    %c0_2 = arith.constant 0 : index
    %1 = vector.load %arg2[%c0_1, %c0_2] : memref<512x32xbf16, #tpu.memory_space<vmem>>, vector<512x32xbf16>
    %cst = arith.constant dense<0.000000e+00> : vector<200x32xf32>
    %2 = tpu.matmul %0, %1, %cst {dimension_numbers = #tpu.dot_dimension_numbers<[1], [0], [0], [1], [0, 0, 1, 1], [], []>} : vector<200x512xbf16>, vector<512x32xbf16>, vector<200x32xf32> -> vector<200x32xf32>
    %cst_3 = arith.constant dense<0.000000e+00> : vector<32xf32>
    %3 = vector.multi_reduction <add>, %2, %cst_3 [0] : vector<200x32xf32> to vector<32xf32>
    %4 = vector.shape_cast %3 : vector<32xf32> to vector<1x32xf32>
    %cst_4 = arith.constant 2.000000e+02 : f32
    %5 = vector.broadcast %cst_4 : f32 to vector<1x32xf32>
    %6 = arith.divf %4, %5 : vector<1x32xf32>
    %7 = vector.broadcast %6 : vector<1x32xf32> to vector<200x32xf32>
    %8 = arith.subf %2, %7 : vector<200x32xf32>
    %9 = arith.mulf %8, %8 : vector<200x32xf32>
    %cst_5 = arith.constant dense<0.000000e+00> : vector<32xf32>
    %10 = vector.multi_reduction <add>, %9, %cst_5 [0] : vector<200x32xf32> to vector<32xf32>
    %11 = vector.shape_cast %10 : vector<32xf32> to vector<1x32xf32>
    %cst_6 = arith.constant 2.000000e+02 : f32
    %12 = vector.broadcast %cst_6 : f32 to vector<1x32xf32>
    %13 = arith.divf %11, %12 : vector<1x32xf32>
    %c0_7 = arith.constant 0 : index
    %c0_8 = arith.constant 0 : index
    %14 = vector.load %arg3[%c0_7, %c0_8] : memref<2x32xf32, #tpu.memory_space<vmem>>, vector<1x32xf32>
    %cst_9 = arith.constant 9.99999974E-6 : f32
    %15 = vector.broadcast %cst_9 : f32 to vector<1x32xf32>
    %16 = arith.addf %13, %15 : vector<1x32xf32>
    %17 = math.rsqrt %16 : vector<1x32xf32>
    %18 = arith.mulf %14, %17 : vector<1x32xf32>
    %19 = vector.broadcast %18 : vector<1x32xf32> to vector<200x32xf32>
    %20 = arith.mulf %8, %19 : vector<200x32xf32>
    %c1 = arith.constant 1 : index
    %c0_10 = arith.constant 0 : index
    %21 = vector.load %arg3[%c1, %c0_10] : memref<2x32xf32, #tpu.memory_space<vmem>>, vector<1x32xf32>
    %22 = vector.broadcast %21 : vector<1x32xf32> to vector<200x32xf32>
    %23 = arith.addf %20, %22 : vector<200x32xf32>
    %cst_11 = arith.constant 0.000000e+00 : f32
    %24 = vector.broadcast %cst_11 : f32 to vector<200x32xf32>
    %25 = arith.maximumf %23, %24 : vector<200x32xf32>
    %26 = arith.truncf %25 : vector<200x32xf32> to vector<200x32xbf16>
    %c0_12 = arith.constant 0 : index
    %c0_13 = arith.constant 0 : index
    %27 = vector.load %arg4[%c0_12, %c0_13] : memref<200x32xbf16, #tpu.memory_space<vmem>>, vector<200x32xbf16>
    tpu.vector_store %arg4[%c0_12, %c0_13], %26 {strides = array<i32>} : memref<200x32xbf16, #tpu.memory_space<vmem>>, vector<200x32xbf16>,
    return
  }
  func.func @transform_0(%arg0: i32) -> (i32, i32) {
    %c0_i32 = arith.constant 0 : i32
    %c0_i32_0 = arith.constant 0 : i32
    %c0_i32_1 = arith.constant 0 : i32
    return %c0_i32, %c0_i32_0 : i32, i32
  }
  func.func @transform_1(%arg0: i32) -> (i32, i32) {
    %c0_i32 = arith.constant 0 : i32
    %c0_i32_0 = arith.constant 0 : i32
    %c0_i32_1 = arith.constant 0 : i32
    return %c0_i32, %c0_i32_0 : i32, i32
  }
  func.func @transform_2(%arg0: i32) -> (i32, i32) {
    %c0_i32 = arith.constant 0 : i32
    %c0_i32_0 = arith.constant 0 : i32
    %c0_i32_1 = arith.constant 0 : i32
    return %c0_i32, %c0_i32_0 : i32, i32
  }
  func.func @transform_3(%arg0: i32) -> (i32, i32) {
    %c0_i32 = arith.constant 0 : i32
    %c0_i32_0 = arith.constant 0 : i32
    %c0_i32_1 = arith.constant 0 : i32
    return %c0_i32, %c0_i32_0 : i32, i32
  }
}

module attributes {stable_mosaic.version = 11 : i64} {
  func.func @conv_gemm_bn_relu_kernel(%arg0: i32, %arg1: memref<200x288xbf16, #tpu.memory_space<vmem>>, %arg2: memref<288x64xbf16, #tpu.memory_space<vmem>>, %arg3: memref<2x64xf32, #tpu.memory_space<vmem>>, %arg4: memref<200x64xbf16, #tpu.memory_space<vmem>>) attributes {dimension_semantics = [#tpu.dimension_semantics<arbitrary>], iteration_bounds = array<i64: 1>, scalar_prefetch = 0 : i64, scratch_operands = 0 : i64, tpu.core_type = #tpu.core_type<tc>, window_params = [{pipeline_mode = #tpu.pipeline_mode<synchronous>, transform_indices = @transform_0, window_bounds = array<i64: 200, 288>}, {pipeline_mode = #tpu.pipeline_mode<synchronous>, transform_indices = @transform_1, window_bounds = array<i64: 288, 64>}, {pipeline_mode = #tpu.pipeline_mode<synchronous>, transform_indices = @transform_2, window_bounds = array<i64: 2, 64>}, {pipeline_mode = #tpu.pipeline_mode<synchronous>, transform_indices = @transform_3, window_bounds = array<i64: 200, 64>}]} {
    %c0 = arith.constant 0 : index
    %c0_0 = arith.constant 0 : index
    %0 = vector.load %arg1[%c0, %c0_0] : memref<200x288xbf16, #tpu.memory_space<vmem>>, vector<200x288xbf16>
    %c0_1 = arith.constant 0 : index
    %c0_2 = arith.constant 0 : index
    %1 = vector.load %arg2[%c0_1, %c0_2] : memref<288x64xbf16, #tpu.memory_space<vmem>>, vector<288x64xbf16>
    %cst = arith.constant dense<0.000000e+00> : vector<200x64xf32>
    %2 = tpu.matmul %0, %1, %cst {dimension_numbers = #tpu.dot_dimension_numbers<[1], [0], [0], [1], [0, 0, 1, 1], [], []>} : vector<200x288xbf16>, vector<288x64xbf16>, vector<200x64xf32> -> vector<200x64xf32>
    %cst_3 = arith.constant dense<0.000000e+00> : vector<64xf32>
    %3 = vector.multi_reduction <add>, %2, %cst_3 [0] : vector<200x64xf32> to vector<64xf32>
    %4 = vector.shape_cast %3 : vector<64xf32> to vector<1x64xf32>
    %cst_4 = arith.constant 2.000000e+02 : f32
    %5 = vector.broadcast %cst_4 : f32 to vector<1x64xf32>
    %6 = arith.divf %4, %5 : vector<1x64xf32>
    %7 = vector.broadcast %6 : vector<1x64xf32> to vector<200x64xf32>
    %8 = arith.subf %2, %7 : vector<200x64xf32>
    %9 = arith.mulf %8, %8 : vector<200x64xf32>
    %cst_5 = arith.constant dense<0.000000e+00> : vector<64xf32>
    %10 = vector.multi_reduction <add>, %9, %cst_5 [0] : vector<200x64xf32> to vector<64xf32>
    %11 = vector.shape_cast %10 : vector<64xf32> to vector<1x64xf32>
    %cst_6 = arith.constant 2.000000e+02 : f32
    %12 = vector.broadcast %cst_6 : f32 to vector<1x64xf32>
    %13 = arith.divf %11, %12 : vector<1x64xf32>
    %c0_7 = arith.constant 0 : index
    %c0_8 = arith.constant 0 : index
    %14 = vector.load %arg3[%c0_7, %c0_8] : memref<2x64xf32, #tpu.memory_space<vmem>>, vector<1x64xf32>
    %cst_9 = arith.constant 9.99999974E-6 : f32
    %15 = vector.broadcast %cst_9 : f32 to vector<1x64xf32>
    %16 = arith.addf %13, %15 : vector<1x64xf32>
    %17 = math.rsqrt %16 : vector<1x64xf32>
    %18 = arith.mulf %14, %17 : vector<1x64xf32>
    %19 = vector.broadcast %18 : vector<1x64xf32> to vector<200x64xf32>
    %20 = arith.mulf %8, %19 : vector<200x64xf32>
    %c1 = arith.constant 1 : index
    %c0_10 = arith.constant 0 : index
    %21 = vector.load %arg3[%c1, %c0_10] : memref<2x64xf32, #tpu.memory_space<vmem>>, vector<1x64xf32>
    %22 = vector.broadcast %21 : vector<1x64xf32> to vector<200x64xf32>
    %23 = arith.addf %20, %22 : vector<200x64xf32>
    %cst_11 = arith.constant 0.000000e+00 : f32
    %24 = vector.broadcast %cst_11 : f32 to vector<200x64xf32>
    %25 = arith.maximumf %23, %24 : vector<200x64xf32>
    %26 = arith.truncf %25 : vector<200x64xf32> to vector<200x64xbf16>
    %c0_12 = arith.constant 0 : index
    %c0_13 = arith.constant 0 : index
    %27 = vector.load %arg4[%c0_12, %c0_13] : memref<200x64xbf16, #tpu.memory_space<vmem>>, vector<200x64xbf16>
    tpu.vector_store %arg4[%c0_12, %c0_13], %26 {strides = array<i32>} : memref<200x64xbf16, #tpu.memory_space<vmem>>, vector<200x64xbf16>,
    return
  }
  func.func @transform_0(%arg0: i32) -> (i32, i32) {
    %c0_i32 = arith.constant 0 : i32
    %c0_i32_0 = arith.constant 0 : i32
    %c0_i32_1 = arith.constant 0 : i32
    return %c0_i32, %c0_i32_0 : i32, i32
  }
  func.func @transform_1(%arg0: i32) -> (i32, i32) {
    %c0_i32 = arith.constant 0 : i32
    %c0_i32_0 = arith.constant 0 : i32
    %c0_i32_1 = arith.constant 0 : i32
    return %c0_i32, %c0_i32_0 : i32, i32
  }
  func.func @transform_2(%arg0: i32) -> (i32, i32) {
    %c0_i32 = arith.constant 0 : i32
    %c0_i32_0 = arith.constant 0 : i32
    %c0_i32_1 = arith.constant 0 : i32
    return %c0_i32, %c0_i32_0 : i32, i32
  }
  func.func @transform_3(%arg0: i32) -> (i32, i32) {
    %c0_i32 = arith.constant 0 : i32
    %c0_i32_0 = arith.constant 0 : i32
    %c0_i32_1 = arith.constant 0 : i32
    return %c0_i32, %c0_i32_0 : i32, i32
  }
}

module attributes {stable_mosaic.version = 11 : i64} {
  func.func @dense_head_kernel(%arg0: i32, %arg1: memref<2x3200xbf16, #tpu.memory_space<vmem>>, %arg2: memref<3200x512xbf16, #tpu.memory_space<vmem>>, %arg3: memref<2x512xf32, #tpu.memory_space<vmem>>, %arg4: memref<512x64xbf16, #tpu.memory_space<vmem>>, %arg5: memref<1x64xf32, #tpu.memory_space<vmem>>, %arg6: memref<2x64xf32, #tpu.memory_space<vmem>>, %arg7: memref<2x512xf32, #tpu.memory_space<vmem>>) attributes {dimension_semantics = [#tpu.dimension_semantics<arbitrary>], iteration_bounds = array<i64: 2>, scalar_prefetch = 0 : i64, scratch_operands = 1 : i64, tpu.core_type = #tpu.core_type<tc>, window_params = [{transform_indices = @transform_0, window_bounds = array<i64: 2, 3200>}, {transform_indices = @transform_1, window_bounds = array<i64: 3200, 512>}, {pipeline_mode = #tpu.pipeline_mode<synchronous>, transform_indices = @transform_2, window_bounds = array<i64: 2, 512>}, {pipeline_mode = #tpu.pipeline_mode<synchronous>, transform_indices = @transform_3, window_bounds = array<i64: 512, 64>}, {pipeline_mode = #tpu.pipeline_mode<synchronous>, transform_indices = @transform_4, window_bounds = array<i64: 1, 64>}, {pipeline_mode = #tpu.pipeline_mode<synchronous>, transform_indices = @transform_5, window_bounds = array<i64: 2, 64>}]} {
    %c0 = arith.constant 0 : index
    %c0_0 = arith.constant 0 : index
    %0 = vector.load %arg1[%c0, %c0_0] : memref<2x3200xbf16, #tpu.memory_space<vmem>>, vector<2x3200xbf16>
    %c0_1 = arith.constant 0 : index
    %c0_2 = arith.constant 0 : index
    %1 = vector.load %arg2[%c0_1, %c0_2] : memref<3200x512xbf16, #tpu.memory_space<vmem>>, vector<3200x512xbf16>
    %cst = arith.constant dense<0.000000e+00> : vector<2x512xf32>
    %2 = tpu.matmul %0, %1, %cst {dimension_numbers = #tpu.dot_dimension_numbers<[1], [0], [0], [1], [0, 0, 1, 1], [], []>} : vector<2x3200xbf16>, vector<3200x512xbf16>, vector<2x512xf32> -> vector<2x512xf32>
    %c0_i32 = arith.constant 0 : i32
    %3 = arith.cmpi eq, %arg0, %c0_i32 : i32
    %4 = arith.extui %3 : i1 to i32
    %c0_i32_3 = arith.constant 0 : i32
    %5 = arith.cmpi ne, %4, %c0_i32_3 : i32
    scf.if %5 {
      %c0_7 = arith.constant 0 : index
      %c0_8 = arith.constant 0 : index
      %12 = vector.load %arg7[%c0_7, %c0_8] : memref<2x512xf32, #tpu.memory_space<vmem>>, vector<2x512xf32>
      tpu.vector_store %arg7[%c0_7, %c0_8], %2 {strides = array<i32>} : memref<2x512xf32, #tpu.memory_space<vmem>>, vector<2x512xf32>,
    } else {
    }
    %c0_i32_4 = arith.constant 0 : i32
    %6 = arith.cmpi sgt, %arg0, %c0_i32_4 : i32
    %7 = arith.extui %6 : i1 to i32
    %c0_i32_5 = arith.constant 0 : i32
    %8 = arith.cmpi ne, %7, %c0_i32_5 : i32
    scf.if %8 {
      %c0_7 = arith.constant 0 : index
      %c0_8 = arith.constant 0 : index
      %12 = vector.load %arg7[%c0_7, %c0_8] : memref<2x512xf32, #tpu.memory_space<vmem>>, vector<2x512xf32>
      %13 = arith.addf %12, %2 : vector<2x512xf32>
      %c0_9 = arith.constant 0 : index
      %c0_10 = arith.constant 0 : index
      %14 = vector.load %arg7[%c0_9, %c0_10] : memref<2x512xf32, #tpu.memory_space<vmem>>, vector<2x512xf32>
      tpu.vector_store %arg7[%c0_9, %c0_10], %13 {strides = array<i32>} : memref<2x512xf32, #tpu.memory_space<vmem>>, vector<2x512xf32>,
    } else {
    }
    %c1_i32 = arith.constant 1 : i32
    %9 = arith.cmpi eq, %arg0, %c1_i32 : i32
    %10 = arith.extui %9 : i1 to i32
    %c0_i32_6 = arith.constant 0 : i32
    %11 = arith.cmpi ne, %10, %c0_i32_6 : i32
    scf.if %11 {
      %c0_7 = arith.constant 0 : index
      %c0_8 = arith.constant 0 : index
      %12 = vector.load %arg7[%c0_7, %c0_8] : memref<2x512xf32, #tpu.memory_space<vmem>>, vector<2x512xf32>
      %cst_9 = arith.constant dense<0.000000e+00> : vector<512xf32>
      %13 = vector.multi_reduction <add>, %12, %cst_9 [0] : vector<2x512xf32> to vector<512xf32>
      %14 = vector.shape_cast %13 : vector<512xf32> to vector<1x512xf32>
      %cst_10 = arith.constant 2.000000e+00 : f32
      %15 = vector.broadcast %cst_10 : f32 to vector<1x512xf32>
      %16 = arith.divf %14, %15 : vector<1x512xf32>
      %17 = vector.broadcast %16 : vector<1x512xf32> to vector<2x512xf32>
      %18 = arith.subf %12, %17 : vector<2x512xf32>
      %19 = arith.mulf %18, %18 : vector<2x512xf32>
      %cst_11 = arith.constant dense<0.000000e+00> : vector<512xf32>
      %20 = vector.multi_reduction <add>, %19, %cst_11 [0] : vector<2x512xf32> to vector<512xf32>
      %21 = vector.shape_cast %20 : vector<512xf32> to vector<1x512xf32>
      %cst_12 = arith.constant 2.000000e+00 : f32
      %22 = vector.broadcast %cst_12 : f32 to vector<1x512xf32>
      %23 = arith.divf %21, %22 : vector<1x512xf32>
      %c0_13 = arith.constant 0 : index
      %c0_14 = arith.constant 0 : index
      %24 = vector.load %arg3[%c0_13, %c0_14] : memref<2x512xf32, #tpu.memory_space<vmem>>, vector<1x512xf32>
      %cst_15 = arith.constant 9.99999974E-6 : f32
      %25 = vector.broadcast %cst_15 : f32 to vector<1x512xf32>
      %26 = arith.addf %23, %25 : vector<1x512xf32>
      %27 = math.rsqrt %26 : vector<1x512xf32>
      %28 = arith.mulf %24, %27 : vector<1x512xf32>
      %29 = vector.broadcast %28 : vector<1x512xf32> to vector<2x512xf32>
      %30 = arith.mulf %18, %29 : vector<2x512xf32>
      %c1 = arith.constant 1 : index
      %c0_16 = arith.constant 0 : index
      %31 = vector.load %arg3[%c1, %c0_16] : memref<2x512xf32, #tpu.memory_space<vmem>>, vector<1x512xf32>
      %32 = vector.broadcast %31 : vector<1x512xf32> to vector<2x512xf32>
      %33 = arith.addf %30, %32 : vector<2x512xf32>
      %cst_17 = arith.constant 0.000000e+00 : f32
      %34 = vector.broadcast %cst_17 : f32 to vector<2x512xf32>
      %35 = arith.maximumf %33, %34 : vector<2x512xf32>
      %36 = arith.truncf %35 : vector<2x512xf32> to vector<2x512xbf16>
      %c0_18 = arith.constant 0 : index
      %c0_19 = arith.constant 0 : index
      %37 = vector.load %arg4[%c0_18, %c0_19] : memref<512x64xbf16, #tpu.memory_space<vmem>>, vector<512x64xbf16>
      %cst_20 = arith.constant dense<0.000000e+00> : vector<2x64xf32>
      %38 = tpu.matmul %36, %37, %cst_20 {dimension_numbers = #tpu.dot_dimension_numbers<[1], [0], [0], [1], [0, 0, 1, 1], [], []>} : vector<2x512xbf16>, vector<512x64xbf16>, vector<2x64xf32> -> vector<2x64xf32>
      %c0_21 = arith.constant 0 : index
      %c0_22 = arith.constant 0 : index
      %39 = vector.load %arg5[%c0_21, %c0_22] : memref<1x64xf32, #tpu.memory_space<vmem>>, vector<1x64xf32>
      %40 = vector.broadcast %39 : vector<1x64xf32> to vector<2x64xf32>
      %41 = arith.addf %38, %40 : vector<2x64xf32>
      %c0_23 = arith.constant 0 : index
      %c0_24 = arith.constant 0 : index
      %42 = vector.load %arg6[%c0_23, %c0_24] : memref<2x64xf32, #tpu.memory_space<vmem>>, vector<2x64xf32>
      tpu.vector_store %arg6[%c0_23, %c0_24], %41 {strides = array<i32>} : memref<2x64xf32, #tpu.memory_space<vmem>>, vector<2x64xf32>,
    } else {
    }
    return
  }
  func.func @transform_0(%arg0: i32) -> (i32, i32) {
    %c0_i32 = arith.constant 0 : i32
    %c0_i32_0 = arith.constant 0 : i32
    return %c0_i32, %arg0 : i32, i32
  }
  func.func @transform_1(%arg0: i32) -> (i32, i32) {
    %c0_i32 = arith.constant 0 : i32
    %c0_i32_0 = arith.constant 0 : i32
    return %arg0, %c0_i32 : i32, i32
  }
  func.func @transform_2(%arg0: i32) -> (i32, i32) {
    %c0_i32 = arith.constant 0 : i32
    %c0_i32_0 = arith.constant 0 : i32
    %c0_i32_1 = arith.constant 0 : i32
    return %c0_i32, %c0_i32_0 : i32, i32
  }
  func.func @transform_3(%arg0: i32) -> (i32, i32) {
    %c0_i32 = arith.constant 0 : i32
    %c0_i32_0 = arith.constant 0 : i32
    %c0_i32_1 = arith.constant 0 : i32
    return %c0_i32, %c0_i32_0 : i32, i32
  }
  func.func @transform_4(%arg0: i32) -> (i32, i32) {
    %c0_i32 = arith.constant 0 : i32
    %c0_i32_0 = arith.constant 0 : i32
    %c0_i32_1 = arith.constant 0 : i32
    return %c0_i32, %c0_i32_0 : i32, i32
  }
  func.func @transform_5(%arg0: i32) -> (i32, i32) {
    %c0_i32 = arith.constant 0 : i32
    %c0_i32_0 = arith.constant 0 : i32
    %c0_i32_1 = arith.constant 0 : i32
    return %c0_i32, %c0_i32_0 : i32, i32
  }
}

</mosaic_0001>

<bundles_post_ra>
// kernel: encoder_forward.4
= control target key start
LH: loop header
LB: loop body
LE: loop exit
PB: predicated region body
PF: predicated region fallthrough
CT: control target
= control target key end

     0   :  { %v3126_v0 = vmov 0   ;;  %vm1176_vm0 = vcmask 261120   ;;  %vm2503_vm1 = vcmask 257024   ;;  %s6239_s1 = inlined_call_operand.vmem [shape: bf16[256,32], index: 1, kind: input, shape index: {}]   ;;  %s6240_s0 = inlined_call_operand.vmem [shape: bf16[800,256], index: 0, kind: input, shape index: {}]   ;;  %s6241_s2 = inlined_call_operand.vmem [shape: f32[2,32], index: 2, kind: input, shape index: {}]   ;;  %s6242_s3 = inlined_call_operand.vmem [shape: bf16[800,32], index: 3, kind: output, shape index: {}]  }
   0x1   :  { %743 = vmatprep.subr.bf16.mxu0 %v3126_v0  ;;  %v2958_v1 = vld [vmem:[%s6239_s1] sm:$0xff]   ;;  %2925 = vmatprep.subr.bf16.mxu1 %v3126_v0  ;;  %v2959_v2 = vld [vmem:[%s6239_s1 + $0x8] sm:$0xff]   ;;  %v2960_v3 = vld [vmem:[%s6239_s1 + $0x10] sm:$0xff]  }
   0x2   :  { %744 = vmatpush1.bf16.msra.mxu0 %v2958_v1  ;;  %2941 = vmatpush1.bf16.msra.mxu1 %v2958_v1  ;;  %v2961_v4 = vld [vmem:[%s6239_s1 + $0x18] sm:$0xff]   ;;  %v2962_v5 = vld [vmem:[%s6239_s1 + $0x20] sm:$0xff]   ;;  %v2963_v7 = vld [vmem:[%s6239_s1 + $0x28] sm:$0xff]  }
   0x3   :  { %745 = vmatprep.subr.bf16.mxu0 %v3126_v0  ;;  %2926 = vmatprep.subr.bf16.mxu1 %v3126_v0  ;;  %v2976_v6 = vld [vmem:[%s6240_s0 + $0x4] ss:$8 sps:$4 sm:$0xff]   ;;  %v2964_v8 = vld [vmem:[%s6239_s1 + $0x30] sm:$0xff]   ;;  %v2965_v9 = vld [vmem:[%s6239_s1 + $0x38] sm:$0xff]  }
   0x4   :  { %775 = vmatprep.mubr.bf16.mxu0 %v2976_v6  ;;  %v2966_v10 = vld [vmem:[%s6239_s1 + $0x40] sm:$0xff]   ;;  %v2967_v11 = vld [vmem:[%s6239_s1 + $0x48] sm:$0xff]   ;;  %v3015_v12 = vld [vmem:[%s6240_s0 + $0x194] ss:$8 sps:$4 sm:$0xff]  }
   0x5   :  { %v2968_v13 = vld [vmem:[%s6239_s1 + $0x50] sm:$0xff]   ;;  %975 = vmatprep.mubr.bf16.mxu1 %v3015_v12  ;;  %v2969_v14 = vld [vmem:[%s6239_s1 + $0x58] sm:$0xff]   ;;  %v2970_v15 = vld [vmem:[%s6239_s1 + $0x60] sm:$0xff]  }
   0x6   :  { %746 = vmatpush1.bf16.msra.mxu0 %v2959_v2  ;;  %2942 = vmatpush1.bf16.msra.mxu1 %v2959_v2  ;;  %v2971_v16 = vld [vmem:[%s6239_s1 + $0x68] sm:$0xff]   ;;  %v2972_v17 = vld [vmem:[%s6239_s1 + $0x70] sm:$0xff]   ;;  %v2973_v18 = vld [vmem:[%s6239_s1 + $0x78] sm:$0xff]  }
   0x7   :  { %747 = vmatprep.subr.bf16.mxu0 %v3126_v0  ;;  %2927 = vmatprep.subr.bf16.mxu1 %v3126_v0  ;;  %v2974_v19 = vld [vmem:[%s6240_s0] ss:$8 sps:$4 sm:$0xff]   ;;  %v3013_v20 = vld [vmem:[%s6240_s0 + $0x190] ss:$8 sps:$4 sm:$0xff]   ;;  %v2977_v21 = vld [vmem:[%s6240_s0 + $0x14] ss:$8 sps:$4 sm:$0xff]  }
   0x8   :  { %v3019_v22 = vld [vmem:[%s6240_s0 + $0x1a4] ss:$8 sps:$4 sm:$0xff]   ;;  %v2979_v23 = vld [vmem:[%s6240_s0 + $0x10] ss:$8 sps:$4 sm:$0xff]   ;;  %v3021_v24 = vld [vmem:[%s6240_s0 + $0x1a0] ss:$8 sps:$4 sm:$0xff]  }
   0x9   :  { %v2980_v25 = vld [vmem:[%s6240_s0 + $0x24] ss:$8 sps:$4 sm:$0xff]   ;;  %v3025_v26 = vld [vmem:[%s6240_s0 + $0x1b4] ss:$8 sps:$4 sm:$0xff]   ;;  %v2982_v27 = vld [vmem:[%s6240_s0 + $0x20] ss:$8 sps:$4 sm:$0xff]  }
   0xa   :  { %748 = vmatpush1.bf16.msra.mxu0 %v2960_v3  ;;  %2943 = vmatpush1.bf16.msra.mxu1 %v2960_v3  ;;  %v3027_v28 = vld [vmem:[%s6240_s0 + $0x1b0] ss:$8 sps:$4 sm:$0xff]   ;;  %v2983_v29 = vld [vmem:[%s6240_s0 + $0x34] ss:$8 sps:$4 sm:$0xff]   ;;  %v3031_v30 = vld [vmem:[%s6240_s0 + $0x1c4] ss:$8 sps:$4 sm:$0xff]  }
   0xb   :  { %749 = vmatprep.subr.bf16.mxu0 %v3126_v0  ;;  %2928 = vmatprep.subr.bf16.mxu1 %v3126_v0  ;;  %v2985_v31 = vld [vmem:[%s6240_s0 + $0x30] ss:$8 sps:$4 sm:$0xff]   ;;  %v3033_v32 = vld [vmem:[%s6240_s0 + $0x1c0] ss:$8 sps:$4 sm:$0xff]   ;;  %v2986_v33 = vld [vmem:[%s6240_s0 + $0x44] ss:$8 sps:$4 sm:$0xff]  }
   0xc   :  { %v3037_v34 = vld [vmem:[%s6240_s0 + $0x1d4] ss:$8 sps:$4 sm:$0xff]   ;;  %v2988_v35 = vld [vmem:[%s6240_s0 + $0x40] ss:$8 sps:$4 sm:$0xff]   ;;  %v3039_v36 = vld [vmem:[%s6240_s0 + $0x1d0] ss:$8 sps:$4 sm:$0xff]  }
   0xd   :  { %v2989_v37 = vld [vmem:[%s6240_s0 + $0x54] ss:$8 sps:$4 sm:$0xff]   ;;  %v3043_v38 = vld [vmem:[%s6240_s0 + $0x1e4] ss:$8 sps:$4 sm:$0xff]   ;;  %v2991_v39 = vld [vmem:[%s6240_s0 + $0x50] ss:$8 sps:$4 sm:$0xff]  }
   0xe   :  { %750 = vmatpush1.bf16.msra.mxu0 %v2961_v4  ;;  %2944 = vmatpush1.bf16.msra.mxu1 %v2961_v4  ;;  %v3045_v40 = vld [vmem:[%s6240_s0 + $0x1e0] ss:$8 sps:$4 sm:$0xff]   ;;  %v2992_v41 = vld [vmem:[%s6240_s0 + $0x64] ss:$8 sps:$4 sm:$0xff]   ;;  %v3049_v42 = vld [vmem:[%s6240_s0 + $0x1f4] ss:$8 sps:$4 sm:$0xff]  }
   0xf   :  { %751 = vmatprep.subr.bf16.mxu0 %v3126_v0  ;;  %2929 = vmatprep.subr.bf16.mxu1 %v3126_v0  ;;  %v2994_v43 = vld [vmem:[%s6240_s0 + $0x60] ss:$8 sps:$4 sm:$0xff]   ;;  %v3051_v44 = vld [vmem:[%s6240_s0 + $0x1f0] ss:$8 sps:$4 sm:$0xff]   ;;  %v2995_v45 = vld [vmem:[%s6240_s0 + $0x74] ss:$8 sps:$4 sm:$0xff]  }
  0x10   :  { %v3055_v46 = vld [vmem:[%s6240_s0 + $0x204] ss:$8 sps:$4 sm:$0xff]   ;;  %v2997_v47 = vld [vmem:[%s6240_s0 + $0x70] ss:$8 sps:$4 sm:$0xff]   ;;  %v3057_v48 = vld [vmem:[%s6240_s0 + $0x200] ss:$8 sps:$4 sm:$0xff]  }
  0x11   :  { %v2998_v49 = vld [vmem:[%s6240_s0 + $0x84] ss:$8 sps:$4 sm:$0xff]   ;;  %v3061_v50 = vld [vmem:[%s6240_s0 + $0x214] ss:$8 sps:$4 sm:$0xff]   ;;  %v3000_v51 = vld [vmem:[%s6240_s0 + $0x80] ss:$8 sps:$4 sm:$0xff]  }
  0x12   :  { %752 = vmatpush1.bf16.msra.mxu0 %v2962_v5  ;;  %2945 = vmatpush1.bf16.msra.mxu1 %v2962_v5  ;;  %v3063_v52 = vld [vmem:[%s6240_s0 + $0x210] ss:$8 sps:$4 sm:$0xff]   ;;  %v3001_v53 = vld [vmem:[%s6240_s0 + $0x94] ss:$8 sps:$4 sm:$0xff]   ;;  %v3067_v54 = vld [vmem:[%s6240_s0 + $0x224] ss:$8 sps:$4 sm:$0xff]  }
  0x13   :  { %753 = vmatprep.subr.bf16.mxu0 %v3126_v0  ;;  %2930 = vmatprep.subr.bf16.mxu1 %v3126_v0  ;;  %v3003_v55 = vld [vmem:[%s6240_s0 + $0x90] ss:$8 sps:$4 sm:$0xff]   ;;  %v3069_v56 = vld [vmem:[%s6240_s0 + $0x220] ss:$8 sps:$4 sm:$0xff]   ;;  %v3004_v57 = vld [vmem:[%s6240_s0 + $0xa4] ss:$8 sps:$4 sm:$0xff]  }
  0x14   :  { %v3073_v58 = vld [vmem:[%s6240_s0 + $0x234] ss:$8 sps:$4 sm:$0xff]   ;;  %v3006_v59 = vld [vmem:[%s6240_s0 + $0xa0] ss:$8 sps:$4 sm:$0xff]   ;;  %v3075_v60 = vld [vmem:[%s6240_s0 + $0x230] ss:$8 sps:$4 sm:$0xff]  }
  0x15   :  { %v3007_v61 = vld [vmem:[%s6240_s0 + $0xb4] ss:$8 sps:$4 sm:$0xff]   ;;  %v3079_v62 = vld [vmem:[%s6240_s0 + $0x244] ss:$8 sps:$4 sm:$0xff]   ;;  %v3009_v63 = vld [vmem:[%s6240_s0 + $0xb0] ss:$8 sps:$4 sm:$0xff]  }
  0x16   :  { %754 = vmatpush1.bf16.msra.mxu0 %v2963_v7  ;;  %2946 = vmatpush1.bf16.msra.mxu1 %v2963_v7  ;;  %v3010_v1 = vld [vmem:[%s6240_s0 + $0xc4] ss:$8 sps:$4 sm:$0xff]   ;;  %v3085_v2 = vld [vmem:[%s6240_s0 + $0x254] ss:$8 sps:$4 sm:$0xff]   ;;  %v3012_v3 = vld [vmem:[%s6240_s0 + $0xc0] ss:$8 sps:$4 sm:$0xff]  }
  0x17   :  { %755 = vmatprep.subr.bf16.mxu0 %v3126_v0  ;;  %2931 = vmatprep.subr.bf16.mxu1 %v3126_v0  ;;  %v3087_v4 = vld [vmem:[%s6240_s0 + $0x250] ss:$8 sps:$4 sm:$0xff]   ;;  %v3016_v5 = vld [vmem:[%s6240_s0 + $0xd4] ss:$8 sps:$4 sm:$0xff]   ;;  %v3088_v6 = vld [vmem:[%s6240_s0 + $0x264] ss:$8 sps:$4 sm:$0xff]  }
  0x18   :  { %v3018_v7 = vld [vmem:[%s6240_s0 + $0xd0] ss:$8 sps:$4 sm:$0xff]  }
  0x19   :  { %v3093_v12 = vld [vmem:[%s6240_s0 + $0x270] ss:$8 sps:$4 sm:$0xff]  }
  0x1a   :  { %756 = vmatpush1.bf16.msra.mxu0 %v2964_v8  ;;  %2947 = vmatpush1.bf16.msra.mxu1 %v2964_v8  ;;  %v3090_v8 = vld [vmem:[%s6240_s0 + $0x260] ss:$8 sps:$4 sm:$0xff]  }
  0x1b   :  { %757 = vmatprep.subr.bf16.mxu0 %v3126_v0  ;;  %2932 = vmatprep.subr.bf16.mxu1 %v3126_v0 }
  0x1e   :  { %758 = vmatpush1.bf16.msra.mxu0 %v2965_v9  ;;  %2948 = vmatpush1.bf16.msra.mxu1 %v2965_v9  ;;  %v3022_v9 = vld [vmem:[%s6240_s0 + $0xe4] ss:$8 sps:$4 sm:$0xff]  }
  0x1f   :  { %759 = vmatprep.subr.bf16.mxu0 %v3126_v0  ;;  %2933 = vmatprep.subr.bf16.mxu1 %v3126_v0 }
  0x22   :  { %760 = vmatpush1.bf16.msra.mxu0 %v2966_v10  ;;  %2949 = vmatpush1.bf16.msra.mxu1 %v2966_v10  ;;  %v3091_v10 = vld [vmem:[%s6240_s0 + $0x274] ss:$8 sps:$4 sm:$0xff]  }
  0x23   :  { %761 = vmatprep.subr.bf16.mxu0 %v3126_v0  ;;  %2934 = vmatprep.subr.bf16.mxu1 %v3126_v0 }
  0x26   :  { %762 = vmatpush1.bf16.msra.mxu0 %v2967_v11  ;;  %2950 = vmatpush1.bf16.msra.mxu1 %v2967_v11  ;;  %v3024_v11 = vld [vmem:[%s6240_s0 + $0xe0] ss:$8 sps:$4 sm:$0xff]  }
  0x27   :  { %763 = vmatprep.subr.bf16.mxu0 %v3126_v0  ;;  %2935 = vmatprep.subr.bf16.mxu1 %v3126_v0 }
  0x2a   :  { %764 = vmatpush1.bf16.msra.mxu0 %v2968_v13  ;;  %2951 = vmatpush1.bf16.msra.mxu1 %v2968_v13  ;;  %v3028_v13 = vld [vmem:[%s6240_s0 + $0xf4] ss:$8 sps:$4 sm:$0xff]  }
  0x2b   :  { %765 = vmatprep.subr.bf16.mxu0 %v3126_v0  ;;  %2936 = vmatprep.subr.bf16.mxu1 %v3126_v0 }
  0x2e   :  { %766 = vmatpush1.bf16.msra.mxu0 %v2969_v14  ;;  %2952 = vmatpush1.bf16.msra.mxu1 %v2969_v14  ;;  %v3094_v14 = vld [vmem:[%s6240_s0 + $0x284] ss:$8 sps:$4 sm:$0xff]  }
  0x2f   :  { %767 = vmatprep.subr.bf16.mxu0 %v3126_v0  ;;  %2937 = vmatprep.subr.bf16.mxu1 %v3126_v0 }
  0x32   :  { %768 = vmatpush1.bf16.msra.mxu0 %v2970_v15  ;;  %2953 = vmatpush1.bf16.msra.mxu1 %v2970_v15  ;;  %v3030_v15 = vld [vmem:[%s6240_s0 + $0xf0] ss:$8 sps:$4 sm:$0xff]  }
  0x33   :  { %769 = vmatprep.subr.bf16.mxu0 %v3126_v0  ;;  %2938 = vmatprep.subr.bf16.mxu1 %v3126_v0 }
  0x36   :  { %770 = vmatpush1.bf16.msra.mxu0 %v2971_v16  ;;  %2954 = vmatpush1.bf16.msra.mxu1 %v2971_v16  ;;  %v3096_v16 = vld [vmem:[%s6240_s0 + $0x280] ss:$8 sps:$4 sm:$0xff]  }
  0x37   :  { %771 = vmatprep.subr.bf16.mxu0 %v3126_v0  ;;  %2939 = vmatprep.subr.bf16.mxu1 %v3126_v0 }
  0x3a   :  { %772 = vmatpush1.bf16.msra.mxu0 %v2972_v17  ;;  %2955 = vmatpush1.bf16.msra.mxu1 %v2972_v17  ;;  %v3034_v17 = vld [vmem:[%s6240_s0 + $0x104] ss:$8 sps:$4 sm:$0xff]  }
  0x3b   :  { %773 = vmatprep.subr.bf16.mxu0 %v3126_v0  ;;  %2940 = vmatprep.subr.bf16.mxu1 %v3126_v0  ;;  %v3081_v0 = vld [vmem:[%s6240_s0 + $0x240] ss:$8 sps:$4 sm:$0xff]  }
  0x3e   :  { %774 = vmatpush1.bf16.msra.mxu0 %v2973_v18  ;;  %2956 = vmatpush1.bf16.msra.mxu1 %v2973_v18  ;;  %v3097_v18 = vld [vmem:[%s6240_s0 + $0x294] ss:$8 sps:$4 sm:$0xff]  }
  0x41   :  { %776 = vmatmul.mubr.bf16.vlgmr.msra.gmra.mrb[0].mxu0 %v2974_v19  ;;  %976 = vmatmul.mubr.bf16.vlgmr.msra.gmra.mrb[0].mxu1 %v3013_v20  ;;  %v3036_v19 = vld [vmem:[%s6240_s0 + $0x100] ss:$8 sps:$4 sm:$0xff]   ;;  %v3099_v20 = vld [vmem:[%s6240_s0 + $0x290] ss:$8 sps:$4 sm:$0xff]  }
  0x42   :  { %783 = vmatprep.mubr.bf16.mxu0 %v2977_v21  ;;  %983 = vmatprep.mubr.bf16.mxu1 %v3019_v22  ;;  %v3040_v21 = vld [vmem:[%s6240_s0 + $0x114] ss:$8 sps:$4 sm:$0xff]   ;;  %v3100_v22 = vld [vmem:[%s6240_s0 + $0x2a4] ss:$8 sps:$4 sm:$0xff]  }
  0x49   :  { %784 = vmatmul.mubr.bf16.gmra.mrb[4].mxu0 %v2979_v23  ;;  %984 = vmatmul.mubr.bf16.gmra.mrb[4].mxu1 %v3021_v24  ;;  %v3042_v23 = vld [vmem:[%s6240_s0 + $0x110] ss:$8 sps:$4 sm:$0xff]   ;;  %v3102_v24 = vld [vmem:[%s6240_s0 + $0x2a0] ss:$8 sps:$4 sm:$0xff]  }
  0x4a   :  { %791 = vmatprep.mubr.bf16.mxu0 %v2980_v25  ;;  %991 = vmatprep.mubr.bf16.mxu1 %v3025_v26  ;;  %v3046_v25 = vld [vmem:[%s6240_s0 + $0x124] ss:$8 sps:$4 sm:$0xff]   ;;  %v3103_v26 = vld [vmem:[%s6240_s0 + $0x2b4] ss:$8 sps:$4 sm:$0xff]  }
  0x51   :  { %792 = vmatmul.mubr.bf16.gmra.mrb[8].mxu0 %v2982_v27  ;;  %992 = vmatmul.mubr.bf16.gmra.mrb[8].mxu1 %v3027_v28  ;;  %v3048_v27 = vld [vmem:[%s6240_s0 + $0x120] ss:$8 sps:$4 sm:$0xff]   ;;  %v3105_v28 = vld [vmem:[%s6240_s0 + $0x2b0] ss:$8 sps:$4 sm:$0xff]  }
  0x52   :  { %799 = vmatprep.mubr.bf16.mxu0 %v2983_v29  ;;  %999 = vmatprep.mubr.bf16.mxu1 %v3031_v30  ;;  %v3052_v29 = vld [vmem:[%s6240_s0 + $0x134] ss:$8 sps:$4 sm:$0xff]   ;;  %v3106_v30 = vld [vmem:[%s6240_s0 + $0x2c4] ss:$8 sps:$4 sm:$0xff]  }
  0x59   :  { %800 = vmatmul.mubr.bf16.gmra.mrb[12].mxu0 %v2985_v31  ;;  %1000 = vmatmul.mubr.bf16.gmra.mrb[12].mxu1 %v3033_v32  ;;  %v3054_v31 = vld [vmem:[%s6240_s0 + $0x130] ss:$8 sps:$4 sm:$0xff]   ;;  %v3108_v32 = vld [vmem:[%s6240_s0 + $0x2c0] ss:$8 sps:$4 sm:$0xff]  }
  0x5a   :  { %807 = vmatprep.mubr.bf16.mxu0 %v2986_v33  ;;  %1007 = vmatprep.mubr.bf16.mxu1 %v3037_v34  ;;  %v3058_v33 = vld [vmem:[%s6240_s0 + $0x144] ss:$8 sps:$4 sm:$0xff]   ;;  %v3109_v34 = vld [vmem:[%s6240_s0 + $0x2d4] ss:$8 sps:$4 sm:$0xff]  }
  0x61   :  { %808 = vmatmul.mubr.bf16.gmra.mrb[16].mxu0 %v2988_v35  ;;  %1008 = vmatmul.mubr.bf16.gmra.mrb[16].mxu1 %v3039_v36  ;;  %v3060_v35 = vld [vmem:[%s6240_s0 + $0x140] ss:$8 sps:$4 sm:$0xff]   ;;  %v3111_v36 = vld [vmem:[%s6240_s0 + $0x2d0] ss:$8 sps:$4 sm:$0xff]  }
  0x62   :  { %815 = vmatprep.mubr.bf16.mxu0 %v2989_v37  ;;  %1015 = vmatprep.mubr.bf16.mxu1 %v3043_v38  ;;  %v3064_v37 = vld [vmem:[%s6240_s0 + $0x154] ss:$8 sps:$4 sm:$0xff]   ;;  %v3112_v38 = vld [vmem:[%s6240_s0 + $0x2e4] ss:$8 sps:$4 sm:$0xff]  }
  0x69   :  { %816 = vmatmul.mubr.bf16.gmra.mrb[20].mxu0 %v2991_v39  ;;  %1016 = vmatmul.mubr.bf16.gmra.mrb[20].mxu1 %v3045_v40  ;;  %v3066_v39 = vld [vmem:[%s6240_s0 + $0x150] ss:$8 sps:$4 sm:$0xff]   ;;  %v3114_v40 = vld [vmem:[%s6240_s0 + $0x2e0] ss:$8 sps:$4 sm:$0xff]  }
  0x6a   :  { %823 = vmatprep.mubr.bf16.mxu0 %v2992_v41  ;;  %1023 = vmatprep.mubr.bf16.mxu1 %v3049_v42  ;;  %v3070_v41 = vld [vmem:[%s6240_s0 + $0x164] ss:$8 sps:$4 sm:$0xff]   ;;  %v3115_v42 = vld [vmem:[%s6240_s0 + $0x2f4] ss:$8 sps:$4 sm:$0xff]  }
  0x71   :  { %824 = vmatmul.mubr.bf16.gmra.mrb[24].mxu0 %v2994_v43  ;;  %1024 = vmatmul.mubr.bf16.gmra.mrb[24].mxu1 %v3051_v44  ;;  %v3072_v43 = vld [vmem:[%s6240_s0 + $0x160] ss:$8 sps:$4 sm:$0xff]   ;;  %v3117_v44 = vld [vmem:[%s6240_s0 + $0x2f0] ss:$8 sps:$4 sm:$0xff]  }
  0x72   :  { %831 = vmatprep.mubr.bf16.mxu0 %v2995_v45  ;;  %1031 = vmatprep.mubr.bf16.mxu1 %v3055_v46  ;;  %v3076_v45 = vld [vmem:[%s6240_s0 + $0x174] ss:$8 sps:$4 sm:$0xff]   ;;  %v3118_v46 = vld [vmem:[%s6240_s0 + $0x304] ss:$8 sps:$4 sm:$0xff]  }
  0x79   :  { %832 = vmatmul.mubr.bf16.gmra.mrb[28].mxu0 %v2997_v47  ;;  %1032 = vmatmul.mubr.bf16.gmra.mrb[28].mxu1 %v3057_v48  ;;  %v3078_v47 = vld [vmem:[%s6240_s0 + $0x170] ss:$8 sps:$4 sm:$0xff]   ;;  %v3120_v48 = vld [vmem:[%s6240_s0 + $0x300] ss:$8 sps:$4 sm:$0xff]  }
  0x7a   :  { %839 = vmatprep.mubr.bf16.mxu0 %v2998_v49  ;;  %1039 = vmatprep.mubr.bf16.mxu1 %v3061_v50  ;;  %v3082_v49 = vld [vmem:[%s6240_s0 + $0x184] ss:$8 sps:$4 sm:$0xff]   ;;  %v3121_v50 = vld [vmem:[%s6240_s0 + $0x314] ss:$8 sps:$4 sm:$0xff]  }
  0x81   :  { %840 = vmatmul.mubr.bf16.gmra.mrb[32].mxu0 %v3000_v51  ;;  %1040 = vmatmul.mubr.bf16.gmra.mrb[32].mxu1 %v3063_v52  ;;  %v3084_v51 = vld [vmem:[%s6240_s0 + $0x180] ss:$8 sps:$4 sm:$0xff]   ;;  %v3123_v52 = vld [vmem:[%s6240_s0 + $0x310] ss:$8 sps:$4 sm:$0xff]  }
  0x82   :  { %847 = vmatprep.mubr.bf16.mxu0 %v3001_v53  ;;  %1047 = vmatprep.mubr.bf16.mxu1 %v3067_v54 }
  0x89   :  { %848 = vmatmul.mubr.bf16.gmra.mrb[36].mxu0 %v3003_v55  ;;  %1048 = vmatmul.mubr.bf16.gmra.mrb[36].mxu1 %v3069_v56 }
  0x8a   :  { %855 = vmatprep.mubr.bf16.mxu0 %v3004_v57  ;;  %1055 = vmatprep.mubr.bf16.mxu1 %v3073_v58 }
  0x91   :  { %856 = vmatmul.mubr.bf16.gmra.mrb[40].mxu0 %v3006_v59  ;;  %1056 = vmatmul.mubr.bf16.gmra.mrb[40].mxu1 %v3075_v60 }
  0x92   :  { %863 = vmatprep.mubr.bf16.mxu0 %v3007_v61  ;;  %1063 = vmatprep.mubr.bf16.mxu1 %v3079_v62 }
  0x99   :  { %864 = vmatmul.mubr.bf16.gmra.mrb[44].mxu0 %v3009_v63  ;;  %1064 = vmatmul.mubr.bf16.gmra.mrb[44].mxu1 %v3081_v0 }
  0x9a   :  { %871 = vmatprep.mubr.bf16.mxu0 %v3010_v1  ;;  %1071 = vmatprep.mubr.bf16.mxu1 %v3085_v2 }
  0xa1   :  { %872 = vmatmul.mubr.bf16.gmra.mrb[48].mxu0 %v3012_v3  ;;  %1072 = vmatmul.mubr.bf16.gmra.mrb[48].mxu1 %v3087_v4 }
  0xa2   :  { %879 = vmatprep.mubr.bf16.mxu0 %v3016_v5  ;;  %1079 = vmatprep.mubr.bf16.mxu1 %v3088_v6 }
  0xa9   :  { %880 = vmatmul.mubr.bf16.gmra.mrb[52].mxu0 %v3018_v7  ;;  %1080 = vmatmul.mubr.bf16.gmra.mrb[52].mxu1 %v3090_v8 }
  0xaa   :  { %887 = vmatprep.mubr.bf16.mxu0 %v3022_v9  ;;  %1087 = vmatprep.mubr.bf16.mxu1 %v3091_v10 }
  0xb1   :  { %888 = vmatmul.mubr.bf16.gmra.mrb[56].mxu0 %v3024_v11  ;;  %1088 = vmatmul.mubr.bf16.gmra.mrb[56].mxu1 %v3093_v12 }
  0xb2   :  { %895 = vmatprep.mubr.bf16.mxu0 %v3028_v13  ;;  %1095 = vmatprep.mubr.bf16.mxu1 %v3094_v14 }
  0xb9   :  { %896 = vmatmul.mubr.bf16.gmra.mrb[60].mxu0 %v3030_v15  ;;  %1096 = vmatmul.mubr.bf16.gmra.mrb[60].mxu1 %v3096_v16 }
  0xba   :  { %903 = vmatprep.mubr.bf16.mxu0 %v3034_v17  ;;  %1103 = vmatprep.mubr.bf16.mxu1 %v3097_v18 }
  0xc1   :  { %904 = vmatmul.mubr.bf16.gmra.mrb[64].mxu0 %v3036_v19  ;;  %1104 = vmatmul.mubr.bf16.gmra.mrb[64].mxu1 %v3099_v20 }
  0xc2   :  { %911 = vmatprep.mubr.bf16.mxu0 %v3040_v21  ;;  %1111 = vmatprep.mubr.bf16.mxu1 %v3100_v22 }
  0xc9   :  { %912 = vmatmul.mubr.bf16.gmra.mrb[68].mxu0 %v3042_v23  ;;  %1112 = vmatmul.mubr.bf16.gmra.mrb[68].mxu1 %v3102_v24 }
  0xca   :  { %919 = vmatprep.mubr.bf16.mxu0 %v3046_v25  ;;  %1119 = vmatprep.mubr.bf16.mxu1 %v3103_v26 }
  0xd1   :  { %920 = vmatmul.mubr.bf16.gmra.mrb[72].mxu0 %v3048_v27  ;;  %1120 = vmatmul.mubr.bf16.gmra.mrb[72].mxu1 %v3105_v28 }
  0xd2   :  { %927 = vmatprep.mubr.bf16.mxu0 %v3052_v29  ;;  %1127 = vmatprep.mubr.bf16.mxu1 %v3106_v30 }
  0xd9   :  { %928 = vmatmul.mubr.bf16.gmra.mrb[76].mxu0 %v3054_v31  ;;  %1128 = vmatmul.mubr.bf16.gmra.mrb[76].mxu1 %v3108_v32 }
  0xda   :  { %935 = vmatprep.mubr.bf16.mxu0 %v3058_v33  ;;  %1135 = vmatprep.mubr.bf16.mxu1 %v3109_v34 }
  0xe1   :  { %936 = vmatmul.mubr.bf16.gmra.mrb[80].mxu0 %v3060_v35  ;;  %1136 = vmatmul.mubr.bf16.gmra.mrb[80].mxu1 %v3111_v36 }
  0xe2   :  { %943 = vmatprep.mubr.bf16.mxu0 %v3064_v37  ;;  %1143 = vmatprep.mubr.bf16.mxu1 %v3112_v38 }
  0xe9   :  { %944 = vmatmul.mubr.bf16.gmra.mrb[84].mxu0 %v3066_v39  ;;  %1144 = vmatmul.mubr.bf16.gmra.mrb[84].mxu1 %v3114_v40 }
  0xea   :  { %951 = vmatprep.mubr.bf16.mxu0 %v3070_v41  ;;  %1151 = vmatprep.mubr.bf16.mxu1 %v3115_v42 }
  0xf1   :  { %952 = vmatmul.mubr.bf16.gmra.mrb[88].mxu0 %v3072_v43  ;;  %1152 = vmatmul.mubr.bf16.gmra.mrb[88].mxu1 %v3117_v44 }
  0xf2   :  { %959 = vmatprep.mubr.bf16.mxu0 %v3076_v45  ;;  %1159 = vmatprep.mubr.bf16.mxu1 %v3118_v46 }
  0xf9   :  { %960 = vmatmul.mubr.bf16.gmra.mrb[92].mxu0 %v3078_v47  ;;  %1160 = vmatmul.mubr.bf16.gmra.mrb[92].mxu1 %v3120_v48 }
  0xfa   :  { %967 = vmatprep.mubr.bf16.mxu0 %v3082_v49  ;;  %1167 = vmatprep.mubr.bf16.mxu1 %v3121_v50 }
 0x101   :  { %968 = vmatmul.mubr.bf16.gmra.mrb[96].mxu0 %v3084_v51  ;;  %1168 = vmatmul.mubr.bf16.gmra.mrb[96].mxu1 %v3123_v52 }
 0x114   :  { %v3527_v53 = vpop.f32.mrb[0].mxu0  ;;  %v3529_v54 = vpop.f32.mrb[0].mxu1 }
 0x115   :  { %6424 = vst [vmem:[#allocation2_spill] sm:$0xff] %v3527_v53  ;;  %v779_v55 = vpop.f32.mrb[1].mxu0  ;;  %v979_v56 = vpop.f32.mrb[1].mxu1  ;;  %v1177_v59 = vsel %vm1176_vm0, %v3527_v53, 0.0 }
 0x116   :  { %v3531_v57 = vpop.f32.mrb[2].mxu0  ;;  %v3533_v58 = vpop.f32.mrb[2].mxu1 }
 0x117   :  { %6425 = vst [vmem:[#allocation3_spill] sm:$0xff] %v3531_v57  ;;  %v1178_v60 = vsel %vm1176_vm0, %v3531_v57, 0.0  ;;  %v782_v61 = vpop.f32.mrb[3].mxu0  ;;  %v982_v62 = vpop.f32.mrb[3].mxu1 }
 0x118   :  { %v1179_v63 = vadd.f32 %v1178_v60, %v1177_v59 }
 0x11c   :  { %v3539_v0 = vpop.f32.mrb[4].mxu0  ;;  %v3541_v1 = vpop.f32.mrb[4].mxu1 }
 0x11d   :  { %6426 = vst [vmem:[#allocation4_spill] sm:$0xff] %v3539_v0  ;;  %v1180_v2 = vsel %vm1176_vm0, %v3539_v0, 0.0  ;;  %v787_v3 = vpop.f32.mrb[5].mxu0  ;;  %v987_v4 = vpop.f32.mrb[5].mxu1 }
 0x11e   :  { %v1181_v5 = vadd.f32 %v1180_v2, %v1179_v63  ;;  %v3545_v6 = vpop.f32.mrb[6].mxu0  ;;  %v3547_v7 = vpop.f32.mrb[6].mxu1 }
 0x11f   :  { %6427 = vst [vmem:[#allocation5_spill] sm:$0xff] %v3545_v6  ;;  %v1182_v8 = vsel %vm1176_vm0, %v3545_v6, 0.0  ;;  %v790_v9 = vpop.f32.mrb[7].mxu0  ;;  %v990_v10 = vpop.f32.mrb[7].mxu1 }
 0x120   :  { %v1183_v11 = vadd.f32 %v1182_v8, %v1181_v5 }
 0x124   :  { %v3551_v12 = vpop.f32.mrb[8].mxu0  ;;  %v3553_v13 = vpop.f32.mrb[8].mxu1 }
 0x125   :  { %6428 = vst [vmem:[#allocation6_spill] sm:$0xff] %v3551_v12  ;;  %v1184_v14 = vsel %vm1176_vm0, %v3551_v12, 0.0  ;;  %v795_v15 = vpop.f32.mrb[9].mxu0  ;;  %v995_v16 = vpop.f32.mrb[9].mxu1 }
 0x126   :  { %v1185_v17 = vadd.f32 %v1184_v14, %v1183_v11  ;;  %v3557_v18 = vpop.f32.mrb[10].mxu0  ;;  %v3559_v19 = vpop.f32.mrb[10].mxu1 }
 0x127   :  { %6429 = vst [vmem:[#allocation7_spill] sm:$0xff] %v3557_v18  ;;  %v1186_v20 = vsel %vm1176_vm0, %v3557_v18, 0.0  ;;  %v798_v21 = vpop.f32.mrb[11].mxu0  ;;  %v998_v22 = vpop.f32.mrb[11].mxu1 }
 0x128   :  { %v1187_v23 = vadd.f32 %v1186_v20, %v1185_v17 }
 0x12c   :  { %v3563_v24 = vpop.f32.mrb[12].mxu0  ;;  %v3565_v25 = vpop.f32.mrb[12].mxu1 }
 0x12d   :  { %6430 = vst [vmem:[#allocation8_spill] sm:$0xff] %v3563_v24  ;;  %v1188_v26 = vsel %vm1176_vm0, %v3563_v24, 0.0  ;;  %v803_v27 = vpop.f32.mrb[13].mxu0  ;;  %v1003_v28 = vpop.f32.mrb[13].mxu1 }
 0x12e   :  { %v1189_v29 = vadd.f32 %v1188_v26, %v1187_v23  ;;  %v3569_v30 = vpop.f32.mrb[14].mxu0  ;;  %v3571_v31 = vpop.f32.mrb[14].mxu1 }
 0x12f   :  { %6431 = vst [vmem:[#allocation9_spill] sm:$0xff] %v3569_v30  ;;  %v1190_v32 = vsel %vm1176_vm0, %v3569_v30, 0.0  ;;  %v806_v33 = vpop.f32.mrb[15].mxu0  ;;  %v1006_v34 = vpop.f32.mrb[15].mxu1 }
 0x130   :  { %v1191_v35 = vadd.f32 %v1190_v32, %v1189_v29 }
 0x134   :  { %v3575_v36 = vpop.f32.mrb[16].mxu0  ;;  %v3577_v37 = vpop.f32.mrb[16].mxu1 }
 0x135   :  { %6432 = vst [vmem:[#allocation10_spill] sm:$0xff] %v3575_v36  ;;  %v1192_v38 = vsel %vm1176_vm0, %v3575_v36, 0.0  ;;  %v811_v39 = vpop.f32.mrb[17].mxu0  ;;  %v1011_v40 = vpop.f32.mrb[17].mxu1 }
 0x136   :  { %v1193_v41 = vadd.f32 %v1192_v38, %v1191_v35  ;;  %v3581_v42 = vpop.f32.mrb[18].mxu0  ;;  %v3583_v43 = vpop.f32.mrb[18].mxu1 }
 0x137   :  { %6433 = vst [vmem:[#allocation11_spill] sm:$0xff] %v3581_v42  ;;  %v1194_v44 = vsel %vm1176_vm0, %v3581_v42, 0.0  ;;  %v814_v45 = vpop.f32.mrb[19].mxu0  ;;  %v1014_v46 = vpop.f32.mrb[19].mxu1 }
 0x138   :  { %v1195_v47 = vadd.f32 %v1194_v44, %v1193_v41 }
 0x13c   :  { %v3587_v48 = vpop.f32.mrb[20].mxu0  ;;  %v3589_v49 = vpop.f32.mrb[20].mxu1 }
 0x13d   :  { %6434 = vst [vmem:[#allocation12_spill] sm:$0xff] %v3587_v48  ;;  %v1196_v50 = vsel %vm1176_vm0, %v3587_v48, 0.0  ;;  %v819_v51 = vpop.f32.mrb[21].mxu0  ;;  %v1019_v52 = vpop.f32.mrb[21].mxu1 }
 0x13e   :  { %v1197_v55 = vadd.f32 %v1196_v50, %v1195_v47  ;;  %v3593_v56 = vpop.f32.mrb[22].mxu0  ;;  %v3595_v59 = vpop.f32.mrb[22].mxu1 }
 0x13f   :  { %6435 = vst [vmem:[#allocation13_spill] sm:$0xff] %v3593_v56  ;;  %v1198_v60 = vsel %vm1176_vm0, %v3593_v56, 0.0  ;;  %v822_v61 = vpop.f32.mrb[23].mxu0  ;;  %v1022_v62 = vpop.f32.mrb[23].mxu1 }
 0x140   :  { %v1199_v63 = vadd.f32 %v1198_v60, %v1197_v55 }
 0x144   :  { %v3599_v2 = vpop.f32.mrb[24].mxu0  ;;  %v3601_v3 = vpop.f32.mrb[24].mxu1 }
 0x145   :  { %6436 = vst [vmem:[#allocation14_spill] sm:$0xff] %v3599_v2  ;;  %v1200_v4 = vsel %vm1176_vm0, %v3599_v2, 0.0  ;;  %v827_v5 = vpop.f32.mrb[25].mxu0  ;;  %v1027_v8 = vpop.f32.mrb[25].mxu1 }
 0x146   :  { %v1201_v9 = vadd.f32 %v1200_v4, %v1199_v63  ;;  %v3605_v10 = vpop.f32.mrb[26].mxu0  ;;  %v3607_v11 = vpop.f32.mrb[26].mxu1 }
 0x147   :  { %6437 = vst [vmem:[#allocation15_spill] sm:$0xff] %v3605_v10  ;;  %v1202_v14 = vsel %vm1176_vm0, %v3605_v10, 0.0  ;;  %v830_v15 = vpop.f32.mrb[27].mxu0  ;;  %v1030_v16 = vpop.f32.mrb[27].mxu1 }
 0x148   :  { %v1203_v17 = vadd.f32 %v1202_v14, %v1201_v9 }
 0x14c   :  { %v3611_v20 = vpop.f32.mrb[28].mxu0  ;;  %v3613_v21 = vpop.f32.mrb[28].mxu1 }
 0x14d   :  { %6438 = vst [vmem:[#allocation16_spill] sm:$0xff] %v3611_v20  ;;  %v1204_v22 = vsel %vm1176_vm0, %v3611_v20, 0.0  ;;  %v835_v23 = vpop.f32.mrb[29].mxu0  ;;  %v1035_v26 = vpop.f32.mrb[29].mxu1 }
 0x14e   :  { %v1205_v27 = vadd.f32 %v1204_v22, %v1203_v17  ;;  %v3617_v28 = vpop.f32.mrb[30].mxu0  ;;  %v3619_v29 = vpop.f32.mrb[30].mxu1 }
 0x14f   :  { %6439 = vst [vmem:[#allocation17_spill] sm:$0xff] %v3617_v28  ;;  %v1206_v32 = vsel %vm1176_vm0, %v3617_v28, 0.0  ;;  %v838_v33 = vpop.f32.mrb[31].mxu0  ;;  %v1038_v34 = vpop.f32.mrb[31].mxu1 }
 0x150   :  { %v1207_v35 = vadd.f32 %v1206_v32, %v1205_v27 }
 0x154   :  { %v3623_v38 = vpop.f32.mrb[32].mxu0  ;;  %v3625_v39 = vpop.f32.mrb[32].mxu1 }
 0x155   :  { %6440 = vst [vmem:[#allocation18_spill] sm:$0xff] %v3623_v38  ;;  %v1208_v40 = vsel %vm1176_vm0, %v3623_v38, 0.0  ;;  %v843_v41 = vpop.f32.mrb[33].mxu0  ;;  %v1043_v44 = vpop.f32.mrb[33].mxu1 }
 0x156   :  { %v1209_v45 = vadd.f32 %v1208_v40, %v1207_v35  ;;  %v3629_v46 = vpop.f32.mrb[34].mxu0  ;;  %v3631_v47 = vpop.f32.mrb[34].mxu1 }
 0x157   :  { %6441 = vst [vmem:[#allocation19_spill] sm:$0xff] %v3629_v46  ;;  %v1210_v50 = vsel %vm1176_vm0, %v3629_v46, 0.0  ;;  %v846_v51 = vpop.f32.mrb[35].mxu0  ;;  %v1046_v52 = vpop.f32.mrb[35].mxu1 }
 0x158   :  { %v1211_v55 = vadd.f32 %v1210_v50, %v1209_v45 }
 0x15c   :  { %v3635_v60 = vpop.f32.mrb[36].mxu0  ;;  %v3637_v61 = vpop.f32.mrb[36].mxu1 }
 0x15d   :  { %6442 = vst [vmem:[#allocation20_spill] sm:$0xff] %v3635_v60  ;;  %v1212_v62 = vsel %vm1176_vm0, %v3635_v60, 0.0  ;;  %v851_v63 = vpop.f32.mrb[37].mxu0  ;;  %v1051_v4 = vpop.f32.mrb[37].mxu1 }
 0x15e   :  { %v1213_v5 = vadd.f32 %v1212_v62, %v1211_v55  ;;  %v3641_v8 = vpop.f32.mrb[38].mxu0  ;;  %v3643_v9 = vpop.f32.mrb[38].mxu1 }
 0x15f   :  { %6443 = vst [vmem:[#allocation21_spill] sm:$0xff] %v3641_v8  ;;  %v1214_v14 = vsel %vm1176_vm0, %v3641_v8, 0.0  ;;  %v854_v15 = vpop.f32.mrb[39].mxu0  ;;  %v1054_v16 = vpop.f32.mrb[39].mxu1 }
 0x160   :  { %v1215_v17 = vadd.f32 %v1214_v14, %v1213_v5 }
 0x164   :  { %v3647_v22 = vpop.f32.mrb[40].mxu0  ;;  %v3649_v23 = vpop.f32.mrb[40].mxu1 }
 0x165   :  { %6444 = vst [vmem:[#allocation22_spill] sm:$0xff] %v3647_v22  ;;  %v1216_v26 = vsel %vm1176_vm0, %v3647_v22, 0.0  ;;  %v859_v27 = vpop.f32.mrb[41].mxu0  ;;  %v1059_v32 = vpop.f32.mrb[41].mxu1 }
 0x166   :  { %v1217_v33 = vadd.f32 %v1216_v26, %v1215_v17  ;;  %v3653_v34 = vpop.f32.mrb[42].mxu0  ;;  %v3655_v35 = vpop.f32.mrb[42].mxu1 }
 0x167   :  { %6445 = vst [vmem:[#allocation23_spill] sm:$0xff] %v3653_v34  ;;  %v1218_v40 = vsel %vm1176_vm0, %v3653_v34, 0.0  ;;  %v862_v41 = vpop.f32.mrb[43].mxu0  ;;  %v1062_v44 = vpop.f32.mrb[43].mxu1 }
 0x168   :  { %v1219_v45 = vadd.f32 %v1218_v40, %v1217_v33 }
 0x16c   :  { %v3659_v50 = vpop.f32.mrb[44].mxu0  ;;  %v3661_v51 = vpop.f32.mrb[44].mxu1 }
 0x16d   :  { %6446 = vst [vmem:[#allocation24_spill] sm:$0xff] %v3659_v50  ;;  %v1220_v52 = vsel %vm1176_vm0, %v3659_v50, 0.0  ;;  %v867_v55 = vpop.f32.mrb[45].mxu0  ;;  %v1067_v62 = vpop.f32.mrb[45].mxu1 }
 0x16e   :  { %v1221_v63 = vadd.f32 %v1220_v52, %v1219_v45  ;;  %v3665_v4 = vpop.f32.mrb[46].mxu0  ;;  %v3667_v5 = vpop.f32.mrb[46].mxu1 }
 0x16f   :  { %6447 = vst [vmem:[#allocation25_spill] sm:$0xff] %v3665_v4  ;;  %v1222_v14 = vsel %vm1176_vm0, %v3665_v4, 0.0  ;;  %v870_v15 = vpop.f32.mrb[47].mxu0  ;;  %v1070_v16 = vpop.f32.mrb[47].mxu1 }
 0x170   :  { %v1223_v17 = vadd.f32 %v1222_v14, %v1221_v63 }
 0x174   :  { %v3671_v26 = vpop.f32.mrb[48].mxu0  ;;  %v3673_v27 = vpop.f32.mrb[48].mxu1 }
 0x175   :  { %6448 = vst [vmem:[#allocation26_spill] sm:$0xff] %v3671_v26  ;;  %v1224_v32 = vsel %vm1176_vm0, %v3671_v26, 0.0  ;;  %v875_v33 = vpop.f32.mrb[49].mxu0  ;;  %v1075_v40 = vpop.f32.mrb[49].mxu1 }
 0x176   :  { %v1225_v41 = vadd.f32 %v1224_v32, %v1223_v17  ;;  %v3677_v44 = vpop.f32.mrb[50].mxu0  ;;  %v3679_v45 = vpop.f32.mrb[50].mxu1 }
 0x177   :  { %6449 = vst [vmem:[#allocation27_spill] sm:$0xff] %v3677_v44  ;;  %v1226_v52 = vsel %vm1176_vm0, %v3677_v44, 0.0  ;;  %v878_v55 = vpop.f32.mrb[51].mxu0  ;;  %v1078_v62 = vpop.f32.mrb[51].mxu1 }
 0x178   :  { %v1227_v63 = vadd.f32 %v1226_v52, %v1225_v41 }
 0x17c   :  { %v3683_v14 = vpop.f32.mrb[52].mxu0  ;;  %v3685_v15 = vpop.f32.mrb[52].mxu1 }
 0x17d   :  { %6450 = vst [vmem:[#allocation28_spill] sm:$0xff] %v3683_v14  ;;  %v1228_v16 = vsel %vm1176_vm0, %v3683_v14, 0.0  ;;  %v883_v33 = vpop.f32.mrb[53].mxu0  ;;  %v1083_v40 = vpop.f32.mrb[53].mxu1 }
 0x17e   :  { %v1229_v17 = vadd.f32 %v1228_v16, %v1227_v63  ;;  %v3689_v32 = vpop.f32.mrb[54].mxu0  ;;  %v3691_v26 = vpop.f32.mrb[54].mxu1 }
 0x17f   :  { %6451 = vst [vmem:[#allocation29_spill] sm:$0xff] %v3689_v32  ;;  %v1230_v44 = vsel %vm1176_vm0, %v3689_v32, 0.0  ;;  %v886_v55 = vpop.f32.mrb[55].mxu0  ;;  %v1086_v62 = vpop.f32.mrb[55].mxu1 }
 0x180   :  { %v1231_v41 = vadd.f32 %v1230_v44, %v1229_v17 }
 0x184   :  { %v3695_v52 = vpop.f32.mrb[56].mxu0  ;;  %v3697_v4 = vpop.f32.mrb[56].mxu1 }
 0x185   :  { %6452 = vst [vmem:[#allocation30_spill] sm:$0xff] %v3695_v52  ;;  %v1232_v14 = vsel %vm1176_vm0, %v3695_v52, 0.0  ;;  %v891_v33 = vpop.f32.mrb[57].mxu0  ;;  %v1091_v40 = vpop.f32.mrb[57].mxu1 }
 0x186   :  { %v1233_v63 = vadd.f32 %v1232_v14, %v1231_v41  ;;  %v3701_v16 = vpop.f32.mrb[58].mxu0  ;;  %v3703_v50 = vpop.f32.mrb[58].mxu1 }
 0x187   :  { %6453 = vst [vmem:[#allocation31_spill] sm:$0xff] %v3701_v16  ;;  %v1234_v32 = vsel %vm1176_vm0, %v3701_v16, 0.0  ;;  %v894_v55 = vpop.f32.mrb[59].mxu0  ;;  %v1094_v62 = vpop.f32.mrb[59].mxu1 }
 0x188   :  { %v1235_v44 = vadd.f32 %v1234_v32, %v1233_v63 }
 0x18c   :  { %v3707_v17 = vpop.f32.mrb[60].mxu0  ;;  %v3709_v34 = vpop.f32.mrb[60].mxu1 }
 0x18d   :  { %6454 = vst [vmem:[#allocation32_spill] sm:$0xff] %v3707_v17  ;;  %v1236_v52 = vsel %vm1176_vm0, %v3707_v17, 0.0  ;;  %v899_v33 = vpop.f32.mrb[61].mxu0  ;;  %v1099_v40 = vpop.f32.mrb[61].mxu1 }
 0x18e   :  { %v1237_v14 = vadd.f32 %v1236_v52, %v1235_v44  ;;  %v3713_v41 = vpop.f32.mrb[62].mxu0  ;;  %v3715_v22 = vpop.f32.mrb[62].mxu1 }
 0x18f   :  { %6455 = vst [vmem:[#allocation33_spill] sm:$0xff] %v3713_v41  ;;  %v1238_v16 = vsel %vm1176_vm0, %v3713_v41, 0.0  ;;  %v902_v55 = vpop.f32.mrb[63].mxu0  ;;  %v1102_v62 = vpop.f32.mrb[63].mxu1 }
 0x190   :  { %v1239_v32 = vadd.f32 %v1238_v16, %v1237_v14 }
 0x194   :  { %v3719_v63 = vpop.f32.mrb[64].mxu0  ;;  %v3721_v8 = vpop.f32.mrb[64].mxu1 }
 0x195   :  { %6456 = vst [vmem:[#allocation34_spill] sm:$0xff] %v3719_v63  ;;  %v1240_v17 = vsel %vm1176_vm0, %v3719_v63, 0.0  ;;  %v907_v33 = vpop.f32.mrb[65].mxu0  ;;  %v1107_v40 = vpop.f32.mrb[65].mxu1 }
 0x196   :  { %v1241_v52 = vadd.f32 %v1240_v17, %v1239_v32  ;;  %v3725_v44 = vpop.f32.mrb[66].mxu0  ;;  %v3727_v60 = vpop.f32.mrb[66].mxu1 }
 0x197   :  { %6457 = vst [vmem:[#allocation35_spill] sm:$0xff] %v3725_v44  ;;  %v1242_v41 = vsel %vm1176_vm0, %v3725_v44, 0.0  ;;  %v910_v55 = vpop.f32.mrb[67].mxu0  ;;  %v1110_v62 = vpop.f32.mrb[67].mxu1 }
 0x198   :  { %v1243_v16 = vadd.f32 %v1242_v41, %v1241_v52 }
 0x19c   :  { %v3731_v14 = vpop.f32.mrb[68].mxu0  ;;  %v3733_v46 = vpop.f32.mrb[68].mxu1 }
 0x19d   :  { %6458 = vst [vmem:[#allocation36_spill] sm:$0xff] %v3731_v14  ;;  %v1244_v63 = vsel %vm1176_vm0, %v3731_v14, 0.0  ;;  %v915_v33 = vpop.f32.mrb[69].mxu0  ;;  %v1115_v40 = vpop.f32.mrb[69].mxu1 }
 0x19e   :  { %v1245_v17 = vadd.f32 %v1244_v63, %v1243_v16  ;;  %v3737_v32 = vpop.f32.mrb[70].mxu0  ;;  %v3739_v38 = vpop.f32.mrb[70].mxu1 }
 0x19f   :  { %6459 = vst [vmem:[#allocation37_spill] sm:$0xff] %v3737_v32  ;;  %v1246_v44 = vsel %vm1176_vm0, %v3737_v32, 0.0  ;;  %v918_v55 = vpop.f32.mrb[71].mxu0  ;;  %v1118_v62 = vpop.f32.mrb[71].mxu1 }
 0x1a0   :  { %v1247_v41 = vadd.f32 %v1246_v44, %v1245_v17 }
 0x1a4   :  { %v3743_v52 = vpop.f32.mrb[72].mxu0  ;;  %v3745_v28 = vpop.f32.mrb[72].mxu1 }
 0x1a5   :  { %6460 = vst [vmem:[#allocation38_spill] sm:$0xff] %v3743_v52  ;;  %v1248_v14 = vsel %vm1176_vm0, %v3743_v52, 0.0  ;;  %v923_v33 = vpop.f32.mrb[73].mxu0  ;;  %v1123_v40 = vpop.f32.mrb[73].mxu1 }
 0x1a6   :  { %v1249_v63 = vadd.f32 %v1248_v14, %v1247_v41  ;;  %v3749_v16 = vpop.f32.mrb[74].mxu0  ;;  %v3751_v20 = vpop.f32.mrb[74].mxu1 }
 0x1a7   :  { %6461 = vst [vmem:[#allocation39_spill] sm:$0xff] %v3749_v16  ;;  %v1250_v32 = vsel %vm1176_vm0, %v3749_v16, 0.0  ;;  %v926_v55 = vpop.f32.mrb[75].mxu0  ;;  %v1126_v62 = vpop.f32.mrb[75].mxu1 }
 0x1a8   :  { %v1251_v44 = vadd.f32 %v1250_v32, %v1249_v63 }
 0x1ac   :  { %v3755_v17 = vpop.f32.mrb[76].mxu0  ;;  %v3757_v10 = vpop.f32.mrb[76].mxu1 }
 0x1ad   :  { %6462 = vst [vmem:[#allocation40_spill] sm:$0xff] %v3755_v17  ;;  %v1252_v52 = vsel %vm1176_vm0, %v3755_v17, 0.0  ;;  %v931_v33 = vpop.f32.mrb[77].mxu0  ;;  %v1131_v40 = vpop.f32.mrb[77].mxu1 }
 0x1ae   :  { %v1253_v14 = vadd.f32 %v1252_v52, %v1251_v44  ;;  %v3761_v41 = vpop.f32.mrb[78].mxu0  ;;  %v3763_v2 = vpop.f32.mrb[78].mxu1 }
 0x1af   :  { %6463 = vst [vmem:[#allocation41_spill] sm:$0xff] %v3761_v41  ;;  %v1254_v16 = vsel %vm1176_vm0, %v3761_v41, 0.0  ;;  %v934_v55 = vpop.f32.mrb[79].mxu0  ;;  %v1134_v62 = vpop.f32.mrb[79].mxu1 }
 0x1b0   :  { %v1255_v32 = vadd.f32 %v1254_v16, %v1253_v14 }
 0x1b4   :  { %v3767_v63 = vpop.f32.mrb[80].mxu0  ;;  %v3769_v56 = vpop.f32.mrb[80].mxu1 }
 0x1b5   :  { %6464 = vst [vmem:[#allocation42_spill] sm:$0xff] %v3767_v63  ;;  %v1256_v17 = vsel %vm1176_vm0, %v3767_v63, 0.0  ;;  %v939_v33 = vpop.f32.mrb[81].mxu0  ;;  %v1139_v40 = vpop.f32.mrb[81].mxu1 }
 0x1b6   :  { %v1257_v52 = vadd.f32 %v1256_v17, %v1255_v32  ;;  %v3773_v44 = vpop.f32.mrb[82].mxu0  ;;  %v3775_v48 = vpop.f32.mrb[82].mxu1 }
 0x1b7   :  { %6465 = vst [vmem:[#allocation43_spill] sm:$0xff] %v3773_v44  ;;  %v1258_v41 = vsel %vm1176_vm0, %v3773_v44, 0.0  ;;  %v942_v55 = vpop.f32.mrb[83].mxu0  ;;  %v1142_v62 = vpop.f32.mrb[83].mxu1 }
 0x1b8   :  { %v1259_v16 = vadd.f32 %v1258_v41, %v1257_v52 }
 0x1bc   :  { %v3779_v14 = vpop.f32.mrb[84].mxu0  ;;  %v3781_v42 = vpop.f32.mrb[84].mxu1 }
 0x1bd   :  { %6466 = vst [vmem:[#allocation44_spill] sm:$0xff] %v3779_v14  ;;  %v1260_v63 = vsel %vm1176_vm0, %v3779_v14, 0.0  ;;  %v947_v33 = vpop.f32.mrb[85].mxu0  ;;  %v1147_v40 = vpop.f32.mrb[85].mxu1 }
 0x1be   :  { %v1261_v17 = vadd.f32 %v1260_v63, %v1259_v16  ;;  %v3785_v32 = vpop.f32.mrb[86].mxu0  ;;  %v3787_v36 = vpop.f32.mrb[86].mxu1 }
 0x1bf   :  { %6467 = vst [vmem:[#allocation45_spill] sm:$0xff] %v3785_v32  ;;  %v1262_v44 = vsel %vm1176_vm0, %v3785_v32, 0.0  ;;  %v950_v55 = vpop.f32.mrb[87].mxu0  ;;  %v1150_v62 = vpop.f32.mrb[87].mxu1 }
 0x1c0   :  { %v1263_v41 = vadd.f32 %v1262_v44, %v1261_v17 }
 0x1c4   :  { %v3791_v52 = vpop.f32.mrb[88].mxu0  ;;  %v3793_v30 = vpop.f32.mrb[88].mxu1 }
 0x1c5   :  { %6468 = vst [vmem:[#allocation46_spill] sm:$0xff] %v3791_v52  ;;  %6469 = vst [vmem:[#allocation47_spill] sm:$0xff] %v3793_v30  ;;  %v1264_v14 = vsel %vm1176_vm0, %v3791_v52, 0.0  ;;  %v955_v33 = vpop.f32.mrb[89].mxu0  ;;  %v1155_v40 = vpop.f32.mrb[89].mxu1 }
 0x1c6   :  { %v1265_v63 = vadd.f32 %v1264_v14, %v1263_v41  ;;  %v3797_v16 = vpop.f32.mrb[90].mxu0  ;;  %v3799_v24 = vpop.f32.mrb[90].mxu1 }
 0x1c7   :  { %6470 = vst [vmem:[#allocation48_spill] sm:$0xff] %v3797_v16  ;;  %6471 = vst [vmem:[#allocation49_spill] sm:$0xff] %v3799_v24  ;;  %v1266_v32 = vsel %vm1176_vm0, %v3797_v16, 0.0  ;;  %v958_v55 = vpop.f32.mrb[91].mxu0  ;;  %v1158_v62 = vpop.f32.mrb[91].mxu1 }
 0x1c8   :  { %v1267_v44 = vadd.f32 %v1266_v32, %v1265_v63 }
 0x1cc   :  { %v3803_v17 = vpop.f32.mrb[92].mxu0  ;;  %v3805_v18 = vpop.f32.mrb[92].mxu1 }
 0x1cd   :  { %6472 = vst [vmem:[#allocation50_spill] sm:$0xff] %v3803_v17  ;;  %6473 = vst [vmem:[#allocation51_spill] sm:$0xff] %v3805_v18  ;;  %v1268_v52 = vsel %vm1176_vm0, %v3803_v17, 0.0  ;;  %v963_v33 = vpop.f32.mrb[93].mxu0  ;;  %v1163_v40 = vpop.f32.mrb[93].mxu1 }
 0x1ce   :  { %v1269_v14 = vadd.f32 %v1268_v52, %v1267_v44  ;;  %v3809_v41 = vpop.f32.mrb[94].mxu0  ;;  %v3811_v12 = vpop.f32.mrb[94].mxu1 }
 0x1cf   :  { %6474 = vst [vmem:[#allocation52_spill] sm:$0xff] %v3809_v41  ;;  %v1270_v16 = vsel %vm1176_vm0, %v3809_v41, 0.0  ;;  %v966_v55 = vpop.f32.mrb[95].mxu0  ;;  %v1166_v62 = vpop.f32.mrb[95].mxu1 }
 0x1d0   :  { %v1271_v32 = vadd.f32 %v1270_v16, %v1269_v14  ;;  %v1276_v14 = vsel %vm1176_vm0, %v3529_v54, 0.0 }
 0x1d4   :  { %v3815_v63 = vpop.f32.mrb[96].mxu0  ;;  %v3817_v6 = vpop.f32.mrb[96].mxu1 }
 0x1d5   :  { %6475 = vst [vmem:[#allocation53_spill] sm:$0xff] %v3815_v63  ;;  %6476 = vst [vmem:[#allocation54_spill] sm:$0xff] %v3817_v6  ;;  %v1272_v17 = vsel %vm1176_vm0, %v3815_v63, 0.0  ;;  %v971_v33 = vpop.f32.mrb[97].mxu0  ;;  %v1171_v40 = vpop.f32.mrb[97].mxu1  ;;  %v1278_v63 = vsel %vm1176_vm0, %v3533_v58, 0.0 }
 0x1d6   :  { %v1273_v52 = vadd.f32 %v1272_v17, %v1271_v32  ;;  %v3821_v44 = vpop.f32.mrb[98].mxu0  ;;  %v3823_v0 = vpop.f32.mrb[98].mxu1  ;;  %v1280_v17 = vsel %vm1176_vm0, %v3541_v1, 0.0  ;;  %v1282_v40 = vsel %vm1176_vm0, %v3547_v7, 0.0 }
 0x1d7   :  { %v1274_v41 = vsel %vm1176_vm0, %v3821_v44, 0.0  ;;  %v974_v55 = vpop.f32.mrb[99].mxu0  ;;  %v1174_v62 = vpop.f32.mrb[99].mxu1 }
 0x1d8   :  { %v1275_v16 = vadd.f32 %v1274_v41, %v1273_v52  ;;  %v1284_v55 = vsel %vm1176_vm0, %v3553_v13, 0.0  ;;  %v1286_v52 = vsel %vm1176_vm0, %v3559_v19, 0.0 }
 0x1da   :  { %v1277_v57 = vadd.f32 %v1276_v14, %v1275_v16  ;;  %v1288_v16 = vsel %vm1176_vm0, %v3565_v25, 0.0 }
 0x1dc   :  { %v1279_v33 = vadd.f32 %v1278_v63, %v1277_v57  ;;  %v1290_v63 = vsel %vm1176_vm0, %v3571_v31, 0.0 }
 0x1de   :  { %v1281_v32 = vadd.f32 %v1280_v17, %v1279_v33  ;;  %v1292_v33 = vsel %vm1176_vm0, %v3577_v37, 0.0 }
 0x1e0   :  { %v1283_v53 = vadd.f32 %v1282_v40, %v1281_v32  ;;  %v1294_v32 = vsel %vm1176_vm0, %v3583_v43, 0.0  ;;  %v1296_v40 = vsel %vm1176_vm0, %v3589_v49, 0.0 }
 0x1e2   :  { %v1285_v41 = vadd.f32 %v1284_v55, %v1283_v53 }
 0x1e4   :  { %v1287_v62 = vadd.f32 %v1286_v52, %v1285_v41  ;;  %v1298_v41 = vsel %vm1176_vm0, %v3595_v59, 0.0 }
 0x1e6   :  { %v1289_v57 = vadd.f32 %v1288_v16, %v1287_v62  ;;  %v1300_v62 = vsel %vm1176_vm0, %v3601_v3, 0.0 }
 0x1e8   :  { %v1291_v14 = vadd.f32 %v1290_v63, %v1289_v57  ;;  %v1302_v57 = vsel %vm1176_vm0, %v3607_v11, 0.0 }
 0x1ea   :  { %v1293_v17 = vadd.f32 %v1292_v33, %v1291_v14  ;;  %v1304_v14 = vsel %vm1176_vm0, %v3613_v21, 0.0 }
 0x1ec   :  { %v1295_v53 = vadd.f32 %v1294_v32, %v1293_v17  ;;  %v1306_v17 = vsel %vm1176_vm0, %v3619_v29, 0.0 }
 0x1ee   :  { %v1297_v55 = vadd.f32 %v1296_v40, %v1295_v53  ;;  %v1308_v53 = vsel %vm1176_vm0, %v3625_v39, 0.0 }
 0x1f0   :  { %v1299_v52 = vadd.f32 %v1298_v41, %v1297_v55  ;;  %v1310_v55 = vsel %vm1176_vm0, %v3631_v47, 0.0 }
 0x1f2   :  { %v1301_v16 = vadd.f32 %v1300_v62, %v1299_v52  ;;  %v1312_v52 = vsel %vm1176_vm0, %v3637_v61, 0.0 }
 0x1f4   :  { %v1303_v63 = vadd.f32 %v1302_v57, %v1301_v16  ;;  %v1314_v16 = vsel %vm1176_vm0, %v3643_v9, 0.0 }
 0x1f6   :  { %v1305_v33 = vadd.f32 %v1304_v14, %v1303_v63  ;;  %v1316_v63 = vsel %vm1176_vm0, %v3649_v23, 0.0 }
 0x1f8   :  { %v1307_v32 = vadd.f32 %v1306_v17, %v1305_v33  ;;  %v1318_v33 = vsel %vm1176_vm0, %v3655_v35, 0.0 }
 0x1fa   :  { %v1309_v40 = vadd.f32 %v1308_v53, %v1307_v32  ;;  %v1320_v32 = vsel %vm1176_vm0, %v3661_v51, 0.0 }
 0x1fc   :  { %v1311_v41 = vadd.f32 %v1310_v55, %v1309_v40  ;;  %v1322_v40 = vsel %vm1176_vm0, %v3667_v5, 0.0 }
 0x1fe   :  { %v1313_v62 = vadd.f32 %v1312_v52, %v1311_v41  ;;  %v1324_v41 = vsel %vm1176_vm0, %v3673_v27, 0.0 }
 0x200   :  { %v1315_v57 = vadd.f32 %v1314_v16, %v1313_v62  ;;  %v1326_v62 = vsel %vm1176_vm0, %v3679_v45, 0.0 }
 0x202   :  { %v1317_v14 = vadd.f32 %v1316_v63, %v1315_v57  ;;  %v1328_v57 = vsel %vm1176_vm0, %v3685_v15, 0.0 }
 0x204   :  { %v1319_v17 = vadd.f32 %v1318_v33, %v1317_v14  ;;  %v1330_v14 = vsel %vm1176_vm0, %v3691_v26, 0.0 }
 0x206   :  { %v1321_v53 = vadd.f32 %v1320_v32, %v1319_v17  ;;  %v1332_v17 = vsel %vm1176_vm0, %v3697_v4, 0.0 }
 0x208   :  { %v1323_v55 = vadd.f32 %v1322_v40, %v1321_v53  ;;  %v1334_v53 = vsel %vm1176_vm0, %v3703_v50, 0.0 }
 0x20a   :  { %v1325_v52 = vadd.f32 %v1324_v41, %v1323_v55  ;;  %v1336_v55 = vsel %vm1176_vm0, %v3709_v34, 0.0 }
 0x20c   :  { %v1327_v16 = vadd.f32 %v1326_v62, %v1325_v52  ;;  %v1338_v52 = vsel %vm1176_vm0, %v3715_v22, 0.0 }
 0x20e   :  { %v1329_v63 = vadd.f32 %v1328_v57, %v1327_v16  ;;  %v1340_v16 = vsel %vm1176_vm0, %v3721_v8, 0.0 }
 0x210   :  { %v1331_v33 = vadd.f32 %v1330_v14, %v1329_v63  ;;  %v1342_v63 = vsel %vm1176_vm0, %v3727_v60, 0.0 }
 0x212   :  { %v1333_v32 = vadd.f32 %v1332_v17, %v1331_v33  ;;  %v1344_v33 = vsel %vm1176_vm0, %v3733_v46, 0.0 }
 0x214   :  { %v1335_v40 = vadd.f32 %v1334_v53, %v1333_v32  ;;  %v1346_v32 = vsel %vm1176_vm0, %v3739_v38, 0.0 }
 0x216   :  { %v1337_v41 = vadd.f32 %v1336_v55, %v1335_v40  ;;  %v1348_v40 = vsel %vm1176_vm0, %v3745_v28, 0.0 }
 0x218   :  { %v1339_v62 = vadd.f32 %v1338_v52, %v1337_v41  ;;  %v1350_v41 = vsel %vm1176_vm0, %v3751_v20, 0.0 }
 0x21a   :  { %v1341_v57 = vadd.f32 %v1340_v16, %v1339_v62  ;;  %v1352_v62 = vsel %vm1176_vm0, %v3757_v10, 0.0 }
 0x21c   :  { %v1343_v14 = vadd.f32 %v1342_v63, %v1341_v57  ;;  %v1354_v57 = vsel %vm1176_vm0, %v3763_v2, 0.0 }
 0x21e   :  { %v1345_v17 = vadd.f32 %v1344_v33, %v1343_v14  ;;  %v1356_v14 = vsel %vm1176_vm0, %v3769_v56, 0.0 }
 0x220   :  { %v1347_v53 = vadd.f32 %v1346_v32, %v1345_v17  ;;  %v1358_v17 = vsel %vm1176_vm0, %v3775_v48, 0.0 }
 0x222   :  { %v1349_v55 = vadd.f32 %v1348_v40, %v1347_v53  ;;  %v1360_v53 = vsel %vm1176_vm0, %v3781_v42, 0.0 }
 0x224   :  { %v1351_v52 = vadd.f32 %v1350_v41, %v1349_v55  ;;  %v1362_v55 = vsel %vm1176_vm0, %v3787_v36, 0.0 }
 0x226   :  { %v1353_v16 = vadd.f32 %v1352_v62, %v1351_v52  ;;  %v1364_v52 = vsel %vm1176_vm0, %v3793_v30, 0.0 }
 0x228   :  { %v1355_v63 = vadd.f32 %v1354_v57, %v1353_v16  ;;  %v1366_v16 = vsel %vm1176_vm0, %v3799_v24, 0.0 }
 0x22a   :  { %v1357_v33 = vadd.f32 %v1356_v14, %v1355_v63  ;;  %v1368_v63 = vsel %vm1176_vm0, %v3805_v18, 0.0 }
 0x22c   :  { %v1359_v32 = vadd.f32 %v1358_v17, %v1357_v33  ;;  %v1370_v33 = vsel %vm1176_vm0, %v3811_v12, 0.0  ;;  %v1372_v17 = vsel %vm1176_vm0, %v3817_v6, 0.0  ;;  %v6479_v6 = vld [vmem:[#allocation3_spill] sm:$0xff] }
 0x22e   :  { %v1361_v40 = vadd.f32 %v1360_v53, %v1359_v32 }
 0x230   :  { %v1363_v41 = vadd.f32 %v1362_v55, %v1361_v40  ;;  %v1374_v40 = vsel %vm1176_vm0, %v3823_v0, 0.0 }
 0x232   :  { %v1365_v62 = vadd.f32 %v1364_v52, %v1363_v41 }
 0x234   :  { %v1367_v57 = vadd.f32 %v1366_v16, %v1365_v62 }
 0x236   :  { %v1369_v14 = vadd.f32 %v1368_v63, %v1367_v57  ;;  %v6477_v57 = vld [vmem:[#allocation2_spill] sm:$0xff] }
 0x238   :  { %v1371_v32 = vadd.f32 %v1370_v33, %v1369_v14  ;;  %v6481_v33 = vld [vmem:[#allocation4_spill] sm:$0xff] }
 0x23a   :  { %v1373_v53 = vadd.f32 %v1372_v17, %v1371_v32  ;;  %v6483_v32 = vld [vmem:[#allocation5_spill] sm:$0xff] }
 0x23c   :  { %v1375_v55 = vadd.f32 %v1374_v40, %v1373_v53  ;;  %v6487_v40 = vld [vmem:[#allocation7_spill] sm:$0xff] }
 0x23e   :  { %v1376_v41 = vrot.slane %v1375_v55, 4 }
 0x240   :  { %v1377_v52 = vadd.f32 %v1376_v41, %v1375_v55  ;;  %v6489_v41 = vld [vmem:[#allocation8_spill] sm:$0xff] }
 0x242   :  { %v1378_v24 = vrot.slane %v1377_v52, 2 }
 0x244   :  { %v1379_v62 = vadd.f32 %v1378_v24, %v1377_v52  ;;  %v6485_v24 = vld [vmem:[#allocation6_spill] sm:$0xff]  ;;  %v6491_v52 = vld [vmem:[#allocation9_spill] sm:$0xff] }
 0x246   :  { %v1380_v16 = vrot.slane %v1379_v62, 1 }
 0x248   :  { %v1381_v30 = vadd.f32 %v1380_v16, %v1379_v62  ;;  %v6493_v16 = vld [vmem:[#allocation10_spill] sm:$0xff] }
 0x24a   :  { %v3927_v18 = vmul.f32 0.00125, %v1381_v30 }
 0x24c   :  { %v3931_v63 = vsub.f32 %v6477_v57, %v3927_v18  ;;  %v3935_v14 = vsub.f32 %v6479_v6, %v3927_v18  ;;  %v3939_v17 = vsub.f32 %v6481_v33, %v3927_v18  ;;  %v3943_v53 = vsub.f32 %v6483_v32, %v3927_v18  ;;  %v6495_v33 = vld [vmem:[#allocation11_spill] sm:$0xff] }
 0x24d   :  { %v3947_v30 = vsub.f32 %v6485_v24, %v3927_v18  ;;  %v3951_v55 = vsub.f32 %v6487_v40, %v3927_v18  ;;  %v3955_v6 = vsub.f32 %v6489_v41, %v3927_v18  ;;  %v3959_v62 = vsub.f32 %v6491_v52, %v3927_v18  ;;  %v6497_v24 = vld [vmem:[#allocation12_spill] sm:$0xff] }
 0x24e   :  { %6478 = vst [vmem:[#allocation2_spill] sm:$0xff] %v3931_v63  ;;  %6480 = vst [vmem:[#allocation3_spill] sm:$0xff] %v3935_v14  ;;  %v3963_v57 = vsub.f32 %v6493_v16, %v3927_v18  ;;  %v3967_v32 = vsub.f32 %v6495_v33, %v3927_v18  ;;  %v3971_v40 = vsub.f32 %v6497_v24, %v3927_v18 }
 0x24f   :  { %6482 = vst [vmem:[#allocation4_spill] sm:$0xff] %v3939_v17  ;;  %6484 = vst [vmem:[#allocation5_spill] sm:$0xff] %v3943_v53 }
 0x250   :  { %6486 = vst [vmem:[#allocation6_spill] sm:$0xff] %v3947_v30  ;;  %6488 = vst [vmem:[#allocation7_spill] sm:$0xff] %v3951_v55  ;;  %v6499_v55 = vld [vmem:[#allocation13_spill] sm:$0xff] }
 0x251   :  { %6490 = vst [vmem:[#allocation8_spill] sm:$0xff] %v3955_v6  ;;  %6492 = vst [vmem:[#allocation9_spill] sm:$0xff] %v3959_v62  ;;  %v3975_v41 = vsub.f32 %v6499_v55, %v3927_v18  ;;  %v6501_v6 = vld [vmem:[#allocation14_spill] sm:$0xff]  ;;  %v6503_v62 = vld [vmem:[#allocation15_spill] sm:$0xff] }
 0x252   :  { %6494 = vst [vmem:[#allocation10_spill] sm:$0xff] %v3963_v57  ;;  %6496 = vst [vmem:[#allocation11_spill] sm:$0xff] %v3967_v32  ;;  %v3979_v52 = vsub.f32 %v6501_v6, %v3927_v18  ;;  %v3983_v16 = vsub.f32 %v6503_v62, %v3927_v18  ;;  %v6505_v57 = vld [vmem:[#allocation16_spill] sm:$0xff]  ;;  %v6507_v32 = vld [vmem:[#allocation17_spill] sm:$0xff] }
 0x253   :  { %6498 = vst [vmem:[#allocation12_spill] sm:$0xff] %v3971_v40  ;;  %6500 = vst [vmem:[#allocation13_spill] sm:$0xff] %v3975_v41  ;;  %v3987_v33 = vsub.f32 %v6505_v57, %v3927_v18  ;;  %v3991_v24 = vsub.f32 %v6507_v32, %v3927_v18  ;;  %v6509_v40 = vld [vmem:[#allocation18_spill] sm:$0xff]  ;;  %v6511_v41 = vld [vmem:[#allocation19_spill] sm:$0xff] }
 0x254   :  { %6502 = vst [vmem:[#allocation14_spill] sm:$0xff] %v3979_v52  ;;  %6504 = vst [vmem:[#allocation15_spill] sm:$0xff] %v3983_v16  ;;  %v3995_v55 = vsub.f32 %v6509_v40, %v3927_v18  ;;  %v3999_v6 = vsub.f32 %v6511_v41, %v3927_v18  ;;  %v6513_v52 = vld [vmem:[#allocation20_spill] sm:$0xff]  ;;  %v6515_v16 = vld [vmem:[#allocation21_spill] sm:$0xff] }
 0x255   :  { %6506 = vst [vmem:[#allocation16_spill] sm:$0xff] %v3987_v33  ;;  %6508 = vst [vmem:[#allocation17_spill] sm:$0xff] %v3991_v24  ;;  %v4003_v62 = vsub.f32 %v6513_v52, %v3927_v18  ;;  %v4007_v57 = vsub.f32 %v6515_v16, %v3927_v18  ;;  %v6517_v33 = vld [vmem:[#allocation22_spill] sm:$0xff]  ;;  %v6519_v24 = vld [vmem:[#allocation23_spill] sm:$0xff] }
 0x256   :  { %6510 = vst [vmem:[#allocation18_spill] sm:$0xff] %v3995_v55  ;;  %6512 = vst [vmem:[#allocation19_spill] sm:$0xff] %v3999_v6  ;;  %v4011_v32 = vsub.f32 %v6517_v33, %v3927_v18  ;;  %v4015_v40 = vsub.f32 %v6519_v24, %v3927_v18  ;;  %v6521_v55 = vld [vmem:[#allocation24_spill] sm:$0xff]  ;;  %v6523_v6 = vld [vmem:[#allocation25_spill] sm:$0xff] }
 0x257   :  { %6514 = vst [vmem:[#allocation20_spill] sm:$0xff] %v4003_v62  ;;  %6516 = vst [vmem:[#allocation21_spill] sm:$0xff] %v4007_v57  ;;  %v4019_v41 = vsub.f32 %v6521_v55, %v3927_v18  ;;  %v4023_v52 = vsub.f32 %v6523_v6, %v3927_v18  ;;  %v6525_v62 = vld [vmem:[#allocation26_spill] sm:$0xff]  ;;  %v6527_v57 = vld [vmem:[#allocation27_spill] sm:$0xff] }
 0x258   :  { %6518 = vst [vmem:[#allocation22_spill] sm:$0xff] %v4011_v32  ;;  %6520 = vst [vmem:[#allocation23_spill] sm:$0xff] %v4015_v40  ;;  %v4027_v16 = vsub.f32 %v6525_v62, %v3927_v18  ;;  %v4031_v33 = vsub.f32 %v6527_v57, %v3927_v18  ;;  %v6529_v32 = vld [vmem:[#allocation28_spill] sm:$0xff]  ;;  %v6531_v40 = vld [vmem:[#allocation29_spill] sm:$0xff] }
 0x259   :  { %6522 = vst [vmem:[#allocation24_spill] sm:$0xff] %v4019_v41  ;;  %6524 = vst [vmem:[#allocation25_spill] sm:$0xff] %v4023_v52  ;;  %v4035_v24 = vsub.f32 %v6529_v32, %v3927_v18  ;;  %v4039_v55 = vsub.f32 %v6531_v40, %v3927_v18  ;;  %v6533_v41 = vld [vmem:[#allocation30_spill] sm:$0xff]  ;;  %v6535_v52 = vld [vmem:[#allocation31_spill] sm:$0xff] }
 0x25a   :  { %6526 = vst [vmem:[#allocation26_spill] sm:$0xff] %v4027_v16  ;;  %6528 = vst [vmem:[#allocation27_spill] sm:$0xff] %v4031_v33  ;;  %v4043_v6 = vsub.f32 %v6533_v41, %v3927_v18  ;;  %v4047_v62 = vsub.f32 %v6535_v52, %v3927_v18  ;;  %v6537_v16 = vld [vmem:[#allocation32_spill] sm:$0xff]  ;;  %v6539_v33 = vld [vmem:[#allocation33_spill] sm:$0xff] }
 0x25b   :  { %6530 = vst [vmem:[#allocation28_spill] sm:$0xff] %v4035_v24  ;;  %6532 = vst [vmem:[#allocation29_spill] sm:$0xff] %v4039_v55  ;;  %v4051_v57 = vsub.f32 %v6537_v16, %v3927_v18  ;;  %v4055_v32 = vsub.f32 %v6539_v33, %v3927_v18  ;;  %v6541_v24 = vld [vmem:[#allocation34_spill] sm:$0xff]  ;;  %v6543_v55 = vld [vmem:[#allocation35_spill] sm:$0xff] }
 0x25c   :  { %6534 = vst [vmem:[#allocation30_spill] sm:$0xff] %v4043_v6  ;;  %6536 = vst [vmem:[#allocation31_spill] sm:$0xff] %v4047_v62  ;;  %v4059_v40 = vsub.f32 %v6541_v24, %v3927_v18  ;;  %v4063_v41 = vsub.f32 %v6543_v55, %v3927_v18  ;;  %v6545_v6 = vld [vmem:[#allocation36_spill] sm:$0xff]  ;;  %v6547_v62 = vld [vmem:[#allocation37_spill] sm:$0xff] }
 0x25d   :  { %6538 = vst [vmem:[#allocation32_spill] sm:$0xff] %v4051_v57  ;;  %6540 = vst [vmem:[#allocation33_spill] sm:$0xff] %v4055_v32  ;;  %v4067_v52 = vsub.f32 %v6545_v6, %v3927_v18  ;;  %v4071_v16 = vsub.f32 %v6547_v62, %v3927_v18  ;;  %v6549_v57 = vld [vmem:[#allocation38_spill] sm:$0xff]  ;;  %v6551_v32 = vld [vmem:[#allocation39_spill] sm:$0xff] }
 0x25e   :  { %6542 = vst [vmem:[#allocation34_spill] sm:$0xff] %v4059_v40  ;;  %6544 = vst [vmem:[#allocation35_spill] sm:$0xff] %v4063_v41  ;;  %v4075_v33 = vsub.f32 %v6549_v57, %v3927_v18  ;;  %v4079_v24 = vsub.f32 %v6551_v32, %v3927_v18  ;;  %v6553_v40 = vld [vmem:[#allocation40_spill] sm:$0xff]  ;;  %v6555_v41 = vld [vmem:[#allocation41_spill] sm:$0xff] }
 0x25f   :  { %6546 = vst [vmem:[#allocation36_spill] sm:$0xff] %v4067_v52  ;;  %6548 = vst [vmem:[#allocation37_spill] sm:$0xff] %v4071_v16  ;;  %v4083_v55 = vsub.f32 %v6553_v40, %v3927_v18  ;;  %v4087_v6 = vsub.f32 %v6555_v41, %v3927_v18  ;;  %v6557_v52 = vld [vmem:[#allocation42_spill] sm:$0xff]  ;;  %v6559_v16 = vld [vmem:[#allocation43_spill] sm:$0xff] }
 0x260   :  { %6550 = vst [vmem:[#allocation38_spill] sm:$0xff] %v4075_v33  ;;  %6552 = vst [vmem:[#allocation39_spill] sm:$0xff] %v4079_v24  ;;  %v4091_v62 = vsub.f32 %v6557_v52, %v3927_v18  ;;  %v4095_v57 = vsub.f32 %v6559_v16, %v3927_v18  ;;  %v6561_v33 = vld [vmem:[#allocation44_spill] sm:$0xff]  ;;  %v6563_v24 = vld [vmem:[#allocation45_spill] sm:$0xff] }
 0x261   :  { %6554 = vst [vmem:[#allocation40_spill] sm:$0xff] %v4083_v55  ;;  %6556 = vst [vmem:[#allocation41_spill] sm:$0xff] %v4087_v6  ;;  %v4099_v32 = vsub.f32 %v6561_v33, %v3927_v18  ;;  %v4103_v40 = vsub.f32 %v6563_v24, %v3927_v18  ;;  %v6564_v55 = vld [vmem:[#allocation46_spill] sm:$0xff]  ;;  %v6565_v6 = vld [vmem:[#allocation48_spill] sm:$0xff] }
 0x262   :  { %6558 = vst [vmem:[#allocation42_spill] sm:$0xff] %v4091_v62  ;;  %6560 = vst [vmem:[#allocation43_spill] sm:$0xff] %v4095_v57  ;;  %v4107_v41 = vsub.f32 %v6564_v55, %v3927_v18  ;;  %v4111_v52 = vsub.f32 %v6565_v6, %v3927_v18  ;;  %v6566_v62 = vld [vmem:[#allocation50_spill] sm:$0xff]  ;;  %v6567_v57 = vld [vmem:[#allocation52_spill] sm:$0xff]  ;;  %v4127_v55 = vsub.f32 %v3821_v44, %v3927_v18 }
 0x263   :  { %6562 = vst [vmem:[#allocation44_spill] sm:$0xff] %v4099_v32  ;;  %v4115_v16 = vsub.f32 %v6566_v62, %v3927_v18  ;;  %v4119_v33 = vsub.f32 %v6567_v57, %v3927_v18  ;;  %v6568_v32 = vld [vmem:[#allocation53_spill] sm:$0xff]  ;;  %v4131_v6 = vsub.f32 %v3529_v54, %v3927_v18  ;;  %v4135_v62 = vsub.f32 %v3533_v58, %v3927_v18 }
 0x264   :  { %v4123_v24 = vsub.f32 %v6568_v32, %v3927_v18  ;;  %v4139_v57 = vsub.f32 %v3541_v1, %v3927_v18  ;;  %v4143_v32 = vsub.f32 %v3547_v7, %v3927_v18  ;;  %v4147_v44 = vsub.f32 %v3553_v13, %v3927_v18 }
 0x265   :  { %v4151_v54 = vsub.f32 %v3559_v19, %v3927_v18  ;;  %v4155_v58 = vsub.f32 %v3565_v25, %v3927_v18  ;;  %v4159_v1 = vsub.f32 %v3571_v31, %v3927_v18  ;;  %v4163_v7 = vsub.f32 %v3577_v37, %v3927_v18 }
 0x266   :  { %v4167_v13 = vsub.f32 %v3583_v43, %v3927_v18  ;;  %v4171_v19 = vsub.f32 %v3589_v49, %v3927_v18  ;;  %v4175_v25 = vsub.f32 %v3595_v59, %v3927_v18  ;;  %v4179_v31 = vsub.f32 %v3601_v3, %v3927_v18 }
 0x267   :  { %v4183_v37 = vsub.f32 %v3607_v11, %v3927_v18  ;;  %v4187_v43 = vsub.f32 %v3613_v21, %v3927_v18  ;;  %v4191_v49 = vsub.f32 %v3619_v29, %v3927_v18  ;;  %v4195_v59 = vsub.f32 %v3625_v39, %v3927_v18 }
 0x268   :  { %v4199_v3 = vsub.f32 %v3631_v47, %v3927_v18  ;;  %v4203_v11 = vsub.f32 %v3637_v61, %v3927_v18  ;;  %v4207_v21 = vsub.f32 %v3643_v9, %v3927_v18  ;;  %v4211_v29 = vsub.f32 %v3649_v23, %v3927_v18 }
 0x269   :  { %v4215_v39 = vsub.f32 %v3655_v35, %v3927_v18  ;;  %v4219_v47 = vsub.f32 %v3661_v51, %v3927_v18  ;;  %v4223_v61 = vsub.f32 %v3667_v5, %v3927_v18  ;;  %v4227_v9 = vsub.f32 %v3673_v27, %v3927_v18 }
 0x26a   :  { %v4231_v23 = vsub.f32 %v3679_v45, %v3927_v18  ;;  %v4235_v35 = vsub.f32 %v3685_v15, %v3927_v18  ;;  %v4239_v51 = vsub.f32 %v3691_v26, %v3927_v18  ;;  %v4243_v5 = vsub.f32 %v3697_v4, %v3927_v18 }
 0x26b   :  { %v4247_v27 = vsub.f32 %v3703_v50, %v3927_v18  ;;  %v4251_v45 = vsub.f32 %v3709_v34, %v3927_v18  ;;  %v4255_v15 = vsub.f32 %v3715_v22, %v3927_v18  ;;  %v4259_v26 = vsub.f32 %v3721_v8, %v3927_v18 }
 0x26c   :  { %v4263_v4 = vsub.f32 %v3727_v60, %v3927_v18  ;;  %v4267_v50 = vsub.f32 %v3733_v46, %v3927_v18  ;;  %v4271_v34 = vsub.f32 %v3739_v38, %v3927_v18  ;;  %v4275_v22 = vsub.f32 %v3745_v28, %v3927_v18 }
 0x26d   :  { %v4279_v8 = vsub.f32 %v3751_v20, %v3927_v18  ;;  %v4283_v60 = vsub.f32 %v3757_v10, %v3927_v18  ;;  %v4287_v46 = vsub.f32 %v3763_v2, %v3927_v18  ;;  %v4291_v38 = vsub.f32 %v3769_v56, %v3927_v18 }
 0x26e   :  { %6569 = vst [vmem:[#allocation45_spill] sm:$0xff] %v4267_v50  ;;  %6570 = vst [vmem:[#allocation46_spill] sm:$0xff] %v4271_v34  ;;  %v4295_v28 = vsub.f32 %v3775_v48, %v3927_v18  ;;  %v4299_v20 = vsub.f32 %v3781_v42, %v3927_v18  ;;  %v4303_v10 = vsub.f32 %v3787_v36, %v3927_v18 }
 0x26f   :  { %6571 = vst [vmem:[#allocation48_spill] sm:$0xff] %v4275_v22  ;;  %6572 = vst [vmem:[#allocation50_spill] sm:$0xff] %v4279_v8  ;;  %v4319_v42 = vsub.f32 %v3811_v12, %v3927_v18  ;;  %v1487_v12 = vmul.f32 %v3943_v53, %v3943_v53 }
 0x270   :  { %6573 = vst [vmem:[#allocation52_spill] sm:$0xff] %v4283_v60  ;;  %6574 = vst [vmem:[#allocation53_spill] sm:$0xff] %v4287_v46  ;;  %v6579_v60 = vld [vmem:[#allocation47_spill] sm:$0xff]  ;;  %v6581_v46 = vld [vmem:[#allocation49_spill] sm:$0xff] }
 0x271   :  { %6575 = vst [vmem:[#allocation55_spill] sm:$0xff] %v4291_v38  ;;  %6576 = vst [vmem:[#allocation56_spill] sm:$0xff] %v4295_v28  ;;  %v4307_v2 = vsub.f32 %v6579_v60, %v3927_v18  ;;  %v4311_v56 = vsub.f32 %v6581_v46, %v3927_v18  ;;  %v6583_v38 = vld [vmem:[#allocation51_spill] sm:$0xff]  ;;  %v4327_v60 = vsub.f32 %v3823_v0, %v3927_v18 }
 0x272   :  { %6577 = vst [vmem:[#allocation57_spill] sm:$0xff] %v4299_v20  ;;  %6578 = vst [vmem:[#allocation58_spill] sm:$0xff] %v4303_v10  ;;  %v4315_v48 = vsub.f32 %v6583_v38, %v3927_v18  ;;  %v6586_v20 = vld [vmem:[#allocation54_spill] sm:$0xff]  ;;  %v1484_v46 = vmul.f32 %v3931_v63, %v3931_v63  ;;  %v1486_v38 = vmul.f32 %v3939_v17, %v3939_v17 }
 0x273   :  { %6580 = vst [vmem:[#allocation47_spill] sm:$0xff] %v4307_v2  ;;  %6582 = vst [vmem:[#allocation49_spill] sm:$0xff] %v4311_v56  ;;  %v4323_v36 = vsub.f32 %v6586_v20, %v3927_v18  ;;  %v1485_v56 = vmul.f32 %v3935_v14, %v3935_v14  ;;  %v1488_v0 = vmul.f32 %v3947_v30, %v3947_v30  ;;  %v6590_v2 = vld [vmem:[#allocation8_spill] sm:$0xff] }
 0x274   :  { %6584 = vst [vmem:[#allocation51_spill] sm:$0xff] %v4315_v48  ;;  %6585 = vst [vmem:[#allocation59_spill] sm:$0xff] %v4319_v42  ;;  %v1584_v42 = vsel %vm1176_vm0, %v1484_v46, 0.0  ;;  %v1587_v18 = vsel %vm1176_vm0, %v1486_v38, 0.0  ;;  %v1589_v48 = vsel %vm1176_vm0, %v1487_v12, 0.0  ;;  %v1490_v53 = vmul.f32 %v6590_v2, %v6590_v2  ;;  %v6592_v38 = vld [vmem:[#allocation10_spill] sm:$0xff] }
 0x275   :  { %6587 = vst [vmem:[#allocation54_spill] sm:$0xff] %v4323_v36  ;;  %6588 = vst [vmem:[#allocation60_spill] sm:$0xff] %v4327_v60  ;;  %v1585_v20 = vsel %vm1176_vm0, %v1485_v56, 0.0  ;;  %v6589_v60 = vld [vmem:[#allocation7_spill] sm:$0xff]  ;;  %v1591_v46 = vsel %vm1176_vm0, %v1488_v0, 0.0  ;;  %v6591_v56 = vld [vmem:[#allocation9_spill] sm:$0xff] }
 0x276   :  { %v1586_v36 = vadd.f32 %v1585_v20, %v1584_v42  ;;  %v1489_v14 = vmul.f32 %v6589_v60, %v6589_v60  ;;  %v1491_v42 = vmul.f32 %v6591_v56, %v6591_v56  ;;  %v6593_v12 = vld [vmem:[#allocation11_spill] sm:$0xff]  ;;  %v6594_v0 = vld [vmem:[#allocation12_spill] sm:$0xff] }
 0x278   :  { %v1588_v63 = vadd.f32 %v1587_v18, %v1586_v36  ;;  %v1593_v20 = vsel %vm1176_vm0, %v1489_v14, 0.0  ;;  %v1492_v36 = vmul.f32 %v6592_v38, %v6592_v38  ;;  %v1595_v18 = vsel %vm1176_vm0, %v1490_v53, 0.0  ;;  %v6595_v14 = vld [vmem:[#allocation13_spill] sm:$0xff]  ;;  %v6596_v53 = vld [vmem:[#allocation14_spill] sm:$0xff] }
 0x27a   :  { %v1590_v17 = vadd.f32 %v1589_v48, %v1588_v63  ;;  %v1493_v63 = vmul.f32 %v6593_v12, %v6593_v12  ;;  %v1597_v48 = vsel %vm1176_vm0, %v1491_v42, 0.0  ;;  %v6597_v42 = vld [vmem:[#allocation15_spill] sm:$0xff] }
 0x27c   :  { %v1592_v10 = vadd.f32 %v1591_v46, %v1590_v17  ;;  %v1494_v17 = vmul.f32 %v6594_v0, %v6594_v0  ;;  %v1599_v46 = vsel %vm1176_vm0, %v1492_v36, 0.0  ;;  %v6598_v36 = vld [vmem:[#allocation16_spill] sm:$0xff] }
 0x27e   :  { %v1594_v30 = vadd.f32 %v1593_v20, %v1592_v10  ;;  %v1495_v10 = vmul.f32 %v6595_v14, %v6595_v14  ;;  %v1601_v20 = vsel %vm1176_vm0, %v1493_v63, 0.0  ;;  %v6599_v63 = vld [vmem:[#allocation17_spill] sm:$0xff] }
 0x280   :  { %v1596_v60 = vadd.f32 %v1595_v18, %v1594_v30  ;;  %v1496_v30 = vmul.f32 %v6596_v53, %v6596_v53  ;;  %v1603_v18 = vsel %vm1176_vm0, %v1494_v17, 0.0  ;;  %v6600_v17 = vld [vmem:[#allocation18_spill] sm:$0xff] }
 0x282   :  { %v1598_v2 = vadd.f32 %v1597_v48, %v1596_v60  ;;  %v1497_v60 = vmul.f32 %v6597_v42, %v6597_v42  ;;  %v1605_v48 = vsel %vm1176_vm0, %v1495_v10, 0.0  ;;  %v6601_v10 = vld [vmem:[#allocation19_spill] sm:$0xff] }
 0x284   :  { %v1600_v56 = vadd.f32 %v1599_v46, %v1598_v2  ;;  %v1498_v2 = vmul.f32 %v6598_v36, %v6598_v36  ;;  %v1607_v46 = vsel %vm1176_vm0, %v1496_v30, 0.0  ;;  %v6602_v30 = vld [vmem:[#allocation20_spill] sm:$0xff] }
 0x286   :  { %v1602_v38 = vadd.f32 %v1601_v20, %v1600_v56  ;;  %v1499_v56 = vmul.f32 %v6599_v63, %v6599_v63  ;;  %v1609_v20 = vsel %vm1176_vm0, %v1497_v60, 0.0  ;;  %v6603_v60 = vld [vmem:[#allocation21_spill] sm:$0xff] }
 0x288   :  { %v1604_v12 = vadd.f32 %v1603_v18, %v1602_v38  ;;  %v1500_v38 = vmul.f32 %v6600_v17, %v6600_v17  ;;  %v1611_v18 = vsel %vm1176_vm0, %v1498_v2, 0.0  ;;  %v6604_v2 = vld [vmem:[#allocation22_spill] sm:$0xff] }
 0x28a   :  { %v1606_v0 = vadd.f32 %v1605_v48, %v1604_v12  ;;  %v1501_v12 = vmul.f32 %v6601_v10, %v6601_v10  ;;  %v1613_v48 = vsel %vm1176_vm0, %v1499_v56, 0.0  ;;  %v6605_v56 = vld [vmem:[#allocation23_spill] sm:$0xff] }
 0x28c   :  { %v1608_v14 = vadd.f32 %v1607_v46, %v1606_v0  ;;  %v1502_v0 = vmul.f32 %v6602_v30, %v6602_v30  ;;  %v1615_v46 = vsel %vm1176_vm0, %v1500_v38, 0.0  ;;  %v6606_v38 = vld [vmem:[#allocation24_spill] sm:$0xff] }
 0x28e   :  { %v1610_v53 = vadd.f32 %v1609_v20, %v1608_v14  ;;  %v1503_v14 = vmul.f32 %v6603_v60, %v6603_v60  ;;  %v1617_v20 = vsel %vm1176_vm0, %v1501_v12, 0.0  ;;  %v6607_v12 = vld [vmem:[#allocation25_spill] sm:$0xff] }
 0x290   :  { %v1612_v42 = vadd.f32 %v1611_v18, %v1610_v53  ;;  %v1504_v53 = vmul.f32 %v6604_v2, %v6604_v2  ;;  %v1619_v18 = vsel %vm1176_vm0, %v1502_v0, 0.0  ;;  %v6608_v0 = vld [vmem:[#allocation26_spill] sm:$0xff] }
 0x292   :  { %v1614_v36 = vadd.f32 %v1613_v48, %v1612_v42  ;;  %v1505_v42 = vmul.f32 %v6605_v56, %v6605_v56  ;;  %v1621_v48 = vsel %vm1176_vm0, %v1503_v14, 0.0  ;;  %v6609_v14 = vld [vmem:[#allocation27_spill] sm:$0xff] }
 0x294   :  { %v1616_v63 = vadd.f32 %v1615_v46, %v1614_v36  ;;  %v1506_v36 = vmul.f32 %v6606_v38, %v6606_v38  ;;  %v1623_v46 = vsel %vm1176_vm0, %v1504_v53, 0.0  ;;  %v6610_v53 = vld [vmem:[#allocation28_spill] sm:$0xff] }
 0x296   :  { %v1618_v17 = vadd.f32 %v1617_v20, %v1616_v63  ;;  %v1507_v63 = vmul.f32 %v6607_v12, %v6607_v12  ;;  %v1625_v20 = vsel %vm1176_vm0, %v1505_v42, 0.0  ;;  %v6611_v42 = vld [vmem:[#allocation29_spill] sm:$0xff] }
 0x298   :  { %v1620_v10 = vadd.f32 %v1619_v18, %v1618_v17  ;;  %v1508_v17 = vmul.f32 %v6608_v0, %v6608_v0  ;;  %v1627_v18 = vsel %vm1176_vm0, %v1506_v36, 0.0  ;;  %v6612_v36 = vld [vmem:[#allocation30_spill] sm:$0xff] }
 0x29a   :  { %v1622_v30 = vadd.f32 %v1621_v48, %v1620_v10  ;;  %v1509_v10 = vmul.f32 %v6609_v14, %v6609_v14  ;;  %v1629_v48 = vsel %vm1176_vm0, %v1507_v63, 0.0  ;;  %v6613_v63 = vld [vmem:[#allocation31_spill] sm:$0xff] }
 0x29c   :  { %v1624_v60 = vadd.f32 %v1623_v46, %v1622_v30  ;;  %v1510_v30 = vmul.f32 %v6610_v53, %v6610_v53  ;;  %v1631_v46 = vsel %vm1176_vm0, %v1508_v17, 0.0  ;;  %v6614_v17 = vld [vmem:[#allocation32_spill] sm:$0xff] }
 0x29e   :  { %v1626_v2 = vadd.f32 %v1625_v20, %v1624_v60  ;;  %v1511_v60 = vmul.f32 %v6611_v42, %v6611_v42  ;;  %v1633_v20 = vsel %vm1176_vm0, %v1509_v10, 0.0  ;;  %v6615_v10 = vld [vmem:[#allocation33_spill] sm:$0xff] }
 0x2a0   :  { %v1628_v56 = vadd.f32 %v1627_v18, %v1626_v2  ;;  %v1512_v2 = vmul.f32 %v6612_v36, %v6612_v36  ;;  %v1635_v18 = vsel %vm1176_vm0, %v1510_v30, 0.0  ;;  %v6616_v30 = vld [vmem:[#allocation34_spill] sm:$0xff] }
 0x2a2   :  { %v1630_v38 = vadd.f32 %v1629_v48, %v1628_v56  ;;  %v1513_v56 = vmul.f32 %v6613_v63, %v6613_v63  ;;  %v1637_v48 = vsel %vm1176_vm0, %v1511_v60, 0.0  ;;  %v6617_v60 = vld [vmem:[#allocation35_spill] sm:$0xff] }
 0x2a4   :  { %v1632_v12 = vadd.f32 %v1631_v46, %v1630_v38  ;;  %v1514_v38 = vmul.f32 %v6614_v17, %v6614_v17  ;;  %v1639_v46 = vsel %vm1176_vm0, %v1512_v2, 0.0  ;;  %v6618_v2 = vld [vmem:[#allocation36_spill] sm:$0xff] }
 0x2a6   :  { %v1634_v0 = vadd.f32 %v1633_v20, %v1632_v12  ;;  %v1515_v12 = vmul.f32 %v6615_v10, %v6615_v10  ;;  %v1641_v20 = vsel %vm1176_vm0, %v1513_v56, 0.0  ;;  %v6619_v56 = vld [vmem:[#allocation37_spill] sm:$0xff] }
 0x2a8   :  { %v1636_v14 = vadd.f32 %v1635_v18, %v1634_v0  ;;  %v1516_v0 = vmul.f32 %v6616_v30, %v6616_v30  ;;  %v1643_v18 = vsel %vm1176_vm0, %v1514_v38, 0.0  ;;  %v6620_v38 = vld [vmem:[#allocation38_spill] sm:$0xff] }
 0x2aa   :  { %v1638_v53 = vadd.f32 %v1637_v48, %v1636_v14  ;;  %v1517_v14 = vmul.f32 %v6617_v60, %v6617_v60  ;;  %v1645_v48 = vsel %vm1176_vm0, %v1515_v12, 0.0  ;;  %v6621_v12 = vld [vmem:[#allocation39_spill] sm:$0xff] }
 0x2ac   :  { %v1640_v42 = vadd.f32 %v1639_v46, %v1638_v53  ;;  %v1518_v53 = vmul.f32 %v6618_v2, %v6618_v2  ;;  %v1647_v46 = vsel %vm1176_vm0, %v1516_v0, 0.0  ;;  %v6622_v0 = vld [vmem:[#allocation40_spill] sm:$0xff] }
 0x2ae   :  { %v1642_v36 = vadd.f32 %v1641_v20, %v1640_v42  ;;  %v1519_v42 = vmul.f32 %v6619_v56, %v6619_v56  ;;  %v1649_v20 = vsel %vm1176_vm0, %v1517_v14, 0.0  ;;  %v6623_v14 = vld [vmem:[#allocation41_spill] sm:$0xff] }
 0x2b0   :  { %v1644_v63 = vadd.f32 %v1643_v18, %v1642_v36  ;;  %v1520_v36 = vmul.f32 %v6620_v38, %v6620_v38  ;;  %v1651_v18 = vsel %vm1176_vm0, %v1518_v53, 0.0  ;;  %v6624_v53 = vld [vmem:[#allocation42_spill] sm:$0xff] }
 0x2b2   :  { %v1646_v17 = vadd.f32 %v1645_v48, %v1644_v63  ;;  %v1521_v63 = vmul.f32 %v6621_v12, %v6621_v12  ;;  %v1653_v48 = vsel %vm1176_vm0, %v1519_v42, 0.0  ;;  %v6625_v42 = vld [vmem:[#allocation43_spill] sm:$0xff] }
 0x2b4   :  { %v1648_v10 = vadd.f32 %v1647_v46, %v1646_v17  ;;  %v1522_v17 = vmul.f32 %v6622_v0, %v6622_v0  ;;  %v1655_v46 = vsel %vm1176_vm0, %v1520_v36, 0.0  ;;  %v6626_v36 = vld [vmem:[#allocation44_spill] sm:$0xff] }
 0x2b6   :  { %v1650_v30 = vadd.f32 %v1649_v20, %v1648_v10  ;;  %v1523_v10 = vmul.f32 %v6623_v14, %v6623_v14  ;;  %v1657_v20 = vsel %vm1176_vm0, %v1521_v63, 0.0 }
 0x2b8   :  { %v1652_v60 = vadd.f32 %v1651_v18, %v1650_v30  ;;  %v1524_v30 = vmul.f32 %v6624_v53, %v6624_v53  ;;  %v1659_v18 = vsel %vm1176_vm0, %v1522_v17, 0.0 }
 0x2ba   :  { %v1654_v2 = vadd.f32 %v1653_v48, %v1652_v60  ;;  %v1525_v60 = vmul.f32 %v6625_v42, %v6625_v42  ;;  %v1661_v48 = vsel %vm1176_vm0, %v1523_v10, 0.0 }
 0x2bc   :  { %v1656_v56 = vadd.f32 %v1655_v46, %v1654_v2  ;;  %v1526_v2 = vmul.f32 %v6626_v36, %v6626_v36  ;;  %v1663_v46 = vsel %vm1176_vm0, %v1524_v30, 0.0  ;;  %v1665_v63 = vsel %vm1176_vm0, %v1525_v60, 0.0 }
 0x2be   :  { %v1658_v38 = vadd.f32 %v1657_v20, %v1656_v56  ;;  %v1527_v56 = vmul.f32 %v4103_v40, %v4103_v40  ;;  %v1667_v17 = vsel %vm1176_vm0, %v1526_v2, 0.0  ;;  %v1532_v2 = vmul.f32 %v4123_v24, %v4123_v24 }
 0x2c0   :  { %v1660_v12 = vadd.f32 %v1659_v18, %v1658_v38  ;;  %v1528_v38 = vmul.f32 %v4107_v41, %v4107_v41  ;;  %v1669_v10 = vsel %vm1176_vm0, %v1527_v56, 0.0  ;;  %v1533_v56 = vmul.f32 %v4127_v55, %v4127_v55 }
 0x2c2   :  { %v1662_v0 = vadd.f32 %v1661_v48, %v1660_v12  ;;  %v1529_v12 = vmul.f32 %v4111_v52, %v4111_v52  ;;  %v1671_v30 = vsel %vm1176_vm0, %v1528_v38, 0.0  ;;  %v1534_v38 = vmul.f32 %v4131_v6, %v4131_v6 }
 0x2c4   :  { %v1664_v14 = vadd.f32 %v1663_v46, %v1662_v0  ;;  %v1530_v0 = vmul.f32 %v4115_v16, %v4115_v16  ;;  %v1673_v60 = vsel %vm1176_vm0, %v1529_v12, 0.0  ;;  %v1535_v12 = vmul.f32 %v4135_v62, %v4135_v62 }
 0x2c6   :  { %v1666_v20 = vadd.f32 %v1665_v63, %v1664_v14  ;;  %v1531_v14 = vmul.f32 %v4119_v33, %v4119_v33 }
 0x2c8   :  { %v1668_v18 = vadd.f32 %v1667_v17, %v1666_v20  ;;  %v1675_v20 = vsel %vm1176_vm0, %v1530_v0, 0.0  ;;  %v1536_v0 = vmul.f32 %v4139_v57, %v4139_v57 }
 0x2ca   :  { %v1670_v48 = vadd.f32 %v1669_v10, %v1668_v18  ;;  %v1677_v18 = vsel %vm1176_vm0, %v1531_v14, 0.0  ;;  %v1537_v14 = vmul.f32 %v4143_v32, %v4143_v32 }
 0x2cc   :  { %v1672_v46 = vadd.f32 %v1671_v30, %v1670_v48  ;;  %v1679_v48 = vsel %vm1176_vm0, %v1532_v2, 0.0  ;;  %v1538_v2 = vmul.f32 %v4147_v44, %v4147_v44 }
 0x2ce   :  { %v1674_v63 = vadd.f32 %v1673_v60, %v1672_v46  ;;  %v1681_v46 = vsel %vm1176_vm0, %v1533_v56, 0.0  ;;  %v1539_v56 = vmul.f32 %v4151_v54, %v4151_v54 }
 0x2d0   :  { %v1676_v17 = vadd.f32 %v1675_v20, %v1674_v63  ;;  %v1683_v63 = vsel %vm1176_vm0, %v1534_v38, 0.0  ;;  %v1540_v38 = vmul.f32 %v4155_v58, %v4155_v58 }
 0x2d2   :  { %v1678_v10 = vadd.f32 %v1677_v18, %v1676_v17  ;;  %v1685_v17 = vsel %vm1176_vm0, %v1535_v12, 0.0  ;;  %v1541_v12 = vmul.f32 %v4159_v1, %v4159_v1 }
 0x2d4   :  { %v1680_v30 = vadd.f32 %v1679_v48, %v1678_v10  ;;  %v1687_v10 = vsel %vm1176_vm0, %v1536_v0, 0.0  ;;  %v1542_v0 = vmul.f32 %v4163_v7, %v4163_v7 }
 0x2d6   :  { %v1682_v60 = vadd.f32 %v1681_v46, %v1680_v30  ;;  %v1689_v30 = vsel %vm1176_vm0, %v1537_v14, 0.0  ;;  %v1543_v14 = vmul.f32 %v4167_v13, %v4167_v13 }
 0x2d8   :  { %v1684_v20 = vadd.f32 %v1683_v63, %v1682_v60  ;;  %v1691_v60 = vsel %vm1176_vm0, %v1538_v2, 0.0  ;;  %v1544_v2 = vmul.f32 %v4171_v19, %v4171_v19 }
 0x2da   :  { %v1686_v18 = vadd.f32 %v1685_v17, %v1684_v20  ;;  %v1693_v20 = vsel %vm1176_vm0, %v1539_v56, 0.0  ;;  %v1545_v56 = vmul.f32 %v4175_v25, %v4175_v25 }
 0x2dc   :  { %v1688_v48 = vadd.f32 %v1687_v10, %v1686_v18  ;;  %v1695_v18 = vsel %vm1176_vm0, %v1540_v38, 0.0  ;;  %v1546_v38 = vmul.f32 %v4179_v31, %v4179_v31 }
 0x2de   :  { %v1690_v46 = vadd.f32 %v1689_v30, %v1688_v48  ;;  %v1697_v48 = vsel %vm1176_vm0, %v1541_v12, 0.0  ;;  %v1547_v12 = vmul.f32 %v4183_v37, %v4183_v37 }
 0x2e0   :  { %v1692_v63 = vadd.f32 %v1691_v60, %v1690_v46  ;;  %v1699_v46 = vsel %vm1176_vm0, %v1542_v0, 0.0  ;;  %v1548_v0 = vmul.f32 %v4187_v43, %v4187_v43 }
 0x2e2   :  { %v1694_v17 = vadd.f32 %v1693_v20, %v1692_v63  ;;  %v1701_v63 = vsel %vm1176_vm0, %v1543_v14, 0.0  ;;  %v1549_v14 = vmul.f32 %v4191_v49, %v4191_v49 }
 0x2e4   :  { %v1696_v10 = vadd.f32 %v1695_v18, %v1694_v17  ;;  %v1703_v17 = vsel %vm1176_vm0, %v1544_v2, 0.0  ;;  %v1550_v2 = vmul.f32 %v4195_v59, %v4195_v59 }
 0x2e6   :  { %v1698_v30 = vadd.f32 %v1697_v48, %v1696_v10  ;;  %v1705_v10 = vsel %vm1176_vm0, %v1545_v56, 0.0  ;;  %v1551_v56 = vmul.f32 %v4199_v3, %v4199_v3 }
 0x2e8   :  { %v1700_v60 = vadd.f32 %v1699_v46, %v1698_v30  ;;  %v1707_v30 = vsel %vm1176_vm0, %v1546_v38, 0.0  ;;  %v1552_v38 = vmul.f32 %v4203_v11, %v4203_v11 }
 0x2ea   :  { %v1702_v20 = vadd.f32 %v1701_v63, %v1700_v60  ;;  %v1709_v60 = vsel %vm1176_vm0, %v1547_v12, 0.0  ;;  %v1553_v12 = vmul.f32 %v4207_v21, %v4207_v21 }
 0x2ec   :  { %v1704_v18 = vadd.f32 %v1703_v17, %v1702_v20  ;;  %v1711_v20 = vsel %vm1176_vm0, %v1548_v0, 0.0  ;;  %v1554_v0 = vmul.f32 %v4211_v29, %v4211_v29 }
 0x2ee   :  { %v1706_v48 = vadd.f32 %v1705_v10, %v1704_v18  ;;  %v1713_v18 = vsel %vm1176_vm0, %v1549_v14, 0.0  ;;  %v1555_v14 = vmul.f32 %v4215_v39, %v4215_v39 }
 0x2f0   :  { %v1708_v46 = vadd.f32 %v1707_v30, %v1706_v48  ;;  %v1715_v48 = vsel %vm1176_vm0, %v1550_v2, 0.0  ;;  %v1556_v2 = vmul.f32 %v4219_v47, %v4219_v47 }
 0x2f2   :  { %v1710_v63 = vadd.f32 %v1709_v60, %v1708_v46  ;;  %v1717_v46 = vsel %vm1176_vm0, %v1551_v56, 0.0  ;;  %v1557_v56 = vmul.f32 %v4223_v61, %v4223_v61 }
 0x2f4   :  { %v1712_v17 = vadd.f32 %v1711_v20, %v1710_v63  ;;  %v1719_v63 = vsel %vm1176_vm0, %v1552_v38, 0.0  ;;  %v1558_v38 = vmul.f32 %v4227_v9, %v4227_v9 }
 0x2f6   :  { %v1714_v10 = vadd.f32 %v1713_v18, %v1712_v17  ;;  %v1721_v17 = vsel %vm1176_vm0, %v1553_v12, 0.0  ;;  %v1559_v12 = vmul.f32 %v4231_v23, %v4231_v23 }
 0x2f8   :  { %v1716_v30 = vadd.f32 %v1715_v48, %v1714_v10  ;;  %v1723_v10 = vsel %vm1176_vm0, %v1554_v0, 0.0  ;;  %v1560_v0 = vmul.f32 %v4235_v35, %v4235_v35 }
 0x2fa   :  { %v1718_v60 = vadd.f32 %v1717_v46, %v1716_v30  ;;  %v1725_v30 = vsel %vm1176_vm0, %v1555_v14, 0.0  ;;  %v1561_v14 = vmul.f32 %v4239_v51, %v4239_v51 }
 0x2fc   :  { %v1720_v20 = vadd.f32 %v1719_v63, %v1718_v60  ;;  %v1727_v60 = vsel %vm1176_vm0, %v1556_v2, 0.0  ;;  %v1562_v2 = vmul.f32 %v4243_v5, %v4243_v5 }
 0x2fe   :  { %v1722_v18 = vadd.f32 %v1721_v17, %v1720_v20  ;;  %v1729_v20 = vsel %vm1176_vm0, %v1557_v56, 0.0  ;;  %v1563_v56 = vmul.f32 %v4247_v27, %v4247_v27 }
 0x300   :  { %v1724_v48 = vadd.f32 %v1723_v10, %v1722_v18  ;;  %v1731_v18 = vsel %vm1176_vm0, %v1558_v38, 0.0  ;;  %v1564_v38 = vmul.f32 %v4251_v45, %v4251_v45 }
 0x302   :  { %v1726_v46 = vadd.f32 %v1725_v30, %v1724_v48  ;;  %v1733_v48 = vsel %vm1176_vm0, %v1559_v12, 0.0  ;;  %v1565_v12 = vmul.f32 %v4255_v15, %v4255_v15 }
 0x304   :  { %v1728_v63 = vadd.f32 %v1727_v60, %v1726_v46  ;;  %v1735_v46 = vsel %vm1176_vm0, %v1560_v0, 0.0  ;;  %v1566_v0 = vmul.f32 %v4259_v26, %v4259_v26 }
 0x306   :  { %v1730_v17 = vadd.f32 %v1729_v20, %v1728_v63  ;;  %v1737_v63 = vsel %vm1176_vm0, %v1561_v14, 0.0  ;;  %v1567_v14 = vmul.f32 %v4263_v4, %v4263_v4 }
 0x308   :  { %v1732_v10 = vadd.f32 %v1731_v18, %v1730_v17  ;;  %v1739_v17 = vsel %vm1176_vm0, %v1562_v2, 0.0  ;;  %v1568_v2 = vmul.f32 %v4267_v50, %v4267_v50 }
 0x30a   :  { %v1734_v30 = vadd.f32 %v1733_v48, %v1732_v10  ;;  %v1741_v10 = vsel %vm1176_vm0, %v1563_v56, 0.0  ;;  %v1569_v56 = vmul.f32 %v4271_v34, %v4271_v34 }
 0x30c   :  { %v1736_v60 = vadd.f32 %v1735_v46, %v1734_v30  ;;  %v1743_v30 = vsel %vm1176_vm0, %v1564_v38, 0.0  ;;  %v1570_v38 = vmul.f32 %v4275_v22, %v4275_v22 }
 0x30e   :  { %v1738_v20 = vadd.f32 %v1737_v63, %v1736_v60  ;;  %v1745_v60 = vsel %vm1176_vm0, %v1565_v12, 0.0  ;;  %v1571_v12 = vmul.f32 %v4279_v8, %v4279_v8 }
 0x310   :  { %v1740_v18 = vadd.f32 %v1739_v17, %v1738_v20  ;;  %v1747_v20 = vsel %vm1176_vm0, %v1566_v0, 0.0  ;;  %v6627_v0 = vld [vmem:[#allocation52_spill] sm:$0xff] }
 0x312   :  { %v1742_v48 = vadd.f32 %v1741_v10, %v1740_v18  ;;  %v1749_v18 = vsel %vm1176_vm0, %v1567_v14, 0.0  ;;  %v6628_v14 = vld [vmem:[#allocation53_spill] sm:$0xff] }
 0x314   :  { %v1744_v46 = vadd.f32 %v1743_v30, %v1742_v48  ;;  %v1751_v48 = vsel %vm1176_vm0, %v1568_v2, 0.0  ;;  %v6629_v2 = vld [vmem:[#allocation55_spill] sm:$0xff] }
 0x316   :  { %v1746_v63 = vadd.f32 %v1745_v60, %v1744_v46  ;;  %v1753_v46 = vsel %vm1176_vm0, %v1569_v56, 0.0  ;;  %v1575_v56 = vmul.f32 %v4295_v28, %v4295_v28 }
 0x318   :  { %v1748_v17 = vadd.f32 %v1747_v20, %v1746_v63  ;;  %v1572_v63 = vmul.f32 %v6627_v0, %v6627_v0  ;;  %v1755_v20 = vsel %vm1176_vm0, %v1570_v38, 0.0  ;;  %v6630_v38 = vld [vmem:[#allocation57_spill] sm:$0xff] }
 0x31a   :  { %v1750_v10 = vadd.f32 %v1749_v18, %v1748_v17  ;;  %v1573_v17 = vmul.f32 %v6628_v14, %v6628_v14  ;;  %v1757_v18 = vsel %vm1176_vm0, %v1571_v12, 0.0  ;;  %v6631_v12 = vld [vmem:[#allocation58_spill] sm:$0xff] }
 0x31c   :  { %v1752_v30 = vadd.f32 %v1751_v48, %v1750_v10  ;;  %v1574_v10 = vmul.f32 %v6629_v2, %v6629_v2  ;;  %v1759_v48 = vsel %vm1176_vm0, %v1572_v63, 0.0  ;;  %v6632_v63 = vld [vmem:[#allocation47_spill] sm:$0xff] }
 0x31e   :  { %v1754_v60 = vadd.f32 %v1753_v46, %v1752_v30  ;;  %v1761_v30 = vsel %vm1176_vm0, %v1573_v17, 0.0  ;;  %v6633_v17 = vld [vmem:[#allocation49_spill] sm:$0xff] }
 0x320   :  { %v1756_v34 = vadd.f32 %v1755_v20, %v1754_v60  ;;  %v1576_v60 = vmul.f32 %v6630_v38, %v6630_v38  ;;  %v1763_v20 = vsel %vm1176_vm0, %v1574_v10, 0.0  ;;  %v6634_v10 = vld [vmem:[#allocation51_spill] sm:$0xff] }
 0x322   :  { %v1758_v22 = vadd.f32 %v1757_v18, %v1756_v34  ;;  %v1577_v34 = vmul.f32 %v6631_v12, %v6631_v12  ;;  %v1765_v18 = vsel %vm1176_vm0, %v1575_v56, 0.0  ;;  %v6635_v56 = vld [vmem:[#allocation59_spill] sm:$0xff] }
 0x324   :  { %v1760_v8 = vadd.f32 %v1759_v48, %v1758_v22  ;;  %v1578_v22 = vmul.f32 %v6632_v63, %v6632_v63  ;;  %v1767_v48 = vsel %vm1176_vm0, %v1576_v60, 0.0  ;;  %v6636_v60 = vld [vmem:[#allocation54_spill] sm:$0xff] }
 0x326   :  { %v1762_v46 = vadd.f32 %v1761_v30, %v1760_v8  ;;  %v1579_v8 = vmul.f32 %v6633_v17, %v6633_v17  ;;  %v1769_v30 = vsel %vm1176_vm0, %v1577_v34, 0.0  ;;  %v6637_v34 = vld [vmem:[#allocation60_spill] sm:$0xff] }
 0x328   :  { %v1764_v14 = vadd.f32 %v1763_v20, %v1762_v46  ;;  %v1580_v46 = vmul.f32 %v6634_v10, %v6634_v10  ;;  %v1771_v20 = vsel %vm1176_vm0, %v1578_v22, 0.0 }
 0x32a   :  { %v1766_v2 = vadd.f32 %v1765_v18, %v1764_v14  ;;  %v1581_v14 = vmul.f32 %v6635_v56, %v6635_v56  ;;  %v1773_v18 = vsel %vm1176_vm0, %v1579_v8, 0.0 }
 0x32c   :  { %v1768_v28 = vadd.f32 %v1767_v48, %v1766_v2  ;;  %v1582_v2 = vmul.f32 %v6636_v60, %v6636_v60  ;;  %v1775_v48 = vsel %vm1176_vm0, %v1580_v46, 0.0 }
 0x32e   :  { %v1770_v38 = vadd.f32 %v1769_v30, %v1768_v28  ;;  %v1583_v28 = vmul.f32 %v6637_v34, %v6637_v34  ;;  %v1777_v30 = vsel %vm1176_vm0, %v1581_v14, 0.0 }
 0x330   :  { %v1772_v12 = vadd.f32 %v1771_v20, %v1770_v38  ;;  %v1779_v38 = vsel %vm1176_vm0, %v1582_v2, 0.0  ;;  %v1781_v20 = vsel %vm1176_vm0, %v1583_v28, 0.0 }
 0x332   :  { %v1774_v63 = vadd.f32 %v1773_v18, %v1772_v12 }
 0x334   :  { %v1776_v17 = vadd.f32 %v1775_v48, %v1774_v63  ;;  %v1794_v48 = vlaneseq }
 0x336   :  { %v1778_v10 = vadd.f32 %v1777_v30, %v1776_v17  ;;  %v1795_v34 = vshrl.u32 %v1794_v48, 7  ;;  %v1790_v17 = vld [vmem:[%s6241_s2] sm:$0x1]  ;;  %v6645_v48 = vld [vmem:[#allocation9_spill] sm:$0xff] }
 0x337   :  { %v6638_v30 = vld [vmem:[#allocation2_spill] sm:$0xff] }
 0x338   :  { %v1780_v22 = vadd.f32 %v1779_v38, %v1778_v10  ;;  %v1796_v14 = vsub.s32 0, %v1795_v34  ;;  %v6639_v38 = vld [vmem:[#allocation3_spill] sm:$0xff]  ;;  %v6642_v34 = vld [vmem:[#allocation6_spill] sm:$0xff] }
 0x33a   :  { %v1782_v56 = vadd.f32 %v1781_v20, %v1780_v22  ;;  %v6641_v22 = vld [vmem:[#allocation5_spill] sm:$0xff] }
 0x33c   :  { %v1783_v8 = vrot.slane %v1782_v56, 4 }
 0x33e   :  { %v1784_v12 = vadd.f32 %v1783_v8, %v1782_v56 }
 0x340   :  { %v1785_v18 = vrot.slane %v1784_v12, 2 }
 0x342   :  { %v1786_v0 = vadd.f32 %v1785_v18, %v1784_v12  ;;  %v6643_v12 = vld [vmem:[#allocation7_spill] sm:$0xff] }
 0x344   :  { %v1787_v60 = vrot.slane %v1786_v0, 1 }
 0x346   :  { %v1788_v50 = vadd.f32 %v1787_v60, %v1786_v0  ;;  %v6640_v0 = vld [vmem:[#allocation4_spill] sm:$0xff] }
 0x348   :  { %v1789_v46 = vmul.f32 0.00125, %v1788_v50 }
 0x34a   :  { %v1791_v63 = vadd.f32 1e-05, %v1789_v46  ;;  %v6644_v46 = vld [vmem:[#allocation8_spill] sm:$0xff] }
 0x34c   :  { %3124 = vrsqrt.f32 %v1791_v63 }
 0x356   :  { %v3125_v10 = vpop.eup %3124 }
 0x357   :  { %v1793_v2 = vmul.f32 %v3125_v10, %v1790_v17 }
 0x359   :  { %v4632_v28 = vrot.slane %v1793_v2, %v1796_v14  ;;  %v6646_v14 = vld [vmem:[#allocation10_spill] sm:$0xff]  ;;  %v6648_v2 = vld [vmem:[#allocation11_spill] sm:$0xff] }
 0x35b   :  { %v4636_v56 = vmul.f32 %v4632_v28, %v6638_v30  ;;  %v4640_v50 = vmul.f32 %v4632_v28, %v6639_v38  ;;  %v4644_v60 = vmul.f32 %v4632_v28, %v6640_v0  ;;  %v4648_v20 = vmul.f32 %v4632_v28, %v6641_v22  ;;  %v6650_v38 = vld [vmem:[#allocation12_spill] sm:$0xff]  ;;  %v6652_v22 = vld [vmem:[#allocation13_spill] sm:$0xff] }
 0x35c   :  { %v4652_v8 = vmul.f32 %v4632_v28, %v6642_v34  ;;  %v4656_v18 = vmul.f32 %v4632_v28, %v6643_v12  ;;  %v4660_v63 = vmul.f32 %v4632_v28, %v6644_v46  ;;  %v4664_v17 = vmul.f32 %v4632_v28, %v6645_v48  ;;  %v6654_v12 = vld [vmem:[#allocation14_spill] sm:$0xff]  ;;  %v6656_v48 = vld [vmem:[#allocation15_spill] sm:$0xff] }
 0x35d   :  { %v4668_v10 = vmul.f32 %v4632_v28, %v6646_v14  ;;  %v4672_v30 = vmul.f32 %v4632_v28, %v6648_v2  ;;  %v4676_v0 = vmul.f32 %v4632_v28, %v6650_v38  ;;  %v4680_v34 = vmul.f32 %v4632_v28, %v6652_v22 }
 0x35e   :  { %v4684_v46 = vmul.f32 %v4632_v28, %v6654_v12  ;;  %v4688_v14 = vmul.f32 %v4632_v28, %v6656_v48 }
 0x35f   :  { %6647 = vst [vmem:[#allocation42_spill] sm:$0xff] %v4668_v10  ;;  %6649 = vst [vmem:[#allocation43_spill] sm:$0xff] %v4672_v30  ;;  %v6658_v10 = vld [vmem:[#allocation16_spill] sm:$0xff]  ;;  %v6660_v30 = vld [vmem:[#allocation17_spill] sm:$0xff] }
 0x360   :  { %6651 = vst [vmem:[#allocation44_spill] sm:$0xff] %v4676_v0  ;;  %6653 = vst [vmem:[#allocation2_spill] sm:$0xff] %v4680_v34  ;;  %v4692_v2 = vmul.f32 %v4632_v28, %v6658_v10  ;;  %v4696_v38 = vmul.f32 %v4632_v28, %v6660_v30  ;;  %v6662_v0 = vld [vmem:[#allocation18_spill] sm:$0xff]  ;;  %v6664_v34 = vld [vmem:[#allocation19_spill] sm:$0xff] }
 0x361   :  { %6655 = vst [vmem:[#allocation3_spill] sm:$0xff] %v4684_v46  ;;  %6657 = vst [vmem:[#allocation4_spill] sm:$0xff] %v4688_v14  ;;  %v4700_v22 = vmul.f32 %v4632_v28, %v6662_v0  ;;  %v4704_v12 = vmul.f32 %v4632_v28, %v6664_v34  ;;  %v6666_v46 = vld [vmem:[#allocation20_spill] sm:$0xff]  ;;  %v6668_v14 = vld [vmem:[#allocation21_spill] sm:$0xff] }
 0x362   :  { %6659 = vst [vmem:[#allocation5_spill] sm:$0xff] %v4692_v2  ;;  %6661 = vst [vmem:[#allocation6_spill] sm:$0xff] %v4696_v38  ;;  %v4708_v48 = vmul.f32 %v4632_v28, %v6666_v46  ;;  %v4712_v10 = vmul.f32 %v4632_v28, %v6668_v14  ;;  %v6670_v2 = vld [vmem:[#allocation22_spill] sm:$0xff]  ;;  %v6672_v38 = vld [vmem:[#allocation23_spill] sm:$0xff] }
 0x363   :  { %6663 = vst [vmem:[#allocation7_spill] sm:$0xff] %v4700_v22  ;;  %6665 = vst [vmem:[#allocation8_spill] sm:$0xff] %v4704_v12  ;;  %v4716_v30 = vmul.f32 %v4632_v28, %v6670_v2  ;;  %v4720_v0 = vmul.f32 %v4632_v28, %v6672_v38  ;;  %v6674_v22 = vld [vmem:[#allocation24_spill] sm:$0xff]  ;;  %v6676_v12 = vld [vmem:[#allocation25_spill] sm:$0xff] }
 0x364   :  { %6667 = vst [vmem:[#allocation9_spill] sm:$0xff] %v4708_v48  ;;  %6669 = vst [vmem:[#allocation10_spill] sm:$0xff] %v4712_v10  ;;  %v4724_v34 = vmul.f32 %v4632_v28, %v6674_v22  ;;  %v4728_v46 = vmul.f32 %v4632_v28, %v6676_v12  ;;  %v6678_v48 = vld [vmem:[#allocation26_spill] sm:$0xff]  ;;  %v6680_v10 = vld [vmem:[#allocation27_spill] sm:$0xff] }
 0x365   :  { %6671 = vst [vmem:[#allocation11_spill] sm:$0xff] %v4716_v30  ;;  %6673 = vst [vmem:[#allocation12_spill] sm:$0xff] %v4720_v0  ;;  %v4732_v14 = vmul.f32 %v4632_v28, %v6678_v48  ;;  %v4736_v2 = vmul.f32 %v4632_v28, %v6680_v10  ;;  %v6682_v30 = vld [vmem:[#allocation28_spill] sm:$0xff]  ;;  %v6684_v0 = vld [vmem:[#allocation29_spill] sm:$0xff] }
 0x366   :  { %6675 = vst [vmem:[#allocation13_spill] sm:$0xff] %v4724_v34  ;;  %6677 = vst [vmem:[#allocation14_spill] sm:$0xff] %v4728_v46  ;;  %v4740_v38 = vmul.f32 %v4632_v28, %v6682_v30  ;;  %v4744_v22 = vmul.f32 %v4632_v28, %v6684_v0  ;;  %v6686_v34 = vld [vmem:[#allocation30_spill] sm:$0xff]  ;;  %v6688_v46 = vld [vmem:[#allocation31_spill] sm:$0xff] }
 0x367   :  { %6679 = vst [vmem:[#allocation15_spill] sm:$0xff] %v4732_v14  ;;  %6681 = vst [vmem:[#allocation16_spill] sm:$0xff] %v4736_v2  ;;  %v4748_v12 = vmul.f32 %v4632_v28, %v6686_v34  ;;  %v4752_v48 = vmul.f32 %v4632_v28, %v6688_v46  ;;  %v6690_v14 = vld [vmem:[#allocation32_spill] sm:$0xff]  ;;  %v6692_v2 = vld [vmem:[#allocation33_spill] sm:$0xff] }
 0x368   :  { %6683 = vst [vmem:[#allocation17_spill] sm:$0xff] %v4740_v38  ;;  %6685 = vst [vmem:[#allocation18_spill] sm:$0xff] %v4744_v22  ;;  %v4756_v10 = vmul.f32 %v4632_v28, %v6690_v14  ;;  %v4760_v30 = vmul.f32 %v4632_v28, %v6692_v2  ;;  %v6694_v38 = vld [vmem:[#allocation34_spill] sm:$0xff]  ;;  %v6696_v22 = vld [vmem:[#allocation35_spill] sm:$0xff] }
 0x369   :  { %6687 = vst [vmem:[#allocation19_spill] sm:$0xff] %v4748_v12  ;;  %6689 = vst [vmem:[#allocation20_spill] sm:$0xff] %v4752_v48  ;;  %v4764_v0 = vmul.f32 %v4632_v28, %v6694_v38  ;;  %v4768_v34 = vmul.f32 %v4632_v28, %v6696_v22  ;;  %v6698_v12 = vld [vmem:[#allocation36_spill] sm:$0xff]  ;;  %v6699_v48 = vld [vmem:[#allocation37_spill] sm:$0xff] }
 0x36a   :  { %6691 = vst [vmem:[#allocation21_spill] sm:$0xff] %v4756_v10  ;;  %6693 = vst [vmem:[#allocation22_spill] sm:$0xff] %v4760_v30  ;;  %v4772_v46 = vmul.f32 %v4632_v28, %v6698_v12  ;;  %v4776_v14 = vmul.f32 %v4632_v28, %v6699_v48  ;;  %v6700_v10 = vld [vmem:[#allocation38_spill] sm:$0xff]  ;;  %v6701_v30 = vld [vmem:[#allocation39_spill] sm:$0xff]  ;;  %v4796_v48 = vmul.f32 %v4632_v28, %v6624_v53 }
 0x36b   :  { %6695 = vst [vmem:[#allocation23_spill] sm:$0xff] %v4764_v0  ;;  %6697 = vst [vmem:[#allocation24_spill] sm:$0xff] %v4768_v34  ;;  %v4780_v2 = vmul.f32 %v4632_v28, %v6700_v10  ;;  %v4784_v38 = vmul.f32 %v4632_v28, %v6701_v30  ;;  %v6702_v0 = vld [vmem:[#allocation40_spill] sm:$0xff]  ;;  %v6703_v34 = vld [vmem:[#allocation41_spill] sm:$0xff]  ;;  %v4800_v10 = vmul.f32 %v4632_v28, %v6625_v42 }
 0x36c   :  { %v4788_v22 = vmul.f32 %v4632_v28, %v6702_v0  ;;  %v4792_v12 = vmul.f32 %v4632_v28, %v6703_v34  ;;  %v4804_v30 = vmul.f32 %v4632_v28, %v6626_v36  ;;  %v4808_v0 = vmul.f32 %v4632_v28, %v4103_v40 }
 0x36d   :  { %v4812_v34 = vmul.f32 %v4632_v28, %v4107_v41  ;;  %v4816_v53 = vmul.f32 %v4632_v28, %v4111_v52  ;;  %v4820_v42 = vmul.f32 %v4632_v28, %v4115_v16  ;;  %v4824_v36 = vmul.f32 %v4632_v28, %v4119_v33 }
 0x36e   :  { %v4828_v40 = vmul.f32 %v4632_v28, %v4123_v24  ;;  %v4832_v41 = vmul.f32 %v4632_v28, %v4127_v55  ;;  %v4836_v52 = vmul.f32 %v4632_v28, %v4131_v6  ;;  %v4840_v16 = vmul.f32 %v4632_v28, %v4135_v62 }
 0x36f   :  { %v4844_v33 = vmul.f32 %v4632_v28, %v4139_v57  ;;  %v4848_v24 = vmul.f32 %v4632_v28, %v4143_v32  ;;  %v4852_v55 = vmul.f32 %v4632_v28, %v4147_v44  ;;  %v4856_v6 = vmul.f32 %v4632_v28, %v4151_v54 }
 0x370   :  { %v4860_v62 = vmul.f32 %v4632_v28, %v4155_v58  ;;  %v4864_v57 = vmul.f32 %v4632_v28, %v4159_v1  ;;  %v4868_v32 = vmul.f32 %v4632_v28, %v4163_v7  ;;  %v4872_v44 = vmul.f32 %v4632_v28, %v4167_v13 }
 0x371   :  { %v4876_v54 = vmul.f32 %v4632_v28, %v4171_v19  ;;  %v4880_v58 = vmul.f32 %v4632_v28, %v4175_v25  ;;  %v4884_v1 = vmul.f32 %v4632_v28, %v4179_v31  ;;  %v4888_v7 = vmul.f32 %v4632_v28, %v4183_v37 }
 0x372   :  { %v4892_v13 = vmul.f32 %v4632_v28, %v4187_v43  ;;  %v4896_v19 = vmul.f32 %v4632_v28, %v4191_v49  ;;  %v4900_v25 = vmul.f32 %v4632_v28, %v4195_v59  ;;  %v4904_v31 = vmul.f32 %v4632_v28, %v4199_v3 }
 0x373   :  { %v4908_v37 = vmul.f32 %v4632_v28, %v4203_v11  ;;  %v4912_v43 = vmul.f32 %v4632_v28, %v4207_v21  ;;  %v4916_v49 = vmul.f32 %v4632_v28, %v4211_v29  ;;  %v4920_v59 = vmul.f32 %v4632_v28, %v4215_v39 }
 0x374   :  { %v4924_v3 = vmul.f32 %v4632_v28, %v4219_v47  ;;  %v4928_v11 = vmul.f32 %v4632_v28, %v4223_v61  ;;  %v4932_v21 = vmul.f32 %v4632_v28, %v4227_v9  ;;  %v4936_v29 = vmul.f32 %v4632_v28, %v4231_v23 }
 0x375   :  { %v4940_v39 = vmul.f32 %v4632_v28, %v4235_v35  ;;  %v4944_v47 = vmul.f32 %v4632_v28, %v4239_v51  ;;  %v4948_v61 = vmul.f32 %v4632_v28, %v4243_v5  ;;  %v4952_v9 = vmul.f32 %v4632_v28, %v4247_v27 }
 0x376   :  { %v4956_v23 = vmul.f32 %v4632_v28, %v4251_v45  ;;  %v4960_v35 = vmul.f32 %v4632_v28, %v4255_v15  ;;  %v4964_v51 = vmul.f32 %v4632_v28, %v4259_v26  ;;  %v4968_v5 = vmul.f32 %v4632_v28, %v4263_v4 }
 0x377   :  { %6704 = vst [vmem:[#allocation25_spill] sm:$0xff] %v4944_v47  ;;  %6705 = vst [vmem:[#allocation26_spill] sm:$0xff] %v4948_v61  ;;  %v6711_v61 = vld [vmem:[#allocation45_spill] sm:$0xff]  ;;  %v6734_v47 = vld [vmem:[#allocation59_spill] sm:$0xff] }
 0x378   :  { %6706 = vst [vmem:[#allocation27_spill] sm:$0xff] %v4952_v9  ;;  %6707 = vst [vmem:[#allocation28_spill] sm:$0xff] %v4956_v23  ;;  %v4972_v27 = vmul.f32 %v4632_v28, %v6711_v61  ;;  %v6713_v9 = vld [vmem:[#allocation46_spill] sm:$0xff]  ;;  %v6715_v23 = vld [vmem:[#allocation48_spill] sm:$0xff] }
 0x379   :  { %6708 = vst [vmem:[#allocation29_spill] sm:$0xff] %v4960_v35  ;;  %6709 = vst [vmem:[#allocation30_spill] sm:$0xff] %v4964_v51  ;;  %v4976_v45 = vmul.f32 %v4632_v28, %v6713_v9  ;;  %v4980_v15 = vmul.f32 %v4632_v28, %v6715_v23  ;;  %v6717_v35 = vld [vmem:[#allocation50_spill] sm:$0xff]  ;;  %v6719_v51 = vld [vmem:[#allocation52_spill] sm:$0xff] }
 0x37a   :  { %6710 = vst [vmem:[#allocation31_spill] sm:$0xff] %v4968_v5  ;;  %6712 = vst [vmem:[#allocation32_spill] sm:$0xff] %v4972_v27  ;;  %v4984_v26 = vmul.f32 %v4632_v28, %v6717_v35  ;;  %v4988_v4 = vmul.f32 %v4632_v28, %v6719_v51  ;;  %v6721_v5 = vld [vmem:[#allocation53_spill] sm:$0xff]  ;;  %v6723_v27 = vld [vmem:[#allocation55_spill] sm:$0xff] }
 0x37b   :  { %6714 = vst [vmem:[#allocation33_spill] sm:$0xff] %v4976_v45  ;;  %6716 = vst [vmem:[#allocation34_spill] sm:$0xff] %v4980_v15  ;;  %v4992_v61 = vmul.f32 %v4632_v28, %v6721_v5  ;;  %v4996_v9 = vmul.f32 %v4632_v28, %v6723_v27  ;;  %v6725_v45 = vld [vmem:[#allocation56_spill] sm:$0xff]  ;;  %v5005_v35 = vld [vmem:[%s6241_s2 + $0x1] ss:$0 sm:$0xff] }
 0x37c   :  { %6718 = vst [vmem:[#allocation35_spill] sm:$0xff] %v4984_v26  ;;  %6720 = vst [vmem:[#allocation36_spill] sm:$0xff] %v4988_v4  ;;  %v5000_v23 = vmul.f32 %v4632_v28, %v6725_v45  ;;  %v6727_v26 = vld [vmem:[#allocation57_spill] sm:$0xff]  ;;  %v6729_v4 = vld [vmem:[#allocation58_spill] sm:$0xff] }
 0x37d   :  { %6722 = vst [vmem:[#allocation37_spill] sm:$0xff] %v4992_v61  ;;  %6724 = vst [vmem:[#allocation38_spill] sm:$0xff] %v4996_v9  ;;  %v5009_v51 = vmul.f32 %v4632_v28, %v6727_v26  ;;  %v5013_v5 = vmul.f32 %v4632_v28, %v6729_v4  ;;  %v6731_v61 = vld [vmem:[#allocation47_spill] sm:$0xff]  ;;  %v6732_v9 = vld [vmem:[#allocation49_spill] sm:$0xff]  ;;  %v5029_v26 = vmul.f32 %v4632_v28, %v6734_v47 }
 0x37e   :  { %6726 = vst [vmem:[#allocation39_spill] sm:$0xff] %v5000_v23  ;;  %v5017_v27 = vmul.f32 %v4632_v28, %v6731_v61  ;;  %v5021_v45 = vmul.f32 %v4632_v28, %v6732_v9  ;;  %v6733_v23 = vld [vmem:[#allocation51_spill] sm:$0xff]  ;;  %v5041_v9 = vadd.f32 %v5005_v35, %v4636_v56  ;;  %v5049_v47 = vadd.f32 %v5005_v35, %v4644_v60 }
 0x37f   :  { %6728 = vst [vmem:[#allocation40_spill] sm:$0xff] %v5009_v51  ;;  %6730 = vst [vmem:[#allocation41_spill] sm:$0xff] %v5013_v5  ;;  %v5025_v15 = vmul.f32 %v4632_v28, %v6733_v23  ;;  %v6735_v51 = vld [vmem:[#allocation54_spill] sm:$0xff]  ;;  %v6736_v5 = vld [vmem:[#allocation60_spill] sm:$0xff]  ;;  %v5045_v23 = vadd.f32 %v5005_v35, %v4640_v50  ;;  %v5061_v56 = vadd.f32 %v5005_v35, %v4656_v18 }
 0x380   :  { %v5033_v4 = vmul.f32 %v4632_v28, %v6735_v51  ;;  %v5037_v61 = vmul.f32 %v4632_v28, %v6736_v5  ;;  %6737 = vst [vmem:[#allocation45_spill] sm:$0xff] %v5041_v9  ;;  %6739 = vst [vmem:[#allocation48_spill] sm:$0xff] %v5049_v47  ;;  %v5053_v51 = vadd.f32 %v5005_v35, %v4648_v20  ;;  %v6745_v5 = vld [vmem:[#allocation42_spill] sm:$0xff] }
 0x381   :  { %6738 = vst [vmem:[#allocation46_spill] sm:$0xff] %v5045_v23  ;;  %v5057_v28 = vadd.f32 %v5005_v35, %v4652_v8  ;;  %6742 = vst [vmem:[#allocation53_spill] sm:$0xff] %v5061_v56  ;;  %v5065_v50 = vadd.f32 %v5005_v35, %v4660_v63  ;;  %v5069_v60 = vadd.f32 %v5005_v35, %v4664_v17  ;;  %v6751_v56 = vld [vmem:[#allocation2_spill] sm:$0xff] }
 0x382   :  { %6740 = vst [vmem:[#allocation50_spill] sm:$0xff] %v5053_v51  ;;  %v5073_v20 = vadd.f32 %v5005_v35, %v6745_v5  ;;  %v6747_v51 = vld [vmem:[#allocation43_spill] sm:$0xff]  ;;  %v5085_v63 = vadd.f32 %v5005_v35, %v6751_v56 }
 0x383   :  { %6741 = vst [vmem:[#allocation52_spill] sm:$0xff] %v5057_v28  ;;  %6743 = vst [vmem:[#allocation55_spill] sm:$0xff] %v5065_v50  ;;  %v5077_v8 = vadd.f32 %v5005_v35, %v6747_v51  ;;  %v6749_v28 = vld [vmem:[#allocation44_spill] sm:$0xff]  ;;  %v6753_v50 = vld [vmem:[#allocation3_spill] sm:$0xff] }
 0x384   :  { %6744 = vst [vmem:[#allocation56_spill] sm:$0xff] %v5069_v60  ;;  %6746 = vst [vmem:[#allocation57_spill] sm:$0xff] %v5073_v20  ;;  %v5081_v18 = vadd.f32 %v5005_v35, %v6749_v28  ;;  %v5089_v17 = vadd.f32 %v5005_v35, %v6753_v50  ;;  %v6755_v60 = vld [vmem:[#allocation4_spill] sm:$0xff]  ;;  %v6757_v20 = vld [vmem:[#allocation5_spill] sm:$0xff] }
 0x385   :  { %6748 = vst [vmem:[#allocation58_spill] sm:$0xff] %v5077_v8  ;;  %6752 = vst [vmem:[#allocation49_spill] sm:$0xff] %v5085_v63  ;;  %v5093_v5 = vadd.f32 %v5005_v35, %v6755_v60  ;;  %v5097_v51 = vadd.f32 %v5005_v35, %v6757_v20  ;;  %v6759_v8 = vld [vmem:[#allocation6_spill] sm:$0xff]  ;;  %v6763_v63 = vld [vmem:[#allocation8_spill] sm:$0xff] }
 0x386   :  { %6750 = vst [vmem:[#allocation47_spill] sm:$0xff] %v5081_v18  ;;  %6754 = vst [vmem:[#allocation51_spill] sm:$0xff] %v5089_v17  ;;  %v5101_v28 = vadd.f32 %v5005_v35, %v6759_v8  ;;  %v6761_v18 = vld [vmem:[#allocation7_spill] sm:$0xff]  ;;  %v5109_v50 = vadd.f32 %v5005_v35, %v6763_v63  ;;  %v6765_v17 = vld [vmem:[#allocation9_spill] sm:$0xff] }
 0x387   :  { %6756 = vst [vmem:[#allocation59_spill] sm:$0xff] %v5093_v5  ;;  %6758 = vst [vmem:[#allocation54_spill] sm:$0xff] %v5097_v51  ;;  %v5105_v56 = vadd.f32 %v5005_v35, %v6761_v18  ;;  %v5113_v60 = vadd.f32 %v5005_v35, %v6765_v17  ;;  %v6767_v5 = vld [vmem:[#allocation10_spill] sm:$0xff]  ;;  %v6769_v51 = vld [vmem:[#allocation11_spill] sm:$0xff] }
 0x388   :  { %6760 = vst [vmem:[#allocation60_spill] sm:$0xff] %v5101_v28  ;;  %6764 = vst [vmem:[#allocation43_spill] sm:$0xff] %v5109_v50  ;;  %v5117_v20 = vadd.f32 %v5005_v35, %v6767_v5  ;;  %v5121_v8 = vadd.f32 %v5005_v35, %v6769_v51  ;;  %v6771_v28 = vld [vmem:[#allocation12_spill] sm:$0xff]  ;;  %v6775_v50 = vld [vmem:[#allocation14_spill] sm:$0xff] }
 0x389   :  { %6762 = vst [vmem:[#allocation42_spill] sm:$0xff] %v5105_v56  ;;  %6766 = vst [vmem:[#allocation44_spill] sm:$0xff] %v5113_v60  ;;  %v5125_v18 = vadd.f32 %v5005_v35, %v6771_v28  ;;  %v6773_v56 = vld [vmem:[#allocation13_spill] sm:$0xff]  ;;  %v5133_v17 = vadd.f32 %v5005_v35, %v6775_v50  ;;  %v6777_v60 = vld [vmem:[#allocation15_spill] sm:$0xff] }
 0x38a   :  { %6768 = vst [vmem:[#allocation2_spill] sm:$0xff] %v5117_v20  ;;  %6770 = vst [vmem:[#allocation3_spill] sm:$0xff] %v5121_v8  ;;  %v5129_v63 = vadd.f32 %v5005_v35, %v6773_v56  ;;  %v5137_v5 = vadd.f32 %v5005_v35, %v6777_v60  ;;  %v6779_v20 = vld [vmem:[#allocation16_spill] sm:$0xff]  ;;  %v6781_v8 = vld [vmem:[#allocation17_spill] sm:$0xff] }
 0x38b   :  { %6772 = vst [vmem:[#allocation4_spill] sm:$0xff] %v5125_v18  ;;  %6776 = vst [vmem:[#allocation6_spill] sm:$0xff] %v5133_v17  ;;  %v5141_v51 = vadd.f32 %v5005_v35, %v6779_v20  ;;  %v5145_v28 = vadd.f32 %v5005_v35, %v6781_v8  ;;  %v6783_v18 = vld [vmem:[#allocation18_spill] sm:$0xff]  ;;  %v6786_v17 = vld [vmem:[#allocation20_spill] sm:$0xff] }
 0x38c   :  { %6774 = vst [vmem:[#allocation5_spill] sm:$0xff] %v5129_v63  ;;  %6778 = vst [vmem:[#allocation7_spill] sm:$0xff] %v5137_v5  ;;  %v5149_v56 = vadd.f32 %v5005_v35, %v6783_v18  ;;  %v6785_v63 = vld [vmem:[#allocation19_spill] sm:$0xff]  ;;  %v5157_v60 = vadd.f32 %v5005_v35, %v6786_v17  ;;  %v6787_v5 = vld [vmem:[#allocation21_spill] sm:$0xff]  ;;  %v5177_v17 = vadd.f32 %v5005_v35, %v4772_v46 }
 0x38d   :  { %6780 = vst [vmem:[#allocation8_spill] sm:$0xff] %v5141_v51  ;;  %6782 = vst [vmem:[#allocation9_spill] sm:$0xff] %v5145_v28  ;;  %v5153_v50 = vadd.f32 %v5005_v35, %v6785_v63  ;;  %v5161_v20 = vadd.f32 %v5005_v35, %v6787_v5  ;;  %v6788_v51 = vld [vmem:[#allocation22_spill] sm:$0xff]  ;;  %v6789_v28 = vld [vmem:[#allocation23_spill] sm:$0xff]  ;;  %v5181_v5 = vadd.f32 %v5005_v35, %v4776_v14 }
 0x38e   :  { %6784 = vst [vmem:[#allocation10_spill] sm:$0xff] %v5149_v56  ;;  %v5165_v8 = vadd.f32 %v5005_v35, %v6788_v51  ;;  %v5169_v18 = vadd.f32 %v5005_v35, %v6789_v28  ;;  %v6790_v56 = vld [vmem:[#allocation24_spill] sm:$0xff]  ;;  %v5185_v51 = vadd.f32 %v5005_v35, %v4780_v2  ;;  %v5189_v28 = vadd.f32 %v5005_v35, %v4784_v38 }
 0x38f   :  { %v5173_v63 = vadd.f32 %v5005_v35, %v6790_v56  ;;  %v5193_v56 = vadd.f32 %v5005_v35, %v4788_v22  ;;  %v5197_v46 = vadd.f32 %v5005_v35, %v4792_v12  ;;  %v5201_v14 = vadd.f32 %v5005_v35, %v4796_v48 }
 0x390   :  { %v5205_v2 = vadd.f32 %v5005_v35, %v4800_v10  ;;  %v5209_v38 = vadd.f32 %v5005_v35, %v4804_v30  ;;  %v5213_v22 = vadd.f32 %v5005_v35, %v4808_v0  ;;  %v5217_v12 = vadd.f32 %v5005_v35, %v4812_v34 }
 0x391   :  { %v5221_v48 = vadd.f32 %v5005_v35, %v4816_v53  ;;  %v5225_v10 = vadd.f32 %v5005_v35, %v4820_v42  ;;  %v5229_v30 = vadd.f32 %v5005_v35, %v4824_v36  ;;  %v5233_v0 = vadd.f32 %v5005_v35, %v4828_v40 }
 0x392   :  { %v5237_v34 = vadd.f32 %v5005_v35, %v4832_v41  ;;  %v5241_v53 = vadd.f32 %v5005_v35, %v4836_v52  ;;  %v5245_v42 = vadd.f32 %v5005_v35, %v4840_v16  ;;  %v5249_v36 = vadd.f32 %v5005_v35, %v4844_v33  ;;  %v6869_v23 = vld [vmem:[#allocation6_spill] sm:$0xff] }
 0x393   :  { %v5253_v40 = vadd.f32 %v5005_v35, %v4848_v24  ;;  %v5257_v41 = vadd.f32 %v5005_v35, %v4852_v55  ;;  %v5261_v52 = vadd.f32 %v5005_v35, %v4856_v6  ;;  %v5265_v16 = vadd.f32 %v5005_v35, %v4860_v62  ;;  %v6868_v9 = vld [vmem:[#allocation5_spill] sm:$0xff]  ;;  %v6870_v47 = vld [vmem:[#allocation7_spill] sm:$0xff] }
 0x394   :  { %v5269_v33 = vadd.f32 %v5005_v35, %v4864_v57  ;;  %v5273_v24 = vadd.f32 %v5005_v35, %v4868_v32  ;;  %v5277_v55 = vadd.f32 %v5005_v35, %v4872_v44  ;;  %v5281_v6 = vadd.f32 %v5005_v35, %v4876_v54 }
 0x395   :  { %v5285_v62 = vadd.f32 %v5005_v35, %v4880_v58  ;;  %v5289_v57 = vadd.f32 %v5005_v35, %v4884_v1  ;;  %v5293_v32 = vadd.f32 %v5005_v35, %v4888_v7  ;;  %v5297_v44 = vadd.f32 %v5005_v35, %v4892_v13 }
 0x396   :  { %6791 = vst [vmem:[#allocation11_spill] sm:$0xff] %v5277_v55  ;;  %6792 = vst [vmem:[#allocation12_spill] sm:$0xff] %v5281_v6  ;;  %v5301_v54 = vadd.f32 %v5005_v35, %v4896_v19  ;;  %v5305_v58 = vadd.f32 %v5005_v35, %v4900_v25  ;;  %v5309_v1 = vadd.f32 %v5005_v35, %v4904_v31  ;;  %v6903_v6 = vld [vmem:[#allocation45_spill] sm:$0xff] }
 0x397   :  { %6793 = vst [vmem:[#allocation13_spill] sm:$0xff] %v5285_v62  ;;  %6794 = vst [vmem:[#allocation14_spill] sm:$0xff] %v5289_v57  ;;  %v5313_v7 = vadd.f32 %v5005_v35, %v4908_v37  ;;  %v5317_v13 = vadd.f32 %v5005_v35, %v4912_v43  ;;  %v5321_v19 = vadd.f32 %v5005_v35, %v4916_v49  ;;  %v6925_v55 = vld [vmem:[#allocation49_spill] sm:$0xff] }
 0x398   :  { %6795 = vst [vmem:[#allocation15_spill] sm:$0xff] %v5293_v32  ;;  %6796 = vst [vmem:[#allocation16_spill] sm:$0xff] %v5297_v44  ;;  %v5325_v25 = vadd.f32 %v5005_v35, %v4920_v59  ;;  %v5329_v31 = vadd.f32 %v5005_v35, %v4924_v3  ;;  %v5333_v37 = vadd.f32 %v5005_v35, %v4928_v11 }
 0x399   :  { %6797 = vst [vmem:[#allocation17_spill] sm:$0xff] %v5301_v54  ;;  %6798 = vst [vmem:[#allocation18_spill] sm:$0xff] %v5305_v58  ;;  %v5337_v43 = vadd.f32 %v5005_v35, %v4932_v21  ;;  %v5341_v49 = vadd.f32 %v5005_v35, %v4936_v29  ;;  %v5345_v59 = vadd.f32 %v5005_v35, %v4940_v39 }
 0x39a   :  { %6799 = vst [vmem:[#allocation19_spill] sm:$0xff] %v5309_v1  ;;  %6800 = vst [vmem:[#allocation20_spill] sm:$0xff] %v5313_v7  ;;  %v6923_v7 = vld [vmem:[#allocation47_spill] sm:$0xff] }
 0x39b   :  { %6801 = vst [vmem:[#allocation21_spill] sm:$0xff] %v5317_v13  ;;  %6802 = vst [vmem:[#allocation22_spill] sm:$0xff] %v5321_v19  ;;  %v6905_v13 = vld [vmem:[#allocation46_spill] sm:$0xff] }
 0x39c   :  { %6803 = vst [vmem:[#allocation23_spill] sm:$0xff] %v5325_v25  ;;  %6804 = vst [vmem:[#allocation24_spill] sm:$0xff] %v5329_v31  ;;  %v6809_v25 = vld [vmem:[#allocation25_spill] sm:$0xff]  ;;  %v6811_v31 = vld [vmem:[#allocation26_spill] sm:$0xff]  ;;  %v6906_v57 = vmax.f32 %v6905_v13, 0.0 }
 0x39d   :  { %6805 = vst [vmem:[#allocation61_spill] sm:$0xff] %v5333_v37  ;;  %6806 = vst [vmem:[#allocation62_spill] sm:$0xff] %v5337_v43  ;;  %v5349_v3 = vadd.f32 %v5005_v35, %v6809_v25  ;;  %v5353_v11 = vadd.f32 %v5005_v35, %v6811_v31  ;;  %v6813_v37 = vld [vmem:[#allocation27_spill] sm:$0xff]  ;;  %v6815_v43 = vld [vmem:[#allocation28_spill] sm:$0xff] }
 0x39e   :  { %6807 = vst [vmem:[#allocation63_spill] sm:$0xff] %v5341_v49  ;;  %6808 = vst [vmem:[#allocation64_spill] sm:$0xff] %v5345_v59  ;;  %v5357_v21 = vadd.f32 %v5005_v35, %v6813_v37  ;;  %v5361_v29 = vadd.f32 %v5005_v35, %v6815_v43  ;;  %v6817_v49 = vld [vmem:[#allocation29_spill] sm:$0xff]  ;;  %v6819_v59 = vld [vmem:[#allocation30_spill] sm:$0xff]  ;;  %v2826_v32 = vpack.c.bf16 %v6906_v57, %v6906_v57 }
 0x39f   :  { %6810 = vst [vmem:[#allocation25_spill] sm:$0xff] %v5349_v3  ;;  %6812 = vst [vmem:[#allocation26_spill] sm:$0xff] %v5353_v11  ;;  %v5365_v39 = vadd.f32 %v5005_v35, %v6817_v49  ;;  %v5369_v25 = vadd.f32 %v5005_v35, %v6819_v59  ;;  %v6821_v3 = vld [vmem:[#allocation31_spill] sm:$0xff]  ;;  %v6823_v11 = vld [vmem:[#allocation32_spill] sm:$0xff] }
 0x3a0   :  { %6814 = vst [vmem:[#allocation27_spill] sm:$0xff] %v5357_v21  ;;  %6816 = vst [vmem:[#allocation28_spill] sm:$0xff] %v5361_v29  ;;  %v5373_v31 = vadd.f32 %v5005_v35, %v6821_v3  ;;  %v5377_v37 = vadd.f32 %v5005_v35, %v6823_v11  ;;  %v6825_v21 = vld [vmem:[#allocation33_spill] sm:$0xff]  ;;  %v6827_v29 = vld [vmem:[#allocation34_spill] sm:$0xff] }
 0x3a1   :  { %6818 = vst [vmem:[#allocation29_spill] sm:$0xff] %v5365_v39  ;;  %6820 = vst [vmem:[#allocation30_spill] sm:$0xff] %v5369_v25  ;;  %v5381_v43 = vadd.f32 %v5005_v35, %v6825_v21  ;;  %v5385_v49 = vadd.f32 %v5005_v35, %v6827_v29  ;;  %v6829_v39 = vld [vmem:[#allocation35_spill] sm:$0xff]  ;;  %v6831_v25 = vld [vmem:[#allocation36_spill] sm:$0xff] }
 0x3a2   :  { %6822 = vst [vmem:[#allocation31_spill] sm:$0xff] %v5373_v31  ;;  %6824 = vst [vmem:[#allocation32_spill] sm:$0xff] %v5377_v37  ;;  %v5389_v59 = vadd.f32 %v5005_v35, %v6829_v39  ;;  %v5393_v3 = vadd.f32 %v5005_v35, %v6831_v25  ;;  %v6833_v31 = vld [vmem:[#allocation37_spill] sm:$0xff]  ;;  %v6835_v37 = vld [vmem:[#allocation38_spill] sm:$0xff] }
 0x3a3   :  { %6826 = vst [vmem:[#allocation33_spill] sm:$0xff] %v5381_v43  ;;  %6828 = vst [vmem:[#allocation34_spill] sm:$0xff] %v5385_v49  ;;  %v5397_v11 = vadd.f32 %v5005_v35, %v6833_v31  ;;  %v5401_v21 = vadd.f32 %v5005_v35, %v6835_v37  ;;  %v6837_v43 = vld [vmem:[#allocation39_spill] sm:$0xff]  ;;  %v6839_v49 = vld [vmem:[#allocation40_spill] sm:$0xff]  ;;  %v5417_v31 = vadd.f32 %v5005_v35, %v5017_v27 }
 0x3a4   :  { %6830 = vst [vmem:[#allocation35_spill] sm:$0xff] %v5389_v59  ;;  %6832 = vst [vmem:[#allocation36_spill] sm:$0xff] %v5393_v3  ;;  %v5405_v29 = vadd.f32 %v5005_v35, %v6837_v43  ;;  %v5409_v39 = vadd.f32 %v5005_v35, %v6839_v49  ;;  %v6841_v59 = vld [vmem:[#allocation41_spill] sm:$0xff]  ;;  %v5421_v37 = vadd.f32 %v5005_v35, %v5021_v45  ;;  %v6907_v45 = vld [vmem:[#allocation48_spill] sm:$0xff] }
 0x3a5   :  { %6834 = vst [vmem:[#allocation37_spill] sm:$0xff] %v5397_v11  ;;  %6836 = vst [vmem:[#allocation38_spill] sm:$0xff] %v5401_v21  ;;  %v5413_v25 = vadd.f32 %v5005_v35, %v6841_v59  ;;  %v5425_v43 = vadd.f32 %v5005_v35, %v5025_v15  ;;  %v5429_v49 = vadd.f32 %v5005_v35, %v5029_v26  ;;  %v6865_v11 = vld [vmem:[#allocation2_spill] sm:$0xff]  ;;  %v6871_v15 = vld [vmem:[#allocation8_spill] sm:$0xff]  ;;  %v6908_v44 = vmax.f32 %v6907_v45, 0.0 }
 0x3a6   :  { %6838 = vst [vmem:[#allocation39_spill] sm:$0xff] %v5405_v29  ;;  %6840 = vst [vmem:[#allocation40_spill] sm:$0xff] %v5409_v39  ;;  %v5433_v59 = vadd.f32 %v5005_v35, %v5033_v4  ;;  %v5437_v27 = vadd.f32 %v5005_v35, %v5037_v61  ;;  %v6863_v29 = vld [vmem:[#allocation43_spill] sm:$0xff]  ;;  %v6864_v4 = vld [vmem:[#allocation44_spill] sm:$0xff] }
 0x3a7   :  { %6842 = vst [vmem:[#allocation41_spill] sm:$0xff] %v5413_v25  ;;  %6843 = vst [vmem:[#allocation65_spill] sm:$0xff] %v5417_v31  ;;  %v6866_v35 = vld [vmem:[#allocation3_spill] sm:$0xff]  ;;  %v6872_v25 = vld [vmem:[#allocation9_spill] sm:$0xff]  ;;  %v6904_v31 = vmax.f32 %v6903_v6, 0.0  ;;  %v2827_v54 = vpack.c.bf16 %v6908_v44, %v6908_v44 }
 0x3a8   :  { %6844 = vst [vmem:[#allocation66_spill] sm:$0xff] %v5421_v37  ;;  %6845 = vst [vmem:[#allocation67_spill] sm:$0xff] %v5425_v43  ;;  %v6873_v26 = vld [vmem:[#allocation10_spill] sm:$0xff]  ;;  %v6915_v21 = vld [vmem:[#allocation55_spill] sm:$0xff] }
 0x3a9   :  { %6846 = vst [vmem:[#allocation68_spill] sm:$0xff] %v5429_v49  ;;  %6847 = vst [vmem:[#allocation69_spill] sm:$0xff] %v5433_v59  ;;  %v2825_v62 = vpack.c.bf16 %v6904_v31, %v6904_v31  ;;  %v6909_v43 = vld [vmem:[#allocation50_spill] sm:$0xff]  ;;  %v6911_v49 = vld [vmem:[#allocation52_spill] sm:$0xff]  ;;  %v6916_v13 = vmax.f32 %v6915_v21, 0.0  ;;  %v6926_v21 = vmax.f32 %v6925_v55, 0.0 }
 0x3aa   :  { %6848 = vst [vmem:[#allocation70_spill] sm:$0xff] %v5437_v27  ;;  %v6867_v27 = vld [vmem:[#allocation4_spill] sm:$0xff]  ;;  %v6910_v58 = vmax.f32 %v6909_v43, 0.0  ;;  %v6912_v3 = vmax.f32 %v6911_v49, 0.0  ;;  %v6913_v59 = vld [vmem:[#allocation53_spill] sm:$0xff]  ;;  %v6921_v19 = vld [vmem:[#allocation58_spill] sm:$0xff] }
 0x3ab   :  { %v6914_v6 = vmax.f32 %v6913_v59, 0.0  ;;  %v2831_v57 = vpack.c.bf16 %v6916_v13, %v6916_v13  ;;  %v6917_v39 = vld [vmem:[#allocation56_spill] sm:$0xff]  ;;  %v6919_v37 = vld [vmem:[#allocation57_spill] sm:$0xff]  ;;  %v6922_v49 = vmax.f32 %v6921_v19, 0.0  ;;  %v6924_v59 = vmax.f32 %v6923_v7, 0.0  ;;  %v6927_v55 = vld [vmem:[#allocation51_spill] sm:$0xff] }
 0x3ac   :  { %v2828_v1 = vpack.c.bf16 %v6910_v58, %v6910_v58  ;;  %v2829_v61 = vpack.c.bf16 %v6912_v3, %v6912_v3  ;;  %v6918_v45 = vmax.f32 %v6917_v39, 0.0  ;;  %v6920_v43 = vmax.f32 %v6919_v37, 0.0  ;;  %2504 = vst.msk [vmem:[%s6242_s3] sm:$0xf] %vm2503_vm1, %v2825_v62  ;;  %2505 = vst.msk [vmem:[%s6242_s3 + $0x4] sm:$0xf] %vm2503_vm1, %v2826_v32 }
 0x3ad   :  { %v2830_v31 = vpack.c.bf16 %v6914_v6, %v6914_v6  ;;  %v2834_v3 = vpack.c.bf16 %v6922_v49, %v6922_v49  ;;  %v2835_v6 = vpack.c.bf16 %v6924_v59, %v6924_v59  ;;  %v2836_v13 = vpack.c.bf16 %v6926_v21, %v6926_v21  ;;  %2506 = vst.msk [vmem:[%s6242_s3 + $0x8] sm:$0xf] %vm2503_vm1, %v2827_v54  ;;  %v6929_v62 = vld [vmem:[#allocation59_spill] sm:$0xff]  ;;  %v6933_v49 = vld [vmem:[#allocation60_spill] sm:$0xff] }
 0x3ae   :  { %v2832_v44 = vpack.c.bf16 %v6918_v45, %v6918_v45  ;;  %v2833_v58 = vpack.c.bf16 %v6920_v43, %v6920_v43  ;;  %2507 = vst.msk [vmem:[%s6242_s3 + $0xc] sm:$0xf] %vm2503_vm1, %v2828_v1  ;;  %v6928_v7 = vmax.f32 %v6927_v55, 0.0  ;;  %v6930_v39 = vmax.f32 %v6929_v62, 0.0  ;;  %v6931_v45 = vld [vmem:[#allocation54_spill] sm:$0xff] }
 0x3af   :  { %v6932_v32 = vmax.f32 %v6931_v45, 0.0  ;;  %v6934_v59 = vmax.f32 %v6933_v49, 0.0  ;;  %2508 = vst.msk [vmem:[%s6242_s3 + $0x10] sm:$0xf] %vm2503_vm1, %v2829_v61  ;;  %2509 = vst.msk [vmem:[%s6242_s3 + $0x14] sm:$0xf] %vm2503_vm1, %v2830_v31 }
 0x3b0   :  { %v2837_v19 = vpack.c.bf16 %v6928_v7, %v6928_v7  ;;  %v2838_v37 = vpack.c.bf16 %v6930_v39, %v6930_v39  ;;  %2510 = vst.msk [vmem:[%s6242_s3 + $0x18] sm:$0xf] %vm2503_vm1, %v2831_v57  ;;  %2511 = vst.msk [vmem:[%s6242_s3 + $0x1c] sm:$0xf] %vm2503_vm1, %v2832_v44  ;;  %v6935_v1 = vld [vmem:[#allocation42_spill] sm:$0xff]  ;;  %v6937_v61 = vmax.f32 %v6863_v29, 0.0 }
 0x3b1   :  { %v2839_v43 = vpack.c.bf16 %v6932_v32, %v6932_v32  ;;  %v2840_v54 = vpack.c.bf16 %v6934_v59, %v6934_v59  ;;  %v6936_v21 = vmax.f32 %v6935_v1, 0.0  ;;  %v6938_v31 = vmax.f32 %v6864_v4, 0.0  ;;  %2512 = vst.msk [vmem:[%s6242_s3 + $0x20] sm:$0xf] %vm2503_vm1, %v2833_v58  ;;  %2513 = vst.msk [vmem:[%s6242_s3 + $0x24] sm:$0xf] %vm2503_vm1, %v2834_v3 }
 0x3b2   :  { %v2842_v7 = vpack.c.bf16 %v6937_v61, %v6937_v61  ;;  %v6939_v39 = vmax.f32 %v6865_v11, 0.0  ;;  %2514 = vst.msk [vmem:[%s6242_s3 + $0x28] sm:$0xf] %vm2503_vm1, %v2835_v6  ;;  %2515 = vst.msk [vmem:[%s6242_s3 + $0x2c] sm:$0xf] %vm2503_vm1, %v2836_v13  ;;  %v6940_v11 = vmax.f32 %v6866_v35, 0.0 }
 0x3b3   :  { %v2841_v55 = vpack.c.bf16 %v6936_v21, %v6936_v21  ;;  %v2843_v62 = vpack.c.bf16 %v6938_v31, %v6938_v31  ;;  %v6941_v4 = vmax.f32 %v6867_v27, 0.0  ;;  %v6942_v58 = vmax.f32 %v6868_v9, 0.0  ;;  %2516 = vst.msk [vmem:[%s6242_s3 + $0x30] sm:$0xf] %vm2503_vm1, %v2837_v19  ;;  %2517 = vst.msk [vmem:[%s6242_s3 + $0x34] sm:$0xf] %vm2503_vm1, %v2838_v37 }
 0x3b4   :  { %v2844_v57 = vpack.c.bf16 %v6939_v39, %v6939_v39  ;;  %v2845_v29 = vpack.c.bf16 %v6940_v11, %v6940_v11  ;;  %v6943_v45 = vmax.f32 %v6869_v23, 0.0  ;;  %2518 = vst.msk [vmem:[%s6242_s3 + $0x38] sm:$0xf] %vm2503_vm1, %v2839_v43  ;;  %2519 = vst.msk [vmem:[%s6242_s3 + $0x3c] sm:$0xf] %vm2503_vm1, %v2840_v54  ;;  %v6944_v9 = vmax.f32 %v6870_v47, 0.0 }
 0x3b5   :  { %v2846_v44 = vpack.c.bf16 %v6941_v4, %v6941_v4  ;;  %v2847_v3 = vpack.c.bf16 %v6942_v58, %v6942_v58  ;;  %v6945_v27 = vmax.f32 %v6871_v15, 0.0  ;;  %v6946_v13 = vmax.f32 %v6872_v25, 0.0  ;;  %2520 = vst.msk [vmem:[%s6242_s3 + $0x40] sm:$0xf] %vm2503_vm1, %v2841_v55  ;;  %2521 = vst.msk [vmem:[%s6242_s3 + $0x44] sm:$0xf] %vm2503_vm1, %v2842_v7 }
 0x3b6   :  { %v2848_v6 = vpack.c.bf16 %v6943_v45, %v6943_v45  ;;  %v2849_v23 = vpack.c.bf16 %v6944_v9, %v6944_v9  ;;  %v6947_v37 = vmax.f32 %v6873_v26, 0.0  ;;  %2522 = vst.msk [vmem:[%s6242_s3 + $0x48] sm:$0xf] %vm2503_vm1, %v2843_v62  ;;  %2523 = vst.msk [vmem:[%s6242_s3 + $0x4c] sm:$0xf] %vm2503_vm1, %v2844_v57  ;;  %v6948_v47 = vmax.f32 %v5153_v50, 0.0 }
 0x3b7   :  { %v2850_v35 = vpack.c.bf16 %v6945_v27, %v6945_v27  ;;  %v2851_v19 = vpack.c.bf16 %v6946_v13, %v6946_v13  ;;  %v6949_v15 = vmax.f32 %v5157_v60, 0.0  ;;  %v6950_v43 = vmax.f32 %v5161_v20, 0.0  ;;  %2524 = vst.msk [vmem:[%s6242_s3 + $0x50] sm:$0xf] %vm2503_vm1, %v2845_v29  ;;  %2525 = vst.msk [vmem:[%s6242_s3 + $0x54] sm:$0xf] %vm2503_vm1, %v2846_v44 }
 0x3b8   :  { %v2852_v32 = vpack.c.bf16 %v6947_v37, %v6947_v37  ;;  %v2853_v25 = vpack.c.bf16 %v6948_v47, %v6948_v47  ;;  %v6951_v59 = vmax.f32 %v5165_v8, 0.0  ;;  %2526 = vst.msk [vmem:[%s6242_s3 + $0x58] sm:$0xf] %vm2503_vm1, %v2847_v3  ;;  %2527 = vst.msk [vmem:[%s6242_s3 + $0x5c] sm:$0xf] %vm2503_vm1, %v2848_v6  ;;  %v6952_v50 = vmax.f32 %v5169_v18, 0.0 }
 0x3b9   :  { %v2854_v26 = vpack.c.bf16 %v6949_v15, %v6949_v15  ;;  %v2855_v49 = vpack.c.bf16 %v6950_v43, %v6950_v43  ;;  %v6953_v20 = vmax.f32 %v5173_v63, 0.0  ;;  %v6954_v1 = vmax.f32 %v5177_v17, 0.0  ;;  %2528 = vst.msk [vmem:[%s6242_s3 + $0x60] sm:$0xf] %vm2503_vm1, %v2849_v23  ;;  %2529 = vst.msk [vmem:[%s6242_s3 + $0x64] sm:$0xf] %vm2503_vm1, %v2850_v35 }
 0x3ba   :  { %v2856_v54 = vpack.c.bf16 %v6951_v59, %v6951_v59  ;;  %v2857_v60 = vpack.c.bf16 %v6952_v50, %v6952_v50  ;;  %v6955_v55 = vmax.f32 %v5181_v5, 0.0  ;;  %2530 = vst.msk [vmem:[%s6242_s3 + $0x68] sm:$0xf] %vm2503_vm1, %v2851_v19  ;;  %2531 = vst.msk [vmem:[%s6242_s3 + $0x6c] sm:$0xf] %vm2503_vm1, %v2852_v32  ;;  %v6956_v18 = vmax.f32 %v5185_v51, 0.0 }
 0x3bb   :  { %v2858_v8 = vpack.c.bf16 %v6953_v20, %v6953_v20  ;;  %v2859_v21 = vpack.c.bf16 %v6954_v1, %v6954_v1  ;;  %v6957_v17 = vmax.f32 %v5189_v28, 0.0  ;;  %v6958_v7 = vmax.f32 %v5193_v56, 0.0  ;;  %2532 = vst.msk [vmem:[%s6242_s3 + $0x70] sm:$0xf] %vm2503_vm1, %v2853_v25  ;;  %2533 = vst.msk [vmem:[%s6242_s3 + $0x74] sm:$0xf] %vm2503_vm1, %v2854_v26 }
 0x3bc   :  { %v2860_v61 = vpack.c.bf16 %v6955_v55, %v6955_v55  ;;  %v2861_v63 = vpack.c.bf16 %v6956_v18, %v6956_v18  ;;  %v6959_v62 = vmax.f32 %v5197_v46, 0.0  ;;  %2534 = vst.msk [vmem:[%s6242_s3 + $0x78] sm:$0xf] %vm2503_vm1, %v2855_v49  ;;  %2535 = vst.msk [vmem:[%s6242_s3 + $0x7c] sm:$0xf] %vm2503_vm1, %v2856_v54  ;;  %v6960_v51 = vmax.f32 %v5201_v14, 0.0 }
 0x3bd   :  { %v2862_v5 = vpack.c.bf16 %v6957_v17, %v6957_v17  ;;  %v2863_v31 = vpack.c.bf16 %v6958_v7, %v6958_v7  ;;  %v6961_v56 = vmax.f32 %v5205_v2, 0.0  ;;  %v6962_v57 = vmax.f32 %v5209_v38, 0.0  ;;  %2536 = vst.msk [vmem:[%s6242_s3 + $0x80] sm:$0xf] %vm2503_vm1, %v2857_v60  ;;  %2537 = vst.msk [vmem:[%s6242_s3 + $0x84] sm:$0xf] %vm2503_vm1, %v2858_v8 }
 0x3be   :  { %v2864_v39 = vpack.c.bf16 %v6959_v62, %v6959_v62  ;;  %v2865_v28 = vpack.c.bf16 %v6960_v51, %v6960_v51  ;;  %v6963_v29 = vmax.f32 %v5213_v22, 0.0  ;;  %2538 = vst.msk [vmem:[%s6242_s3 + $0x88] sm:$0xf] %vm2503_vm1, %v2859_v21  ;;  %2539 = vst.msk [vmem:[%s6242_s3 + $0x8c] sm:$0xf] %vm2503_vm1, %v2860_v61  ;;  %v6964_v14 = vmax.f32 %v5217_v12, 0.0 }
 0x3bf   :  { %v2866_v46 = vpack.c.bf16 %v6961_v56, %v6961_v56  ;;  %v2867_v11 = vpack.c.bf16 %v6962_v57, %v6962_v57  ;;  %v6965_v38 = vmax.f32 %v5221_v48, 0.0  ;;  %v6966_v44 = vmax.f32 %v5225_v10, 0.0  ;;  %2540 = vst.msk [vmem:[%s6242_s3 + $0x90] sm:$0xf] %vm2503_vm1, %v2861_v63  ;;  %2541 = vst.msk [vmem:[%s6242_s3 + $0x94] sm:$0xf] %vm2503_vm1, %v2862_v5 }
 0x3c0   :  { %v2868_v4 = vpack.c.bf16 %v6963_v29, %v6963_v29  ;;  %v2869_v2 = vpack.c.bf16 %v6964_v14, %v6964_v14  ;;  %v6967_v3 = vmax.f32 %v5229_v30, 0.0  ;;  %2542 = vst.msk [vmem:[%s6242_s3 + $0x98] sm:$0xf] %vm2503_vm1, %v2863_v31  ;;  %2543 = vst.msk [vmem:[%s6242_s3 + $0x9c] sm:$0xf] %vm2503_vm1, %v2864_v39  ;;  %v6968_v12 = vmax.f32 %v5233_v0, 0.0 }
 0x3c1   :  { %v2870_v22 = vpack.c.bf16 %v6965_v38, %v6965_v38  ;;  %v2871_v58 = vpack.c.bf16 %v6966_v44, %v6966_v44  ;;  %v6969_v10 = vmax.f32 %v5237_v34, 0.0  ;;  %v6970_v6 = vmax.f32 %v5241_v53, 0.0  ;;  %2544 = vst.msk [vmem:[%s6242_s3 + $0xa0] sm:$0xf] %vm2503_vm1, %v2865_v28  ;;  %2545 = vst.msk [vmem:[%s6242_s3 + $0xa4] sm:$0xf] %vm2503_vm1, %v2866_v46 }
 0x3c2   :  { %v2872_v45 = vpack.c.bf16 %v6967_v3, %v6967_v3  ;;  %v2873_v48 = vpack.c.bf16 %v6968_v12, %v6968_v12  ;;  %v6971_v23 = vmax.f32 %v5245_v42, 0.0  ;;  %2546 = vst.msk [vmem:[%s6242_s3 + $0xa8] sm:$0xf] %vm2503_vm1, %v2867_v11  ;;  %2547 = vst.msk [vmem:[%s6242_s3 + $0xac] sm:$0xf] %vm2503_vm1, %v2868_v4  ;;  %v6972_v0 = vmax.f32 %v5249_v36, 0.0 }
 0x3c3   :  { %v2874_v30 = vpack.c.bf16 %v6969_v10, %v6969_v10  ;;  %v2875_v9 = vpack.c.bf16 %v6970_v6, %v6970_v6  ;;  %v6973_v53 = vmax.f32 %v5253_v40, 0.0  ;;  %v6974_v35 = vmax.f32 %v5257_v41, 0.0  ;;  %2548 = vst.msk [vmem:[%s6242_s3 + $0xb0] sm:$0xf] %vm2503_vm1, %v2869_v2  ;;  %2549 = vst.msk [vmem:[%s6242_s3 + $0xb4] sm:$0xf] %vm2503_vm1, %v2870_v22 }
 0x3c4   :  { %v2876_v27 = vpack.c.bf16 %v6971_v23, %v6971_v23  ;;  %v2877_v34 = vpack.c.bf16 %v6972_v0, %v6972_v0  ;;  %v6975_v19 = vmax.f32 %v5261_v52, 0.0  ;;  %2550 = vst.msk [vmem:[%s6242_s3 + $0xb8] sm:$0xf] %vm2503_vm1, %v2871_v58  ;;  %2551 = vst.msk [vmem:[%s6242_s3 + $0xbc] sm:$0xf] %vm2503_vm1, %v2872_v45  ;;  %v6976_v36 = vmax.f32 %v5265_v16, 0.0 }
 0x3c5   :  { %v2878_v42 = vpack.c.bf16 %v6973_v53, %v6973_v53  ;;  %v2879_v13 = vpack.c.bf16 %v6974_v35, %v6974_v35  ;;  %v6977_v41 = vmax.f32 %v5269_v33, 0.0  ;;  %v6978_v32 = vmax.f32 %v5273_v24, 0.0  ;;  %v6979_v25 = vld [vmem:[#allocation11_spill] sm:$0xff]  ;;  %2552 = vst.msk [vmem:[%s6242_s3 + $0xc0] sm:$0xf] %vm2503_vm1, %v2873_v48  ;;  %v6981_v16 = vld [vmem:[#allocation12_spill] sm:$0xff] }
 0x3c6   :  { %v2880_v37 = vpack.c.bf16 %v6975_v19, %v6975_v19  ;;  %v2881_v40 = vpack.c.bf16 %v6976_v36, %v6976_v36  ;;  %v6980_v15 = vmax.f32 %v6979_v25, 0.0  ;;  %2553 = vst.msk [vmem:[%s6242_s3 + $0xc4] sm:$0xf] %vm2503_vm1, %v2874_v30  ;;  %2554 = vst.msk [vmem:[%s6242_s3 + $0xc8] sm:$0xf] %vm2503_vm1, %v2875_v9  ;;  %v6982_v33 = vmax.f32 %v6981_v16, 0.0 }
 0x3c7   :  { %v2882_v52 = vpack.c.bf16 %v6977_v41, %v6977_v41  ;;  %v2883_v47 = vpack.c.bf16 %v6978_v32, %v6978_v32  ;;  %2555 = vst.msk [vmem:[%s6242_s3 + $0xcc] sm:$0xf] %vm2503_vm1, %v2876_v27  ;;  %v6983_v43 = vld [vmem:[#allocation13_spill] sm:$0xff]  ;;  %v6985_v54 = vld [vmem:[#allocation14_spill] sm:$0xff]  ;;  %v6987_v20 = vld [vmem:[#allocation15_spill] sm:$0xff] }
 0x3c8   :  { %v2884_v26 = vpack.c.bf16 %v6980_v15, %v6980_v15  ;;  %v2885_v24 = vpack.c.bf16 %v6982_v33, %v6982_v33  ;;  %v6984_v49 = vmax.f32 %v6983_v43, 0.0  ;;  %v6986_v50 = vmax.f32 %v6985_v54, 0.0  ;;  %2556 = vst.msk [vmem:[%s6242_s3 + $0xd0] sm:$0xf] %vm2503_vm1, %v2877_v34  ;;  %2557 = vst.msk [vmem:[%s6242_s3 + $0xd4] sm:$0xf] %vm2503_vm1, %v2878_v42 }
 0x3c9   :  { %v6988_v8 = vmax.f32 %v6987_v20, 0.0  ;;  %2558 = vst.msk [vmem:[%s6242_s3 + $0xd8] sm:$0xf] %vm2503_vm1, %v2879_v13  ;;  %2559 = vst.msk [vmem:[%s6242_s3 + $0xdc] sm:$0xf] %vm2503_vm1, %v2880_v37  ;;  %v6989_v21 = vld [vmem:[#allocation16_spill] sm:$0xff] }
 0x3ca   :  { %v2886_v59 = vpack.c.bf16 %v6984_v49, %v6984_v49  ;;  %v2887_v60 = vpack.c.bf16 %v6986_v50, %v6986_v50  ;;  %v6990_v55 = vmax.f32 %v6989_v21, 0.0  ;;  %v6991_v18 = vld [vmem:[#allocation17_spill] sm:$0xff]  ;;  %v6993_v5 = vld [vmem:[#allocation18_spill] sm:$0xff]  ;;  %v6995_v62 = vld [vmem:[#allocation19_spill] sm:$0xff]  ;;  %2560 = vst.msk [vmem:[%s6242_s3 + $0xe0] sm:$0xf] %vm2503_vm1, %v2881_v40 }
 0x3cb   :  { %v2888_v1 = vpack.c.bf16 %v6988_v8, %v6988_v8  ;;  %v6992_v63 = vmax.f32 %v6991_v18, 0.0  ;;  %v6994_v7 = vmax.f32 %v6993_v5, 0.0  ;;  %v6996_v39 = vmax.f32 %v6995_v62, 0.0  ;;  %2561 = vst.msk [vmem:[%s6242_s3 + $0xe4] sm:$0xf] %vm2503_vm1, %v2882_v52  ;;  %v6997_v28 = vld [vmem:[#allocation20_spill] sm:$0xff] }
 0x3cc   :  { %v2889_v61 = vpack.c.bf16 %v6990_v55, %v6990_v55  ;;  %2562 = vst.msk [vmem:[%s6242_s3 + $0xe8] sm:$0xf] %vm2503_vm1, %v2883_v47  ;;  %2563 = vst.msk [vmem:[%s6242_s3 + $0xec] sm:$0xf] %vm2503_vm1, %v2884_v26  ;;  %v6998_v56 = vmax.f32 %v6997_v28, 0.0  ;;  %v6999_v57 = vld [vmem:[#allocation21_spill] sm:$0xff] }
 0x3cd   :  { %v2890_v17 = vpack.c.bf16 %v6992_v63, %v6992_v63  ;;  %v2891_v31 = vpack.c.bf16 %v6994_v7, %v6994_v7  ;;  %v2892_v51 = vpack.c.bf16 %v6996_v39, %v6996_v39  ;;  %v7000_v11 = vmax.f32 %v6999_v57, 0.0  ;;  %v7001_v4 = vld [vmem:[#allocation22_spill] sm:$0xff]  ;;  %v7003_v38 = vld [vmem:[#allocation23_spill] sm:$0xff]  ;;  %2564 = vst.msk [vmem:[%s6242_s3 + $0xf0] sm:$0xf] %vm2503_vm1, %v2885_v24  ;;  %v7005_v58 = vld [vmem:[#allocation24_spill] sm:$0xff] }
 0x3ce   :  { %v2893_v46 = vpack.c.bf16 %v6998_v56, %v6998_v56  ;;  %v7002_v14 = vmax.f32 %v7001_v4, 0.0  ;;  %v7004_v22 = vmax.f32 %v7003_v38, 0.0  ;;  %2565 = vst.msk [vmem:[%s6242_s3 + $0xf4] sm:$0xf] %vm2503_vm1, %v2886_v59  ;;  %2566 = vst.msk [vmem:[%s6242_s3 + $0xf8] sm:$0xf] %vm2503_vm1, %v2887_v60 }
 0x3cf   :  { %v2894_v29 = vpack.c.bf16 %v7000_v11, %v7000_v11  ;;  %2567 = vst.msk [vmem:[%s6242_s3 + $0xfc] sm:$0xf] %vm2503_vm1, %v2888_v1  ;;  %v7006_v3 = vmax.f32 %v7005_v58, 0.0  ;;  %v7007_v12 = vld [vmem:[#allocation61_spill] sm:$0xff]  ;;  %v7009_v30 = vld [vmem:[#allocation62_spill] sm:$0xff]  ;;  %v7011_v23 = vld [vmem:[#allocation63_spill] sm:$0xff] }
 0x3d0   :  { %v2895_v2 = vpack.c.bf16 %v7002_v14, %v7002_v14  ;;  %v2896_v44 = vpack.c.bf16 %v7004_v22, %v7004_v22  ;;  %v7008_v48 = vmax.f32 %v7007_v12, 0.0  ;;  %v7010_v6 = vmax.f32 %v7009_v30, 0.0  ;;  %2568 = vst.msk [vmem:[%s6242_s3 + $0x100] sm:$0xf] %vm2503_vm1, %v2889_v61  ;;  %2569 = vst.msk [vmem:[%s6242_s3 + $0x104] sm:$0xf] %vm2503_vm1, %v2890_v17 }
 0x3d1   :  { %v2897_v45 = vpack.c.bf16 %v7006_v3, %v7006_v3  ;;  %v7012_v27 = vmax.f32 %v7011_v23, 0.0  ;;  %2570 = vst.msk [vmem:[%s6242_s3 + $0x108] sm:$0xf] %vm2503_vm1, %v2891_v31  ;;  %2571 = vst.msk [vmem:[%s6242_s3 + $0x10c] sm:$0xf] %vm2503_vm1, %v2892_v51  ;;  %v7013_v34 = vld [vmem:[#allocation64_spill] sm:$0xff] }
 0x3d2   :  { %v2898_v10 = vpack.c.bf16 %v7008_v48, %v7008_v48  ;;  %v2899_v9 = vpack.c.bf16 %v7010_v6, %v7010_v6  ;;  %v7014_v53 = vmax.f32 %v7013_v34, 0.0  ;;  %v7015_v35 = vld [vmem:[#allocation25_spill] sm:$0xff]  ;;  %v7017_v37 = vld [vmem:[#allocation26_spill] sm:$0xff]  ;;  %v7019_v41 = vld [vmem:[#allocation27_spill] sm:$0xff]  ;;  %2572 = vst.msk [vmem:[%s6242_s3 + $0x110] sm:$0xf] %vm2503_vm1, %v2893_v46 }
 0x3d3   :  { %v2900_v0 = vpack.c.bf16 %v7012_v27, %v7012_v27  ;;  %v7016_v13 = vmax.f32 %v7015_v35, 0.0  ;;  %v7018_v36 = vmax.f32 %v7017_v37, 0.0  ;;  %v7020_v52 = vmax.f32 %v7019_v41, 0.0  ;;  %2573 = vst.msk [vmem:[%s6242_s3 + $0x114] sm:$0xf] %vm2503_vm1, %v2894_v29  ;;  %v7021_v47 = vld [vmem:[#allocation28_spill] sm:$0xff] }
 0x3d4   :  { %v2901_v42 = vpack.c.bf16 %v7014_v53, %v7014_v53  ;;  %2574 = vst.msk [vmem:[%s6242_s3 + $0x118] sm:$0xf] %vm2503_vm1, %v2895_v2  ;;  %2575 = vst.msk [vmem:[%s6242_s3 + $0x11c] sm:$0xf] %vm2503_vm1, %v2896_v44  ;;  %v7022_v25 = vmax.f32 %v7021_v47, 0.0  ;;  %v7023_v26 = vld [vmem:[#allocation29_spill] sm:$0xff] }
 0x3d5   :  { %v2902_v19 = vpack.c.bf16 %v7016_v13, %v7016_v13  ;;  %v2903_v40 = vpack.c.bf16 %v7018_v36, %v7018_v36  ;;  %v2904_v32 = vpack.c.bf16 %v7020_v52, %v7020_v52  ;;  %v7024_v16 = vmax.f32 %v7023_v26, 0.0  ;;  %v7025_v24 = vld [vmem:[#allocation30_spill] sm:$0xff]  ;;  %v7027_v59 = vld [vmem:[#allocation31_spill] sm:$0xff]  ;;  %2576 = vst.msk [vmem:[%s6242_s3 + $0x120] sm:$0xf] %vm2503_vm1, %v2897_v45  ;;  %v7029_v60 = vld [vmem:[#allocation32_spill] sm:$0xff] }
 0x3d6   :  { %v2905_v15 = vpack.c.bf16 %v7022_v25, %v7022_v25  ;;  %v7026_v43 = vmax.f32 %v7025_v24, 0.0  ;;  %v7028_v54 = vmax.f32 %v7027_v59, 0.0  ;;  %2577 = vst.msk [vmem:[%s6242_s3 + $0x124] sm:$0xf] %vm2503_vm1, %v2898_v10  ;;  %2578 = vst.msk [vmem:[%s6242_s3 + $0x128] sm:$0xf] %vm2503_vm1, %v2899_v9 }
 0x3d7   :  { %v2906_v33 = vpack.c.bf16 %v7024_v16, %v7024_v16  ;;  %2579 = vst.msk [vmem:[%s6242_s3 + $0x12c] sm:$0xf] %vm2503_vm1, %v2900_v0  ;;  %v7030_v20 = vmax.f32 %v7029_v60, 0.0  ;;  %v7031_v1 = vld [vmem:[#allocation33_spill] sm:$0xff]  ;;  %v7033_v61 = vld [vmem:[#allocation34_spill] sm:$0xff]  ;;  %v7035_v17 = vld [vmem:[#allocation35_spill] sm:$0xff] }
 0x3d8   :  { %v2907_v49 = vpack.c.bf16 %v7026_v43, %v7026_v43  ;;  %v2908_v50 = vpack.c.bf16 %v7028_v54, %v7028_v54  ;;  %v7032_v21 = vmax.f32 %v7031_v1, 0.0  ;;  %v7034_v18 = vmax.f32 %v7033_v61, 0.0  ;;  %2580 = vst.msk [vmem:[%s6242_s3 + $0x130] sm:$0xf] %vm2503_vm1, %v2901_v42  ;;  %2581 = vst.msk [vmem:[%s6242_s3 + $0x134] sm:$0xf] %vm2503_vm1, %v2902_v19 }
 0x3d9   :  { %v2909_v8 = vpack.c.bf16 %v7030_v20, %v7030_v20  ;;  %v7036_v5 = vmax.f32 %v7035_v17, 0.0  ;;  %2582 = vst.msk [vmem:[%s6242_s3 + $0x138] sm:$0xf] %vm2503_vm1, %v2903_v40  ;;  %2583 = vst.msk [vmem:[%s6242_s3 + $0x13c] sm:$0xf] %vm2503_vm1, %v2904_v32  ;;  %v7037_v31 = vld [vmem:[#allocation36_spill] sm:$0xff] }
 0x3da   :  { %v2910_v55 = vpack.c.bf16 %v7032_v21, %v7032_v21  ;;  %v2911_v63 = vpack.c.bf16 %v7034_v18, %v7034_v18  ;;  %v7038_v62 = vmax.f32 %v7037_v31, 0.0  ;;  %v7039_v51 = vld [vmem:[#allocation37_spill] sm:$0xff]  ;;  %v7041_v46 = vld [vmem:[#allocation38_spill] sm:$0xff]  ;;  %v7043_v29 = vld [vmem:[#allocation39_spill] sm:$0xff]  ;;  %2584 = vst.msk [vmem:[%s6242_s3 + $0x140] sm:$0xf] %vm2503_vm1, %v2905_v15 }
 0x3db   :  { %v2912_v7 = vpack.c.bf16 %v7036_v5, %v7036_v5  ;;  %v7040_v28 = vmax.f32 %v7039_v51, 0.0  ;;  %v7042_v57 = vmax.f32 %v7041_v46, 0.0  ;;  %v7044_v4 = vmax.f32 %v7043_v29, 0.0  ;;  %2585 = vst.msk [vmem:[%s6242_s3 + $0x144] sm:$0xf] %vm2503_vm1, %v2906_v33  ;;  %v7045_v2 = vld [vmem:[#allocation40_spill] sm:$0xff] }
 0x3dc   :  { %v2913_v39 = vpack.c.bf16 %v7038_v62, %v7038_v62  ;;  %2586 = vst.msk [vmem:[%s6242_s3 + $0x148] sm:$0xf] %vm2503_vm1, %v2907_v49  ;;  %2587 = vst.msk [vmem:[%s6242_s3 + $0x14c] sm:$0xf] %vm2503_vm1, %v2908_v50  ;;  %v7046_v38 = vmax.f32 %v7045_v2, 0.0  ;;  %v7047_v44 = vld [vmem:[#allocation41_spill] sm:$0xff] }
 0x3dd   :  { %v2914_v56 = vpack.c.bf16 %v7040_v28, %v7040_v28  ;;  %v2915_v11 = vpack.c.bf16 %v7042_v57, %v7042_v57  ;;  %v2916_v14 = vpack.c.bf16 %v7044_v4, %v7044_v4  ;;  %v7048_v58 = vmax.f32 %v7047_v44, 0.0  ;;  %v7049_v45 = vld [vmem:[#allocation65_spill] sm:$0xff]  ;;  %v7051_v10 = vld [vmem:[#allocation66_spill] sm:$0xff]  ;;  %2588 = vst.msk [vmem:[%s6242_s3 + $0x150] sm:$0xf] %vm2503_vm1, %v2909_v8  ;;  %v7053_v9 = vld [vmem:[#allocation67_spill] sm:$0xff] }
 0x3de   :  { %v2917_v22 = vpack.c.bf16 %v7046_v38, %v7046_v38  ;;  %v7050_v12 = vmax.f32 %v7049_v45, 0.0  ;;  %v7052_v30 = vmax.f32 %v7051_v10, 0.0  ;;  %2589 = vst.msk [vmem:[%s6242_s3 + $0x154] sm:$0xf] %vm2503_vm1, %v2910_v55  ;;  %2590 = vst.msk [vmem:[%s6242_s3 + $0x158] sm:$0xf] %vm2503_vm1, %v2911_v63 }
 0x3df   :  { %v2918_v3 = vpack.c.bf16 %v7048_v58, %v7048_v58  ;;  %2591 = vst.msk [vmem:[%s6242_s3 + $0x15c] sm:$0xf] %vm2503_vm1, %v2912_v7  ;;  %v7054_v23 = vmax.f32 %v7053_v9, 0.0  ;;  %v7055_v0 = vld [vmem:[#allocation68_spill] sm:$0xff]  ;;  %v7057_v42 = vld [vmem:[#allocation69_spill] sm:$0xff]  ;;  %v7059_v19 = vld [vmem:[#allocation70_spill] sm:$0xff] }
 0x3e0   :  { %v2919_v48 = vpack.c.bf16 %v7050_v12, %v7050_v12  ;;  %v2920_v6 = vpack.c.bf16 %v7052_v30, %v7052_v30  ;;  %v7056_v34 = vmax.f32 %v7055_v0, 0.0  ;;  %v7058_v35 = vmax.f32 %v7057_v42, 0.0  ;;  %2592 = vst.msk [vmem:[%s6242_s3 + $0x160] sm:$0xf] %vm2503_vm1, %v2913_v39  ;;  %2593 = vst.msk [vmem:[%s6242_s3 + $0x164] sm:$0xf] %vm2503_vm1, %v2914_v56 }
 0x3e1   :  { %v2921_v27 = vpack.c.bf16 %v7054_v23, %v7054_v23  ;;  %v7060_v37 = vmax.f32 %v7059_v19, 0.0  ;;  %2594 = vst.msk [vmem:[%s6242_s3 + $0x168] sm:$0xf] %vm2503_vm1, %v2915_v11  ;;  %2595 = vst.msk [vmem:[%s6242_s3 + $0x16c] sm:$0xf] %vm2503_vm1, %v2916_v14 }
 0x3e2   :  { %v2922_v53 = vpack.c.bf16 %v7056_v34, %v7056_v34  ;;  %v2923_v13 = vpack.c.bf16 %v7058_v35, %v7058_v35  ;;  %2596 = vst.msk [vmem:[%s6242_s3 + $0x170] sm:$0xf] %vm2503_vm1, %v2917_v22  ;;  %2597 = vst.msk [vmem:[%s6242_s3 + $0x174] sm:$0xf] %vm2503_vm1, %v2918_v3 }
 0x3e3   :  { %v2924_v36 = vpack.c.bf16 %v7060_v37, %v7060_v37  ;;  %2598 = vst.msk [vmem:[%s6242_s3 + $0x178] sm:$0xf] %vm2503_vm1, %v2919_v48  ;;  %2599 = vst.msk [vmem:[%s6242_s3 + $0x17c] sm:$0xf] %vm2503_vm1, %v2920_v6 }
 0x3e4   :  { %2600 = vst.msk [vmem:[%s6242_s3 + $0x180] sm:$0xf] %vm2503_vm1, %v2921_v27  ;;  %2601 = vst.msk [vmem:[%s6242_s3 + $0x184] sm:$0xf] %vm2503_vm1, %v2922_v53 }
 0x3e5   :  { %2602 = vst.msk [vmem:[%s6242_s3 + $0x188] sm:$0xf] %vm2503_vm1, %v2923_v13  ;;  %2603 = vst.msk [vmem:[%s6242_s3 + $0x18c] sm:$0xf] %vm2503_vm1, %v2924_v36 }

// kernel: encoder_forward.5
= control target key start
LH: loop header
LB: loop body
LE: loop exit
PB: predicated region body
PF: predicated region fallthrough
CT: control target
= control target key end

     0   :  { %vm847_vm0 = vcmask 261120   ;;  %vm1200_vm1 = vcmask 257024   ;;  %s2310_s1 = inlined_call_operand.vmem [shape: bf16[512,32], index: 1, kind: input, shape index: {}]   ;;  %s2311_s0 = inlined_call_operand.vmem [shape: bf16[200,512], index: 0, kind: input, shape index: {}]   ;;  %s2312_s2 = inlined_call_operand.vmem [shape: f32[2,32], index: 2, kind: input, shape index: {}]   ;;  %s2313_s3 = inlined_call_operand.vmem [shape: bf16[200,32], index: 3, kind: output, shape index: {}]  }
   0x1   :  { %v1553_v0 = vld [vmem:[%s2310_s1 + $0x40] sm:$0xff]   ;;  %v1557_v4 = vld [vmem:[%s2310_s1 + $0x48] sm:$0xff]   ;;  %v1561_v8 = vld [vmem:[%s2310_s1 + $0x50] sm:$0xff]  }
   0x2   :  { %v1554_v1 = vld [vmem:[%s2310_s1 + $0xc0] sm:$0xff]   ;;  %1365 = vmatprep.subr.bf16.mxu0 %v1553_v0  ;;  %v1558_v5 = vld [vmem:[%s2310_s1 + $0xc8] sm:$0xff]   ;;  %v1562_v9 = vld [vmem:[%s2310_s1 + $0xd0] sm:$0xff]  }
   0x3   :  { %v1555_v2 = vld [vmem:[%s2310_s1] sm:$0xff]   ;;  %1459 = vmatprep.subr.bf16.mxu1 %v1554_v1  ;;  %v1559_v6 = vld [vmem:[%s2310_s1 + $0x8] sm:$0xff]   ;;  %v1563_v10 = vld [vmem:[%s2310_s1 + $0x10] sm:$0xff]  }
   0x4   :  { %v1556_v3 = vld [vmem:[%s2310_s1 + $0x80] sm:$0xff]   ;;  %1366 = vmatpush3.bf16.msra.mxu0 %v1555_v2  ;;  %v1560_v7 = vld [vmem:[%s2310_s1 + $0x88] sm:$0xff]   ;;  %v1564_v11 = vld [vmem:[%s2310_s1 + $0x90] sm:$0xff]  }
   0x5   :  { %1460 = vmatpush3.bf16.msra.mxu1 %v1556_v3  ;;  %1367 = vmatprep.subr.bf16.mxu0 %v1557_v4  ;;  %v1565_v12 = vld [vmem:[%s2310_s1 + $0x58] sm:$0xff]   ;;  %v1569_v16 = vld [vmem:[%s2310_s1 + $0x60] sm:$0xff]   ;;  %v1573_v20 = vld [vmem:[%s2310_s1 + $0x68] sm:$0xff]  }
   0x6   :  { %1461 = vmatprep.subr.bf16.mxu1 %v1558_v5  ;;  %v1566_v13 = vld [vmem:[%s2310_s1 + $0xd8] sm:$0xff]   ;;  %v1570_v17 = vld [vmem:[%s2310_s1 + $0xe0] sm:$0xff]   ;;  %v1574_v21 = vld [vmem:[%s2310_s1 + $0xe8] sm:$0xff]  }
   0x7   :  { %v1567_v14 = vld [vmem:[%s2310_s1 + $0x18] sm:$0xff]   ;;  %v1571_v18 = vld [vmem:[%s2310_s1 + $0x20] sm:$0xff]   ;;  %v1575_v22 = vld [vmem:[%s2310_s1 + $0x28] sm:$0xff]  }
   0x8   :  { %1368 = vmatpush3.bf16.msra.mxu0 %v1559_v6  ;;  %v1568_v15 = vld [vmem:[%s2310_s1 + $0x98] sm:$0xff]   ;;  %v1572_v19 = vld [vmem:[%s2310_s1 + $0xa0] sm:$0xff]   ;;  %v1576_v23 = vld [vmem:[%s2310_s1 + $0xa8] sm:$0xff]  }
   0x9   :  { %1462 = vmatpush3.bf16.msra.mxu1 %v1560_v7  ;;  %1369 = vmatprep.subr.bf16.mxu0 %v1561_v8  ;;  %v1577_v24 = vld [vmem:[%s2310_s1 + $0x70] sm:$0xff]   ;;  %v1581_v28 = vld [vmem:[%s2310_s1 + $0x78] sm:$0xff]  }
   0xa   :  { %1463 = vmatprep.subr.bf16.mxu1 %v1562_v9  ;;  %v1578_v25 = vld [vmem:[%s2310_s1 + $0xf0] sm:$0xff]   ;;  %v1582_v29 = vld [vmem:[%s2310_s1 + $0xf8] sm:$0xff]  }
   0xb   :  { %v1579_v26 = vld [vmem:[%s2310_s1 + $0x30] sm:$0xff]   ;;  %v1583_v30 = vld [vmem:[%s2310_s1 + $0x38] sm:$0xff]  }
   0xc   :  { %1370 = vmatpush3.bf16.msra.mxu0 %v1563_v10  ;;  %v1580_v27 = vld [vmem:[%s2310_s1 + $0xb0] sm:$0xff]   ;;  %v1584_v31 = vld [vmem:[%s2310_s1 + $0xb8] sm:$0xff]  }
   0xd   :  { %1464 = vmatpush3.bf16.msra.mxu1 %v1564_v11  ;;  %1371 = vmatprep.subr.bf16.mxu0 %v1565_v12  ;;  %v1585_v32 = vld [vmem:[%s2311_s0] ss:$16 sps:$4 sm:$0xff]   ;;  %v1587_v33 = vld [vmem:[%s2311_s0 + $0x4] ss:$16 sps:$4 sm:$0xff]   ;;  %v1588_v34 = vld [vmem:[%s2311_s0 + $0x8] ss:$16 sps:$4 sm:$0xff]  }
   0xe   :  { %1465 = vmatprep.subr.bf16.mxu1 %v1566_v13  ;;  %v1590_v35 = vld [vmem:[%s2311_s0 + $0xc] ss:$16 sps:$4 sm:$0xff]   ;;  %607 = vmatprep.mubr.bf16.mxu0 %v1587_v33  ;;  %v1591_v36 = vld [vmem:[%s2311_s0 + $0x24] ss:$16 sps:$4 sm:$0xff]   ;;  %v1595_v38 = vld [vmem:[%s2311_s0 + $0x20] ss:$16 sps:$4 sm:$0xff]  }
   0xf   :  { %743 = vmatprep.mubr.bf16.mxu1 %v1590_v35  ;;  %v1593_v37 = vld [vmem:[%s2311_s0 + $0x2c] ss:$16 sps:$4 sm:$0xff]   ;;  %v1596_v39 = vld [vmem:[%s2311_s0 + $0x28] ss:$16 sps:$4 sm:$0xff]   ;;  %v1597_v40 = vld [vmem:[%s2311_s0 + $0x44] ss:$16 sps:$4 sm:$0xff]  }
  0x10   :  { %1372 = vmatpush3.bf16.msra.mxu0 %v1567_v14  ;;  %v1599_v41 = vld [vmem:[%s2311_s0 + $0x4c] ss:$16 sps:$4 sm:$0xff]   ;;  %v1601_v42 = vld [vmem:[%s2311_s0 + $0x40] ss:$16 sps:$4 sm:$0xff]   ;;  %v1602_v43 = vld [vmem:[%s2311_s0 + $0x48] ss:$16 sps:$4 sm:$0xff]  }
  0x11   :  { %1466 = vmatpush3.bf16.msra.mxu1 %v1568_v15  ;;  %1373 = vmatprep.subr.bf16.mxu0 %v1569_v16  ;;  %v1603_v44 = vld [vmem:[%s2311_s0 + $0x64] ss:$16 sps:$4 sm:$0xff]   ;;  %v1605_v45 = vld [vmem:[%s2311_s0 + $0x6c] ss:$16 sps:$4 sm:$0xff]   ;;  %v1607_v46 = vld [vmem:[%s2311_s0 + $0x60] ss:$16 sps:$4 sm:$0xff]  }
  0x12   :  { %1467 = vmatprep.subr.bf16.mxu1 %v1570_v17  ;;  %v1608_v47 = vld [vmem:[%s2311_s0 + $0x68] ss:$16 sps:$4 sm:$0xff]   ;;  %v1609_v48 = vld [vmem:[%s2311_s0 + $0x84] ss:$16 sps:$4 sm:$0xff]   ;;  %v1611_v49 = vld [vmem:[%s2311_s0 + $0x8c] ss:$16 sps:$4 sm:$0xff]  }
  0x13   :  { %v1613_v50 = vld [vmem:[%s2311_s0 + $0x80] ss:$16 sps:$4 sm:$0xff]   ;;  %v1614_v51 = vld [vmem:[%s2311_s0 + $0x88] ss:$16 sps:$4 sm:$0xff]   ;;  %v1615_v52 = vld [vmem:[%s2311_s0 + $0xa4] ss:$16 sps:$4 sm:$0xff]  }
  0x14   :  { %1374 = vmatpush3.bf16.msra.mxu0 %v1571_v18  ;;  %v1617_v53 = vld [vmem:[%s2311_s0 + $0xac] ss:$16 sps:$4 sm:$0xff]   ;;  %v1619_v54 = vld [vmem:[%s2311_s0 + $0xa0] ss:$16 sps:$4 sm:$0xff]   ;;  %v1620_v55 = vld [vmem:[%s2311_s0 + $0xa8] ss:$16 sps:$4 sm:$0xff]  }
  0x15   :  { %1468 = vmatpush3.bf16.msra.mxu1 %v1572_v19  ;;  %1375 = vmatprep.subr.bf16.mxu0 %v1573_v20  ;;  %v1621_v56 = vld [vmem:[%s2311_s0 + $0xc4] ss:$16 sps:$4 sm:$0xff]   ;;  %v1623_v57 = vld [vmem:[%s2311_s0 + $0xcc] ss:$16 sps:$4 sm:$0xff]   ;;  %v1625_v58 = vld [vmem:[%s2311_s0 + $0xc0] ss:$16 sps:$4 sm:$0xff]  }
  0x16   :  { %1469 = vmatprep.subr.bf16.mxu1 %v1574_v21  ;;  %v1626_v59 = vld [vmem:[%s2311_s0 + $0xc8] ss:$16 sps:$4 sm:$0xff]   ;;  %v1627_v60 = vld [vmem:[%s2311_s0 + $0xe4] ss:$16 sps:$4 sm:$0xff]   ;;  %v1629_v61 = vld [vmem:[%s2311_s0 + $0xec] ss:$16 sps:$4 sm:$0xff]  }
  0x17   :  { %v1631_v62 = vld [vmem:[%s2311_s0 + $0xe0] ss:$16 sps:$4 sm:$0xff]   ;;  %v1632_v63 = vld [vmem:[%s2311_s0 + $0xe8] ss:$16 sps:$4 sm:$0xff]   ;;  %v1633_v0 = vld [vmem:[%s2311_s0 + $0x104] ss:$16 sps:$4 sm:$0xff]  }
  0x18   :  { %1376 = vmatpush3.bf16.msra.mxu0 %v1575_v22  ;;  %v1635_v1 = vld [vmem:[%s2311_s0 + $0x10c] ss:$16 sps:$4 sm:$0xff]   ;;  %v1637_v2 = vld [vmem:[%s2311_s0 + $0x100] ss:$16 sps:$4 sm:$0xff]   ;;  %v1638_v3 = vld [vmem:[%s2311_s0 + $0x108] ss:$16 sps:$4 sm:$0xff]  }
  0x19   :  { %1470 = vmatpush3.bf16.msra.mxu1 %v1576_v23  ;;  %1377 = vmatprep.subr.bf16.mxu0 %v1577_v24  ;;  %v1639_v4 = vld [vmem:[%s2311_s0 + $0x124] ss:$16 sps:$4 sm:$0xff]   ;;  %v1641_v5 = vld [vmem:[%s2311_s0 + $0x12c] ss:$16 sps:$4 sm:$0xff]   ;;  %v1643_v6 = vld [vmem:[%s2311_s0 + $0x120] ss:$16 sps:$4 sm:$0xff]  }
  0x1a   :  { %1471 = vmatprep.subr.bf16.mxu1 %v1578_v25  ;;  %v1644_v7 = vld [vmem:[%s2311_s0 + $0x128] ss:$16 sps:$4 sm:$0xff]   ;;  %v1645_v8 = vld [vmem:[%s2311_s0 + $0x144] ss:$16 sps:$4 sm:$0xff]   ;;  %v1647_v9 = vld [vmem:[%s2311_s0 + $0x14c] ss:$16 sps:$4 sm:$0xff]  }
  0x1b   :  { %v1649_v10 = vld [vmem:[%s2311_s0 + $0x140] ss:$16 sps:$4 sm:$0xff]   ;;  %v1650_v11 = vld [vmem:[%s2311_s0 + $0x148] ss:$16 sps:$4 sm:$0xff]   ;;  %v1651_v12 = vld [vmem:[%s2311_s0 + $0x164] ss:$16 sps:$4 sm:$0xff]  }
  0x1c   :  { %1378 = vmatpush3.bf16.msra.mxu0 %v1579_v26  ;;  %v1653_v13 = vld [vmem:[%s2311_s0 + $0x16c] ss:$16 sps:$4 sm:$0xff]   ;;  %v63_v14 = vld [vmem:[%s2311_s0 + $0x180] sm:$0xff]  ;;  %v1656_v17 = vld [vmem:[%s2311_s0 + $0x168] ss:$16 sps:$4 sm:$0xff]  }
  0x1d   :  { %1472 = vmatpush3.bf16.msra.mxu1 %v1580_v27  ;;  %1379 = vmatprep.subr.bf16.mxu0 %v1581_v28  ;;  %v64_v15 = vld [vmem:[%s2311_s0 + $0x188] sm:$0xff]  ;;  %v1655_v16 = vld [vmem:[%s2311_s0 + $0x160] ss:$16 sps:$4 sm:$0xff]   ;;  %v1279_v18 = vcombine.high %v63_v14, %v63_v14  ;;  %v1278_v20 = vcombine.low %v63_v14, %v63_v14 }
  0x1e   :  { %1473 = vmatprep.subr.bf16.mxu1 %v1582_v29  ;;  %v1281_v19 = vcombine.high %v64_v15, %v64_v15  ;;  %v1280_v21 = vcombine.low %v64_v15, %v64_v15 }
  0x20   :  { %1380 = vmatpush3.bf16.msra.mxu0 %v1583_v30 }
  0x21   :  { %1474 = vmatpush3.bf16.msra.mxu1 %v1584_v31 }
  0x23   :  { %608 = vmatmul.mubr.bf16.vlgmr.msra.gmra.mrb[0].mxu0 %v1585_v32 }
  0x24   :  { %744 = vmatmul.mubr.bf16.vlgmr.msra.gmra.mrb[0].mxu1 %v1588_v34  ;;  %615 = vmatprep.mubr.bf16.mxu0 %v1591_v36 }
  0x25   :  { %751 = vmatprep.mubr.bf16.mxu1 %v1593_v37 }
  0x2b   :  { %616 = vmatmul.mubr.bf16.gmra.mrb[4].mxu0 %v1595_v38 }
  0x2c   :  { %752 = vmatmul.mubr.bf16.gmra.mrb[4].mxu1 %v1596_v39  ;;  %623 = vmatprep.mubr.bf16.mxu0 %v1597_v40 }
  0x2d   :  { %759 = vmatprep.mubr.bf16.mxu1 %v1599_v41 }
  0x33   :  { %624 = vmatmul.mubr.bf16.gmra.mrb[8].mxu0 %v1601_v42 }
  0x34   :  { %760 = vmatmul.mubr.bf16.gmra.mrb[8].mxu1 %v1602_v43  ;;  %631 = vmatprep.mubr.bf16.mxu0 %v1603_v44 }
  0x35   :  { %767 = vmatprep.mubr.bf16.mxu1 %v1605_v45 }
  0x3b   :  { %632 = vmatmul.mubr.bf16.gmra.mrb[12].mxu0 %v1607_v46 }
  0x3c   :  { %768 = vmatmul.mubr.bf16.gmra.mrb[12].mxu1 %v1608_v47  ;;  %639 = vmatprep.mubr.bf16.mxu0 %v1609_v48 }
  0x3d   :  { %775 = vmatprep.mubr.bf16.mxu1 %v1611_v49 }
  0x43   :  { %640 = vmatmul.mubr.bf16.gmra.mrb[16].mxu0 %v1613_v50 }
  0x44   :  { %776 = vmatmul.mubr.bf16.gmra.mrb[16].mxu1 %v1614_v51  ;;  %647 = vmatprep.mubr.bf16.mxu0 %v1615_v52 }
  0x45   :  { %783 = vmatprep.mubr.bf16.mxu1 %v1617_v53 }
  0x4b   :  { %648 = vmatmul.mubr.bf16.gmra.mrb[20].mxu0 %v1619_v54 }
  0x4c   :  { %784 = vmatmul.mubr.bf16.gmra.mrb[20].mxu1 %v1620_v55  ;;  %655 = vmatprep.mubr.bf16.mxu0 %v1621_v56 }
  0x4d   :  { %791 = vmatprep.mubr.bf16.mxu1 %v1623_v57 }
  0x53   :  { %656 = vmatmul.mubr.bf16.gmra.mrb[24].mxu0 %v1625_v58 }
  0x54   :  { %792 = vmatmul.mubr.bf16.gmra.mrb[24].mxu1 %v1626_v59  ;;  %663 = vmatprep.mubr.bf16.mxu0 %v1627_v60 }
  0x55   :  { %799 = vmatprep.mubr.bf16.mxu1 %v1629_v61 }
  0x5b   :  { %664 = vmatmul.mubr.bf16.gmra.mrb[28].mxu0 %v1631_v62 }
  0x5c   :  { %800 = vmatmul.mubr.bf16.gmra.mrb[28].mxu1 %v1632_v63  ;;  %671 = vmatprep.mubr.bf16.mxu0 %v1633_v0 }
  0x5d   :  { %807 = vmatprep.mubr.bf16.mxu1 %v1635_v1 }
  0x63   :  { %672 = vmatmul.mubr.bf16.gmra.mrb[32].mxu0 %v1637_v2 }
  0x64   :  { %808 = vmatmul.mubr.bf16.gmra.mrb[32].mxu1 %v1638_v3  ;;  %679 = vmatprep.mubr.bf16.mxu0 %v1639_v4 }
  0x65   :  { %815 = vmatprep.mubr.bf16.mxu1 %v1641_v5 }
  0x6b   :  { %680 = vmatmul.mubr.bf16.gmra.mrb[36].mxu0 %v1643_v6 }
  0x6c   :  { %816 = vmatmul.mubr.bf16.gmra.mrb[36].mxu1 %v1644_v7  ;;  %687 = vmatprep.mubr.bf16.mxu0 %v1645_v8 }
  0x6d   :  { %823 = vmatprep.mubr.bf16.mxu1 %v1647_v9 }
  0x73   :  { %688 = vmatmul.mubr.bf16.gmra.mrb[40].mxu0 %v1649_v10 }
  0x74   :  { %824 = vmatmul.mubr.bf16.gmra.mrb[40].mxu1 %v1650_v11  ;;  %695 = vmatprep.mubr.bf16.mxu0 %v1651_v12 }
  0x75   :  { %831 = vmatprep.mubr.bf16.mxu1 %v1653_v13 }
  0x7b   :  { %696 = vmatmul.mubr.bf16.gmra.mrb[44].mxu0 %v1655_v16 }
  0x7c   :  { %832 = vmatmul.mubr.bf16.gmra.mrb[44].mxu1 %v1656_v17  ;;  %703 = vmatprep.mubr.bf16.mxu0 %v1279_v18 }
  0x7d   :  { %839 = vmatprep.mubr.bf16.mxu1 %v1281_v19 }
  0x83   :  { %704 = vmatmul.mubr.bf16.gmra.mrb[48].mxu0 %v1278_v20 }
  0x84   :  { %840 = vmatmul.mubr.bf16.gmra.mrb[48].mxu1 %v1280_v21 }
  0xf6   :  { %v1381_v22 = vpop.f32.mrb[0].mxu0 }
  0xf7   :  { %v1475_v23 = vpop.f32.mrb[0].mxu1  ;;  %v1382_v24 = vpop.f32.mrb[1].mxu0 }
  0xf8   :  { %v1383_v25 = vadd.f32 %v1382_v24, %v1381_v22  ;;  %v1476_v26 = vpop.f32.mrb[1].mxu1  ;;  %v1384_v27 = vpop.f32.mrb[2].mxu0 }
  0xf9   :  { %v1477_v28 = vadd.f32 %v1476_v26, %v1475_v23  ;;  %v1478_v29 = vpop.f32.mrb[2].mxu1  ;;  %v1385_v30 = vpop.f32.mrb[3].mxu0 }
  0xfa   :  { %v1386_v31 = vadd.f32 %v1385_v30, %v1384_v27  ;;  %v1479_v32 = vpop.f32.mrb[3].mxu1 }
  0xfb   :  { %v1929_v33 = vadd.f32 %v1477_v28, %v1383_v25  ;;  %v1480_v34 = vadd.f32 %v1479_v32, %v1478_v29 }
  0xfd   :  { %v1931_v35 = vadd.f32 %v1480_v34, %v1386_v31  ;;  %v848_v37 = vsel %vm847_vm0, %v1929_v33, 0.0 }
  0xfe   :  { %v1387_v36 = vpop.f32.mrb[4].mxu0 }
  0xff   :  { %v849_v38 = vsel %vm847_vm0, %v1931_v35, 0.0  ;;  %v1481_v39 = vpop.f32.mrb[4].mxu1  ;;  %v1388_v40 = vpop.f32.mrb[5].mxu0 }
 0x100   :  { %v850_v41 = vadd.f32 %v849_v38, %v848_v37  ;;  %v1389_v42 = vadd.f32 %v1388_v40, %v1387_v36  ;;  %v1482_v43 = vpop.f32.mrb[5].mxu1  ;;  %v1390_v44 = vpop.f32.mrb[6].mxu0 }
 0x101   :  { %v1483_v45 = vadd.f32 %v1482_v43, %v1481_v39  ;;  %v1484_v46 = vpop.f32.mrb[6].mxu1  ;;  %v1391_v47 = vpop.f32.mrb[7].mxu0 }
 0x102   :  { %v1392_v48 = vadd.f32 %v1391_v47, %v1390_v44  ;;  %v1485_v49 = vpop.f32.mrb[7].mxu1 }
 0x103   :  { %v1937_v50 = vadd.f32 %v1483_v45, %v1389_v42  ;;  %v1486_v51 = vadd.f32 %v1485_v49, %v1484_v46 }
 0x105   :  { %v851_v52 = vsel %vm847_vm0, %v1937_v50, 0.0  ;;  %v1941_v53 = vadd.f32 %v1486_v51, %v1392_v48 }
 0x106   :  { %v852_v54 = vadd.f32 %v851_v52, %v850_v41  ;;  %v1393_v55 = vpop.f32.mrb[8].mxu0 }
 0x107   :  { %v853_v56 = vsel %vm847_vm0, %v1941_v53, 0.0  ;;  %v1487_v57 = vpop.f32.mrb[8].mxu1  ;;  %v1394_v58 = vpop.f32.mrb[9].mxu0 }
 0x108   :  { %v854_v59 = vadd.f32 %v853_v56, %v852_v54  ;;  %v1395_v60 = vadd.f32 %v1394_v58, %v1393_v55  ;;  %v1488_v61 = vpop.f32.mrb[9].mxu1  ;;  %v1396_v62 = vpop.f32.mrb[10].mxu0 }
 0x109   :  { %v1489_v63 = vadd.f32 %v1488_v61, %v1487_v57  ;;  %v1490_v0 = vpop.f32.mrb[10].mxu1  ;;  %v1397_v1 = vpop.f32.mrb[11].mxu0 }
 0x10a   :  { %v1398_v2 = vadd.f32 %v1397_v1, %v1396_v62  ;;  %v1491_v3 = vpop.f32.mrb[11].mxu1 }
 0x10b   :  { %v1945_v4 = vadd.f32 %v1489_v63, %v1395_v60  ;;  %v1492_v5 = vadd.f32 %v1491_v3, %v1490_v0 }
 0x10d   :  { %v855_v6 = vsel %vm847_vm0, %v1945_v4, 0.0  ;;  %v1949_v7 = vadd.f32 %v1492_v5, %v1398_v2 }
 0x10e   :  { %v856_v8 = vadd.f32 %v855_v6, %v854_v59  ;;  %v1399_v9 = vpop.f32.mrb[12].mxu0 }
 0x10f   :  { %v857_v10 = vsel %vm847_vm0, %v1949_v7, 0.0  ;;  %v1493_v11 = vpop.f32.mrb[12].mxu1  ;;  %v1400_v12 = vpop.f32.mrb[13].mxu0 }
 0x110   :  { %v858_v13 = vadd.f32 %v857_v10, %v856_v8  ;;  %v1401_v14 = vadd.f32 %v1400_v12, %v1399_v9  ;;  %v1494_v15 = vpop.f32.mrb[13].mxu1  ;;  %v1402_v16 = vpop.f32.mrb[14].mxu0 }
 0x111   :  { %v1495_v17 = vadd.f32 %v1494_v15, %v1493_v11  ;;  %v1496_v18 = vpop.f32.mrb[14].mxu1  ;;  %v1403_v19 = vpop.f32.mrb[15].mxu0 }
 0x112   :  { %v1404_v20 = vadd.f32 %v1403_v19, %v1402_v16  ;;  %v1497_v21 = vpop.f32.mrb[15].mxu1 }
 0x113   :  { %v1953_v22 = vadd.f32 %v1495_v17, %v1401_v14  ;;  %v1498_v23 = vadd.f32 %v1497_v21, %v1496_v18 }
 0x115   :  { %v859_v24 = vsel %vm847_vm0, %v1953_v22, 0.0  ;;  %v1957_v25 = vadd.f32 %v1498_v23, %v1404_v20 }
 0x116   :  { %v860_v26 = vadd.f32 %v859_v24, %v858_v13  ;;  %v1405_v27 = vpop.f32.mrb[16].mxu0 }
 0x117   :  { %v861_v28 = vsel %vm847_vm0, %v1957_v25, 0.0  ;;  %v1499_v29 = vpop.f32.mrb[16].mxu1  ;;  %v1406_v30 = vpop.f32.mrb[17].mxu0 }
 0x118   :  { %v862_v31 = vadd.f32 %v861_v28, %v860_v26  ;;  %v1407_v32 = vadd.f32 %v1406_v30, %v1405_v27  ;;  %v1500_v34 = vpop.f32.mrb[17].mxu1  ;;  %v1408_v36 = vpop.f32.mrb[18].mxu0 }
 0x119   :  { %v1501_v37 = vadd.f32 %v1500_v34, %v1499_v29  ;;  %v1502_v38 = vpop.f32.mrb[18].mxu1  ;;  %v1409_v39 = vpop.f32.mrb[19].mxu0 }
 0x11a   :  { %v1410_v40 = vadd.f32 %v1409_v39, %v1408_v36  ;;  %v1503_v41 = vpop.f32.mrb[19].mxu1 }
 0x11b   :  { %v1961_v42 = vadd.f32 %v1501_v37, %v1407_v32  ;;  %v1504_v43 = vadd.f32 %v1503_v41, %v1502_v38 }
 0x11d   :  { %v863_v44 = vsel %vm847_vm0, %v1961_v42, 0.0  ;;  %v1965_v45 = vadd.f32 %v1504_v43, %v1410_v40 }
 0x11e   :  { %v864_v46 = vadd.f32 %v863_v44, %v862_v31  ;;  %v1411_v47 = vpop.f32.mrb[20].mxu0 }
 0x11f   :  { %v865_v48 = vsel %vm847_vm0, %v1965_v45, 0.0  ;;  %v1505_v49 = vpop.f32.mrb[20].mxu1  ;;  %v1412_v51 = vpop.f32.mrb[21].mxu0 }
 0x120   :  { %v866_v52 = vadd.f32 %v865_v48, %v864_v46  ;;  %v1413_v54 = vadd.f32 %v1412_v51, %v1411_v47  ;;  %v1506_v55 = vpop.f32.mrb[21].mxu1  ;;  %v1414_v56 = vpop.f32.mrb[22].mxu0 }
 0x121   :  { %v1507_v57 = vadd.f32 %v1506_v55, %v1505_v49  ;;  %v1508_v58 = vpop.f32.mrb[22].mxu1  ;;  %v1415_v59 = vpop.f32.mrb[23].mxu0 }
 0x122   :  { %v1416_v60 = vadd.f32 %v1415_v59, %v1414_v56  ;;  %v1509_v61 = vpop.f32.mrb[23].mxu1 }
 0x123   :  { %v1969_v62 = vadd.f32 %v1507_v57, %v1413_v54  ;;  %v1510_v63 = vadd.f32 %v1509_v61, %v1508_v58 }
 0x125   :  { %v867_v0 = vsel %vm847_vm0, %v1969_v62, 0.0  ;;  %v1973_v1 = vadd.f32 %v1510_v63, %v1416_v60 }
 0x126   :  { %v868_v2 = vadd.f32 %v867_v0, %v866_v52  ;;  %v1417_v3 = vpop.f32.mrb[24].mxu0 }
 0x127   :  { %v869_v5 = vsel %vm847_vm0, %v1973_v1, 0.0  ;;  %v1511_v6 = vpop.f32.mrb[24].mxu1  ;;  %v1418_v8 = vpop.f32.mrb[25].mxu0 }
 0x128   :  { %v870_v9 = vadd.f32 %v869_v5, %v868_v2  ;;  %v1419_v10 = vadd.f32 %v1418_v8, %v1417_v3  ;;  %v1512_v11 = vpop.f32.mrb[25].mxu1  ;;  %v1420_v12 = vpop.f32.mrb[26].mxu0 }
 0x129   :  { %v1513_v13 = vadd.f32 %v1512_v11, %v1511_v6  ;;  %v1514_v14 = vpop.f32.mrb[26].mxu1  ;;  %v1421_v15 = vpop.f32.mrb[27].mxu0 }
 0x12a   :  { %v1422_v16 = vadd.f32 %v1421_v15, %v1420_v12  ;;  %v1515_v17 = vpop.f32.mrb[27].mxu1 }
 0x12b   :  { %v1977_v18 = vadd.f32 %v1513_v13, %v1419_v10  ;;  %v1516_v19 = vadd.f32 %v1515_v17, %v1514_v14 }
 0x12d   :  { %v871_v20 = vsel %vm847_vm0, %v1977_v18, 0.0  ;;  %v1981_v21 = vadd.f32 %v1516_v19, %v1422_v16 }
 0x12e   :  { %v872_v23 = vadd.f32 %v871_v20, %v870_v9  ;;  %v1423_v24 = vpop.f32.mrb[28].mxu0 }
 0x12f   :  { %v873_v26 = vsel %vm847_vm0, %v1981_v21, 0.0  ;;  %v1517_v27 = vpop.f32.mrb[28].mxu1  ;;  %v1424_v28 = vpop.f32.mrb[29].mxu0 }
 0x130   :  { %v874_v29 = vadd.f32 %v873_v26, %v872_v23  ;;  %v1425_v30 = vadd.f32 %v1424_v28, %v1423_v24  ;;  %v1518_v31 = vpop.f32.mrb[29].mxu1  ;;  %v1426_v32 = vpop.f32.mrb[30].mxu0 }
 0x131   :  { %v1519_v34 = vadd.f32 %v1518_v31, %v1517_v27  ;;  %v1520_v36 = vpop.f32.mrb[30].mxu1  ;;  %v1427_v37 = vpop.f32.mrb[31].mxu0 }
 0x132   :  { %v1428_v38 = vadd.f32 %v1427_v37, %v1426_v32  ;;  %v1521_v39 = vpop.f32.mrb[31].mxu1 }
 0x133   :  { %v1985_v40 = vadd.f32 %v1519_v34, %v1425_v30  ;;  %v1522_v41 = vadd.f32 %v1521_v39, %v1520_v36 }
 0x135   :  { %v875_v43 = vsel %vm847_vm0, %v1985_v40, 0.0  ;;  %v1989_v44 = vadd.f32 %v1522_v41, %v1428_v38 }
 0x136   :  { %v876_v46 = vadd.f32 %v875_v43, %v874_v29  ;;  %v1429_v47 = vpop.f32.mrb[32].mxu0 }
 0x137   :  { %v877_v48 = vsel %vm847_vm0, %v1989_v44, 0.0  ;;  %v1523_v49 = vpop.f32.mrb[32].mxu1  ;;  %v1430_v51 = vpop.f32.mrb[33].mxu0 }
 0x138   :  { %v878_v52 = vadd.f32 %v877_v48, %v876_v46  ;;  %v1431_v54 = vadd.f32 %v1430_v51, %v1429_v47  ;;  %v1524_v55 = vpop.f32.mrb[33].mxu1  ;;  %v1432_v56 = vpop.f32.mrb[34].mxu0 }
 0x139   :  { %v1525_v57 = vadd.f32 %v1524_v55, %v1523_v49  ;;  %v1526_v58 = vpop.f32.mrb[34].mxu1  ;;  %v1433_v59 = vpop.f32.mrb[35].mxu0 }
 0x13a   :  { %v1434_v60 = vadd.f32 %v1433_v59, %v1432_v56  ;;  %v1527_v61 = vpop.f32.mrb[35].mxu1 }
 0x13b   :  { %v1993_v63 = vadd.f32 %v1525_v57, %v1431_v54  ;;  %v1528_v0 = vadd.f32 %v1527_v61, %v1526_v58 }
 0x13d   :  { %v879_v2 = vsel %vm847_vm0, %v1993_v63, 0.0  ;;  %v1997_v3 = vadd.f32 %v1528_v0, %v1434_v60 }
 0x13e   :  { %v880_v5 = vadd.f32 %v879_v2, %v878_v52  ;;  %v1435_v6 = vpop.f32.mrb[36].mxu0 }
 0x13f   :  { %v881_v8 = vsel %vm847_vm0, %v1997_v3, 0.0  ;;  %v1529_v9 = vpop.f32.mrb[36].mxu1  ;;  %v1436_v10 = vpop.f32.mrb[37].mxu0 }
 0x140   :  { %v882_v11 = vadd.f32 %v881_v8, %v880_v5  ;;  %v1437_v12 = vadd.f32 %v1436_v10, %v1435_v6  ;;  %v1530_v13 = vpop.f32.mrb[37].mxu1  ;;  %v1438_v14 = vpop.f32.mrb[38].mxu0 }
 0x141   :  { %v1531_v15 = vadd.f32 %v1530_v13, %v1529_v9  ;;  %v1532_v16 = vpop.f32.mrb[38].mxu1  ;;  %v1439_v17 = vpop.f32.mrb[39].mxu0 }
 0x142   :  { %v1440_v19 = vadd.f32 %v1439_v17, %v1438_v14  ;;  %v1533_v20 = vpop.f32.mrb[39].mxu1 }
 0x143   :  { %v2001_v23 = vadd.f32 %v1531_v15, %v1437_v12  ;;  %v1534_v24 = vadd.f32 %v1533_v20, %v1532_v16 }
 0x145   :  { %v883_v26 = vsel %vm847_vm0, %v2001_v23, 0.0  ;;  %v2005_v27 = vadd.f32 %v1534_v24, %v1440_v19 }
 0x146   :  { %v884_v28 = vadd.f32 %v883_v26, %v882_v11  ;;  %v1441_v29 = vpop.f32.mrb[40].mxu0 }
 0x147   :  { %v885_v30 = vsel %vm847_vm0, %v2005_v27, 0.0  ;;  %v1535_v31 = vpop.f32.mrb[40].mxu1  ;;  %v1442_v32 = vpop.f32.mrb[41].mxu0 }
 0x148   :  { %v886_v34 = vadd.f32 %v885_v30, %v884_v28  ;;  %v1443_v36 = vadd.f32 %v1442_v32, %v1441_v29  ;;  %v1536_v37 = vpop.f32.mrb[41].mxu1  ;;  %v1444_v38 = vpop.f32.mrb[42].mxu0 }
 0x149   :  { %v1537_v39 = vadd.f32 %v1536_v37, %v1535_v31  ;;  %v1538_v41 = vpop.f32.mrb[42].mxu1  ;;  %v1445_v43 = vpop.f32.mrb[43].mxu0 }
 0x14a   :  { %v1446_v46 = vadd.f32 %v1445_v43, %v1444_v38  ;;  %v1539_v47 = vpop.f32.mrb[43].mxu1 }
 0x14b   :  { %v2009_v48 = vadd.f32 %v1537_v39, %v1443_v36  ;;  %v1540_v49 = vadd.f32 %v1539_v47, %v1538_v41 }
 0x14d   :  { %v887_v51 = vsel %vm847_vm0, %v2009_v48, 0.0  ;;  %v2013_v52 = vadd.f32 %v1540_v49, %v1446_v46 }
 0x14e   :  { %v888_v54 = vadd.f32 %v887_v51, %v886_v34  ;;  %v1447_v55 = vpop.f32.mrb[44].mxu0 }
 0x14f   :  { %v889_v56 = vsel %vm847_vm0, %v2013_v52, 0.0  ;;  %v1541_v57 = vpop.f32.mrb[44].mxu1  ;;  %v1448_v58 = vpop.f32.mrb[45].mxu0 }
 0x150   :  { %v890_v59 = vadd.f32 %v889_v56, %v888_v54  ;;  %v1449_v60 = vadd.f32 %v1448_v58, %v1447_v55  ;;  %v1542_v61 = vpop.f32.mrb[45].mxu1  ;;  %v1450_v0 = vpop.f32.mrb[46].mxu0 }
 0x151   :  { %v1543_v2 = vadd.f32 %v1542_v61, %v1541_v57  ;;  %v1544_v5 = vpop.f32.mrb[46].mxu1  ;;  %v1451_v6 = vpop.f32.mrb[47].mxu0 }
 0x152   :  { %v1452_v8 = vadd.f32 %v1451_v6, %v1450_v0  ;;  %v1545_v9 = vpop.f32.mrb[47].mxu1 }
 0x153   :  { %v834_v10 = vadd.f32 %v1543_v2, %v1449_v60  ;;  %v1546_v11 = vadd.f32 %v1545_v9, %v1544_v5 }
 0x155   :  { %v891_v12 = vsel %vm847_vm0, %v834_v10, 0.0  ;;  %v837_v13 = vadd.f32 %v1546_v11, %v1452_v8 }
 0x156   :  { %v892_v14 = vadd.f32 %v891_v12, %v890_v59  ;;  %v1453_v15 = vpop.f32.mrb[48].mxu0 }
 0x157   :  { %v893_v16 = vsel %vm847_vm0, %v837_v13, 0.0  ;;  %v1547_v17 = vpop.f32.mrb[48].mxu1  ;;  %v1454_v19 = vpop.f32.mrb[49].mxu0 }
 0x158   :  { %v894_v20 = vadd.f32 %v893_v16, %v892_v14  ;;  %v1455_v24 = vadd.f32 %v1454_v19, %v1453_v15  ;;  %v1548_v26 = vpop.f32.mrb[49].mxu1  ;;  %v1456_v28 = vpop.f32.mrb[50].mxu0 }
 0x159   :  { %v1549_v29 = vadd.f32 %v1548_v26, %v1547_v17  ;;  %v1550_v30 = vpop.f32.mrb[50].mxu1  ;;  %v1457_v31 = vpop.f32.mrb[51].mxu0 }
 0x15a   :  { %v1551_v32 = vpop.f32.mrb[51].mxu1 }
 0x15b   :  { %v842_v34 = vadd.f32 %v1549_v29, %v1455_v24 }
 0x15d   :  { %v895_v36 = vsel %vm847_vm0, %v842_v34, 0.0 }
 0x15e   :  { %v896_v37 = vadd.f32 %v895_v36, %v894_v20 }
 0x160   :  { %v897_v38 = vrot.slane %v896_v37, 4 }
 0x162   :  { %v898_v39 = vadd.f32 %v897_v38, %v896_v37 }
 0x164   :  { %v899_v41 = vrot.slane %v898_v39, 2 }
 0x166   :  { %v900_v43 = vadd.f32 %v899_v41, %v898_v39 }
 0x168   :  { %v901_v46 = vrot.slane %v900_v43, 1 }
 0x16a   :  { %v902_v47 = vadd.f32 %v901_v46, %v900_v43 }
 0x16c   :  { %v904_v49 = vmul.f32 0.005, %v902_v47 }
 0x16e   :  { %v2021_v51 = vsub.f32 %v1929_v33, %v904_v49  ;;  %v2024_v54 = vsub.f32 %v1931_v35, %v904_v49  ;;  %v2027_v55 = vsub.f32 %v1937_v50, %v904_v49  ;;  %v2030_v56 = vsub.f32 %v1941_v53, %v904_v49 }
 0x16f   :  { %v2033_v57 = vsub.f32 %v1945_v4, %v904_v49  ;;  %v2036_v58 = vsub.f32 %v1949_v7, %v904_v49  ;;  %v2039_v59 = vsub.f32 %v1953_v22, %v904_v49  ;;  %v2042_v33 = vsub.f32 %v1957_v25, %v904_v49 }
 0x170   :  { %v2045_v35 = vsub.f32 %v1961_v42, %v904_v49  ;;  %v2048_v50 = vsub.f32 %v1965_v45, %v904_v49  ;;  %v2051_v53 = vsub.f32 %v1969_v62, %v904_v49  ;;  %v2054_v4 = vsub.f32 %v1973_v1, %v904_v49 }
 0x171   :  { %v2057_v7 = vsub.f32 %v1977_v18, %v904_v49  ;;  %v2060_v22 = vsub.f32 %v1981_v21, %v904_v49  ;;  %v2063_v25 = vsub.f32 %v1985_v40, %v904_v49  ;;  %v2066_v42 = vsub.f32 %v1989_v44, %v904_v49 }
 0x172   :  { %v2069_v45 = vsub.f32 %v1993_v63, %v904_v49  ;;  %v2072_v62 = vsub.f32 %v1997_v3, %v904_v49  ;;  %v2075_v1 = vsub.f32 %v2001_v23, %v904_v49  ;;  %v2078_v18 = vsub.f32 %v2005_v27, %v904_v49 }
 0x173   :  { %v2081_v21 = vsub.f32 %v2009_v48, %v904_v49  ;;  %v2084_v40 = vsub.f32 %v2013_v52, %v904_v49  ;;  %v2086_v44 = vsub.f32 %v834_v10, %v904_v49  ;;  %v2088_v60 = vsub.f32 %v837_v13, %v904_v49 }
 0x174   :  { %v2090_v63 = vsub.f32 %v842_v34, %v904_v49  ;;  %v930_v3 = vmul.f32 %v2021_v51, %v2021_v51  ;;  %v931_v23 = vmul.f32 %v2024_v54, %v2024_v54  ;;  %v932_v27 = vmul.f32 %v2027_v55, %v2027_v55 }
 0x175   :  { %v933_v48 = vmul.f32 %v2030_v56, %v2030_v56  ;;  %v934_v2 = vmul.f32 %v2033_v57, %v2033_v57  ;;  %v935_v8 = vmul.f32 %v2036_v58, %v2036_v58  ;;  %v936_v11 = vmul.f32 %v2039_v59, %v2039_v59 }
 0x176   :  { %v955_v52 = vsel %vm847_vm0, %v930_v3, 0.0  ;;  %v956_v61 = vsel %vm847_vm0, %v931_v23, 0.0  ;;  %v958_v5 = vsel %vm847_vm0, %v932_v27, 0.0  ;;  %v937_v14 = vmul.f32 %v2042_v33, %v2042_v33 }
 0x177   :  { %v957_v0 = vadd.f32 %v956_v61, %v955_v52  ;;  %v960_v9 = vsel %vm847_vm0, %v933_v48, 0.0  ;;  %v962_v12 = vsel %vm847_vm0, %v934_v2, 0.0  ;;  %v964_v15 = vsel %vm847_vm0, %v935_v8, 0.0 }
 0x178   :  { %v938_v17 = vmul.f32 %v2045_v35, %v2045_v35  ;;  %v966_v19 = vsel %vm847_vm0, %v936_v11, 0.0  ;;  %v939_v24 = vmul.f32 %v2048_v50, %v2048_v50  ;;  %v968_v26 = vsel %vm847_vm0, %v937_v14, 0.0 }
 0x179   :  { %v959_v6 = vadd.f32 %v958_v5, %v957_v0  ;;  %v940_v29 = vmul.f32 %v2051_v53, %v2051_v53  ;;  %v941_v32 = vmul.f32 %v2054_v4, %v2054_v4  ;;  %v942_v37 = vmul.f32 %v2057_v7, %v2057_v7 }
 0x17a   :  { %v970_v30 = vsel %vm847_vm0, %v938_v17, 0.0  ;;  %v972_v34 = vsel %vm847_vm0, %v939_v24, 0.0  ;;  %v943_v41 = vmul.f32 %v2060_v22, %v2060_v22  ;;  %v944_v47 = vmul.f32 %v2063_v25, %v2063_v25 }
 0x17b   :  { %v961_v10 = vadd.f32 %v960_v9, %v959_v6  ;;  %v974_v38 = vsel %vm847_vm0, %v940_v29, 0.0  ;;  %v976_v43 = vsel %vm847_vm0, %v941_v32, 0.0  ;;  %v978_v49 = vsel %vm847_vm0, %v942_v37, 0.0 }
 0x17c   :  { %v945_v23 = vmul.f32 %v2066_v42, %v2066_v42  ;;  %v980_v27 = vsel %vm847_vm0, %v943_v41, 0.0  ;;  %v946_v52 = vmul.f32 %v2069_v45, %v2069_v45  ;;  %v982_v61 = vsel %vm847_vm0, %v944_v47, 0.0 }
 0x17d   :  { %v963_v13 = vadd.f32 %v962_v12, %v961_v10  ;;  %v947_v2 = vmul.f32 %v2072_v62, %v2072_v62  ;;  %v948_v8 = vmul.f32 %v2075_v1, %v2075_v1  ;;  %v949_v11 = vmul.f32 %v2078_v18, %v2078_v18 }
 0x17e   :  { %v984_v5 = vsel %vm847_vm0, %v945_v23, 0.0  ;;  %v986_v9 = vsel %vm847_vm0, %v946_v52, 0.0  ;;  %v950_v14 = vmul.f32 %v2081_v21, %v2081_v21  ;;  %v951_v17 = vmul.f32 %v2084_v40, %v2084_v40 }
 0x17f   :  { %v965_v16 = vadd.f32 %v964_v15, %v963_v13  ;;  %v988_v12 = vsel %vm847_vm0, %v947_v2, 0.0  ;;  %v990_v15 = vsel %vm847_vm0, %v948_v8, 0.0  ;;  %v952_v24 = vmul.f32 %v2086_v44, %v2086_v44 }
 0x180   :  { %v953_v29 = vmul.f32 %v2088_v60, %v2088_v60  ;;  %v954_v32 = vmul.f32 %v2090_v63, %v2090_v63  ;;  %v1015_v52 = vlaneseq }
 0x181   :  { %v967_v20 = vadd.f32 %v966_v19, %v965_v16  ;;  %v992_v19 = vsel %vm847_vm0, %v949_v11, 0.0 }
 0x182   :  { %v1000_v37 = vsel %vm847_vm0, %v953_v29, 0.0 }
 0x183   :  { %v969_v28 = vadd.f32 %v968_v26, %v967_v20  ;;  %v994_v26 = vsel %vm847_vm0, %v950_v14, 0.0 }
 0x185   :  { %v971_v31 = vadd.f32 %v970_v30, %v969_v28  ;;  %v996_v30 = vsel %vm847_vm0, %v951_v17, 0.0 }
 0x187   :  { %v973_v36 = vadd.f32 %v972_v34, %v971_v31  ;;  %v998_v34 = vsel %vm847_vm0, %v952_v24, 0.0 }
 0x189   :  { %v975_v39 = vadd.f32 %v974_v38, %v973_v36 }
 0x18b   :  { %v977_v46 = vadd.f32 %v976_v43, %v975_v39  ;;  %v1002_v39 = vsel %vm847_vm0, %v954_v32, 0.0 }
 0x18d   :  { %v979_v3 = vadd.f32 %v978_v49, %v977_v46 }
 0x18f   :  { %v981_v48 = vadd.f32 %v980_v27, %v979_v3 }
 0x191   :  { %v983_v0 = vadd.f32 %v982_v61, %v981_v48  ;;  %v1016_v61 = vshrl.u32 %v1015_v52, 7 }
 0x193   :  { %v985_v6 = vadd.f32 %v984_v5, %v983_v0  ;;  %v1011_v0 = vld [vmem:[%s2312_s2] sm:$0x1]  ;;  %v1017_v2 = vsub.s32 0, %v1016_v61 }
 0x195   :  { %v987_v10 = vadd.f32 %v986_v9, %v985_v6 }
 0x197   :  { %v989_v13 = vadd.f32 %v988_v12, %v987_v10 }
 0x199   :  { %v991_v16 = vadd.f32 %v990_v15, %v989_v13 }
 0x19b   :  { %v993_v20 = vadd.f32 %v992_v19, %v991_v16 }
 0x19d   :  { %v995_v28 = vadd.f32 %v994_v26, %v993_v20 }
 0x19f   :  { %v997_v31 = vadd.f32 %v996_v30, %v995_v28 }
 0x1a1   :  { %v999_v36 = vadd.f32 %v998_v34, %v997_v31 }
 0x1a3   :  { %v1001_v38 = vadd.f32 %v1000_v37, %v999_v36 }
 0x1a5   :  { %v1003_v41 = vadd.f32 %v1002_v39, %v1001_v38 }
 0x1a7   :  { %v1004_v43 = vrot.slane %v1003_v41, 4 }
 0x1a9   :  { %v1005_v46 = vadd.f32 %v1004_v43, %v1003_v41 }
 0x1ab   :  { %v1006_v47 = vrot.slane %v1005_v46, 2 }
 0x1ad   :  { %v1007_v49 = vadd.f32 %v1006_v47, %v1005_v46 }
 0x1af   :  { %v1008_v3 = vrot.slane %v1007_v49, 1 }
 0x1b1   :  { %v1009_v23 = vadd.f32 %v1008_v3, %v1007_v49 }
 0x1b3   :  { %v1010_v27 = vmul.f32 0.005, %v1009_v23 }
 0x1b5   :  { %v1012_v48 = vadd.f32 1e-05, %v1010_v27 }
 0x1b7   :  { %1661 = vrsqrt.f32 %v1012_v48 }
 0x1c1   :  { %v1662_v5 = vpop.eup %1661 }
 0x1c2   :  { %v1014_v6 = vmul.f32 %v1662_v5, %v1011_v0 }
 0x1c4   :  { %v1018_v8 = vrot.slane %v1014_v6, %v1017_v2 }
 0x1c6   :  { %v1019_v9 = vmul.f32 %v1018_v8, %v2021_v51  ;;  %v1020_v10 = vmul.f32 %v1018_v8, %v2024_v54  ;;  %v1021_v11 = vmul.f32 %v1018_v8, %v2027_v55  ;;  %v1022_v12 = vmul.f32 %v1018_v8, %v2030_v56 }
 0x1c7   :  { %v1023_v13 = vmul.f32 %v1018_v8, %v2033_v57  ;;  %v1024_v14 = vmul.f32 %v1018_v8, %v2036_v58  ;;  %v1025_v15 = vmul.f32 %v1018_v8, %v2039_v59  ;;  %v1026_v16 = vmul.f32 %v1018_v8, %v2042_v33  ;;  %v1314_v59 = vld [vmem:[%s2312_s2 + $0x1] ss:$0 sm:$0xff] }
 0x1c8   :  { %v1027_v17 = vmul.f32 %v1018_v8, %v2045_v35  ;;  %v1028_v19 = vmul.f32 %v1018_v8, %v2048_v50  ;;  %v1029_v51 = vmul.f32 %v1018_v8, %v2051_v53  ;;  %v1030_v54 = vmul.f32 %v1018_v8, %v2054_v4 }
 0x1c9   :  { %v1031_v55 = vmul.f32 %v1018_v8, %v2057_v7  ;;  %v1032_v56 = vmul.f32 %v1018_v8, %v2060_v22  ;;  %v1033_v57 = vmul.f32 %v1018_v8, %v2063_v25  ;;  %v1034_v58 = vmul.f32 %v1018_v8, %v2066_v42 }
 0x1ca   :  { %v1035_v33 = vmul.f32 %v1018_v8, %v2069_v45  ;;  %v1036_v35 = vmul.f32 %v1018_v8, %v2072_v62  ;;  %v1037_v50 = vmul.f32 %v1018_v8, %v2075_v1  ;;  %v1038_v53 = vmul.f32 %v1018_v8, %v2078_v18 }
 0x1cb   :  { %v1039_v4 = vmul.f32 %v1018_v8, %v2081_v21  ;;  %v1040_v7 = vmul.f32 %v1018_v8, %v2084_v40  ;;  %v1041_v22 = vmul.f32 %v1018_v8, %v2086_v44  ;;  %v1042_v25 = vmul.f32 %v1018_v8, %v2088_v60 }
 0x1cc   :  { %v1043_v42 = vmul.f32 %v1018_v8, %v2090_v63  ;;  %v1049_v20 = vadd.f32 %v1314_v59, %v1019_v9  ;;  %v1050_v24 = vadd.f32 %v1314_v59, %v1020_v10  ;;  %v1051_v26 = vadd.f32 %v1314_v59, %v1021_v11 }
 0x1cd   :  { %v1052_v45 = vadd.f32 %v1314_v59, %v1022_v12  ;;  %v1053_v28 = vadd.f32 %v1314_v59, %v1023_v13  ;;  %v1054_v62 = vadd.f32 %v1314_v59, %v1024_v14  ;;  %v1055_v29 = vadd.f32 %v1314_v59, %v1025_v15 }
 0x1ce   :  { %v1056_v1 = vadd.f32 %v1314_v59, %v1026_v16  ;;  %v1057_v30 = vadd.f32 %v1314_v59, %v1027_v17  ;;  %v1058_v18 = vadd.f32 %v1314_v59, %v1028_v19  ;;  %v1059_v31 = vadd.f32 %v1314_v59, %v1029_v51 }
 0x1cf   :  { %v1060_v21 = vadd.f32 %v1314_v59, %v1030_v54  ;;  %v1061_v32 = vadd.f32 %v1314_v59, %v1031_v55  ;;  %v1062_v40 = vadd.f32 %v1314_v59, %v1032_v56  ;;  %v1063_v34 = vadd.f32 %v1314_v59, %v1033_v57 }
 0x1d0   :  { %v1064_v44 = vadd.f32 %v1314_v59, %v1034_v58  ;;  %v1065_v60 = vadd.f32 %v1314_v59, %v1035_v33  ;;  %v1066_v36 = vadd.f32 %v1314_v59, %v1036_v35  ;;  %v1067_v63 = vadd.f32 %v1314_v59, %v1037_v50 }
 0x1d1   :  { %v1068_v37 = vadd.f32 %v1314_v59, %v1038_v53  ;;  %v1069_v38 = vadd.f32 %v1314_v59, %v1039_v4  ;;  %v2198_v39 = vadd.f32 %v1314_v59, %v1040_v7  ;;  %v2200_v41 = vadd.f32 %v1314_v59, %v1041_v22 }
 0x1d2   :  { %v2202_v43 = vadd.f32 %v1314_v59, %v1042_v25  ;;  %v2204_v46 = vadd.f32 %v1314_v59, %v1043_v42  ;;  %v1074_v47 = vmax.f32 %v1049_v20, 0.0  ;;  %v1075_v49 = vmax.f32 %v1050_v24, 0.0 }
 0x1d3   :  { %v1076_v3 = vmax.f32 %v1051_v26, 0.0  ;;  %v1077_v23 = vmax.f32 %v1052_v45, 0.0  ;;  %v1078_v27 = vmax.f32 %v1053_v28, 0.0  ;;  %v1079_v48 = vmax.f32 %v1054_v62, 0.0 }
 0x1d4   :  { %v1080_v52 = vmax.f32 %v1055_v29, 0.0  ;;  %v1081_v61 = vmax.f32 %v1056_v1, 0.0  ;;  %v1082_v0 = vmax.f32 %v1057_v30, 0.0  ;;  %v1083_v2 = vmax.f32 %v1058_v18, 0.0 }
 0x1d5   :  { %v1084_v5 = vmax.f32 %v1059_v31, 0.0  ;;  %v1085_v6 = vmax.f32 %v1060_v21, 0.0  ;;  %v1086_v8 = vmax.f32 %v1061_v32, 0.0  ;;  %v1087_v9 = vmax.f32 %v1062_v40, 0.0 }
 0x1d6   :  { %v1088_v10 = vmax.f32 %v1063_v34, 0.0  ;;  %v1089_v11 = vmax.f32 %v1064_v44, 0.0  ;;  %v1090_v12 = vmax.f32 %v1065_v60, 0.0  ;;  %v1091_v13 = vmax.f32 %v1066_v36, 0.0 }
 0x1d7   :  { %v1092_v14 = vmax.f32 %v1067_v63, 0.0  ;;  %v1093_v15 = vmax.f32 %v1068_v37, 0.0  ;;  %v1094_v16 = vmax.f32 %v1069_v38, 0.0  ;;  %v1095_v17 = vmax.f32 %v2198_v39, 0.0 }
 0x1d8   :  { %v1096_v19 = vmax.f32 %v2200_v41, 0.0  ;;  %v1097_v51 = vmax.f32 %v2202_v43, 0.0  ;;  %v1098_v54 = vmax.f32 %v2204_v46, 0.0  ;;  %v1340_v55 = vpack.c.bf16 %v1074_v47, %v1074_v47 }
 0x1d9   :  { %v1341_v56 = vpack.c.bf16 %v1075_v49, %v1075_v49  ;;  %v1342_v57 = vpack.c.bf16 %v1076_v3, %v1076_v3  ;;  %v1343_v58 = vpack.c.bf16 %v1077_v23, %v1077_v23  ;;  %v1344_v59 = vpack.c.bf16 %v1078_v27, %v1078_v27 }
 0x1da   :  { %v1345_v33 = vpack.c.bf16 %v1079_v48, %v1079_v48  ;;  %v1346_v35 = vpack.c.bf16 %v1080_v52, %v1080_v52  ;;  %v1347_v50 = vpack.c.bf16 %v1081_v61, %v1081_v61  ;;  %v1348_v53 = vpack.c.bf16 %v1082_v0, %v1082_v0  ;;  %1201 = vst.msk [vmem:[%s2313_s3] sm:$0xf] %vm1200_vm1, %v1340_v55 }
 0x1db   :  { %v1349_v4 = vpack.c.bf16 %v1083_v2, %v1083_v2  ;;  %v1350_v7 = vpack.c.bf16 %v1084_v5, %v1084_v5  ;;  %v1351_v22 = vpack.c.bf16 %v1085_v6, %v1085_v6  ;;  %v1352_v25 = vpack.c.bf16 %v1086_v8, %v1086_v8  ;;  %1202 = vst.msk [vmem:[%s2313_s3 + $0x4] sm:$0xf] %vm1200_vm1, %v1341_v56 }
 0x1dc   :  { %1203 = vst.msk [vmem:[%s2313_s3 + $0x8] sm:$0xf] %vm1200_vm1, %v1342_v57  ;;  %1204 = vst.msk [vmem:[%s2313_s3 + $0xc] sm:$0xf] %vm1200_vm1, %v1343_v58  ;;  %v1353_v42 = vpack.c.bf16 %v1087_v9, %v1087_v9  ;;  %v1354_v20 = vpack.c.bf16 %v1088_v10, %v1088_v10  ;;  %v1355_v24 = vpack.c.bf16 %v1089_v11, %v1089_v11 }
 0x1dd   :  { %1205 = vst.msk [vmem:[%s2313_s3 + $0x10] sm:$0xf] %vm1200_vm1, %v1344_v59  ;;  %v1356_v26 = vpack.c.bf16 %v1090_v12, %v1090_v12  ;;  %1206 = vst.msk [vmem:[%s2313_s3 + $0x14] sm:$0xf] %vm1200_vm1, %v1345_v33  ;;  %v1357_v45 = vpack.c.bf16 %v1091_v13, %v1091_v13  ;;  %v1358_v28 = vpack.c.bf16 %v1092_v14, %v1092_v14 }
 0x1de   :  { %1207 = vst.msk [vmem:[%s2313_s3 + $0x18] sm:$0xf] %vm1200_vm1, %v1346_v35  ;;  %1208 = vst.msk [vmem:[%s2313_s3 + $0x1c] sm:$0xf] %vm1200_vm1, %v1347_v50  ;;  %v1359_v62 = vpack.c.bf16 %v1093_v15, %v1093_v15  ;;  %v1360_v29 = vpack.c.bf16 %v1094_v16, %v1094_v16  ;;  %v1361_v1 = vpack.c.bf16 %v1095_v17, %v1095_v17 }
 0x1df   :  { %1209 = vst.msk [vmem:[%s2313_s3 + $0x20] sm:$0xf] %vm1200_vm1, %v1348_v53  ;;  %1210 = vst.msk [vmem:[%s2313_s3 + $0x24] sm:$0xf] %vm1200_vm1, %v1349_v4  ;;  %v1362_v30 = vpack.c.bf16 %v1096_v19, %v1096_v19  ;;  %v1363_v18 = vpack.c.bf16 %v1097_v51, %v1097_v51  ;;  %v1364_v31 = vpack.c.bf16 %v1098_v54, %v1098_v54 }
 0x1e0   :  { %1211 = vst.msk [vmem:[%s2313_s3 + $0x28] sm:$0xf] %vm1200_vm1, %v1350_v7  ;;  %1212 = vst.msk [vmem:[%s2313_s3 + $0x2c] sm:$0xf] %vm1200_vm1, %v1351_v22 }
 0x1e1   :  { %1213 = vst.msk [vmem:[%s2313_s3 + $0x30] sm:$0xf] %vm1200_vm1, %v1352_v25  ;;  %1214 = vst.msk [vmem:[%s2313_s3 + $0x34] sm:$0xf] %vm1200_vm1, %v1353_v42 }
 0x1e2   :  { %1215 = vst.msk [vmem:[%s2313_s3 + $0x38] sm:$0xf] %vm1200_vm1, %v1354_v20  ;;  %1216 = vst.msk [vmem:[%s2313_s3 + $0x3c] sm:$0xf] %vm1200_vm1, %v1355_v24 }
 0x1e3   :  { %1217 = vst.msk [vmem:[%s2313_s3 + $0x40] sm:$0xf] %vm1200_vm1, %v1356_v26  ;;  %1218 = vst.msk [vmem:[%s2313_s3 + $0x44] sm:$0xf] %vm1200_vm1, %v1357_v45 }
 0x1e4   :  { %1219 = vst.msk [vmem:[%s2313_s3 + $0x48] sm:$0xf] %vm1200_vm1, %v1358_v28  ;;  %1220 = vst.msk [vmem:[%s2313_s3 + $0x4c] sm:$0xf] %vm1200_vm1, %v1359_v62 }
 0x1e5   :  { %1221 = vst.msk [vmem:[%s2313_s3 + $0x50] sm:$0xf] %vm1200_vm1, %v1360_v29  ;;  %1222 = vst.msk [vmem:[%s2313_s3 + $0x54] sm:$0xf] %vm1200_vm1, %v1361_v1 }
 0x1e6   :  { %1223 = vst.msk [vmem:[%s2313_s3 + $0x58] sm:$0xf] %vm1200_vm1, %v1362_v30  ;;  %1224 = vst.msk [vmem:[%s2313_s3 + $0x5c] sm:$0xf] %vm1200_vm1, %v1363_v18 }
 0x1e7   :  { %1225 = vst.msk [vmem:[%s2313_s3 + $0x60] sm:$0xf] %vm1200_vm1, %v1364_v31 }

// kernel: encoder_forward.6
= control target key start
LH: loop header
LB: loop body
LE: loop exit
PB: predicated region body
PF: predicated region fallthrough
CT: control target
= control target key end

     0   :  { %v1453_v1 = vmov 0.0   ;;  %vm1454_vm0 = vmmov 0   ;;  %vm399_vm1 = vcmask 261120   ;;  %vm711_vm2 = vcmask 523264   ;;  %s2057_s1 = inlined_call_operand.vmem [shape: bf16[288,64], index: 1, kind: input, shape index: {}]   ;;  %s2058_s0 = inlined_call_operand.vmem [shape: bf16[200,288], index: 0, kind: input, shape index: {}]   ;;  %s2059_s2 = inlined_call_operand.vmem [shape: f32[2,64], index: 2, kind: input, shape index: {}]   ;;  %s2060_s3 = inlined_call_operand.vmem [shape: bf16[200,64], index: 3, kind: output, shape index: {}]  }
   0x1   :  { %v1382_v0 = vld [vmem:[%s2057_s1 + $0x40] sm:$0xff]   ;;  %1324 = vmatprep.subr.bf16.mxu1 %v1453_v1  ;;  %1328 = vmatprep.mubr.msk.bf16.mxu1 %vm1454_vm0, %v1453_v1  ;;  %v1384_v3 = vld [vmem:[%s2057_s1 + $0x48] sm:$0xff]   ;;  %v1386_v5 = vld [vmem:[%s2057_s1 + $0x50] sm:$0xff]   ;;  %vm1064_vm3 = vcmask 519168  }
   0x2   :  { %v1383_v2 = vld [vmem:[%s2057_s1] sm:$0xff]   ;;  %1215 = vmatprep.subr.bf16.mxu0 %v1382_v0  ;;  %v1385_v4 = vld [vmem:[%s2057_s1 + $0x8] sm:$0xff]   ;;  %v1387_v6 = vld [vmem:[%s2057_s1 + $0x10] sm:$0xff]  }
   0x3   :  { %1216 = vmatpush3.bf16.msra.mxu0 %v1383_v2  ;;  %v1388_v7 = vld [vmem:[%s2057_s1 + $0x58] sm:$0xff]   ;;  %v1390_v9 = vld [vmem:[%s2057_s1 + $0x60] sm:$0xff]   ;;  %v1392_v12 = vld [vmem:[%s2057_s1 + $0x68] sm:$0xff]  }
   0x4   :  { %1217 = vmatprep.subr.bf16.mxu0 %v1384_v3  ;;  %v1389_v8 = vld [vmem:[%s2057_s1 + $0x18] sm:$0xff]   ;;  %v1396_v10 = vld [vmem:[%s2057_s1 + $0x80] sm:$0xff]   ;;  %v1393_v13 = vld [vmem:[%s2057_s1 + $0x28] sm:$0xff]  }
   0x5   :  { %v1391_v11 = vld [vmem:[%s2057_s1 + $0x20] sm:$0xff]   ;;  %1325 = vmatpush3.bf16.msra.mxu1 %v1396_v10  ;;  %v1399_v14 = vld [vmem:[%s2057_s1 + $0x88] sm:$0xff]   ;;  %v1394_v15 = vld [vmem:[%s2057_s1 + $0x70] sm:$0xff]  }
   0x6   :  { %1326 = vmatprep.subr.bf16.mxu1 %v1453_v1  ;;  %v1402_v16 = vld [vmem:[%s2058_s0 + $0x4] ss:$12 sps:$4 sm:$0xff]   ;;  %v1403_v17 = vld [vmem:[%s2058_s0 + $0x8] ss:$12 sps:$4 sm:$0xff]   ;;  %v1397_v19 = vld [vmem:[%s2057_s1 + $0x78] sm:$0xff]  }
   0x7   :  { %1218 = vmatpush3.bf16.msra.mxu0 %v1385_v4  ;;  %471 = vmatprep.mubr.bf16.mxu0 %v1402_v16  ;;  %v1395_v18 = vld [vmem:[%s2057_s1 + $0x30] sm:$0xff]   ;;  %v1398_v20 = vld [vmem:[%s2057_s1 + $0x38] sm:$0xff]   ;;  %v1407_v21 = vld [vmem:[%s2058_s0 + $0x20] ss:$12 sps:$4 sm:$0xff]  }
   0x8   :  { %1219 = vmatprep.subr.bf16.mxu0 %v1386_v5  ;;  %v1400_v22 = vld [vmem:[%s2058_s0] ss:$12 sps:$4 sm:$0xff]   ;;  %v1404_v23 = vld [vmem:[%s2058_s0 + $0x1c] ss:$12 sps:$4 sm:$0xff]   ;;  %v1411_v24 = vld [vmem:[%s2058_s0 + $0x38] ss:$12 sps:$4 sm:$0xff]  }
   0x9   :  { %1327 = vmatpush3.bf16.msra.mxu1 %v1399_v14  ;;  %v1406_v25 = vld [vmem:[%s2058_s0 + $0x18] ss:$12 sps:$4 sm:$0xff]   ;;  %v1408_v26 = vld [vmem:[%s2058_s0 + $0x34] ss:$12 sps:$4 sm:$0xff]   ;;  %v1415_v27 = vld [vmem:[%s2058_s0 + $0x50] ss:$12 sps:$4 sm:$0xff]  }
   0xa   :  { %v1410_v28 = vld [vmem:[%s2058_s0 + $0x30] ss:$12 sps:$4 sm:$0xff]   ;;  %v1412_v29 = vld [vmem:[%s2058_s0 + $0x4c] ss:$12 sps:$4 sm:$0xff]   ;;  %v1419_v30 = vld [vmem:[%s2058_s0 + $0x68] ss:$12 sps:$4 sm:$0xff]  }
   0xb   :  { %1220 = vmatpush3.bf16.msra.mxu0 %v1387_v6  ;;  %v1414_v31 = vld [vmem:[%s2058_s0 + $0x48] ss:$12 sps:$4 sm:$0xff]   ;;  %v1416_v32 = vld [vmem:[%s2058_s0 + $0x64] ss:$12 sps:$4 sm:$0xff]   ;;  %v1423_v33 = vld [vmem:[%s2058_s0 + $0x80] ss:$12 sps:$4 sm:$0xff]  }
   0xc   :  { %1221 = vmatprep.subr.bf16.mxu0 %v1388_v7  ;;  %1329 = vmatmul.mubr.msk.bf16.vlgmr.msra.gmra.mrb[0].mxu1 %vm399_vm1, %v1403_v17  ;;  %v1418_v34 = vld [vmem:[%s2058_s0 + $0x60] ss:$12 sps:$4 sm:$0xff]   ;;  %v1420_v35 = vld [vmem:[%s2058_s0 + $0x7c] ss:$12 sps:$4 sm:$0xff]   ;;  %v1427_v36 = vld [vmem:[%s2058_s0 + $0x98] ss:$12 sps:$4 sm:$0xff]  }
   0xd   :  { %1332 = vmatprep.mubr.msk.bf16.mxu1 %vm1454_vm0, %v1453_v1  ;;  %v1422_v37 = vld [vmem:[%s2058_s0 + $0x78] ss:$12 sps:$4 sm:$0xff]   ;;  %v1424_v38 = vld [vmem:[%s2058_s0 + $0x94] ss:$12 sps:$4 sm:$0xff]   ;;  %v1431_v39 = vld [vmem:[%s2058_s0 + $0xb0] ss:$12 sps:$4 sm:$0xff]  }
   0xe   :  { %v1426_v40 = vld [vmem:[%s2058_s0 + $0x90] ss:$12 sps:$4 sm:$0xff]   ;;  %v1428_v41 = vld [vmem:[%s2058_s0 + $0xac] ss:$12 sps:$4 sm:$0xff]   ;;  %v1435_v42 = vld [vmem:[%s2058_s0 + $0xc8] ss:$12 sps:$4 sm:$0xff]  }
   0xf   :  { %1222 = vmatpush3.bf16.msra.mxu0 %v1389_v8  ;;  %v1430_v43 = vld [vmem:[%s2058_s0 + $0xa8] ss:$12 sps:$4 sm:$0xff]   ;;  %v1432_v44 = vld [vmem:[%s2058_s0 + $0xc4] ss:$12 sps:$4 sm:$0xff]   ;;  %v1439_v45 = vld [vmem:[%s2058_s0 + $0xe0] ss:$12 sps:$4 sm:$0xff]  }
  0x10   :  { %1223 = vmatprep.subr.bf16.mxu0 %v1390_v9  ;;  %v1434_v46 = vld [vmem:[%s2058_s0 + $0xc0] ss:$12 sps:$4 sm:$0xff]   ;;  %v1436_v47 = vld [vmem:[%s2058_s0 + $0xdc] ss:$12 sps:$4 sm:$0xff]   ;;  %v1443_v48 = vld [vmem:[%s2058_s0 + $0xf8] ss:$12 sps:$4 sm:$0xff]  }
  0x11   :  { %v1438_v49 = vld [vmem:[%s2058_s0 + $0xd8] ss:$12 sps:$4 sm:$0xff]   ;;  %v1440_v50 = vld [vmem:[%s2058_s0 + $0xf4] ss:$12 sps:$4 sm:$0xff]   ;;  %v1447_v51 = vld [vmem:[%s2058_s0 + $0x110] ss:$12 sps:$4 sm:$0xff]  }
  0x12   :  { %v1442_v52 = vld [vmem:[%s2058_s0 + $0xf0] ss:$12 sps:$4 sm:$0xff]   ;;  %v1444_v53 = vld [vmem:[%s2058_s0 + $0x10c] ss:$12 sps:$4 sm:$0xff]   ;;  %v1450_v54 = vld [vmem:[%s2058_s0 + $0x128] ss:$0 sps:$4 sm:$0xff]  }
  0x13   :  { %1224 = vmatpush3.bf16.msra.mxu0 %v1391_v11  ;;  %v63_v55 = vld [vmem:[%s2058_s0 + $0x120] sm:$0xff]  ;;  %v1446_v56 = vld [vmem:[%s2058_s0 + $0x108] ss:$12 sps:$4 sm:$0xff]  }
  0x14   :  { %1225 = vmatprep.subr.bf16.mxu0 %v1392_v12  ;;  %1333 = vmatmul.mubr.msk.bf16.gmra.mrb[4].mxu1 %vm399_vm1, %v1407_v21  ;;  %v1131_v57 = vcombine.high %v63_v55, %v63_v55  ;;  %v1130_v58 = vcombine.low %v63_v55, %v63_v55 }
  0x15   :  { %1336 = vmatprep.mubr.msk.bf16.mxu1 %vm1454_vm0, %v1453_v1 }
  0x17   :  { %1226 = vmatpush3.bf16.msra.mxu0 %v1393_v13 }
  0x18   :  { %1227 = vmatprep.subr.bf16.mxu0 %v1394_v15 }
  0x1b   :  { %1228 = vmatpush3.bf16.msra.mxu0 %v1395_v18 }
  0x1c   :  { %1229 = vmatprep.subr.bf16.mxu0 %v1397_v19  ;;  %1337 = vmatmul.mubr.msk.bf16.gmra.mrb[8].mxu1 %vm399_vm1, %v1411_v24 }
  0x1d   :  { %1340 = vmatprep.mubr.msk.bf16.mxu1 %vm1454_vm0, %v1453_v1 }
  0x1f   :  { %1230 = vmatpush3.bf16.msra.mxu0 %v1398_v20 }
  0x22   :  { %472 = vmatmul.mubr.bf16.vlgmr.msra.gmra.mrb[0].mxu0 %v1400_v22 }
  0x23   :  { %479 = vmatprep.mubr.bf16.mxu0 %v1404_v23 }
  0x24   :  { %1341 = vmatmul.mubr.msk.bf16.gmra.mrb[12].mxu1 %vm399_vm1, %v1415_v27 }
  0x25   :  { %1344 = vmatprep.mubr.msk.bf16.mxu1 %vm1454_vm0, %v1453_v1 }
  0x2a   :  { %480 = vmatmul.mubr.bf16.gmra.mrb[4].mxu0 %v1406_v25 }
  0x2b   :  { %487 = vmatprep.mubr.bf16.mxu0 %v1408_v26 }
  0x2c   :  { %1345 = vmatmul.mubr.msk.bf16.gmra.mrb[16].mxu1 %vm399_vm1, %v1419_v30 }
  0x2d   :  { %1348 = vmatprep.mubr.msk.bf16.mxu1 %vm1454_vm0, %v1453_v1 }
  0x32   :  { %488 = vmatmul.mubr.bf16.gmra.mrb[8].mxu0 %v1410_v28 }
  0x33   :  { %495 = vmatprep.mubr.bf16.mxu0 %v1412_v29 }
  0x34   :  { %1349 = vmatmul.mubr.msk.bf16.gmra.mrb[20].mxu1 %vm399_vm1, %v1423_v33 }
  0x35   :  { %1352 = vmatprep.mubr.msk.bf16.mxu1 %vm1454_vm0, %v1453_v1 }
  0x3a   :  { %496 = vmatmul.mubr.bf16.gmra.mrb[12].mxu0 %v1414_v31 }
  0x3b   :  { %503 = vmatprep.mubr.bf16.mxu0 %v1416_v32 }
  0x3c   :  { %1353 = vmatmul.mubr.msk.bf16.gmra.mrb[24].mxu1 %vm399_vm1, %v1427_v36 }
  0x3d   :  { %1356 = vmatprep.mubr.msk.bf16.mxu1 %vm1454_vm0, %v1453_v1 }
  0x42   :  { %504 = vmatmul.mubr.bf16.gmra.mrb[16].mxu0 %v1418_v34 }
  0x43   :  { %511 = vmatprep.mubr.bf16.mxu0 %v1420_v35 }
  0x44   :  { %1357 = vmatmul.mubr.msk.bf16.gmra.mrb[28].mxu1 %vm399_vm1, %v1431_v39 }
  0x45   :  { %1360 = vmatprep.mubr.msk.bf16.mxu1 %vm1454_vm0, %v1453_v1 }
  0x4a   :  { %512 = vmatmul.mubr.bf16.gmra.mrb[20].mxu0 %v1422_v37 }
  0x4b   :  { %519 = vmatprep.mubr.bf16.mxu0 %v1424_v38 }
  0x4c   :  { %1361 = vmatmul.mubr.msk.bf16.gmra.mrb[32].mxu1 %vm399_vm1, %v1435_v42 }
  0x4d   :  { %1364 = vmatprep.mubr.msk.bf16.mxu1 %vm1454_vm0, %v1453_v1 }
  0x52   :  { %520 = vmatmul.mubr.bf16.gmra.mrb[24].mxu0 %v1426_v40 }
  0x53   :  { %527 = vmatprep.mubr.bf16.mxu0 %v1428_v41 }
  0x54   :  { %1365 = vmatmul.mubr.msk.bf16.gmra.mrb[36].mxu1 %vm399_vm1, %v1439_v45 }
  0x55   :  { %1368 = vmatprep.mubr.msk.bf16.mxu1 %vm1454_vm0, %v1453_v1 }
  0x5a   :  { %528 = vmatmul.mubr.bf16.gmra.mrb[28].mxu0 %v1430_v43 }
  0x5b   :  { %535 = vmatprep.mubr.bf16.mxu0 %v1432_v44 }
  0x5c   :  { %1369 = vmatmul.mubr.msk.bf16.gmra.mrb[40].mxu1 %vm399_vm1, %v1443_v48 }
  0x5d   :  { %1372 = vmatprep.mubr.msk.bf16.mxu1 %vm1454_vm0, %v1453_v1 }
  0x62   :  { %536 = vmatmul.mubr.bf16.gmra.mrb[32].mxu0 %v1434_v46 }
  0x63   :  { %543 = vmatprep.mubr.bf16.mxu0 %v1436_v47 }
  0x64   :  { %1373 = vmatmul.mubr.msk.bf16.gmra.mrb[44].mxu1 %vm399_vm1, %v1447_v51 }
  0x65   :  { %1376 = vmatprep.mubr.msk.bf16.mxu1 %vm1454_vm0, %v1453_v1 }
  0x6a   :  { %544 = vmatmul.mubr.bf16.gmra.mrb[36].mxu0 %v1438_v49 }
  0x6b   :  { %551 = vmatprep.mubr.bf16.mxu0 %v1440_v50 }
  0x6c   :  { %1377 = vmatmul.mubr.msk.bf16.gmra.mrb[48].mxu1 %vm399_vm1, %v1450_v54 }
  0x72   :  { %552 = vmatmul.mubr.bf16.gmra.mrb[40].mxu0 %v1442_v52 }
  0x73   :  { %559 = vmatprep.mubr.bf16.mxu0 %v1444_v53 }
  0x7a   :  { %560 = vmatmul.mubr.bf16.gmra.mrb[44].mxu0 %v1446_v56 }
  0x7b   :  { %567 = vmatprep.mubr.bf16.mxu0 %v1131_v57 }
  0x82   :  { %568 = vmatmul.mubr.bf16.gmra.mrb[48].mxu0 %v1130_v58 }
  0xdf   :  { %v609_v59 = vpop.f32.mrb[0].mxu1 }
  0xe0   :  { %v1330_v60 = vpop.f32.mrb[1].mxu1 }
  0xe1   :  { %v612_v61 = vpop.f32.mrb[2].mxu1 }
  0xe2   :  { %v1331_v62 = vpop.f32.mrb[3].mxu1 }
  0xe7   :  { %v617_v63 = vpop.f32.mrb[4].mxu1 }
  0xe8   :  { %v1334_v0 = vpop.f32.mrb[5].mxu1 }
  0xe9   :  { %v620_v1 = vpop.f32.mrb[6].mxu1 }
  0xea   :  { %v1335_v3 = vpop.f32.mrb[7].mxu1 }
  0xef   :  { %v625_v10 = vpop.f32.mrb[8].mxu1 }
  0xf0   :  { %v1338_v12 = vpop.f32.mrb[9].mxu1 }
  0xf1   :  { %v628_v13 = vpop.f32.mrb[10].mxu1 }
  0xf2   :  { %v1339_v17 = vpop.f32.mrb[11].mxu1 }
  0xf5   :  { %v1231_v2 = vpop.f32.mrb[0].mxu0 }
  0xf6   :  { %v1232_v4 = vpop.f32.mrb[1].mxu0 }
  0xf7   :  { %v1233_v5 = vadd.f32 %v1232_v4, %v1231_v2  ;;  %v1234_v6 = vpop.f32.mrb[2].mxu0  ;;  %v633_v25 = vpop.f32.mrb[12].mxu1 }
  0xf8   :  { %v1235_v7 = vpop.f32.mrb[3].mxu0  ;;  %v1342_v28 = vpop.f32.mrb[13].mxu1 }
  0xf9   :  { %v1684_v8 = vadd.f32 %v1233_v5, %v609_v59  ;;  %v1236_v9 = vadd.f32 %v1235_v7, %v1234_v6  ;;  %v636_v30 = vpop.f32.mrb[14].mxu1 }
  0xfa   :  { %v1343_v33 = vpop.f32.mrb[15].mxu1 }
  0xfb   :  { %v1686_v11 = vadd.f32 %v1236_v9, %v612_v61  ;;  %v712_v14 = vsel %vm711_vm2, %v1684_v8, 0.0 }
  0xfd   :  { %v713_v15 = vsel %vm711_vm2, %v1686_v11, 0.0  ;;  %v1237_v16 = vpop.f32.mrb[4].mxu0 }
  0xfe   :  { %v714_v18 = vadd.f32 %v713_v15, %v712_v14  ;;  %v1238_v19 = vpop.f32.mrb[5].mxu0 }
  0xff   :  { %v1239_v20 = vadd.f32 %v1238_v19, %v1237_v16  ;;  %v1240_v21 = vpop.f32.mrb[6].mxu0  ;;  %v641_v41 = vpop.f32.mrb[16].mxu1 }
 0x100   :  { %v1241_v22 = vpop.f32.mrb[7].mxu0  ;;  %v1346_v44 = vpop.f32.mrb[17].mxu1 }
 0x101   :  { %v1692_v23 = vadd.f32 %v1239_v20, %v617_v63  ;;  %v1242_v24 = vadd.f32 %v1241_v22, %v1240_v21  ;;  %v644_v46 = vpop.f32.mrb[18].mxu1 }
 0x102   :  { %v1347_v49 = vpop.f32.mrb[19].mxu1 }
 0x103   :  { %v715_v26 = vsel %vm711_vm2, %v1692_v23, 0.0  ;;  %v1696_v27 = vadd.f32 %v1242_v24, %v620_v1 }
 0x104   :  { %v716_v29 = vadd.f32 %v715_v26, %v714_v18 }
 0x105   :  { %v717_v31 = vsel %vm711_vm2, %v1696_v27, 0.0  ;;  %v1243_v32 = vpop.f32.mrb[8].mxu0 }
 0x106   :  { %v718_v34 = vadd.f32 %v717_v31, %v716_v29  ;;  %v1244_v35 = vpop.f32.mrb[9].mxu0 }
 0x107   :  { %v1245_v36 = vadd.f32 %v1244_v35, %v1243_v32  ;;  %v1246_v37 = vpop.f32.mrb[10].mxu0  ;;  %v649_v57 = vpop.f32.mrb[20].mxu1 }
 0x108   :  { %v1247_v38 = vpop.f32.mrb[11].mxu0  ;;  %v1350_v60 = vpop.f32.mrb[21].mxu1 }
 0x109   :  { %v1700_v39 = vadd.f32 %v1245_v36, %v625_v10  ;;  %v1248_v40 = vadd.f32 %v1247_v38, %v1246_v37  ;;  %v652_v62 = vpop.f32.mrb[22].mxu1 }
 0x10a   :  { %v1351_v1 = vpop.f32.mrb[23].mxu1 }
 0x10b   :  { %v719_v42 = vsel %vm711_vm2, %v1700_v39, 0.0  ;;  %v1704_v43 = vadd.f32 %v1248_v40, %v628_v13 }
 0x10c   :  { %v720_v45 = vadd.f32 %v719_v42, %v718_v34 }
 0x10d   :  { %v721_v47 = vsel %vm711_vm2, %v1704_v43, 0.0  ;;  %v1249_v48 = vpop.f32.mrb[12].mxu0 }
 0x10e   :  { %v722_v50 = vadd.f32 %v721_v47, %v720_v45  ;;  %v1250_v51 = vpop.f32.mrb[13].mxu0 }
 0x10f   :  { %v1251_v52 = vadd.f32 %v1250_v51, %v1249_v48  ;;  %v1252_v53 = vpop.f32.mrb[14].mxu0  ;;  %v657_v10 = vpop.f32.mrb[24].mxu1 }
 0x110   :  { %v1253_v54 = vpop.f32.mrb[15].mxu0  ;;  %v1354_v14 = vpop.f32.mrb[25].mxu1 }
 0x111   :  { %v1708_v55 = vadd.f32 %v1251_v52, %v633_v25  ;;  %v1254_v56 = vadd.f32 %v1253_v54, %v1252_v53  ;;  %v660_v16 = vpop.f32.mrb[26].mxu1 }
 0x112   :  { %v1355_v19 = vpop.f32.mrb[27].mxu1 }
 0x113   :  { %v723_v58 = vsel %vm711_vm2, %v1708_v55, 0.0  ;;  %v1712_v59 = vadd.f32 %v1254_v56, %v636_v30 }
 0x114   :  { %v724_v61 = vadd.f32 %v723_v58, %v722_v50 }
 0x115   :  { %v725_v63 = vsel %vm711_vm2, %v1712_v59, 0.0  ;;  %v1255_v0 = vpop.f32.mrb[16].mxu0 }
 0x116   :  { %v726_v2 = vadd.f32 %v725_v63, %v724_v61  ;;  %v1256_v3 = vpop.f32.mrb[17].mxu0 }
 0x117   :  { %v1257_v4 = vadd.f32 %v1256_v3, %v1255_v0  ;;  %v1258_v5 = vpop.f32.mrb[18].mxu0  ;;  %v665_v29 = vpop.f32.mrb[28].mxu1 }
 0x118   :  { %v1259_v6 = vpop.f32.mrb[19].mxu0  ;;  %v1358_v32 = vpop.f32.mrb[29].mxu1 }
 0x119   :  { %v1716_v7 = vadd.f32 %v1257_v4, %v641_v41  ;;  %v1260_v9 = vadd.f32 %v1259_v6, %v1258_v5  ;;  %v668_v34 = vpop.f32.mrb[30].mxu1 }
 0x11a   :  { %v1359_v37 = vpop.f32.mrb[31].mxu1 }
 0x11b   :  { %v727_v12 = vsel %vm711_vm2, %v1716_v7, 0.0  ;;  %v1720_v13 = vadd.f32 %v1260_v9, %v644_v46 }
 0x11c   :  { %v728_v15 = vadd.f32 %v727_v12, %v726_v2 }
 0x11d   :  { %v729_v17 = vsel %vm711_vm2, %v1720_v13, 0.0  ;;  %v1261_v18 = vpop.f32.mrb[20].mxu0 }
 0x11e   :  { %v730_v20 = vadd.f32 %v729_v17, %v728_v15  ;;  %v1262_v21 = vpop.f32.mrb[21].mxu0 }
 0x11f   :  { %v1263_v22 = vadd.f32 %v1262_v21, %v1261_v18  ;;  %v1264_v24 = vpop.f32.mrb[22].mxu0  ;;  %v673_v47 = vpop.f32.mrb[32].mxu1 }
 0x120   :  { %v1265_v25 = vpop.f32.mrb[23].mxu0  ;;  %v1362_v50 = vpop.f32.mrb[33].mxu1 }
 0x121   :  { %v1724_v26 = vadd.f32 %v1263_v22, %v649_v57  ;;  %v1266_v28 = vadd.f32 %v1265_v25, %v1264_v24  ;;  %v676_v52 = vpop.f32.mrb[34].mxu1 }
 0x122   :  { %v1363_v56 = vpop.f32.mrb[35].mxu1 }
 0x123   :  { %v731_v30 = vsel %vm711_vm2, %v1724_v26, 0.0  ;;  %v1728_v31 = vadd.f32 %v1266_v28, %v652_v62 }
 0x124   :  { %v732_v33 = vadd.f32 %v731_v30, %v730_v20 }
 0x125   :  { %v733_v35 = vsel %vm711_vm2, %v1728_v31, 0.0  ;;  %v1267_v36 = vpop.f32.mrb[24].mxu0 }
 0x126   :  { %v734_v38 = vadd.f32 %v733_v35, %v732_v33  ;;  %v1268_v40 = vpop.f32.mrb[25].mxu0 }
 0x127   :  { %v1269_v41 = vadd.f32 %v1268_v40, %v1267_v36  ;;  %v1270_v42 = vpop.f32.mrb[26].mxu0  ;;  %v681_v1 = vpop.f32.mrb[36].mxu1 }
 0x128   :  { %v1271_v44 = vpop.f32.mrb[27].mxu0  ;;  %v1366_v4 = vpop.f32.mrb[37].mxu1 }
 0x129   :  { %v1732_v45 = vadd.f32 %v1269_v41, %v657_v10  ;;  %v1272_v46 = vadd.f32 %v1271_v44, %v1270_v42  ;;  %v684_v6 = vpop.f32.mrb[38].mxu1 }
 0x12a   :  { %v1367_v12 = vpop.f32.mrb[39].mxu1 }
 0x12b   :  { %v735_v48 = vsel %vm711_vm2, %v1732_v45, 0.0  ;;  %v1736_v49 = vadd.f32 %v1272_v46, %v660_v16 }
 0x12c   :  { %v736_v51 = vadd.f32 %v735_v48, %v734_v38 }
 0x12d   :  { %v737_v53 = vsel %vm711_vm2, %v1736_v49, 0.0  ;;  %v1273_v54 = vpop.f32.mrb[28].mxu0 }
 0x12e   :  { %v738_v57 = vadd.f32 %v737_v53, %v736_v51  ;;  %v1274_v58 = vpop.f32.mrb[29].mxu0 }
 0x12f   :  { %v1275_v60 = vadd.f32 %v1274_v58, %v1273_v54  ;;  %v1276_v61 = vpop.f32.mrb[30].mxu0  ;;  %v689_v21 = vpop.f32.mrb[40].mxu1 }
 0x130   :  { %v1277_v62 = vpop.f32.mrb[31].mxu0  ;;  %v1370_v25 = vpop.f32.mrb[41].mxu1 }
 0x131   :  { %v1740_v63 = vadd.f32 %v1275_v60, %v665_v29  ;;  %v1278_v0 = vadd.f32 %v1277_v62, %v1276_v61  ;;  %v692_v29 = vpop.f32.mrb[42].mxu1 }
 0x132   :  { %v1371_v33 = vpop.f32.mrb[43].mxu1 }
 0x133   :  { %v739_v2 = vsel %vm711_vm2, %v1740_v63, 0.0  ;;  %v1744_v3 = vadd.f32 %v1278_v0, %v668_v34 }
 0x134   :  { %v740_v5 = vadd.f32 %v739_v2, %v738_v57 }
 0x135   :  { %v741_v9 = vsel %vm711_vm2, %v1744_v3, 0.0  ;;  %v1279_v10 = vpop.f32.mrb[32].mxu0 }
 0x136   :  { %v742_v14 = vadd.f32 %v741_v9, %v740_v5  ;;  %v1280_v15 = vpop.f32.mrb[33].mxu0 }
 0x137   :  { %v1281_v16 = vadd.f32 %v1280_v15, %v1279_v10  ;;  %v1282_v17 = vpop.f32.mrb[34].mxu0  ;;  %v697_v42 = vpop.f32.mrb[44].mxu1 }
 0x138   :  { %v1283_v18 = vpop.f32.mrb[35].mxu0 }
 0x139   :  { %v1748_v19 = vadd.f32 %v1281_v16, %v673_v47  ;;  %v1284_v20 = vadd.f32 %v1283_v18, %v1282_v17  ;;  %v1374_v47 = vpop.f32.mrb[45].mxu1 }
 0x13a   :  { %v700_v50 = vpop.f32.mrb[46].mxu1 }
 0x13b   :  { %v743_v22 = vsel %vm711_vm2, %v1748_v19, 0.0  ;;  %v1752_v24 = vadd.f32 %v1284_v20, %v676_v52  ;;  %v1375_v53 = vpop.f32.mrb[47].mxu1 }
 0x13c   :  { %v744_v28 = vadd.f32 %v743_v22, %v742_v14 }
 0x13d   :  { %v745_v30 = vsel %vm711_vm2, %v1752_v24, 0.0  ;;  %v1285_v32 = vpop.f32.mrb[36].mxu0 }
 0x13e   :  { %v746_v34 = vadd.f32 %v745_v30, %v744_v28  ;;  %v1286_v35 = vpop.f32.mrb[37].mxu0 }
 0x13f   :  { %v1287_v36 = vadd.f32 %v1286_v35, %v1285_v32  ;;  %v1288_v37 = vpop.f32.mrb[38].mxu0  ;;  %v705_v0 = vpop.f32.mrb[48].mxu1 }
 0x140   :  { %v1289_v38 = vpop.f32.mrb[39].mxu0  ;;  %v1378_v4 = vpop.f32.mrb[49].mxu1 }
 0x141   :  { %v1756_v40 = vadd.f32 %v1287_v36, %v681_v1  ;;  %v1290_v41 = vadd.f32 %v1289_v38, %v1288_v37 }
 0x143   :  { %v747_v44 = vsel %vm711_vm2, %v1756_v40, 0.0  ;;  %v1760_v46 = vadd.f32 %v1290_v41, %v684_v6  ;;  %v708_v6 = vpop.f32.mrb[50].mxu1 }
 0x144   :  { %v748_v48 = vadd.f32 %v747_v44, %v746_v34  ;;  %v1379_v12 = vpop.f32.mrb[51].mxu1 }
 0x145   :  { %v749_v51 = vsel %vm711_vm2, %v1760_v46, 0.0  ;;  %v1291_v52 = vpop.f32.mrb[40].mxu0 }
 0x146   :  { %v750_v54 = vadd.f32 %v749_v51, %v748_v48  ;;  %v1292_v56 = vpop.f32.mrb[41].mxu0 }
 0x147   :  { %v1293_v57 = vadd.f32 %v1292_v56, %v1291_v52  ;;  %v1294_v58 = vpop.f32.mrb[42].mxu0 }
 0x148   :  { %v1295_v60 = vpop.f32.mrb[43].mxu0 }
 0x149   :  { %v690_v61 = vadd.f32 %v1293_v57, %v689_v21  ;;  %v1296_v62 = vadd.f32 %v1295_v60, %v1294_v58 }
 0x14b   :  { %v751_v1 = vsel %vm711_vm2, %v690_v61, 0.0  ;;  %v693_v2 = vadd.f32 %v1296_v62, %v692_v29 }
 0x14c   :  { %v752_v5 = vadd.f32 %v751_v1, %v750_v54 }
 0x14d   :  { %v753_v9 = vsel %vm711_vm2, %v693_v2, 0.0  ;;  %v1297_v10 = vpop.f32.mrb[44].mxu0 }
 0x14e   :  { %v754_v14 = vadd.f32 %v753_v9, %v752_v5  ;;  %v1298_v15 = vpop.f32.mrb[45].mxu0 }
 0x14f   :  { %v1299_v16 = vadd.f32 %v1298_v15, %v1297_v10  ;;  %v1300_v17 = vpop.f32.mrb[46].mxu0 }
 0x150   :  { %v1301_v18 = vpop.f32.mrb[47].mxu0 }
 0x151   :  { %v698_v20 = vadd.f32 %v1299_v16, %v697_v42  ;;  %v1302_v22 = vadd.f32 %v1301_v18, %v1300_v17 }
 0x153   :  { %v755_v21 = vsel %vm711_vm2, %v698_v20, 0.0  ;;  %v701_v25 = vadd.f32 %v1302_v22, %v700_v50 }
 0x154   :  { %v756_v28 = vadd.f32 %v755_v21, %v754_v14 }
 0x155   :  { %v757_v29 = vsel %vm711_vm2, %v701_v25, 0.0  ;;  %v1303_v30 = vpop.f32.mrb[48].mxu0 }
 0x156   :  { %v758_v32 = vadd.f32 %v757_v29, %v756_v28  ;;  %v1304_v33 = vpop.f32.mrb[49].mxu0 }
 0x157   :  { %v1305_v34 = vadd.f32 %v1304_v33, %v1303_v30  ;;  %v1306_v35 = vpop.f32.mrb[50].mxu0 }
 0x158   :  { %v1307_v36 = vpop.f32.mrb[51].mxu0 }
 0x159   :  { %v706_v37 = vadd.f32 %v1305_v34, %v705_v0 }
 0x15b   :  { %v759_v38 = vsel %vm711_vm2, %v706_v37, 0.0 }
 0x15c   :  { %v760_v41 = vadd.f32 %v759_v38, %v758_v32 }
 0x15e   :  { %v761_v44 = vrot.slane %v760_v41, 4 }
 0x160   :  { %v762_v47 = vadd.f32 %v761_v44, %v760_v41 }
 0x162   :  { %v763_v42 = vrot.slane %v762_v47, 2 }
 0x164   :  { %v764_v48 = vadd.f32 %v763_v42, %v762_v47 }
 0x166   :  { %v765_v51 = vrot.slane %v764_v48, 1 }
 0x168   :  { %v766_v52 = vadd.f32 %v765_v51, %v764_v48 }
 0x16a   :  { %v768_v50 = vmul.f32 0.005, %v766_v52 }
 0x16c   :  { %v1770_v53 = vsub.f32 %v1684_v8, %v768_v50  ;;  %v1773_v54 = vsub.f32 %v1686_v11, %v768_v50  ;;  %v1776_v56 = vsub.f32 %v1692_v23, %v768_v50  ;;  %v1779_v57 = vsub.f32 %v1696_v27, %v768_v50 }
 0x16d   :  { %v1782_v58 = vsub.f32 %v1700_v39, %v768_v50  ;;  %v1785_v60 = vsub.f32 %v1704_v43, %v768_v50  ;;  %v1788_v62 = vsub.f32 %v1708_v55, %v768_v50  ;;  %v1791_v8 = vsub.f32 %v1712_v59, %v768_v50 }
 0x16e   :  { %v1794_v11 = vsub.f32 %v1716_v7, %v768_v50  ;;  %v1797_v23 = vsub.f32 %v1720_v13, %v768_v50  ;;  %v1800_v27 = vsub.f32 %v1724_v26, %v768_v50  ;;  %v1803_v39 = vsub.f32 %v1728_v31, %v768_v50 }
 0x16f   :  { %v1806_v43 = vsub.f32 %v1732_v45, %v768_v50  ;;  %v1809_v55 = vsub.f32 %v1736_v49, %v768_v50  ;;  %v1812_v59 = vsub.f32 %v1740_v63, %v768_v50  ;;  %v1815_v7 = vsub.f32 %v1744_v3, %v768_v50 }
 0x170   :  { %v1818_v13 = vsub.f32 %v1748_v19, %v768_v50  ;;  %v1821_v26 = vsub.f32 %v1752_v24, %v768_v50  ;;  %v1824_v31 = vsub.f32 %v1756_v40, %v768_v50  ;;  %v1827_v45 = vsub.f32 %v1760_v46, %v768_v50 }
 0x171   :  { %v1829_v49 = vsub.f32 %v690_v61, %v768_v50  ;;  %v1831_v0 = vsub.f32 %v693_v2, %v768_v50  ;;  %v1833_v63 = vsub.f32 %v698_v20, %v768_v50  ;;  %v1835_v3 = vsub.f32 %v701_v25, %v768_v50 }
 0x172   :  { %v1837_v1 = vsub.f32 %v706_v37, %v768_v50  ;;  %v794_v19 = vmul.f32 %v1770_v53, %v1770_v53  ;;  %v795_v24 = vmul.f32 %v1773_v54, %v1773_v54  ;;  %v796_v40 = vmul.f32 %v1776_v56, %v1776_v56 }
 0x173   :  { %v797_v46 = vmul.f32 %v1779_v57, %v1779_v57  ;;  %v798_v5 = vmul.f32 %v1782_v58, %v1782_v58  ;;  %v799_v10 = vmul.f32 %v1785_v60, %v1785_v60  ;;  %v800_v15 = vmul.f32 %v1788_v62, %v1788_v62 }
 0x174   :  { %v819_v61 = vsel %vm711_vm2, %v794_v19, 0.0  ;;  %v820_v2 = vsel %vm711_vm2, %v795_v24, 0.0  ;;  %v822_v6 = vsel %vm711_vm2, %v796_v40, 0.0  ;;  %v801_v18 = vmul.f32 %v1791_v8, %v1791_v8 }
 0x175   :  { %v821_v4 = vadd.f32 %v820_v2, %v819_v61  ;;  %v824_v12 = vsel %vm711_vm2, %v797_v46, 0.0  ;;  %v826_v16 = vsel %vm711_vm2, %v798_v5, 0.0  ;;  %v828_v20 = vsel %vm711_vm2, %v799_v10, 0.0 }
 0x176   :  { %v802_v21 = vmul.f32 %v1794_v11, %v1794_v11  ;;  %v830_v25 = vsel %vm711_vm2, %v800_v15, 0.0  ;;  %v803_v29 = vmul.f32 %v1797_v23, %v1797_v23  ;;  %v832_v30 = vsel %vm711_vm2, %v801_v18, 0.0 }
 0x177   :  { %v823_v9 = vadd.f32 %v822_v6, %v821_v4  ;;  %v804_v33 = vmul.f32 %v1800_v27, %v1800_v27  ;;  %v805_v36 = vmul.f32 %v1803_v39, %v1803_v39  ;;  %v806_v41 = vmul.f32 %v1806_v43, %v1806_v43 }
 0x178   :  { %v834_v34 = vsel %vm711_vm2, %v802_v21, 0.0  ;;  %v836_v37 = vsel %vm711_vm2, %v803_v29, 0.0  ;;  %v807_v42 = vmul.f32 %v1809_v55, %v1809_v55  ;;  %v808_v52 = vmul.f32 %v1812_v59, %v1812_v59 }
 0x179   :  { %v825_v14 = vadd.f32 %v824_v12, %v823_v9  ;;  %v838_v44 = vsel %vm711_vm2, %v804_v33, 0.0  ;;  %v840_v48 = vsel %vm711_vm2, %v805_v36, 0.0  ;;  %v842_v50 = vsel %vm711_vm2, %v806_v41, 0.0 }
 0x17a   :  { %v809_v24 = vmul.f32 %v1815_v7, %v1815_v7  ;;  %v844_v40 = vsel %vm711_vm2, %v807_v42, 0.0  ;;  %v810_v61 = vmul.f32 %v1818_v13, %v1818_v13  ;;  %v846_v2 = vsel %vm711_vm2, %v808_v52, 0.0 }
 0x17b   :  { %v827_v17 = vadd.f32 %v826_v16, %v825_v14  ;;  %v811_v5 = vmul.f32 %v1821_v26, %v1821_v26  ;;  %v812_v10 = vmul.f32 %v1824_v31, %v1824_v31  ;;  %v813_v15 = vmul.f32 %v1827_v45, %v1827_v45 }
 0x17c   :  { %v848_v6 = vsel %vm711_vm2, %v809_v24, 0.0  ;;  %v850_v12 = vsel %vm711_vm2, %v810_v61, 0.0  ;;  %v814_v18 = vmul.f32 %v1829_v49, %v1829_v49  ;;  %v815_v21 = vmul.f32 %v1831_v0, %v1831_v0 }
 0x17d   :  { %v829_v22 = vadd.f32 %v828_v20, %v827_v17  ;;  %v852_v16 = vsel %vm711_vm2, %v811_v5, 0.0  ;;  %v854_v20 = vsel %vm711_vm2, %v812_v10, 0.0  ;;  %v816_v29 = vmul.f32 %v1833_v63, %v1833_v63 }
 0x17e   :  { %v817_v33 = vmul.f32 %v1835_v3, %v1835_v3  ;;  %v818_v36 = vmul.f32 %v1837_v1, %v1837_v1  ;;  %v879_v61 = vlaneseq }
 0x17f   :  { %v831_v28 = vadd.f32 %v830_v25, %v829_v22  ;;  %v856_v25 = vsel %vm711_vm2, %v813_v15, 0.0 }
 0x180   :  { %v864_v41 = vsel %vm711_vm2, %v817_v33, 0.0 }
 0x181   :  { %v833_v32 = vadd.f32 %v832_v30, %v831_v28  ;;  %v858_v30 = vsel %vm711_vm2, %v814_v18, 0.0 }
 0x183   :  { %v835_v35 = vadd.f32 %v834_v34, %v833_v32  ;;  %v860_v34 = vsel %vm711_vm2, %v815_v21, 0.0 }
 0x185   :  { %v837_v38 = vadd.f32 %v836_v37, %v835_v35  ;;  %v862_v37 = vsel %vm711_vm2, %v816_v29, 0.0 }
 0x187   :  { %v839_v47 = vadd.f32 %v838_v44, %v837_v38 }
 0x189   :  { %v841_v51 = vadd.f32 %v840_v48, %v839_v47  ;;  %v866_v47 = vsel %vm711_vm2, %v818_v36, 0.0 }
 0x18b   :  { %v843_v19 = vadd.f32 %v842_v50, %v841_v51 }
 0x18d   :  { %v845_v46 = vadd.f32 %v844_v40, %v843_v19 }
 0x18f   :  { %v847_v4 = vadd.f32 %v846_v2, %v845_v46  ;;  %v880_v2 = vshrl.u32 %v879_v61, 7 }
 0x191   :  { %v849_v9 = vadd.f32 %v848_v6, %v847_v4  ;;  %v875_v4 = vld [vmem:[%s2059_s2] sm:$0x1]  ;;  %v881_v5 = vsub.s32 0, %v880_v2 }
 0x193   :  { %v851_v14 = vadd.f32 %v850_v12, %v849_v9 }
 0x195   :  { %v853_v17 = vadd.f32 %v852_v16, %v851_v14 }
 0x197   :  { %v855_v22 = vadd.f32 %v854_v20, %v853_v17 }
 0x199   :  { %v857_v28 = vadd.f32 %v856_v25, %v855_v22 }
 0x19b   :  { %v859_v32 = vadd.f32 %v858_v30, %v857_v28 }
 0x19d   :  { %v861_v35 = vadd.f32 %v860_v34, %v859_v32 }
 0x19f   :  { %v863_v38 = vadd.f32 %v862_v37, %v861_v35 }
 0x1a1   :  { %v865_v44 = vadd.f32 %v864_v41, %v863_v38 }
 0x1a3   :  { %v867_v42 = vadd.f32 %v866_v47, %v865_v44 }
 0x1a5   :  { %v868_v48 = vrot.slane %v867_v42, 4 }
 0x1a7   :  { %v869_v51 = vadd.f32 %v868_v48, %v867_v42 }
 0x1a9   :  { %v870_v52 = vrot.slane %v869_v51, 2 }
 0x1ab   :  { %v871_v50 = vadd.f32 %v870_v52, %v869_v51 }
 0x1ad   :  { %v872_v19 = vrot.slane %v871_v50, 1 }
 0x1af   :  { %v873_v24 = vadd.f32 %v872_v19, %v871_v50 }
 0x1b1   :  { %v874_v40 = vmul.f32 0.005, %v873_v24 }
 0x1b3   :  { %v876_v46 = vadd.f32 1e-05, %v874_v40 }
 0x1b5   :  { %1451 = vrsqrt.f32 %v876_v46 }
 0x1bf   :  { %v1452_v6 = vpop.eup %1451 }
 0x1c0   :  { %v878_v9 = vmul.f32 %v1452_v6, %v875_v4 }
 0x1c2   :  { %v882_v10 = vrot.slane %v878_v9, %v881_v5 }
 0x1c4   :  { %v883_v12 = vmul.f32 %v882_v10, %v1770_v53  ;;  %v884_v14 = vmul.f32 %v882_v10, %v1773_v54  ;;  %v885_v15 = vmul.f32 %v882_v10, %v1776_v56  ;;  %v886_v16 = vmul.f32 %v882_v10, %v1779_v57 }
 0x1c5   :  { %v887_v17 = vmul.f32 %v882_v10, %v1782_v58  ;;  %v888_v18 = vmul.f32 %v882_v10, %v1785_v60  ;;  %v889_v20 = vmul.f32 %v882_v10, %v1788_v62  ;;  %v890_v22 = vmul.f32 %v882_v10, %v1791_v8  ;;  %v1164_v62 = vld [vmem:[%s2059_s2 + $0x1] ss:$0 sm:$0xff] }
 0x1c6   :  { %v891_v21 = vmul.f32 %v882_v10, %v1794_v11  ;;  %v892_v25 = vmul.f32 %v882_v10, %v1797_v23  ;;  %v893_v53 = vmul.f32 %v882_v10, %v1800_v27  ;;  %v894_v54 = vmul.f32 %v882_v10, %v1803_v39 }
 0x1c7   :  { %v895_v56 = vmul.f32 %v882_v10, %v1806_v43  ;;  %v896_v57 = vmul.f32 %v882_v10, %v1809_v55  ;;  %v897_v58 = vmul.f32 %v882_v10, %v1812_v59  ;;  %v898_v60 = vmul.f32 %v882_v10, %v1815_v7 }
 0x1c8   :  { %v899_v8 = vmul.f32 %v882_v10, %v1818_v13  ;;  %v900_v11 = vmul.f32 %v882_v10, %v1821_v26  ;;  %v901_v23 = vmul.f32 %v882_v10, %v1824_v31  ;;  %v902_v27 = vmul.f32 %v882_v10, %v1827_v45 }
 0x1c9   :  { %v903_v39 = vmul.f32 %v882_v10, %v1829_v49  ;;  %v904_v43 = vmul.f32 %v882_v10, %v1831_v0  ;;  %v905_v55 = vmul.f32 %v882_v10, %v1833_v63  ;;  %v906_v59 = vmul.f32 %v882_v10, %v1835_v3 }
 0x1ca   :  { %v907_v7 = vmul.f32 %v882_v10, %v1837_v1  ;;  %v913_v28 = vadd.f32 %v1164_v62, %v883_v12  ;;  %v914_v29 = vadd.f32 %v1164_v62, %v884_v14  ;;  %v915_v30 = vadd.f32 %v1164_v62, %v885_v15 }
 0x1cb   :  { %v916_v13 = vadd.f32 %v1164_v62, %v886_v16  ;;  %v917_v32 = vadd.f32 %v1164_v62, %v887_v17  ;;  %v918_v26 = vadd.f32 %v1164_v62, %v888_v18  ;;  %v919_v33 = vadd.f32 %v1164_v62, %v889_v20 }
 0x1cc   :  { %v920_v31 = vadd.f32 %v1164_v62, %v890_v22  ;;  %v921_v34 = vadd.f32 %v1164_v62, %v891_v21  ;;  %v922_v45 = vadd.f32 %v1164_v62, %v892_v25  ;;  %v923_v35 = vadd.f32 %v1164_v62, %v893_v53 }
 0x1cd   :  { %v924_v49 = vadd.f32 %v1164_v62, %v894_v54  ;;  %v925_v36 = vadd.f32 %v1164_v62, %v895_v56  ;;  %v926_v0 = vadd.f32 %v1164_v62, %v896_v57  ;;  %v927_v37 = vadd.f32 %v1164_v62, %v897_v58 }
 0x1ce   :  { %v928_v63 = vadd.f32 %v1164_v62, %v898_v60  ;;  %v929_v3 = vadd.f32 %v1164_v62, %v899_v8  ;;  %v930_v38 = vadd.f32 %v1164_v62, %v900_v11  ;;  %v931_v1 = vadd.f32 %v1164_v62, %v901_v23 }
 0x1cf   :  { %v932_v41 = vadd.f32 %v1164_v62, %v902_v27  ;;  %v933_v44 = vadd.f32 %v1164_v62, %v903_v39  ;;  %v1945_v47 = vadd.f32 %v1164_v62, %v904_v43  ;;  %v1947_v42 = vadd.f32 %v1164_v62, %v905_v55 }
 0x1d0   :  { %v1949_v48 = vadd.f32 %v1164_v62, %v906_v59  ;;  %v1951_v51 = vadd.f32 %v1164_v62, %v907_v7  ;;  %v938_v52 = vmax.f32 %v913_v28, 0.0  ;;  %v939_v50 = vmax.f32 %v914_v29, 0.0 }
 0x1d1   :  { %v940_v19 = vmax.f32 %v915_v30, 0.0  ;;  %v941_v24 = vmax.f32 %v916_v13, 0.0  ;;  %v942_v40 = vmax.f32 %v917_v32, 0.0  ;;  %v943_v46 = vmax.f32 %v918_v26, 0.0 }
 0x1d2   :  { %v944_v61 = vmax.f32 %v919_v33, 0.0  ;;  %v945_v2 = vmax.f32 %v920_v31, 0.0  ;;  %v946_v4 = vmax.f32 %v921_v34, 0.0  ;;  %v947_v5 = vmax.f32 %v922_v45, 0.0 }
 0x1d3   :  { %v948_v6 = vmax.f32 %v923_v35, 0.0  ;;  %v949_v9 = vmax.f32 %v924_v49, 0.0  ;;  %v950_v10 = vmax.f32 %v925_v36, 0.0  ;;  %v951_v12 = vmax.f32 %v926_v0, 0.0 }
 0x1d4   :  { %v952_v14 = vmax.f32 %v927_v37, 0.0  ;;  %v953_v15 = vmax.f32 %v928_v63, 0.0  ;;  %v954_v16 = vmax.f32 %v929_v3, 0.0  ;;  %v955_v17 = vmax.f32 %v930_v38, 0.0 }
 0x1d5   :  { %v956_v18 = vmax.f32 %v931_v1, 0.0  ;;  %v957_v20 = vmax.f32 %v932_v41, 0.0  ;;  %v958_v22 = vmax.f32 %v933_v44, 0.0  ;;  %v959_v21 = vmax.f32 %v1945_v47, 0.0 }
 0x1d6   :  { %v960_v25 = vmax.f32 %v1947_v42, 0.0  ;;  %v961_v53 = vmax.f32 %v1949_v48, 0.0  ;;  %v962_v54 = vmax.f32 %v1951_v51, 0.0  ;;  %v1190_v56 = vpack.c.bf16 %v938_v52, %v938_v52 }
 0x1d7   :  { %v1191_v57 = vpack.c.bf16 %v939_v50, %v939_v50  ;;  %v1192_v58 = vpack.c.bf16 %v940_v19, %v940_v19  ;;  %v1193_v60 = vpack.c.bf16 %v941_v24, %v941_v24  ;;  %v1194_v62 = vpack.c.bf16 %v942_v40, %v942_v40 }
 0x1d8   :  { %v1195_v8 = vpack.c.bf16 %v943_v46, %v943_v46  ;;  %v1196_v11 = vpack.c.bf16 %v944_v61, %v944_v61  ;;  %v1197_v23 = vpack.c.bf16 %v945_v2, %v945_v2  ;;  %v1198_v27 = vpack.c.bf16 %v946_v4, %v946_v4  ;;  %1065 = vst.msk [vmem:[%s2060_s3] sm:$0xf] %vm1064_vm3, %v1190_v56 }
 0x1d9   :  { %v1199_v39 = vpack.c.bf16 %v947_v5, %v947_v5  ;;  %v1200_v43 = vpack.c.bf16 %v948_v6, %v948_v6  ;;  %v1201_v55 = vpack.c.bf16 %v949_v9, %v949_v9  ;;  %v1202_v59 = vpack.c.bf16 %v950_v10, %v950_v10  ;;  %1066 = vst.msk [vmem:[%s2060_s3 + $0x4] sm:$0xf] %vm1064_vm3, %v1191_v57 }
 0x1da   :  { %1067 = vst.msk [vmem:[%s2060_s3 + $0x8] sm:$0xf] %vm1064_vm3, %v1192_v58  ;;  %1068 = vst.msk [vmem:[%s2060_s3 + $0xc] sm:$0xf] %vm1064_vm3, %v1193_v60  ;;  %v1203_v7 = vpack.c.bf16 %v951_v12, %v951_v12  ;;  %v1204_v28 = vpack.c.bf16 %v952_v14, %v952_v14  ;;  %v1205_v29 = vpack.c.bf16 %v953_v15, %v953_v15 }
 0x1db   :  { %1069 = vst.msk [vmem:[%s2060_s3 + $0x10] sm:$0xf] %vm1064_vm3, %v1194_v62  ;;  %v1206_v30 = vpack.c.bf16 %v954_v16, %v954_v16  ;;  %1070 = vst.msk [vmem:[%s2060_s3 + $0x14] sm:$0xf] %vm1064_vm3, %v1195_v8  ;;  %v1207_v13 = vpack.c.bf16 %v955_v17, %v955_v17  ;;  %v1208_v32 = vpack.c.bf16 %v956_v18, %v956_v18 }
 0x1dc   :  { %1071 = vst.msk [vmem:[%s2060_s3 + $0x18] sm:$0xf] %vm1064_vm3, %v1196_v11  ;;  %1072 = vst.msk [vmem:[%s2060_s3 + $0x1c] sm:$0xf] %vm1064_vm3, %v1197_v23  ;;  %v1209_v26 = vpack.c.bf16 %v957_v20, %v957_v20  ;;  %v1210_v33 = vpack.c.bf16 %v958_v22, %v958_v22  ;;  %v1211_v31 = vpack.c.bf16 %v959_v21, %v959_v21 }
 0x1dd   :  { %1073 = vst.msk [vmem:[%s2060_s3 + $0x20] sm:$0xf] %vm1064_vm3, %v1198_v27  ;;  %1074 = vst.msk [vmem:[%s2060_s3 + $0x24] sm:$0xf] %vm1064_vm3, %v1199_v39  ;;  %v1212_v34 = vpack.c.bf16 %v960_v25, %v960_v25  ;;  %v1213_v45 = vpack.c.bf16 %v961_v53, %v961_v53  ;;  %v1214_v35 = vpack.c.bf16 %v962_v54, %v962_v54 }
 0x1de   :  { %1075 = vst.msk [vmem:[%s2060_s3 + $0x28] sm:$0xf] %vm1064_vm3, %v1200_v43  ;;  %1076 = vst.msk [vmem:[%s2060_s3 + $0x2c] sm:$0xf] %vm1064_vm3, %v1201_v55 }
 0x1df   :  { %1077 = vst.msk [vmem:[%s2060_s3 + $0x30] sm:$0xf] %vm1064_vm3, %v1202_v59  ;;  %1078 = vst.msk [vmem:[%s2060_s3 + $0x34] sm:$0xf] %vm1064_vm3, %v1203_v7 }
 0x1e0   :  { %1079 = vst.msk [vmem:[%s2060_s3 + $0x38] sm:$0xf] %vm1064_vm3, %v1204_v28  ;;  %1080 = vst.msk [vmem:[%s2060_s3 + $0x3c] sm:$0xf] %vm1064_vm3, %v1205_v29 }
 0x1e1   :  { %1081 = vst.msk [vmem:[%s2060_s3 + $0x40] sm:$0xf] %vm1064_vm3, %v1206_v30  ;;  %1082 = vst.msk [vmem:[%s2060_s3 + $0x44] sm:$0xf] %vm1064_vm3, %v1207_v13 }
 0x1e2   :  { %1083 = vst.msk [vmem:[%s2060_s3 + $0x48] sm:$0xf] %vm1064_vm3, %v1208_v32  ;;  %1084 = vst.msk [vmem:[%s2060_s3 + $0x4c] sm:$0xf] %vm1064_vm3, %v1209_v26 }
 0x1e3   :  { %1085 = vst.msk [vmem:[%s2060_s3 + $0x50] sm:$0xf] %vm1064_vm3, %v1210_v33  ;;  %1086 = vst.msk [vmem:[%s2060_s3 + $0x54] sm:$0xf] %vm1064_vm3, %v1211_v31 }
 0x1e4   :  { %1087 = vst.msk [vmem:[%s2060_s3 + $0x58] sm:$0xf] %vm1064_vm3, %v1212_v34  ;;  %1088 = vst.msk [vmem:[%s2060_s3 + $0x5c] sm:$0xf] %vm1064_vm3, %v1213_v45 }
 0x1e5   :  { %1089 = vst.msk [vmem:[%s2060_s3 + $0x60] sm:$0xf] %vm1064_vm3, %v1214_v35 }

// kernel: encoder_forward.7
= control target key start
LH: loop header
LB: loop body
LE: loop exit
PB: predicated region body
PF: predicated region fallthrough
CT: control target
= control target key end

     0   :  { %10 = vsyncpa [#allocation4], 0  ;;  %s9360_s18 = smov 0   ;;  %s10482_s0 = inlined_call_operand.vmem [shape: bf16[2,6400], index: 0, kind: input, shape index: {}]   ;;  %s10483_s1 = inlined_call_operand.vmem [shape: bf16[6400,512], index: 1, kind: input, shape index: {}]   ;;  %s10484_s2 = inlined_call_operand.vmem [shape: f32[2,512], index: 2, kind: input, shape index: {}]   ;;  %s10485_s3 = inlined_call_operand.vmem [shape: bf16[512,64], index: 3, kind: input, shape index: {}]   ;;  %s10486_s4 = inlined_call_operand.vmem [shape: f32[1,64], index: 4, kind: input, shape index: {}]   ;;  %s10487_s5 = inlined_call_operand.hbm [shape: f32[2,64], index: 5, kind: output, shape index: {}]  }
   0x1 LB: > { %s9366_s19 = sadd.s32 4294967295, %s9322_s18   ;;  %p7034_p0 = scmp.ge.s32.totalorder %s9322_s18, 1  ;;  %s9322_s18 = sphi %s9360_s18, %s16_s18  }
   0x2   : > { %p195_p1 = scmp.lt.s32.totalorder %s9322_s18, 3 }
   0x4   : > { %p196_p2 = pnand %p7034_p0, %p195_p1 }
   0x5   : > { %s228_s20 = smul.u32 (!%p196_p2), 400, %s9366_s19  ;;  %v9324_v36 = vmov (!%p196_p2), 1966171168   ;;  %v1048_v38 = vlaneseq (!%p196_p2)  ;;  %p7838_p5 = scmp.ne.s32.totalorder (!%p196_p2), %s9366_s19, 0 }
   0x6   : > { %199 = sbr.rel (%p196_p2) target bundleno = 1403 (0x57b), region = 40  ;;  %v1046_v37 = vunpack.c.l.s4 (!%p196_p2), %v9324_v36 }
   0x7   : > { %p229_p3 = scmp.lt.s32.totalorder (!%p196_p2), %s228_s20, 799  ;;  %s223_s25 = smul.u32 (!%p196_p2), 25, %s9366_s19  ;;  %v9416_v43 = vshrl.u32 (!%p196_p2), %v1048_v38, 7 }
   0x8   : > { %v1047_v42 = vunpack.c.0.s8 (!%p196_p2), %v1046_v37 }
   0x9   : > { %p224_p4 = scmp.lt.s32.totalorder (!%p196_p2), %s223_s25, 49 }
   0xa   : > { %v9429_v49 = vsub.s32 (!%p196_p2), %v1047_v42, %v9416_v43 }
   0xd   : > { %s10489_s20 = smov (!%p229_p3, %s228_s20), 799  ;;  %s10491_s25 = smov (!%p224_p4, %s223_s25), 49 }
   0xe   : > { %s7879_s21 = sshll.u32 %s10489_s20, 4  ;;  %s9426_s28 = scalar_lea.vmem %s10482_s0, %s10491_s25 }
   0xf   : > { %s9374_s24 = scalar_lea.vmem %s10483_s1, %s7879_s21  ;;  %v9434_v52 = vld [vmem:[%s9426_s28] sm:$0xff] }
  0x10   : > { %v8040_v0 = vld [vmem:[%s9374_s24 + $0x4] ss:$16 sps:$4 sm:$0xff]   ;;  %v8042_v1 = vld [vmem:[%s9374_s24 + $0xc] ss:$16 sps:$4 sm:$0xff]   ;;  %v8044_v2 = vld [vmem:[%s9374_s24] ss:$16 sps:$4 sm:$0xff]   ;;  %v1051_v54 = vrot.slane %v9434_v52, %v9429_v49 }
  0x11   : > { %5230 = vmatprep.subr.bf16.mxu0 %v8040_v0  ;;  %v8045_v3 = vld [vmem:[%s9374_s24 + $0x8] ss:$16 sps:$4 sm:$0xff]   ;;  %5763 = vmatprep.subr.bf16.mxu1 %v8042_v1  ;;  %v8046_v4 = vld [vmem:[%s9374_s24 + $0x24] ss:$16 sps:$4 sm:$0xff]   ;;  %v8048_v5 = vld [vmem:[%s9374_s24 + $0x2c] ss:$16 sps:$4 sm:$0xff]  }
  0x12   : > { %5231 = vmatpush1.bf16.msra.mxu0 %v8044_v2  ;;  %5764 = vmatpush1.bf16.msra.mxu1 %v8045_v3  ;;  %v8050_v6 = vld [vmem:[%s9374_s24 + $0x20] ss:$16 sps:$4 sm:$0xff]   ;;  %v8051_v7 = vld [vmem:[%s9374_s24 + $0x28] ss:$16 sps:$4 sm:$0xff]   ;;  %v8052_v8 = vld [vmem:[%s9374_s24 + $0x44] ss:$16 sps:$4 sm:$0xff]   ;;  %v1059_v58 = vcombine.high %v1051_v54, %v1051_v54 }
  0x13   : > { %5232 = vmatprep.subr.bf16.mxu0 %v8046_v4  ;;  %5765 = vmatprep.subr.bf16.mxu1 %v8048_v5  ;;  %v8054_v9 = vld [vmem:[%s9374_s24 + $0x4c] ss:$16 sps:$4 sm:$0xff]   ;;  %v8056_v10 = vld [vmem:[%s9374_s24 + $0x40] ss:$16 sps:$4 sm:$0xff]   ;;  %v8057_v11 = vld [vmem:[%s9374_s24 + $0x48] ss:$16 sps:$4 sm:$0xff]  }
  0x14   : > { %v8058_v12 = vld [vmem:[%s9374_s24 + $0x64] ss:$16 sps:$4 sm:$0xff]   ;;  %v8060_v13 = vld [vmem:[%s9374_s24 + $0x6c] ss:$16 sps:$4 sm:$0xff]   ;;  %v8062_v14 = vld [vmem:[%s9374_s24 + $0x60] ss:$16 sps:$4 sm:$0xff]   ;;  %v1081_v60 = vrot.slane %v1059_v58, %v9429_v49 }
  0x15   : > { %v8063_v15 = vld [vmem:[%s9374_s24 + $0x68] ss:$16 sps:$4 sm:$0xff]   ;;  %v8064_v16 = vld [vmem:[%s9374_s24 + $0x84] ss:$16 sps:$4 sm:$0xff]   ;;  %v8066_v17 = vld [vmem:[%s9374_s24 + $0x8c] ss:$16 sps:$4 sm:$0xff]  }
  0x16   : > { %5233 = vmatpush1.bf16.msra.mxu0 %v8050_v6  ;;  %5766 = vmatpush1.bf16.msra.mxu1 %v8051_v7  ;;  %v8068_v18 = vld [vmem:[%s9374_s24 + $0x80] ss:$16 sps:$4 sm:$0xff]   ;;  %v8069_v19 = vld [vmem:[%s9374_s24 + $0x88] ss:$16 sps:$4 sm:$0xff]   ;;  %v8070_v20 = vld [vmem:[%s9374_s24 + $0xa4] ss:$16 sps:$4 sm:$0xff]  }
  0x17   : > { %5234 = vmatprep.subr.bf16.mxu0 %v8052_v8  ;;  %5767 = vmatprep.subr.bf16.mxu1 %v8054_v9  ;;  %v8072_v21 = vld [vmem:[%s9374_s24 + $0xac] ss:$16 sps:$4 sm:$0xff]   ;;  %v8074_v22 = vld [vmem:[%s9374_s24 + $0xa0] ss:$16 sps:$4 sm:$0xff]   ;;  %v8075_v23 = vld [vmem:[%s9374_s24 + $0xa8] ss:$16 sps:$4 sm:$0xff]  }
  0x18   : > { %v8076_v24 = vld [vmem:[%s9374_s24 + $0xc4] ss:$16 sps:$4 sm:$0xff]   ;;  %v8078_v25 = vld [vmem:[%s9374_s24 + $0xcc] ss:$16 sps:$4 sm:$0xff]   ;;  %v8080_v26 = vld [vmem:[%s9374_s24 + $0xc0] ss:$16 sps:$4 sm:$0xff]   ;;  %5262 = vmatprep.mubr.bf16.mxu0 %v1081_v60  ;;  %5795 = vmatprep.mubr.bf16.mxu1 %v1081_v60 }
  0x19   : > { %v8081_v27 = vld [vmem:[%s9374_s24 + $0xc8] ss:$16 sps:$4 sm:$0xff]   ;;  %v8082_v28 = vld [vmem:[%s9374_s24 + $0xe4] ss:$16 sps:$4 sm:$0xff]   ;;  %v8084_v29 = vld [vmem:[%s9374_s24 + $0xec] ss:$16 sps:$4 sm:$0xff]  }
  0x1a   : > { %5235 = vmatpush1.bf16.msra.mxu0 %v8056_v10  ;;  %5768 = vmatpush1.bf16.msra.mxu1 %v8057_v11  ;;  %v8086_v30 = vld [vmem:[%s9374_s24 + $0xe0] ss:$16 sps:$4 sm:$0xff]   ;;  %v8087_v31 = vld [vmem:[%s9374_s24 + $0xe8] ss:$16 sps:$4 sm:$0xff]   ;;  %v8088_v32 = vld [vmem:[%s9374_s24 + $0x104] ss:$16 sps:$4 sm:$0xff]  }
  0x1b   : > { %5236 = vmatprep.subr.bf16.mxu0 %v8058_v12  ;;  %5769 = vmatprep.subr.bf16.mxu1 %v8060_v13  ;;  %v8090_v33 = vld [vmem:[%s9374_s24 + $0x10c] ss:$16 sps:$4 sm:$0xff]   ;;  %v8092_v34 = vld [vmem:[%s9374_s24 + $0x100] ss:$16 sps:$4 sm:$0xff]   ;;  %v8093_v35 = vld [vmem:[%s9374_s24 + $0x108] ss:$16 sps:$4 sm:$0xff]   ;;  %v9461_v13 = vrot.slane %v1051_v54, %v9429_v49 }
  0x1c   : > { %v8094_v39 = vld [vmem:[%s9374_s24 + $0x124] ss:$16 sps:$4 sm:$0xff]   ;;  %v8096_v40 = vld [vmem:[%s9374_s24 + $0x12c] ss:$16 sps:$4 sm:$0xff]   ;;  %v8098_v41 = vld [vmem:[%s9374_s24 + $0x120] ss:$16 sps:$4 sm:$0xff]  }
  0x1d   : > { %v8099_v44 = vld [vmem:[%s9374_s24 + $0x128] ss:$16 sps:$4 sm:$0xff]   ;;  %v8100_v45 = vld [vmem:[%s9374_s24 + $0x144] ss:$16 sps:$4 sm:$0xff]   ;;  %v8102_v46 = vld [vmem:[%s9374_s24 + $0x14c] ss:$16 sps:$4 sm:$0xff]  }
  0x1e   : > { %5237 = vmatpush1.bf16.msra.mxu0 %v8062_v14  ;;  %5770 = vmatpush1.bf16.msra.mxu1 %v8063_v15  ;;  %v8104_v47 = vld [vmem:[%s9374_s24 + $0x140] ss:$16 sps:$4 sm:$0xff]   ;;  %v8105_v48 = vld [vmem:[%s9374_s24 + $0x148] ss:$16 sps:$4 sm:$0xff]   ;;  %v8106_v50 = vld [vmem:[%s9374_s24 + $0x164] ss:$16 sps:$4 sm:$0xff]  }
  0x1f   : > { %5238 = vmatprep.subr.bf16.mxu0 %v8064_v16  ;;  %5771 = vmatprep.subr.bf16.mxu1 %v8066_v17  ;;  %v8108_v51 = vld [vmem:[%s9374_s24 + $0x16c] ss:$16 sps:$4 sm:$0xff]   ;;  %v8110_v53 = vld [vmem:[%s9374_s24 + $0x160] ss:$16 sps:$4 sm:$0xff]   ;;  %v8111_v55 = vld [vmem:[%s9374_s24 + $0x168] ss:$16 sps:$4 sm:$0xff]   ;;  %v1091_v17 = vcombine.high %v1081_v60, %v1081_v60 }
  0x20   : > { %v8112_v56 = vld [vmem:[%s9374_s24 + $0x184] ss:$16 sps:$4 sm:$0xff]   ;;  %v8114_v57 = vld [vmem:[%s9374_s24 + $0x18c] ss:$16 sps:$4 sm:$0xff]   ;;  %v8116_v59 = vld [vmem:[%s9374_s24 + $0x180] ss:$16 sps:$4 sm:$0xff]  }
  0x21   : > { %v8117_v61 = vld [vmem:[%s9374_s24 + $0x188] ss:$16 sps:$4 sm:$0xff]   ;;  %v8118_v62 = vld [vmem:[%s9374_s24 + $0x1a4] ss:$16 sps:$4 sm:$0xff]   ;;  %v8120_v63 = vld [vmem:[%s9374_s24 + $0x1ac] ss:$16 sps:$4 sm:$0xff]  }
  0x22   : > { %5239 = vmatpush1.bf16.msra.mxu0 %v8068_v18  ;;  %5772 = vmatpush1.bf16.msra.mxu1 %v8069_v19  ;;  %v8122_v0 = vld [vmem:[%s9374_s24 + $0x1a0] ss:$16 sps:$4 sm:$0xff]   ;;  %v8123_v1 = vld [vmem:[%s9374_s24 + $0x1a8] ss:$16 sps:$4 sm:$0xff]   ;;  %v8124_v2 = vld [vmem:[%s9374_s24 + $0x1c4] ss:$16 sps:$4 sm:$0xff]  }
  0x23   : > { %5240 = vmatprep.subr.bf16.mxu0 %v8070_v20  ;;  %5773 = vmatprep.subr.bf16.mxu1 %v8072_v21  ;;  %v8126_v3 = vld [vmem:[%s9374_s24 + $0x1cc] ss:$16 sps:$4 sm:$0xff]   ;;  %v8128_v4 = vld [vmem:[%s9374_s24 + $0x1c0] ss:$16 sps:$4 sm:$0xff]   ;;  %v8129_v5 = vld [vmem:[%s9374_s24 + $0x1c8] ss:$16 sps:$4 sm:$0xff]  }
  0x24   : > { %v8130_v6 = vld [vmem:[%s9374_s24 + $0x1e4] ss:$16 sps:$4 sm:$0xff]   ;;  %v8132_v7 = vld [vmem:[%s9374_s24 + $0x1ec] ss:$16 sps:$4 sm:$0xff]   ;;  %v8134_v8 = vld [vmem:[%s9374_s24 + $0x1e0] ss:$16 sps:$4 sm:$0xff]  }
  0x25   : > { %v8135_v9 = vld [vmem:[%s9374_s24 + $0x1e8] ss:$16 sps:$4 sm:$0xff]   ;;  %v8138_v10 = vld [vmem:[%s9374_s24 + $0x204] ss:$16 sps:$4 sm:$0xff]   ;;  %v8141_v11 = vld [vmem:[%s9374_s24 + $0x20c] ss:$16 sps:$4 sm:$0xff]  }
  0x26   : > { %5241 = vmatpush1.bf16.msra.mxu0 %v8074_v22  ;;  %5774 = vmatpush1.bf16.msra.mxu1 %v8075_v23  ;;  %v8136_v12 = vld [vmem:[%s9374_s24 + $0x200] ss:$16 sps:$4 sm:$0xff]   ;;  %v8139_v14 = vld [vmem:[%s9374_s24 + $0x208] ss:$16 sps:$4 sm:$0xff]   ;;  %v8144_v15 = vld [vmem:[%s9374_s24 + $0x224] ss:$16 sps:$4 sm:$0xff]  }
  0x27   : > { %5242 = vmatprep.subr.bf16.mxu0 %v8076_v24  ;;  %5775 = vmatprep.subr.bf16.mxu1 %v8078_v25  ;;  %v8147_v16 = vld [vmem:[%s9374_s24 + $0x22c] ss:$16 sps:$4 sm:$0xff]   ;;  %v8142_v18 = vld [vmem:[%s9374_s24 + $0x220] ss:$16 sps:$4 sm:$0xff]   ;;  %v8145_v19 = vld [vmem:[%s9374_s24 + $0x228] ss:$16 sps:$4 sm:$0xff]  }
  0x28   : > { %v8150_v20 = vld [vmem:[%s9374_s24 + $0x244] ss:$16 sps:$4 sm:$0xff]   ;;  %v8153_v21 = vld [vmem:[%s9374_s24 + $0x24c] ss:$16 sps:$4 sm:$0xff]   ;;  %v8148_v22 = vld [vmem:[%s9374_s24 + $0x240] ss:$16 sps:$4 sm:$0xff]  }
  0x29   : > { %v8151_v23 = vld [vmem:[%s9374_s24 + $0x248] ss:$16 sps:$4 sm:$0xff]   ;;  %v8156_v24 = vld [vmem:[%s9374_s24 + $0x264] ss:$16 sps:$4 sm:$0xff]   ;;  %v8159_v25 = vld [vmem:[%s9374_s24 + $0x26c] ss:$16 sps:$4 sm:$0xff]  }
  0x2a   : > { %5243 = vmatpush1.bf16.msra.mxu0 %v8080_v26  ;;  %5776 = vmatpush1.bf16.msra.mxu1 %v8081_v27  ;;  %v8154_v26 = vld [vmem:[%s9374_s24 + $0x260] ss:$16 sps:$4 sm:$0xff]   ;;  %v8157_v27 = vld [vmem:[%s9374_s24 + $0x268] ss:$16 sps:$4 sm:$0xff]   ;;  %v8174_v36 = vld [vmem:[%s9374_s24 + $0x2c4] ss:$16 sps:$4 sm:$0xff]  }
  0x2b   : > { %5244 = vmatprep.subr.bf16.mxu0 %v8082_v28  ;;  %5777 = vmatprep.subr.bf16.mxu1 %v8084_v29  ;;  %v8162_v28 = vld [vmem:[%s9374_s24 + $0x284] ss:$16 sps:$4 sm:$0xff]   ;;  %v8165_v29 = vld [vmem:[%s9374_s24 + $0x28c] ss:$16 sps:$4 sm:$0xff]   ;;  %v8172_v38 = vld [vmem:[%s9374_s24 + $0x2c0] ss:$16 sps:$4 sm:$0xff]  }
  0x2c   : > { %v8177_v37 = vld [vmem:[%s9374_s24 + $0x2cc] ss:$16 sps:$4 sm:$0xff]   ;;  %v8178_v42 = vld [vmem:[%s9374_s24 + $0x2e0] ss:$16 sps:$4 sm:$0xff]   ;;  %v8193_v54 = vld [vmem:[%s9374_s24 + $0x328] ss:$16 sps:$4 sm:$0xff]  }
  0x2d   : > { %v8199_v58 = vld [vmem:[%s9374_s24 + $0x348] ss:$16 sps:$4 sm:$0xff]   ;;  %v8207_v60 = vld [vmem:[%s9374_s24 + $0x36c] ss:$16 sps:$4 sm:$0xff]  }
  0x2e   : > { %5245 = vmatpush1.bf16.msra.mxu0 %v8086_v30  ;;  %5778 = vmatpush1.bf16.msra.mxu1 %v8087_v31  ;;  %v8160_v30 = vld [vmem:[%s9374_s24 + $0x280] ss:$16 sps:$4 sm:$0xff]   ;;  %v8163_v31 = vld [vmem:[%s9374_s24 + $0x288] ss:$16 sps:$4 sm:$0xff]  }
  0x2f   : > { %5246 = vmatprep.subr.bf16.mxu0 %v8088_v32  ;;  %5779 = vmatprep.subr.bf16.mxu1 %v8090_v33  ;;  %v8168_v32 = vld [vmem:[%s9374_s24 + $0x2a4] ss:$16 sps:$4 sm:$0xff]   ;;  %v8171_v33 = vld [vmem:[%s9374_s24 + $0x2ac] ss:$16 sps:$4 sm:$0xff]  }
  0x32   : > { %5247 = vmatpush1.bf16.msra.mxu0 %v8092_v34  ;;  %5780 = vmatpush1.bf16.msra.mxu1 %v8093_v35  ;;  %v8166_v34 = vld [vmem:[%s9374_s24 + $0x2a0] ss:$16 sps:$4 sm:$0xff]   ;;  %v8169_v35 = vld [vmem:[%s9374_s24 + $0x2a8] ss:$16 sps:$4 sm:$0xff]  }
  0x33   : > { %5248 = vmatprep.subr.bf16.mxu0 %v8094_v39  ;;  %5781 = vmatprep.subr.bf16.mxu1 %v8096_v40  ;;  %v8175_v39 = vld [vmem:[%s9374_s24 + $0x2c8] ss:$16 sps:$4 sm:$0xff]   ;;  %v8180_v40 = vld [vmem:[%s9374_s24 + $0x2e4] ss:$16 sps:$4 sm:$0xff]  }
  0x36   : > { %5249 = vmatpush1.bf16.msra.mxu0 %v8098_v41  ;;  %5782 = vmatpush1.bf16.msra.mxu1 %v8099_v44  ;;  %v8183_v41 = vld [vmem:[%s9374_s24 + $0x2ec] ss:$16 sps:$4 sm:$0xff]   ;;  %v8181_v44 = vld [vmem:[%s9374_s24 + $0x2e8] ss:$16 sps:$4 sm:$0xff]  }
  0x37   : > { %5250 = vmatprep.subr.bf16.mxu0 %v8100_v45  ;;  %5783 = vmatprep.subr.bf16.mxu1 %v8102_v46  ;;  %v8186_v45 = vld [vmem:[%s9374_s24 + $0x304] ss:$16 sps:$4 sm:$0xff]   ;;  %v8189_v46 = vld [vmem:[%s9374_s24 + $0x30c] ss:$16 sps:$4 sm:$0xff]  }
  0x3a   : > { %5251 = vmatpush1.bf16.msra.mxu0 %v8104_v47  ;;  %5784 = vmatpush1.bf16.msra.mxu1 %v8105_v48  ;;  %v8184_v47 = vld [vmem:[%s9374_s24 + $0x300] ss:$16 sps:$4 sm:$0xff]   ;;  %v8187_v48 = vld [vmem:[%s9374_s24 + $0x308] ss:$16 sps:$4 sm:$0xff]  }
  0x3b   : > { %5252 = vmatprep.subr.bf16.mxu0 %v8106_v50  ;;  %5785 = vmatprep.subr.bf16.mxu1 %v8108_v51  ;;  %v8192_v50 = vld [vmem:[%s9374_s24 + $0x324] ss:$16 sps:$4 sm:$0xff]   ;;  %v8195_v51 = vld [vmem:[%s9374_s24 + $0x32c] ss:$16 sps:$4 sm:$0xff]  }
  0x3e   : > { %5253 = vmatpush1.bf16.msra.mxu0 %v8110_v53  ;;  %5786 = vmatpush1.bf16.msra.mxu1 %v8111_v55  ;;  %v8190_v53 = vld [vmem:[%s9374_s24 + $0x320] ss:$16 sps:$4 sm:$0xff]   ;;  %v8198_v55 = vld [vmem:[%s9374_s24 + $0x344] ss:$16 sps:$4 sm:$0xff]  }
  0x3f   : > { %5254 = vmatprep.subr.bf16.mxu0 %v8112_v56  ;;  %5787 = vmatprep.subr.bf16.mxu1 %v8114_v57  ;;  %v8201_v56 = vld [vmem:[%s9374_s24 + $0x34c] ss:$16 sps:$4 sm:$0xff]   ;;  %v8196_v57 = vld [vmem:[%s9374_s24 + $0x340] ss:$16 sps:$4 sm:$0xff]  }
  0x42   : > { %5255 = vmatpush1.bf16.msra.mxu0 %v8116_v59  ;;  %5788 = vmatpush1.bf16.msra.mxu1 %v8117_v61  ;;  %v8204_v59 = vld [vmem:[%s9374_s24 + $0x364] ss:$16 sps:$4 sm:$0xff]   ;;  %v8202_v61 = vld [vmem:[%s9374_s24 + $0x360] ss:$16 sps:$4 sm:$0xff]  }
  0x43   : > { %5256 = vmatprep.subr.bf16.mxu0 %v8118_v62  ;;  %5789 = vmatprep.subr.bf16.mxu1 %v8120_v63  ;;  %v8205_v62 = vld [vmem:[%s9374_s24 + $0x368] ss:$16 sps:$4 sm:$0xff]   ;;  %v8210_v63 = vld [vmem:[%s9374_s24 + $0x384] ss:$16 sps:$4 sm:$0xff]  }
  0x46   : > { %5257 = vmatpush1.bf16.msra.mxu0 %v8122_v0  ;;  %5790 = vmatpush1.bf16.msra.mxu1 %v8123_v1  ;;  %v8213_v0 = vld [vmem:[%s9374_s24 + $0x38c] ss:$16 sps:$4 sm:$0xff]   ;;  %v8208_v1 = vld [vmem:[%s9374_s24 + $0x380] ss:$16 sps:$4 sm:$0xff]  }
  0x47   : > { %5258 = vmatprep.subr.bf16.mxu0 %v8124_v2  ;;  %5791 = vmatprep.subr.bf16.mxu1 %v8126_v3  ;;  %v8211_v2 = vld [vmem:[%s9374_s24 + $0x388] ss:$16 sps:$4 sm:$0xff]   ;;  %v8216_v3 = vld [vmem:[%s9374_s24 + $0x3a4] ss:$16 sps:$4 sm:$0xff]  }
  0x4a   : > { %5259 = vmatpush1.bf16.msra.mxu0 %v8128_v4  ;;  %5792 = vmatpush1.bf16.msra.mxu1 %v8129_v5  ;;  %v8219_v4 = vld [vmem:[%s9374_s24 + $0x3ac] ss:$16 sps:$4 sm:$0xff]   ;;  %v8214_v5 = vld [vmem:[%s9374_s24 + $0x3a0] ss:$16 sps:$4 sm:$0xff]  }
  0x4b   : > { %5260 = vmatprep.subr.bf16.mxu0 %v8130_v6  ;;  %5793 = vmatprep.subr.bf16.mxu1 %v8132_v7  ;;  %v8217_v6 = vld [vmem:[%s9374_s24 + $0x3a8] ss:$16 sps:$4 sm:$0xff]   ;;  %v8222_v7 = vld [vmem:[%s9374_s24 + $0x3c4] ss:$16 sps:$4 sm:$0xff]  }
  0x4e   : > { %5261 = vmatpush1.bf16.msra.mxu0 %v8134_v8  ;;  %5794 = vmatpush1.bf16.msra.mxu1 %v8135_v9  ;;  %v8225_v8 = vld [vmem:[%s9374_s24 + $0x3cc] ss:$16 sps:$4 sm:$0xff]   ;;  %v1044_v9 = vcombine.high %v9434_v52, %v9434_v52  ;;  %v8229_v52 = vld [vmem:[%s9374_s24 + $0x3e8] ss:$16 sps:$4 sm:$0xff]  }
  0x4f   : > { %5271 = vmatprep.subr.bf16.mxu0 %v8138_v10  ;;  %5804 = vmatprep.subr.bf16.mxu1 %v8141_v11  ;;  %v8220_v10 = vld [vmem:[%s9374_s24 + $0x3c0] ss:$16 sps:$4 sm:$0xff]   ;;  %v8223_v11 = vld [vmem:[%s9374_s24 + $0x3c8] ss:$16 sps:$4 sm:$0xff]  }
  0x51   : > { %5263 = vmatmul.mubr.bf16.vlgmr.msra.gmra.mrb[0].mxu0 %v9461_v13  ;;  %5796 = vmatmul.mubr.bf16.vlgmr.msra.gmra.mrb[0].mxu1 %v9461_v13 }
  0x52   : > { %5272 = vmatpush1.bf16.msra.mxu0 %v8136_v12  ;;  %5805 = vmatpush1.bf16.msra.mxu1 %v8139_v14  ;;  %v8228_v12 = vld [vmem:[%s9374_s24 + $0x3e4] ss:$16 sps:$4 sm:$0xff]   ;;  %v8231_v14 = vld [vmem:[%s9374_s24 + $0x3ec] ss:$16 sps:$4 sm:$0xff]  }
  0x53   : > { %5273 = vmatprep.subr.bf16.mxu0 %v8144_v15  ;;  %5806 = vmatprep.subr.bf16.mxu1 %v8147_v16  ;;  %v9527_v15 = vrot.slane %v1044_v9, %v9429_v49  ;;  %v8226_v16 = vld [vmem:[%s9374_s24 + $0x3e0] ss:$16 sps:$4 sm:$0xff]   ;;  %v8307_v9 = vld [vmem:[%s9374_s24 + $0x588] ss:$16 sps:$4 sm:$0xff]  }
  0x54   : > { %5303 = vmatprep.mubr.bf16.mxu0 %v1091_v17  ;;  %5836 = vmatprep.mubr.bf16.mxu1 %v1091_v17  ;;  %v8234_v17 = vld [vmem:[%s9374_s24 + $0x404] ss:$16 sps:$4 sm:$0xff]  }
  0x56   : > { %5274 = vmatpush1.bf16.msra.mxu0 %v8142_v18  ;;  %5807 = vmatpush1.bf16.msra.mxu1 %v8145_v19  ;;  %v8237_v18 = vld [vmem:[%s9374_s24 + $0x40c] ss:$16 sps:$4 sm:$0xff]   ;;  %v1060_v19 = vcombine.high %v9527_v15, %v9527_v15 }
  0x57   : > { %5275 = vmatprep.subr.bf16.mxu0 %v8150_v20  ;;  %5808 = vmatprep.subr.bf16.mxu1 %v8153_v21  ;;  %v8232_v20 = vld [vmem:[%s9374_s24 + $0x400] ss:$16 sps:$4 sm:$0xff]   ;;  %v1089_v21 = vcombine.high %v9461_v13, %v9461_v13  ;;  %v8241_v13 = vld [vmem:[%s9374_s24 + $0x428] ss:$16 sps:$4 sm:$0xff]  }
  0x5a   : > { %5276 = vmatpush1.bf16.msra.mxu0 %v8148_v22  ;;  %5809 = vmatpush1.bf16.msra.mxu1 %v8151_v23  ;;  %v8235_v22 = vld [vmem:[%s9374_s24 + $0x408] ss:$16 sps:$4 sm:$0xff]   ;;  %v8240_v23 = vld [vmem:[%s9374_s24 + $0x424] ss:$16 sps:$4 sm:$0xff]  }
  0x5b   : > { %5277 = vmatprep.subr.bf16.mxu0 %v8156_v24  ;;  %5810 = vmatprep.subr.bf16.mxu1 %v8159_v25  ;;  %v8243_v24 = vld [vmem:[%s9374_s24 + $0x42c] ss:$16 sps:$4 sm:$0xff]   ;;  %v9542_v25 = vrot.slane %v1060_v19, %v9429_v49  ;;  %v8324_v19 = vld [vmem:[%s9374_s24 + $0x5e4] ss:$16 sps:$4 sm:$0xff]  }
  0x5e   : > { %5278 = vmatpush1.bf16.msra.mxu0 %v8154_v26  ;;  %5811 = vmatpush1.bf16.msra.mxu1 %v8157_v27  ;;  %v8238_v26 = vld [vmem:[%s9374_s24 + $0x420] ss:$16 sps:$4 sm:$0xff]   ;;  %v8246_v27 = vld [vmem:[%s9374_s24 + $0x444] ss:$16 sps:$4 sm:$0xff]  }
  0x5f   : > { %5279 = vmatprep.subr.bf16.mxu0 %v8162_v28  ;;  %5812 = vmatprep.subr.bf16.mxu1 %v8165_v29  ;;  %v8249_v28 = vld [vmem:[%s9374_s24 + $0x44c] ss:$16 sps:$4 sm:$0xff]   ;;  %v8244_v29 = vld [vmem:[%s9374_s24 + $0x440] ss:$16 sps:$4 sm:$0xff]  }
  0x62   : > { %5280 = vmatpush1.bf16.msra.mxu0 %v8160_v30  ;;  %5813 = vmatpush1.bf16.msra.mxu1 %v8163_v31  ;;  %v8247_v30 = vld [vmem:[%s9374_s24 + $0x448] ss:$16 sps:$4 sm:$0xff]   ;;  %v8252_v31 = vld [vmem:[%s9374_s24 + $0x464] ss:$16 sps:$4 sm:$0xff]  }
  0x63   : > { %5281 = vmatprep.subr.bf16.mxu0 %v8168_v32  ;;  %5814 = vmatprep.subr.bf16.mxu1 %v8171_v33  ;;  %v8255_v32 = vld [vmem:[%s9374_s24 + $0x46c] ss:$16 sps:$4 sm:$0xff]   ;;  %v8250_v33 = vld [vmem:[%s9374_s24 + $0x460] ss:$16 sps:$4 sm:$0xff]  }
  0x66   : > { %5282 = vmatpush1.bf16.msra.mxu0 %v8166_v34  ;;  %5815 = vmatpush1.bf16.msra.mxu1 %v8169_v35  ;;  %v8253_v34 = vld [vmem:[%s9374_s24 + $0x468] ss:$16 sps:$4 sm:$0xff]   ;;  %v8258_v35 = vld [vmem:[%s9374_s24 + $0x484] ss:$16 sps:$4 sm:$0xff]  }
  0x67   : > { %5283 = vmatprep.subr.bf16.mxu0 %v8174_v36  ;;  %5816 = vmatprep.subr.bf16.mxu1 %v8177_v37  ;;  %v8261_v36 = vld [vmem:[%s9374_s24 + $0x48c] ss:$16 sps:$4 sm:$0xff]   ;;  %v8256_v37 = vld [vmem:[%s9374_s24 + $0x480] ss:$16 sps:$4 sm:$0xff]  }
  0x6a   : > { %5284 = vmatpush1.bf16.msra.mxu0 %v8172_v38  ;;  %5817 = vmatpush1.bf16.msra.mxu1 %v8175_v39  ;;  %v8259_v38 = vld [vmem:[%s9374_s24 + $0x488] ss:$16 sps:$4 sm:$0xff]   ;;  %v8264_v39 = vld [vmem:[%s9374_s24 + $0x4a4] ss:$16 sps:$4 sm:$0xff]  }
  0x6b   : > { %5285 = vmatprep.subr.bf16.mxu0 %v8180_v40  ;;  %5818 = vmatprep.subr.bf16.mxu1 %v8183_v41  ;;  %v8267_v40 = vld [vmem:[%s9374_s24 + $0x4ac] ss:$16 sps:$4 sm:$0xff]   ;;  %v8262_v41 = vld [vmem:[%s9374_s24 + $0x4a0] ss:$16 sps:$4 sm:$0xff]  }
  0x6e   : > { %5286 = vmatpush1.bf16.msra.mxu0 %v8178_v42  ;;  %5819 = vmatpush1.bf16.msra.mxu1 %v8181_v44  ;;  %v8265_v42 = vld [vmem:[%s9374_s24 + $0x4a8] ss:$16 sps:$4 sm:$0xff]   ;;  %v8270_v44 = vld [vmem:[%s9374_s24 + $0x4c4] ss:$16 sps:$4 sm:$0xff]  }
  0x6f   : > { %5287 = vmatprep.subr.bf16.mxu0 %v8186_v45  ;;  %5820 = vmatprep.subr.bf16.mxu1 %v8189_v46  ;;  %v8273_v45 = vld [vmem:[%s9374_s24 + $0x4cc] ss:$16 sps:$4 sm:$0xff]   ;;  %v8268_v46 = vld [vmem:[%s9374_s24 + $0x4c0] ss:$16 sps:$4 sm:$0xff]  }
  0x72   : > { %5288 = vmatpush1.bf16.msra.mxu0 %v8184_v47  ;;  %5821 = vmatpush1.bf16.msra.mxu1 %v8187_v48  ;;  %v8271_v47 = vld [vmem:[%s9374_s24 + $0x4c8] ss:$16 sps:$4 sm:$0xff]   ;;  %v8276_v48 = vld [vmem:[%s9374_s24 + $0x4e4] ss:$16 sps:$4 sm:$0xff]  }
  0x73   : > { %5289 = vmatprep.subr.bf16.mxu0 %v8192_v50  ;;  %5822 = vmatprep.subr.bf16.mxu1 %v8195_v51  ;;  %v8279_v50 = vld [vmem:[%s9374_s24 + $0x4ec] ss:$16 sps:$4 sm:$0xff]   ;;  %v8274_v51 = vld [vmem:[%s9374_s24 + $0x4e0] ss:$16 sps:$4 sm:$0xff]  }
  0x76   : > { %5290 = vmatpush1.bf16.msra.mxu0 %v8190_v53  ;;  %5823 = vmatpush1.bf16.msra.mxu1 %v8193_v54  ;;  %v8277_v53 = vld [vmem:[%s9374_s24 + $0x4e8] ss:$16 sps:$4 sm:$0xff]   ;;  %v8282_v54 = vld [vmem:[%s9374_s24 + $0x504] ss:$16 sps:$4 sm:$0xff]  }
  0x77   : > { %5291 = vmatprep.subr.bf16.mxu0 %v8198_v55  ;;  %5824 = vmatprep.subr.bf16.mxu1 %v8201_v56  ;;  %v8285_v55 = vld [vmem:[%s9374_s24 + $0x50c] ss:$16 sps:$4 sm:$0xff]   ;;  %v8280_v56 = vld [vmem:[%s9374_s24 + $0x500] ss:$16 sps:$4 sm:$0xff]  }
  0x7a   : > { %5292 = vmatpush1.bf16.msra.mxu0 %v8196_v57  ;;  %5825 = vmatpush1.bf16.msra.mxu1 %v8199_v58  ;;  %v8283_v57 = vld [vmem:[%s9374_s24 + $0x508] ss:$16 sps:$4 sm:$0xff]   ;;  %v8288_v58 = vld [vmem:[%s9374_s24 + $0x524] ss:$16 sps:$4 sm:$0xff]  }
  0x7b   : > { %5293 = vmatprep.subr.bf16.mxu0 %v8204_v59  ;;  %5826 = vmatprep.subr.bf16.mxu1 %v8207_v60  ;;  %v8291_v59 = vld [vmem:[%s9374_s24 + $0x52c] ss:$16 sps:$4 sm:$0xff]   ;;  %v8286_v60 = vld [vmem:[%s9374_s24 + $0x520] ss:$16 sps:$4 sm:$0xff]  }
  0x7e   : > { %5294 = vmatpush1.bf16.msra.mxu0 %v8202_v61  ;;  %5827 = vmatpush1.bf16.msra.mxu1 %v8205_v62  ;;  %v8289_v61 = vld [vmem:[%s9374_s24 + $0x528] ss:$16 sps:$4 sm:$0xff]   ;;  %v8294_v62 = vld [vmem:[%s9374_s24 + $0x544] ss:$16 sps:$4 sm:$0xff]  }
  0x7f   : > { %5295 = vmatprep.subr.bf16.mxu0 %v8210_v63  ;;  %5828 = vmatprep.subr.bf16.mxu1 %v8213_v0  ;;  %v8297_v63 = vld [vmem:[%s9374_s24 + $0x54c] ss:$16 sps:$4 sm:$0xff]   ;;  %v8292_v0 = vld [vmem:[%s9374_s24 + $0x540] ss:$16 sps:$4 sm:$0xff]  }
  0x82   : > { %5296 = vmatpush1.bf16.msra.mxu0 %v8208_v1  ;;  %5829 = vmatpush1.bf16.msra.mxu1 %v8211_v2  ;;  %v8295_v1 = vld [vmem:[%s9374_s24 + $0x548] ss:$16 sps:$4 sm:$0xff]   ;;  %v8300_v2 = vld [vmem:[%s9374_s24 + $0x564] ss:$16 sps:$4 sm:$0xff]  }
  0x83   : > { %5297 = vmatprep.subr.bf16.mxu0 %v8216_v3  ;;  %5830 = vmatprep.subr.bf16.mxu1 %v8219_v4  ;;  %v8303_v3 = vld [vmem:[%s9374_s24 + $0x56c] ss:$16 sps:$4 sm:$0xff]   ;;  %v8298_v4 = vld [vmem:[%s9374_s24 + $0x560] ss:$16 sps:$4 sm:$0xff]  }
  0x86   : > { %5298 = vmatpush1.bf16.msra.mxu0 %v8214_v5  ;;  %5831 = vmatpush1.bf16.msra.mxu1 %v8217_v6  ;;  %v8301_v5 = vld [vmem:[%s9374_s24 + $0x568] ss:$16 sps:$4 sm:$0xff]   ;;  %v8306_v6 = vld [vmem:[%s9374_s24 + $0x584] ss:$16 sps:$4 sm:$0xff]  }
  0x87   : > { %5299 = vmatprep.subr.bf16.mxu0 %v8222_v7  ;;  %5832 = vmatprep.subr.bf16.mxu1 %v8225_v8  ;;  %v8309_v7 = vld [vmem:[%s9374_s24 + $0x58c] ss:$16 sps:$4 sm:$0xff]   ;;  %v8304_v8 = vld [vmem:[%s9374_s24 + $0x580] ss:$16 sps:$4 sm:$0xff]  }
  0x8a   : > { %5300 = vmatpush1.bf16.msra.mxu0 %v8220_v10  ;;  %5833 = vmatpush1.bf16.msra.mxu1 %v8223_v11  ;;  %v8312_v10 = vld [vmem:[%s9374_s24 + $0x5a4] ss:$16 sps:$4 sm:$0xff]   ;;  %v8315_v11 = vld [vmem:[%s9374_s24 + $0x5ac] ss:$16 sps:$4 sm:$0xff]  }
  0x8b   : > { %5301 = vmatprep.subr.bf16.mxu0 %v8228_v12  ;;  %5834 = vmatprep.subr.bf16.mxu1 %v8231_v14  ;;  %v8310_v12 = vld [vmem:[%s9374_s24 + $0x5a0] ss:$16 sps:$4 sm:$0xff]   ;;  %v8313_v14 = vld [vmem:[%s9374_s24 + $0x5a8] ss:$16 sps:$4 sm:$0xff]  }
  0x8e   : > { %5302 = vmatpush1.bf16.msra.mxu0 %v8226_v16  ;;  %5835 = vmatpush1.bf16.msra.mxu1 %v8229_v52  ;;  %v8318_v16 = vld [vmem:[%s9374_s24 + $0x5c4] ss:$16 sps:$4 sm:$0xff]   ;;  %v8321_v52 = vld [vmem:[%s9374_s24 + $0x5cc] ss:$16 sps:$4 sm:$0xff]  }
  0x8f   : > { %5312 = vmatprep.subr.bf16.mxu0 %v8234_v17  ;;  %5845 = vmatprep.subr.bf16.mxu1 %v8237_v18  ;;  %v8316_v17 = vld [vmem:[%s9374_s24 + $0x5c0] ss:$16 sps:$4 sm:$0xff]   ;;  %v8319_v18 = vld [vmem:[%s9374_s24 + $0x5c8] ss:$16 sps:$4 sm:$0xff]  }
  0x91   : > { %5304 = vmatmul.mubr.bf16.vlgmr.msra.gmra.mrb[0].mxu0 %v1089_v21  ;;  %5837 = vmatmul.mubr.bf16.vlgmr.msra.gmra.mrb[0].mxu1 %v1089_v21  ;;  %v8322_v21 = vld [vmem:[%s9374_s24 + $0x5e0] ss:$16 sps:$4 sm:$0xff]  }
  0x92   : > { %5313 = vmatpush1.bf16.msra.mxu0 %v8232_v20  ;;  %5846 = vmatpush1.bf16.msra.mxu1 %v8235_v22  ;;  %v8327_v20 = vld [vmem:[%s9374_s24 + $0x5ec] ss:$16 sps:$4 sm:$0xff]   ;;  %v8325_v22 = vld [vmem:[%s9374_s24 + $0x5e8] ss:$16 sps:$4 sm:$0xff]  }
  0x93   : > { %5314 = vmatprep.subr.bf16.mxu0 %v8240_v23  ;;  %5847 = vmatprep.subr.bf16.mxu1 %v8243_v24  ;;  %v8331_v23 = vld [vmem:[%s9374_s24 + $0x604] ss:$16 sps:$4 sm:$0xff]   ;;  %v8334_v24 = vld [vmem:[%s9374_s24 + $0x60c] ss:$16 sps:$4 sm:$0xff]  }
  0x94   : > { %5344 = vmatprep.mubr.bf16.mxu0 %v9542_v25  ;;  %5877 = vmatprep.mubr.bf16.mxu1 %v9542_v25 }
  0x96   : > { %5315 = vmatpush1.bf16.msra.mxu0 %v8238_v26  ;;  %5848 = vmatpush1.bf16.msra.mxu1 %v8241_v13  ;;  %v8329_v26 = vld [vmem:[%s9374_s24 + $0x600] ss:$16 sps:$4 sm:$0xff]   ;;  %v9609_v13 = vrot.slane %v9527_v15, %v9429_v49 }
  0x97   : > { %5316 = vmatprep.subr.bf16.mxu0 %v8246_v27  ;;  %5849 = vmatprep.subr.bf16.mxu1 %v8249_v28  ;;  %v8332_v27 = vld [vmem:[%s9374_s24 + $0x608] ss:$16 sps:$4 sm:$0xff]   ;;  %v8337_v28 = vld [vmem:[%s9374_s24 + $0x624] ss:$16 sps:$4 sm:$0xff]   ;;  %v8335_v15 = vld [vmem:[%s9374_s24 + $0x620] ss:$16 sps:$4 sm:$0xff]  }
  0x9a   : > { %5317 = vmatpush1.bf16.msra.mxu0 %v8244_v29  ;;  %5850 = vmatpush1.bf16.msra.mxu1 %v8247_v30  ;;  %v8340_v29 = vld [vmem:[%s9374_s24 + $0x62c] ss:$16 sps:$4 sm:$0xff]   ;;  %v1092_v30 = vcombine.high %v9542_v25, %v9542_v25  ;;  %v8341_v25 = vld [vmem:[%s9374_s24 + $0x640] ss:$16 sps:$4 sm:$0xff]  }
  0x9b   : > { %5318 = vmatprep.subr.bf16.mxu0 %v8252_v31  ;;  %5851 = vmatprep.subr.bf16.mxu1 %v8255_v32  ;;  %v8338_v31 = vld [vmem:[%s9374_s24 + $0x628] ss:$16 sps:$4 sm:$0xff]   ;;  %v8343_v32 = vld [vmem:[%s9374_s24 + $0x644] ss:$16 sps:$4 sm:$0xff]  }
  0x9e   : > { %5319 = vmatpush1.bf16.msra.mxu0 %v8250_v33  ;;  %5852 = vmatpush1.bf16.msra.mxu1 %v8253_v34  ;;  %v8346_v33 = vld [vmem:[%s9374_s24 + $0x64c] ss:$16 sps:$4 sm:$0xff]   ;;  %v8344_v34 = vld [vmem:[%s9374_s24 + $0x648] ss:$16 sps:$4 sm:$0xff]  }
  0x9f   : > { %5320 = vmatprep.subr.bf16.mxu0 %v8258_v35  ;;  %5853 = vmatprep.subr.bf16.mxu1 %v8261_v36  ;;  %v8349_v35 = vld [vmem:[%s9374_s24 + $0x664] ss:$16 sps:$4 sm:$0xff]   ;;  %v8352_v36 = vld [vmem:[%s9374_s24 + $0x66c] ss:$16 sps:$4 sm:$0xff]  }
  0xa2   : > { %5321 = vmatpush1.bf16.msra.mxu0 %v8256_v37  ;;  %5854 = vmatpush1.bf16.msra.mxu1 %v8259_v38  ;;  %v8347_v37 = vld [vmem:[%s9374_s24 + $0x660] ss:$16 sps:$4 sm:$0xff]   ;;  %v8350_v38 = vld [vmem:[%s9374_s24 + $0x668] ss:$16 sps:$4 sm:$0xff]  }
  0xa3   : > { %5322 = vmatprep.subr.bf16.mxu0 %v8264_v39  ;;  %5855 = vmatprep.subr.bf16.mxu1 %v8267_v40  ;;  %v8355_v39 = vld [vmem:[%s9374_s24 + $0x684] ss:$16 sps:$4 sm:$0xff]   ;;  %v8358_v40 = vld [vmem:[%s9374_s24 + $0x68c] ss:$16 sps:$4 sm:$0xff]  }
  0xa6   : > { %5323 = vmatpush1.bf16.msra.mxu0 %v8262_v41  ;;  %5856 = vmatpush1.bf16.msra.mxu1 %v8265_v42  ;;  %v8353_v41 = vld [vmem:[%s9374_s24 + $0x680] ss:$16 sps:$4 sm:$0xff]   ;;  %v8356_v42 = vld [vmem:[%s9374_s24 + $0x688] ss:$16 sps:$4 sm:$0xff]  }
  0xa7   : > { %5324 = vmatprep.subr.bf16.mxu0 %v8270_v44  ;;  %5857 = vmatprep.subr.bf16.mxu1 %v8273_v45  ;;  %v8361_v44 = vld [vmem:[%s9374_s24 + $0x6a4] ss:$16 sps:$4 sm:$0xff]   ;;  %v8364_v45 = vld [vmem:[%s9374_s24 + $0x6ac] ss:$16 sps:$4 sm:$0xff]  }
  0xaa   : > { %5325 = vmatpush1.bf16.msra.mxu0 %v8268_v46  ;;  %5858 = vmatpush1.bf16.msra.mxu1 %v8271_v47  ;;  %v8359_v46 = vld [vmem:[%s9374_s24 + $0x6a0] ss:$16 sps:$4 sm:$0xff]   ;;  %v8362_v47 = vld [vmem:[%s9374_s24 + $0x6a8] ss:$16 sps:$4 sm:$0xff]  }
  0xab   : > { %5326 = vmatprep.subr.bf16.mxu0 %v8276_v48  ;;  %5859 = vmatprep.subr.bf16.mxu1 %v8279_v50  ;;  %v8367_v48 = vld [vmem:[%s9374_s24 + $0x6c4] ss:$16 sps:$4 sm:$0xff]   ;;  %v8370_v50 = vld [vmem:[%s9374_s24 + $0x6cc] ss:$16 sps:$4 sm:$0xff]  }
  0xae   : > { %5327 = vmatpush1.bf16.msra.mxu0 %v8274_v51  ;;  %5860 = vmatpush1.bf16.msra.mxu1 %v8277_v53  ;;  %v8365_v51 = vld [vmem:[%s9374_s24 + $0x6c0] ss:$16 sps:$4 sm:$0xff]   ;;  %v8368_v53 = vld [vmem:[%s9374_s24 + $0x6c8] ss:$16 sps:$4 sm:$0xff]  }
  0xaf   : > { %5328 = vmatprep.subr.bf16.mxu0 %v8282_v54  ;;  %5861 = vmatprep.subr.bf16.mxu1 %v8285_v55  ;;  %v8373_v54 = vld [vmem:[%s9374_s24 + $0x6e4] ss:$16 sps:$4 sm:$0xff]   ;;  %v8376_v55 = vld [vmem:[%s9374_s24 + $0x6ec] ss:$16 sps:$4 sm:$0xff]  }
  0xb2   : > { %5329 = vmatpush1.bf16.msra.mxu0 %v8280_v56  ;;  %5862 = vmatpush1.bf16.msra.mxu1 %v8283_v57  ;;  %v8371_v56 = vld [vmem:[%s9374_s24 + $0x6e0] ss:$16 sps:$4 sm:$0xff]   ;;  %v8374_v57 = vld [vmem:[%s9374_s24 + $0x6e8] ss:$16 sps:$4 sm:$0xff]  }
  0xb3   : > { %5330 = vmatprep.subr.bf16.mxu0 %v8288_v58  ;;  %5863 = vmatprep.subr.bf16.mxu1 %v8291_v59  ;;  %v8379_v58 = vld [vmem:[%s9374_s24 + $0x704] ss:$16 sps:$4 sm:$0xff]   ;;  %v8382_v59 = vld [vmem:[%s9374_s24 + $0x70c] ss:$16 sps:$4 sm:$0xff]  }
  0xb6   : > { %5331 = vmatpush1.bf16.msra.mxu0 %v8286_v60  ;;  %5864 = vmatpush1.bf16.msra.mxu1 %v8289_v61  ;;  %v8377_v60 = vld [vmem:[%s9374_s24 + $0x700] ss:$16 sps:$4 sm:$0xff]   ;;  %v8380_v61 = vld [vmem:[%s9374_s24 + $0x708] ss:$16 sps:$4 sm:$0xff]  }
  0xb7   : > { %5332 = vmatprep.subr.bf16.mxu0 %v8294_v62  ;;  %5865 = vmatprep.subr.bf16.mxu1 %v8297_v63  ;;  %v8385_v62 = vld [vmem:[%s9374_s24 + $0x724] ss:$16 sps:$4 sm:$0xff]   ;;  %v8388_v63 = vld [vmem:[%s9374_s24 + $0x72c] ss:$16 sps:$4 sm:$0xff]  }
  0xba   : > { %5333 = vmatpush1.bf16.msra.mxu0 %v8292_v0  ;;  %5866 = vmatpush1.bf16.msra.mxu1 %v8295_v1  ;;  %v8383_v0 = vld [vmem:[%s9374_s24 + $0x720] ss:$16 sps:$4 sm:$0xff]   ;;  %v8386_v1 = vld [vmem:[%s9374_s24 + $0x728] ss:$16 sps:$4 sm:$0xff]  }
  0xbb   : > { %5334 = vmatprep.subr.bf16.mxu0 %v8300_v2  ;;  %5867 = vmatprep.subr.bf16.mxu1 %v8303_v3  ;;  %v8391_v2 = vld [vmem:[%s9374_s24 + $0x744] ss:$16 sps:$4 sm:$0xff]   ;;  %v8394_v3 = vld [vmem:[%s9374_s24 + $0x74c] ss:$16 sps:$4 sm:$0xff]  }
  0xbe   : > { %5335 = vmatpush1.bf16.msra.mxu0 %v8298_v4  ;;  %5868 = vmatpush1.bf16.msra.mxu1 %v8301_v5  ;;  %v8389_v4 = vld [vmem:[%s9374_s24 + $0x740] ss:$16 sps:$4 sm:$0xff]   ;;  %v8392_v5 = vld [vmem:[%s9374_s24 + $0x748] ss:$16 sps:$4 sm:$0xff]  }
  0xbf   : > { %5336 = vmatprep.subr.bf16.mxu0 %v8306_v6  ;;  %5869 = vmatprep.subr.bf16.mxu1 %v8309_v7  ;;  %v8397_v6 = vld [vmem:[%s9374_s24 + $0x764] ss:$16 sps:$4 sm:$0xff]   ;;  %v8400_v7 = vld [vmem:[%s9374_s24 + $0x76c] ss:$16 sps:$4 sm:$0xff]  }
  0xc2   : > { %5337 = vmatpush1.bf16.msra.mxu0 %v8304_v8  ;;  %5870 = vmatpush1.bf16.msra.mxu1 %v8307_v9  ;;  %v8395_v8 = vld [vmem:[%s9374_s24 + $0x760] ss:$16 sps:$4 sm:$0xff]   ;;  %v8398_v9 = vld [vmem:[%s9374_s24 + $0x768] ss:$16 sps:$4 sm:$0xff]  }
  0xc3   : > { %5338 = vmatprep.subr.bf16.mxu0 %v8312_v10  ;;  %5871 = vmatprep.subr.bf16.mxu1 %v8315_v11  ;;  %v8403_v10 = vld [vmem:[%s9374_s24 + $0x784] ss:$16 sps:$4 sm:$0xff]   ;;  %v8406_v11 = vld [vmem:[%s9374_s24 + $0x78c] ss:$16 sps:$4 sm:$0xff]  }
  0xc6   : > { %5339 = vmatpush1.bf16.msra.mxu0 %v8310_v12  ;;  %5872 = vmatpush1.bf16.msra.mxu1 %v8313_v14  ;;  %v8401_v12 = vld [vmem:[%s9374_s24 + $0x780] ss:$16 sps:$4 sm:$0xff]   ;;  %v8404_v14 = vld [vmem:[%s9374_s24 + $0x788] ss:$16 sps:$4 sm:$0xff]  }
  0xc7   : > { %5340 = vmatprep.subr.bf16.mxu0 %v8318_v16  ;;  %5873 = vmatprep.subr.bf16.mxu1 %v8321_v52  ;;  %v8409_v16 = vld [vmem:[%s9374_s24 + $0x7a4] ss:$16 sps:$4 sm:$0xff]   ;;  %v8412_v52 = vld [vmem:[%s9374_s24 + $0x7ac] ss:$16 sps:$4 sm:$0xff]  }
  0xca   : > { %5341 = vmatpush1.bf16.msra.mxu0 %v8316_v17  ;;  %5874 = vmatpush1.bf16.msra.mxu1 %v8319_v18  ;;  %v8407_v17 = vld [vmem:[%s9374_s24 + $0x7a0] ss:$16 sps:$4 sm:$0xff]   ;;  %v8410_v18 = vld [vmem:[%s9374_s24 + $0x7a8] ss:$16 sps:$4 sm:$0xff]  }
  0xcb   : > { %5342 = vmatprep.subr.bf16.mxu0 %v8324_v19  ;;  %5875 = vmatprep.subr.bf16.mxu1 %v8327_v20  ;;  %v8415_v19 = vld [vmem:[%s9374_s24 + $0x7c4] ss:$16 sps:$4 sm:$0xff]   ;;  %v8418_v20 = vld [vmem:[%s9374_s24 + $0x7cc] ss:$16 sps:$4 sm:$0xff]  }
  0xce   : > { %5343 = vmatpush1.bf16.msra.mxu0 %v8322_v21  ;;  %5876 = vmatpush1.bf16.msra.mxu1 %v8325_v22  ;;  %v9671_v21 = vld.sshfl [vmem:[%s9426_s28 + $0x8] sm:$0xff pattern:$0x75316420]  ;;  %v8413_v22 = vld [vmem:[%s9374_s24 + $0x7c0] ss:$16 sps:$4 sm:$0xff]  }
  0xcf   : > { %5353 = vmatprep.subr.bf16.mxu0 %v8331_v23  ;;  %5886 = vmatprep.subr.bf16.mxu1 %v8334_v24  ;;  %v8416_v23 = vld [vmem:[%s9374_s24 + $0x7c8] ss:$16 sps:$4 sm:$0xff]   ;;  %v8421_v24 = vld [vmem:[%s9374_s24 + $0x7e4] ss:$16 sps:$4 sm:$0xff]  }
  0xd1   : > { %5345 = vmatmul.mubr.bf16.vlgmr.msra.gmra.mrb[0].mxu0 %v9609_v13  ;;  %5878 = vmatmul.mubr.bf16.vlgmr.msra.gmra.mrb[0].mxu1 %v9609_v13 }
  0xd2   : > { %5354 = vmatpush1.bf16.msra.mxu0 %v8329_v26  ;;  %5887 = vmatpush1.bf16.msra.mxu1 %v8332_v27  ;;  %v8424_v26 = vld [vmem:[%s9374_s24 + $0x7ec] ss:$16 sps:$4 sm:$0xff]   ;;  %v8419_v27 = vld [vmem:[%s9374_s24 + $0x7e0] ss:$16 sps:$4 sm:$0xff]  }
  0xd3   : > { %5355 = vmatprep.subr.bf16.mxu0 %v8337_v28  ;;  %5888 = vmatprep.subr.bf16.mxu1 %v8340_v29  ;;  %v8422_v28 = vld [vmem:[%s9374_s24 + $0x7e8] ss:$16 sps:$4 sm:$0xff]   ;;  %v8427_v29 = vld [vmem:[%s9374_s24 + $0x804] ss:$16 sps:$4 sm:$0xff]  }
  0xd4   : > { %5385 = vmatprep.mubr.bf16.mxu0 %v1092_v30  ;;  %5918 = vmatprep.mubr.bf16.mxu1 %v1092_v30  ;;  %v8430_v30 = vld [vmem:[%s9374_s24 + $0x80c] ss:$16 sps:$4 sm:$0xff]  }
  0xd6   : > { %5356 = vmatpush1.bf16.msra.mxu0 %v8335_v15  ;;  %5889 = vmatpush1.bf16.msra.mxu1 %v8338_v31  ;;  %v1108_v15 = vcombine.high %v9671_v21, %v9671_v21  ;;  %v1090_v31 = vcombine.high %v9609_v13, %v9609_v13  ;;  %v8431_v13 = vld [vmem:[%s9374_s24 + $0x820] ss:$16 sps:$4 sm:$0xff]  }
  0xd7   : > { %5357 = vmatprep.subr.bf16.mxu0 %v8343_v32  ;;  %5890 = vmatprep.subr.bf16.mxu1 %v8346_v33  ;;  %v8425_v32 = vld [vmem:[%s9374_s24 + $0x800] ss:$16 sps:$4 sm:$0xff]   ;;  %v8428_v33 = vld [vmem:[%s9374_s24 + $0x808] ss:$16 sps:$4 sm:$0xff]  }
  0xda   : > { %5358 = vmatpush1.bf16.msra.mxu0 %v8341_v25  ;;  %5891 = vmatpush1.bf16.msra.mxu1 %v8344_v34  ;;  %v8433_v25 = vld [vmem:[%s9374_s24 + $0x824] ss:$16 sps:$4 sm:$0xff]   ;;  %v8436_v34 = vld [vmem:[%s9374_s24 + $0x82c] ss:$16 sps:$4 sm:$0xff]  }
  0xdb   : > { %5359 = vmatprep.subr.bf16.mxu0 %v8349_v35  ;;  %5892 = vmatprep.subr.bf16.mxu1 %v8352_v36  ;;  %v9690_v35 = vrot.slane %v1108_v15, %v9429_v49  ;;  %v8434_v36 = vld [vmem:[%s9374_s24 + $0x828] ss:$16 sps:$4 sm:$0xff]   ;;  %v8517_v15 = vld [vmem:[%s9374_s24 + $0x9e4] ss:$16 sps:$4 sm:$0xff]  }
  0xde   : > { %5360 = vmatpush1.bf16.msra.mxu0 %v8347_v37  ;;  %5893 = vmatpush1.bf16.msra.mxu1 %v8350_v38  ;;  %v8439_v37 = vld [vmem:[%s9374_s24 + $0x844] ss:$16 sps:$4 sm:$0xff]   ;;  %v8442_v38 = vld [vmem:[%s9374_s24 + $0x84c] ss:$16 sps:$4 sm:$0xff]  }
  0xdf   : > { %5361 = vmatprep.subr.bf16.mxu0 %v8355_v39  ;;  %5894 = vmatprep.subr.bf16.mxu1 %v8358_v40  ;;  %v8437_v39 = vld [vmem:[%s9374_s24 + $0x840] ss:$16 sps:$4 sm:$0xff]   ;;  %v8440_v40 = vld [vmem:[%s9374_s24 + $0x848] ss:$16 sps:$4 sm:$0xff]  }
  0xe2   : > { %5362 = vmatpush1.bf16.msra.mxu0 %v8353_v41  ;;  %5895 = vmatpush1.bf16.msra.mxu1 %v8356_v42  ;;  %v8445_v41 = vld [vmem:[%s9374_s24 + $0x864] ss:$16 sps:$4 sm:$0xff]   ;;  %v8448_v42 = vld [vmem:[%s9374_s24 + $0x86c] ss:$16 sps:$4 sm:$0xff]  }
  0xe3   : > { %5363 = vmatprep.subr.bf16.mxu0 %v8361_v44  ;;  %5896 = vmatprep.subr.bf16.mxu1 %v8364_v45  ;;  %v8443_v44 = vld [vmem:[%s9374_s24 + $0x860] ss:$16 sps:$4 sm:$0xff]   ;;  %v8446_v45 = vld [vmem:[%s9374_s24 + $0x868] ss:$16 sps:$4 sm:$0xff]  }
  0xe6   : > { %5364 = vmatpush1.bf16.msra.mxu0 %v8359_v46  ;;  %5897 = vmatpush1.bf16.msra.mxu1 %v8362_v47  ;;  %v8451_v46 = vld [vmem:[%s9374_s24 + $0x884] ss:$16 sps:$4 sm:$0xff]   ;;  %v8454_v47 = vld [vmem:[%s9374_s24 + $0x88c] ss:$16 sps:$4 sm:$0xff]  }
  0xe7   : > { %5365 = vmatprep.subr.bf16.mxu0 %v8367_v48  ;;  %5898 = vmatprep.subr.bf16.mxu1 %v8370_v50  ;;  %v8449_v48 = vld [vmem:[%s9374_s24 + $0x880] ss:$16 sps:$4 sm:$0xff]   ;;  %v8452_v50 = vld [vmem:[%s9374_s24 + $0x888] ss:$16 sps:$4 sm:$0xff]  }
  0xea   : > { %5366 = vmatpush1.bf16.msra.mxu0 %v8365_v51  ;;  %5899 = vmatpush1.bf16.msra.mxu1 %v8368_v53  ;;  %v8457_v51 = vld [vmem:[%s9374_s24 + $0x8a4] ss:$16 sps:$4 sm:$0xff]   ;;  %v8460_v53 = vld [vmem:[%s9374_s24 + $0x8ac] ss:$16 sps:$4 sm:$0xff]  }
  0xeb   : > { %5367 = vmatprep.subr.bf16.mxu0 %v8373_v54  ;;  %5900 = vmatprep.subr.bf16.mxu1 %v8376_v55  ;;  %v8455_v54 = vld [vmem:[%s9374_s24 + $0x8a0] ss:$16 sps:$4 sm:$0xff]   ;;  %v8458_v55 = vld [vmem:[%s9374_s24 + $0x8a8] ss:$16 sps:$4 sm:$0xff]  }
  0xee   : > { %5368 = vmatpush1.bf16.msra.mxu0 %v8371_v56  ;;  %5901 = vmatpush1.bf16.msra.mxu1 %v8374_v57  ;;  %v8463_v56 = vld [vmem:[%s9374_s24 + $0x8c4] ss:$16 sps:$4 sm:$0xff]   ;;  %v8466_v57 = vld [vmem:[%s9374_s24 + $0x8cc] ss:$16 sps:$4 sm:$0xff]  }
  0xef   : > { %5369 = vmatprep.subr.bf16.mxu0 %v8379_v58  ;;  %5902 = vmatprep.subr.bf16.mxu1 %v8382_v59  ;;  %v8461_v58 = vld [vmem:[%s9374_s24 + $0x8c0] ss:$16 sps:$4 sm:$0xff]   ;;  %v8464_v59 = vld [vmem:[%s9374_s24 + $0x8c8] ss:$16 sps:$4 sm:$0xff]  }
  0xf2   : > { %5370 = vmatpush1.bf16.msra.mxu0 %v8377_v60  ;;  %5903 = vmatpush1.bf16.msra.mxu1 %v8380_v61  ;;  %v8469_v60 = vld [vmem:[%s9374_s24 + $0x8e4] ss:$16 sps:$4 sm:$0xff]   ;;  %v8472_v61 = vld [vmem:[%s9374_s24 + $0x8ec] ss:$16 sps:$4 sm:$0xff]  }
  0xf3   : > { %5371 = vmatprep.subr.bf16.mxu0 %v8385_v62  ;;  %5904 = vmatprep.subr.bf16.mxu1 %v8388_v63  ;;  %v8467_v62 = vld [vmem:[%s9374_s24 + $0x8e0] ss:$16 sps:$4 sm:$0xff]   ;;  %v8470_v63 = vld [vmem:[%s9374_s24 + $0x8e8] ss:$16 sps:$4 sm:$0xff]  }
  0xf6   : > { %5372 = vmatpush1.bf16.msra.mxu0 %v8383_v0  ;;  %5905 = vmatpush1.bf16.msra.mxu1 %v8386_v1  ;;  %v8475_v0 = vld [vmem:[%s9374_s24 + $0x904] ss:$16 sps:$4 sm:$0xff]   ;;  %v8478_v1 = vld [vmem:[%s9374_s24 + $0x90c] ss:$16 sps:$4 sm:$0xff]  }
  0xf7   : > { %5373 = vmatprep.subr.bf16.mxu0 %v8391_v2  ;;  %5906 = vmatprep.subr.bf16.mxu1 %v8394_v3  ;;  %v8473_v2 = vld [vmem:[%s9374_s24 + $0x900] ss:$16 sps:$4 sm:$0xff]   ;;  %v8476_v3 = vld [vmem:[%s9374_s24 + $0x908] ss:$16 sps:$4 sm:$0xff]  }
  0xfa   : > { %5374 = vmatpush1.bf16.msra.mxu0 %v8389_v4  ;;  %5907 = vmatpush1.bf16.msra.mxu1 %v8392_v5  ;;  %v8481_v4 = vld [vmem:[%s9374_s24 + $0x924] ss:$16 sps:$4 sm:$0xff]   ;;  %v8484_v5 = vld [vmem:[%s9374_s24 + $0x92c] ss:$16 sps:$4 sm:$0xff]  }
  0xfb   : > { %5375 = vmatprep.subr.bf16.mxu0 %v8397_v6  ;;  %5908 = vmatprep.subr.bf16.mxu1 %v8400_v7  ;;  %v8479_v6 = vld [vmem:[%s9374_s24 + $0x920] ss:$16 sps:$4 sm:$0xff]   ;;  %v8482_v7 = vld [vmem:[%s9374_s24 + $0x928] ss:$16 sps:$4 sm:$0xff]  }
  0xfe   : > { %5376 = vmatpush1.bf16.msra.mxu0 %v8395_v8  ;;  %5909 = vmatpush1.bf16.msra.mxu1 %v8398_v9  ;;  %v8487_v8 = vld [vmem:[%s9374_s24 + $0x944] ss:$16 sps:$4 sm:$0xff]   ;;  %v8490_v9 = vld [vmem:[%s9374_s24 + $0x94c] ss:$16 sps:$4 sm:$0xff]  }
  0xff   : > { %5377 = vmatprep.subr.bf16.mxu0 %v8403_v10  ;;  %5910 = vmatprep.subr.bf16.mxu1 %v8406_v11  ;;  %v8485_v10 = vld [vmem:[%s9374_s24 + $0x940] ss:$16 sps:$4 sm:$0xff]   ;;  %v8488_v11 = vld [vmem:[%s9374_s24 + $0x948] ss:$16 sps:$4 sm:$0xff]  }
 0x102   : > { %5378 = vmatpush1.bf16.msra.mxu0 %v8401_v12  ;;  %5911 = vmatpush1.bf16.msra.mxu1 %v8404_v14  ;;  %v8493_v12 = vld [vmem:[%s9374_s24 + $0x964] ss:$16 sps:$4 sm:$0xff]   ;;  %v8496_v14 = vld [vmem:[%s9374_s24 + $0x96c] ss:$16 sps:$4 sm:$0xff]  }
 0x103   : > { %5379 = vmatprep.subr.bf16.mxu0 %v8409_v16  ;;  %5912 = vmatprep.subr.bf16.mxu1 %v8412_v52  ;;  %v8491_v16 = vld [vmem:[%s9374_s24 + $0x960] ss:$16 sps:$4 sm:$0xff]   ;;  %v8494_v52 = vld [vmem:[%s9374_s24 + $0x968] ss:$16 sps:$4 sm:$0xff]  }
 0x106   : > { %5380 = vmatpush1.bf16.msra.mxu0 %v8407_v17  ;;  %5913 = vmatpush1.bf16.msra.mxu1 %v8410_v18  ;;  %v8499_v17 = vld [vmem:[%s9374_s24 + $0x984] ss:$16 sps:$4 sm:$0xff]   ;;  %v8502_v18 = vld [vmem:[%s9374_s24 + $0x98c] ss:$16 sps:$4 sm:$0xff]  }
 0x107   : > { %5381 = vmatprep.subr.bf16.mxu0 %v8415_v19  ;;  %5914 = vmatprep.subr.bf16.mxu1 %v8418_v20  ;;  %v8497_v19 = vld [vmem:[%s9374_s24 + $0x980] ss:$16 sps:$4 sm:$0xff]   ;;  %v8500_v20 = vld [vmem:[%s9374_s24 + $0x988] ss:$16 sps:$4 sm:$0xff]  }
 0x10a   : > { %5382 = vmatpush1.bf16.msra.mxu0 %v8413_v22  ;;  %5915 = vmatpush1.bf16.msra.mxu1 %v8416_v23  ;;  %v8505_v22 = vld [vmem:[%s9374_s24 + $0x9a4] ss:$16 sps:$4 sm:$0xff]   ;;  %v8508_v23 = vld [vmem:[%s9374_s24 + $0x9ac] ss:$16 sps:$4 sm:$0xff]  }
 0x10b   : > { %5383 = vmatprep.subr.bf16.mxu0 %v8421_v24  ;;  %5916 = vmatprep.subr.bf16.mxu1 %v8424_v26  ;;  %v8503_v24 = vld [vmem:[%s9374_s24 + $0x9a0] ss:$16 sps:$4 sm:$0xff]   ;;  %v8506_v26 = vld [vmem:[%s9374_s24 + $0x9a8] ss:$16 sps:$4 sm:$0xff]  }
 0x10e   : > { %5384 = vmatpush1.bf16.msra.mxu0 %v8419_v27  ;;  %5917 = vmatpush1.bf16.msra.mxu1 %v8422_v28  ;;  %v8511_v27 = vld [vmem:[%s9374_s24 + $0x9c4] ss:$16 sps:$4 sm:$0xff]   ;;  %v8514_v28 = vld [vmem:[%s9374_s24 + $0x9cc] ss:$16 sps:$4 sm:$0xff]  }
 0x10f   : > { %5394 = vmatprep.subr.bf16.mxu0 %v8427_v29  ;;  %5927 = vmatprep.subr.bf16.mxu1 %v8430_v30  ;;  %v8509_v29 = vld [vmem:[%s9374_s24 + $0x9c0] ss:$16 sps:$4 sm:$0xff]   ;;  %v8512_v30 = vld [vmem:[%s9374_s24 + $0x9c8] ss:$16 sps:$4 sm:$0xff]  }
 0x111   : > { %5386 = vmatmul.mubr.bf16.vlgmr.msra.gmra.mrb[0].mxu0 %v1090_v31  ;;  %5919 = vmatmul.mubr.bf16.vlgmr.msra.gmra.mrb[0].mxu1 %v1090_v31  ;;  %v8520_v31 = vld [vmem:[%s9374_s24 + $0x9ec] ss:$16 sps:$4 sm:$0xff]  }
 0x112   : > { %5395 = vmatpush1.bf16.msra.mxu0 %v8425_v32  ;;  %5928 = vmatpush1.bf16.msra.mxu1 %v8428_v33  ;;  %v8515_v32 = vld [vmem:[%s9374_s24 + $0x9e0] ss:$16 sps:$4 sm:$0xff]   ;;  %v8518_v33 = vld [vmem:[%s9374_s24 + $0x9e8] ss:$16 sps:$4 sm:$0xff]  }
 0x113   : > { %5396 = vmatprep.subr.bf16.mxu0 %v8433_v25  ;;  %5929 = vmatprep.subr.bf16.mxu1 %v8436_v34  ;;  %v8523_v25 = vld [vmem:[%s9374_s24 + $0xa04] ss:$16 sps:$4 sm:$0xff]   ;;  %v8526_v34 = vld [vmem:[%s9374_s24 + $0xa0c] ss:$16 sps:$4 sm:$0xff]  }
 0x114   : > { %5426 = vmatprep.mubr.bf16.mxu0 %v9690_v35  ;;  %5959 = vmatprep.mubr.bf16.mxu1 %v9690_v35 }
 0x116   : > { %5397 = vmatpush1.bf16.msra.mxu0 %v8431_v13  ;;  %5930 = vmatpush1.bf16.msra.mxu1 %v8434_v36  ;;  %v9756_v13 = vrot.slane %v9671_v21, %v9429_v49  ;;  %v8521_v36 = vld [vmem:[%s9374_s24 + $0xa00] ss:$16 sps:$4 sm:$0xff]  }
 0x117   : > { %5398 = vmatprep.subr.bf16.mxu0 %v8439_v37  ;;  %5931 = vmatprep.subr.bf16.mxu1 %v8442_v38  ;;  %v8524_v37 = vld [vmem:[%s9374_s24 + $0xa08] ss:$16 sps:$4 sm:$0xff]   ;;  %v8529_v38 = vld [vmem:[%s9374_s24 + $0xa24] ss:$16 sps:$4 sm:$0xff]   ;;  %v8527_v21 = vld [vmem:[%s9374_s24 + $0xa20] ss:$16 sps:$4 sm:$0xff]  }
 0x11a   : > { %5399 = vmatpush1.bf16.msra.mxu0 %v8437_v39  ;;  %5932 = vmatpush1.bf16.msra.mxu1 %v8440_v40  ;;  %v8532_v39 = vld [vmem:[%s9374_s24 + $0xa2c] ss:$16 sps:$4 sm:$0xff]   ;;  %v1140_v40 = vcombine.high %v9690_v35, %v9690_v35  ;;  %v8533_v35 = vld [vmem:[%s9374_s24 + $0xa40] ss:$16 sps:$4 sm:$0xff]  }
 0x11b   : > { %5400 = vmatprep.subr.bf16.mxu0 %v8445_v41  ;;  %5933 = vmatprep.subr.bf16.mxu1 %v8448_v42  ;;  %v8530_v41 = vld [vmem:[%s9374_s24 + $0xa28] ss:$16 sps:$4 sm:$0xff]   ;;  %v8535_v42 = vld [vmem:[%s9374_s24 + $0xa44] ss:$16 sps:$4 sm:$0xff]  }
 0x11e   : > { %5401 = vmatpush1.bf16.msra.mxu0 %v8443_v44  ;;  %5934 = vmatpush1.bf16.msra.mxu1 %v8446_v45  ;;  %v8538_v44 = vld [vmem:[%s9374_s24 + $0xa4c] ss:$16 sps:$4 sm:$0xff]   ;;  %v8536_v45 = vld [vmem:[%s9374_s24 + $0xa48] ss:$16 sps:$4 sm:$0xff]  }
 0x11f   : > { %5402 = vmatprep.subr.bf16.mxu0 %v8451_v46  ;;  %5935 = vmatprep.subr.bf16.mxu1 %v8454_v47  ;;  %v8541_v46 = vld [vmem:[%s9374_s24 + $0xa64] ss:$16 sps:$4 sm:$0xff]   ;;  %v8544_v47 = vld [vmem:[%s9374_s24 + $0xa6c] ss:$16 sps:$4 sm:$0xff]  }
 0x122   : > { %5403 = vmatpush1.bf16.msra.mxu0 %v8449_v48  ;;  %5936 = vmatpush1.bf16.msra.mxu1 %v8452_v50  ;;  %v8539_v48 = vld [vmem:[%s9374_s24 + $0xa60] ss:$16 sps:$4 sm:$0xff]   ;;  %v8542_v50 = vld [vmem:[%s9374_s24 + $0xa68] ss:$16 sps:$4 sm:$0xff]  }
 0x123   : > { %5404 = vmatprep.subr.bf16.mxu0 %v8457_v51  ;;  %5937 = vmatprep.subr.bf16.mxu1 %v8460_v53  ;;  %v8547_v51 = vld [vmem:[%s9374_s24 + $0xa84] ss:$16 sps:$4 sm:$0xff]   ;;  %v8550_v53 = vld [vmem:[%s9374_s24 + $0xa8c] ss:$16 sps:$4 sm:$0xff]  }
 0x126   : > { %5405 = vmatpush1.bf16.msra.mxu0 %v8455_v54  ;;  %5938 = vmatpush1.bf16.msra.mxu1 %v8458_v55  ;;  %v8545_v54 = vld [vmem:[%s9374_s24 + $0xa80] ss:$16 sps:$4 sm:$0xff]   ;;  %v8548_v55 = vld [vmem:[%s9374_s24 + $0xa88] ss:$16 sps:$4 sm:$0xff]  }
 0x127   : > { %5406 = vmatprep.subr.bf16.mxu0 %v8463_v56  ;;  %5939 = vmatprep.subr.bf16.mxu1 %v8466_v57  ;;  %v8553_v56 = vld [vmem:[%s9374_s24 + $0xaa4] ss:$16 sps:$4 sm:$0xff]   ;;  %v8556_v57 = vld [vmem:[%s9374_s24 + $0xaac] ss:$16 sps:$4 sm:$0xff]  }
 0x12a   : > { %5407 = vmatpush1.bf16.msra.mxu0 %v8461_v58  ;;  %5940 = vmatpush1.bf16.msra.mxu1 %v8464_v59  ;;  %v8551_v58 = vld [vmem:[%s9374_s24 + $0xaa0] ss:$16 sps:$4 sm:$0xff]   ;;  %v8554_v59 = vld [vmem:[%s9374_s24 + $0xaa8] ss:$16 sps:$4 sm:$0xff]  }
 0x12b   : > { %5408 = vmatprep.subr.bf16.mxu0 %v8469_v60  ;;  %5941 = vmatprep.subr.bf16.mxu1 %v8472_v61  ;;  %v8559_v60 = vld [vmem:[%s9374_s24 + $0xac4] ss:$16 sps:$4 sm:$0xff]   ;;  %v8562_v61 = vld [vmem:[%s9374_s24 + $0xacc] ss:$16 sps:$4 sm:$0xff]  }
 0x12e   : > { %5409 = vmatpush1.bf16.msra.mxu0 %v8467_v62  ;;  %5942 = vmatpush1.bf16.msra.mxu1 %v8470_v63  ;;  %v8557_v62 = vld [vmem:[%s9374_s24 + $0xac0] ss:$16 sps:$4 sm:$0xff]   ;;  %v8560_v63 = vld [vmem:[%s9374_s24 + $0xac8] ss:$16 sps:$4 sm:$0xff]  }
 0x12f   : > { %5410 = vmatprep.subr.bf16.mxu0 %v8475_v0  ;;  %5943 = vmatprep.subr.bf16.mxu1 %v8478_v1  ;;  %v8565_v0 = vld [vmem:[%s9374_s24 + $0xae4] ss:$16 sps:$4 sm:$0xff]   ;;  %v8568_v1 = vld [vmem:[%s9374_s24 + $0xaec] ss:$16 sps:$4 sm:$0xff]  }
 0x132   : > { %5411 = vmatpush1.bf16.msra.mxu0 %v8473_v2  ;;  %5944 = vmatpush1.bf16.msra.mxu1 %v8476_v3  ;;  %v8563_v2 = vld [vmem:[%s9374_s24 + $0xae0] ss:$16 sps:$4 sm:$0xff]   ;;  %v8566_v3 = vld [vmem:[%s9374_s24 + $0xae8] ss:$16 sps:$4 sm:$0xff]  }
 0x133   : > { %5412 = vmatprep.subr.bf16.mxu0 %v8481_v4  ;;  %5945 = vmatprep.subr.bf16.mxu1 %v8484_v5  ;;  %v8571_v4 = vld [vmem:[%s9374_s24 + $0xb04] ss:$16 sps:$4 sm:$0xff]   ;;  %v8574_v5 = vld [vmem:[%s9374_s24 + $0xb0c] ss:$16 sps:$4 sm:$0xff]  }
 0x136   : > { %5413 = vmatpush1.bf16.msra.mxu0 %v8479_v6  ;;  %5946 = vmatpush1.bf16.msra.mxu1 %v8482_v7  ;;  %v8569_v6 = vld [vmem:[%s9374_s24 + $0xb00] ss:$16 sps:$4 sm:$0xff]   ;;  %v8572_v7 = vld [vmem:[%s9374_s24 + $0xb08] ss:$16 sps:$4 sm:$0xff]  }
 0x137   : > { %5414 = vmatprep.subr.bf16.mxu0 %v8487_v8  ;;  %5947 = vmatprep.subr.bf16.mxu1 %v8490_v9  ;;  %v8577_v8 = vld [vmem:[%s9374_s24 + $0xb24] ss:$16 sps:$4 sm:$0xff]   ;;  %v8580_v9 = vld [vmem:[%s9374_s24 + $0xb2c] ss:$16 sps:$4 sm:$0xff]  }
 0x13a   : > { %5415 = vmatpush1.bf16.msra.mxu0 %v8485_v10  ;;  %5948 = vmatpush1.bf16.msra.mxu1 %v8488_v11  ;;  %v8575_v10 = vld [vmem:[%s9374_s24 + $0xb20] ss:$16 sps:$4 sm:$0xff]   ;;  %v8578_v11 = vld [vmem:[%s9374_s24 + $0xb28] ss:$16 sps:$4 sm:$0xff]  }
 0x13b   : > { %5416 = vmatprep.subr.bf16.mxu0 %v8493_v12  ;;  %5949 = vmatprep.subr.bf16.mxu1 %v8496_v14  ;;  %v8583_v12 = vld [vmem:[%s9374_s24 + $0xb44] ss:$16 sps:$4 sm:$0xff]   ;;  %v8586_v14 = vld [vmem:[%s9374_s24 + $0xb4c] ss:$16 sps:$4 sm:$0xff]  }
 0x13e   : > { %5417 = vmatpush1.bf16.msra.mxu0 %v8491_v16  ;;  %5950 = vmatpush1.bf16.msra.mxu1 %v8494_v52  ;;  %v8581_v16 = vld [vmem:[%s9374_s24 + $0xb40] ss:$16 sps:$4 sm:$0xff]   ;;  %v8584_v52 = vld [vmem:[%s9374_s24 + $0xb48] ss:$16 sps:$4 sm:$0xff]  }
 0x13f   : > { %5418 = vmatprep.subr.bf16.mxu0 %v8499_v17  ;;  %5951 = vmatprep.subr.bf16.mxu1 %v8502_v18  ;;  %v8589_v17 = vld [vmem:[%s9374_s24 + $0xb64] ss:$16 sps:$4 sm:$0xff]   ;;  %v8592_v18 = vld [vmem:[%s9374_s24 + $0xb6c] ss:$16 sps:$4 sm:$0xff]  }
 0x142   : > { %5419 = vmatpush1.bf16.msra.mxu0 %v8497_v19  ;;  %5952 = vmatpush1.bf16.msra.mxu1 %v8500_v20  ;;  %v8587_v19 = vld [vmem:[%s9374_s24 + $0xb60] ss:$16 sps:$4 sm:$0xff]   ;;  %v8590_v20 = vld [vmem:[%s9374_s24 + $0xb68] ss:$16 sps:$4 sm:$0xff]  }
 0x143   : > { %5420 = vmatprep.subr.bf16.mxu0 %v8505_v22  ;;  %5953 = vmatprep.subr.bf16.mxu1 %v8508_v23  ;;  %v8595_v22 = vld [vmem:[%s9374_s24 + $0xb84] ss:$16 sps:$4 sm:$0xff]   ;;  %v8598_v23 = vld [vmem:[%s9374_s24 + $0xb8c] ss:$16 sps:$4 sm:$0xff]  }
 0x146   : > { %5421 = vmatpush1.bf16.msra.mxu0 %v8503_v24  ;;  %5954 = vmatpush1.bf16.msra.mxu1 %v8506_v26  ;;  %v8593_v24 = vld [vmem:[%s9374_s24 + $0xb80] ss:$16 sps:$4 sm:$0xff]   ;;  %v8596_v26 = vld [vmem:[%s9374_s24 + $0xb88] ss:$16 sps:$4 sm:$0xff]  }
 0x147   : > { %5422 = vmatprep.subr.bf16.mxu0 %v8511_v27  ;;  %5955 = vmatprep.subr.bf16.mxu1 %v8514_v28  ;;  %v8601_v27 = vld [vmem:[%s9374_s24 + $0xba4] ss:$16 sps:$4 sm:$0xff]   ;;  %v8604_v28 = vld [vmem:[%s9374_s24 + $0xbac] ss:$16 sps:$4 sm:$0xff]  }
 0x14a   : > { %5423 = vmatpush1.bf16.msra.mxu0 %v8509_v29  ;;  %5956 = vmatpush1.bf16.msra.mxu1 %v8512_v30  ;;  %v8599_v29 = vld [vmem:[%s9374_s24 + $0xba0] ss:$16 sps:$4 sm:$0xff]   ;;  %v8602_v30 = vld [vmem:[%s9374_s24 + $0xba8] ss:$16 sps:$4 sm:$0xff]  }
 0x14b   : > { %5424 = vmatprep.subr.bf16.mxu0 %v8517_v15  ;;  %5957 = vmatprep.subr.bf16.mxu1 %v8520_v31  ;;  %v8607_v15 = vld [vmem:[%s9374_s24 + $0xbc4] ss:$16 sps:$4 sm:$0xff]   ;;  %v8610_v31 = vld [vmem:[%s9374_s24 + $0xbcc] ss:$16 sps:$4 sm:$0xff]  }
 0x14e   : > { %5425 = vmatpush1.bf16.msra.mxu0 %v8515_v32  ;;  %5958 = vmatpush1.bf16.msra.mxu1 %v8518_v33  ;;  %v9243_v32 = vld [vmem:[%s9426_s28 + $0x8] sm:$0xff] }
 0x14f   : > { %5435 = vmatprep.subr.bf16.mxu0 %v8523_v25  ;;  %5968 = vmatprep.subr.bf16.mxu1 %v8526_v34  ;;  %v1093_v33 = vcombine.high %v9243_v32, %v9243_v32  ;;  %v8605_v25 = vld [vmem:[%s9374_s24 + $0xbc0] ss:$16 sps:$4 sm:$0xff]   ;;  %v8608_v34 = vld [vmem:[%s9374_s24 + $0xbc8] ss:$16 sps:$4 sm:$0xff]  }
 0x150   : > { %v8689_v32 = vld [vmem:[%s9374_s24 + $0xd80] ss:$16 sps:$4 sm:$0xff]  }
 0x151   : > { %5427 = vmatmul.mubr.bf16.vlgmr.msra.gmra.mrb[0].mxu0 %v9756_v13  ;;  %5960 = vmatmul.mubr.bf16.vlgmr.msra.gmra.mrb[0].mxu1 %v9756_v13 }
 0x152   : > { %5436 = vmatpush1.bf16.msra.mxu0 %v8521_v36  ;;  %5969 = vmatpush1.bf16.msra.mxu1 %v8524_v37  ;;  %v8613_v36 = vld [vmem:[%s9374_s24 + $0xbe4] ss:$16 sps:$4 sm:$0xff]   ;;  %v8616_v37 = vld [vmem:[%s9374_s24 + $0xbec] ss:$16 sps:$4 sm:$0xff]  }
 0x153   : > { %5437 = vmatprep.subr.bf16.mxu0 %v8529_v38  ;;  %5970 = vmatprep.subr.bf16.mxu1 %v8532_v39  ;;  %v9824_v38 = vrot.slane %v1093_v33, %v9429_v49  ;;  %v8611_v39 = vld [vmem:[%s9374_s24 + $0xbe0] ss:$16 sps:$4 sm:$0xff]   ;;  %v8692_v33 = vld [vmem:[%s9374_s24 + $0xd88] ss:$16 sps:$4 sm:$0xff]  }
 0x154   : > { %5467 = vmatprep.mubr.bf16.mxu0 %v1140_v40  ;;  %6000 = vmatprep.mubr.bf16.mxu1 %v1140_v40  ;;  %v8614_v40 = vld [vmem:[%s9374_s24 + $0xbe8] ss:$16 sps:$4 sm:$0xff]  }
 0x156   : > { %5438 = vmatpush1.bf16.msra.mxu0 %v8527_v21  ;;  %5971 = vmatpush1.bf16.msra.mxu1 %v8530_v41  ;;  %v8619_v21 = vld [vmem:[%s9374_s24 + $0xc04] ss:$16 sps:$4 sm:$0xff]   ;;  %v8622_v41 = vld [vmem:[%s9374_s24 + $0xc0c] ss:$16 sps:$4 sm:$0xff]  }
 0x157   : > { %5439 = vmatprep.subr.bf16.mxu0 %v8535_v42  ;;  %5972 = vmatprep.subr.bf16.mxu1 %v8538_v44  ;;  %v1109_v42 = vcombine.high %v9824_v38, %v9824_v38  ;;  %v1138_v44 = vcombine.high %v9756_v13, %v9756_v13  ;;  %v8623_v13 = vld [vmem:[%s9374_s24 + $0xc20] ss:$16 sps:$4 sm:$0xff]  }
 0x15a   : > { %5440 = vmatpush1.bf16.msra.mxu0 %v8533_v35  ;;  %5973 = vmatpush1.bf16.msra.mxu1 %v8536_v45  ;;  %v8617_v35 = vld [vmem:[%s9374_s24 + $0xc00] ss:$16 sps:$4 sm:$0xff]   ;;  %v8620_v45 = vld [vmem:[%s9374_s24 + $0xc08] ss:$16 sps:$4 sm:$0xff]  }
 0x15b   : > { %5441 = vmatprep.subr.bf16.mxu0 %v8541_v46  ;;  %5974 = vmatprep.subr.bf16.mxu1 %v8544_v47  ;;  %v8625_v46 = vld [vmem:[%s9374_s24 + $0xc24] ss:$16 sps:$4 sm:$0xff]   ;;  %v8628_v47 = vld [vmem:[%s9374_s24 + $0xc2c] ss:$16 sps:$4 sm:$0xff]  }
 0x15e   : > { %5442 = vmatpush1.bf16.msra.mxu0 %v8539_v48  ;;  %5975 = vmatpush1.bf16.msra.mxu1 %v8542_v50  ;;  %v9839_v48 = vrot.slane %v1109_v42, %v9429_v49  ;;  %v8626_v50 = vld [vmem:[%s9374_s24 + $0xc28] ss:$16 sps:$4 sm:$0xff]   ;;  %v8709_v42 = vld [vmem:[%s9374_s24 + $0xde4] ss:$16 sps:$4 sm:$0xff]  }
 0x15f   : > { %5443 = vmatprep.subr.bf16.mxu0 %v8547_v51  ;;  %5976 = vmatprep.subr.bf16.mxu1 %v8550_v53  ;;  %v8631_v51 = vld [vmem:[%s9374_s24 + $0xc44] ss:$16 sps:$4 sm:$0xff]   ;;  %v8634_v53 = vld [vmem:[%s9374_s24 + $0xc4c] ss:$16 sps:$4 sm:$0xff]  }
 0x162   : > { %5444 = vmatpush1.bf16.msra.mxu0 %v8545_v54  ;;  %5977 = vmatpush1.bf16.msra.mxu1 %v8548_v55  ;;  %v8629_v54 = vld [vmem:[%s9374_s24 + $0xc40] ss:$16 sps:$4 sm:$0xff]   ;;  %v8632_v55 = vld [vmem:[%s9374_s24 + $0xc48] ss:$16 sps:$4 sm:$0xff]  }
 0x163   : > { %5445 = vmatprep.subr.bf16.mxu0 %v8553_v56  ;;  %5978 = vmatprep.subr.bf16.mxu1 %v8556_v57  ;;  %v8637_v56 = vld [vmem:[%s9374_s24 + $0xc64] ss:$16 sps:$4 sm:$0xff]   ;;  %v8640_v57 = vld [vmem:[%s9374_s24 + $0xc6c] ss:$16 sps:$4 sm:$0xff]  }
 0x166   : > { %5446 = vmatpush1.bf16.msra.mxu0 %v8551_v58  ;;  %5979 = vmatpush1.bf16.msra.mxu1 %v8554_v59  ;;  %v8635_v58 = vld [vmem:[%s9374_s24 + $0xc60] ss:$16 sps:$4 sm:$0xff]   ;;  %v8638_v59 = vld [vmem:[%s9374_s24 + $0xc68] ss:$16 sps:$4 sm:$0xff]  }
 0x167   : > { %5447 = vmatprep.subr.bf16.mxu0 %v8559_v60  ;;  %5980 = vmatprep.subr.bf16.mxu1 %v8562_v61  ;;  %v8643_v60 = vld [vmem:[%s9374_s24 + $0xc84] ss:$16 sps:$4 sm:$0xff]   ;;  %v8646_v61 = vld [vmem:[%s9374_s24 + $0xc8c] ss:$16 sps:$4 sm:$0xff]  }
 0x16a   : > { %5448 = vmatpush1.bf16.msra.mxu0 %v8557_v62  ;;  %5981 = vmatpush1.bf16.msra.mxu1 %v8560_v63  ;;  %v8641_v62 = vld [vmem:[%s9374_s24 + $0xc80] ss:$16 sps:$4 sm:$0xff]   ;;  %v8644_v63 = vld [vmem:[%s9374_s24 + $0xc88] ss:$16 sps:$4 sm:$0xff]  }
 0x16b   : > { %5449 = vmatprep.subr.bf16.mxu0 %v8565_v0  ;;  %5982 = vmatprep.subr.bf16.mxu1 %v8568_v1  ;;  %v8649_v0 = vld [vmem:[%s9374_s24 + $0xca4] ss:$16 sps:$4 sm:$0xff]   ;;  %v8652_v1 = vld [vmem:[%s9374_s24 + $0xcac] ss:$16 sps:$4 sm:$0xff]  }
 0x16e   : > { %5450 = vmatpush1.bf16.msra.mxu0 %v8563_v2  ;;  %5983 = vmatpush1.bf16.msra.mxu1 %v8566_v3  ;;  %v8647_v2 = vld [vmem:[%s9374_s24 + $0xca0] ss:$16 sps:$4 sm:$0xff]   ;;  %v8650_v3 = vld [vmem:[%s9374_s24 + $0xca8] ss:$16 sps:$4 sm:$0xff]  }
 0x16f   : > { %5451 = vmatprep.subr.bf16.mxu0 %v8571_v4  ;;  %5984 = vmatprep.subr.bf16.mxu1 %v8574_v5  ;;  %v8655_v4 = vld [vmem:[%s9374_s24 + $0xcc4] ss:$16 sps:$4 sm:$0xff]   ;;  %v8658_v5 = vld [vmem:[%s9374_s24 + $0xccc] ss:$16 sps:$4 sm:$0xff]  }
 0x172   : > { %5452 = vmatpush1.bf16.msra.mxu0 %v8569_v6  ;;  %5985 = vmatpush1.bf16.msra.mxu1 %v8572_v7  ;;  %v8653_v6 = vld [vmem:[%s9374_s24 + $0xcc0] ss:$16 sps:$4 sm:$0xff]   ;;  %v8656_v7 = vld [vmem:[%s9374_s24 + $0xcc8] ss:$16 sps:$4 sm:$0xff]  }
 0x173   : > { %5453 = vmatprep.subr.bf16.mxu0 %v8577_v8  ;;  %5986 = vmatprep.subr.bf16.mxu1 %v8580_v9  ;;  %v8661_v8 = vld [vmem:[%s9374_s24 + $0xce4] ss:$16 sps:$4 sm:$0xff]   ;;  %v8664_v9 = vld [vmem:[%s9374_s24 + $0xcec] ss:$16 sps:$4 sm:$0xff]  }
 0x176   : > { %5454 = vmatpush1.bf16.msra.mxu0 %v8575_v10  ;;  %5987 = vmatpush1.bf16.msra.mxu1 %v8578_v11  ;;  %v8659_v10 = vld [vmem:[%s9374_s24 + $0xce0] ss:$16 sps:$4 sm:$0xff]   ;;  %v8662_v11 = vld [vmem:[%s9374_s24 + $0xce8] ss:$16 sps:$4 sm:$0xff]  }
 0x177   : > { %5455 = vmatprep.subr.bf16.mxu0 %v8583_v12  ;;  %5988 = vmatprep.subr.bf16.mxu1 %v8586_v14  ;;  %v8667_v12 = vld [vmem:[%s9374_s24 + $0xd04] ss:$16 sps:$4 sm:$0xff]   ;;  %v8670_v14 = vld [vmem:[%s9374_s24 + $0xd0c] ss:$16 sps:$4 sm:$0xff]  }
 0x17a   : > { %5456 = vmatpush1.bf16.msra.mxu0 %v8581_v16  ;;  %5989 = vmatpush1.bf16.msra.mxu1 %v8584_v52  ;;  %v8665_v16 = vld [vmem:[%s9374_s24 + $0xd00] ss:$16 sps:$4 sm:$0xff]   ;;  %v8668_v52 = vld [vmem:[%s9374_s24 + $0xd08] ss:$16 sps:$4 sm:$0xff]  }
 0x17b   : > { %5457 = vmatprep.subr.bf16.mxu0 %v8589_v17  ;;  %5990 = vmatprep.subr.bf16.mxu1 %v8592_v18  ;;  %v8673_v17 = vld [vmem:[%s9374_s24 + $0xd24] ss:$16 sps:$4 sm:$0xff]   ;;  %v8676_v18 = vld [vmem:[%s9374_s24 + $0xd2c] ss:$16 sps:$4 sm:$0xff]  }
 0x17e   : > { %5458 = vmatpush1.bf16.msra.mxu0 %v8587_v19  ;;  %5991 = vmatpush1.bf16.msra.mxu1 %v8590_v20  ;;  %v8671_v19 = vld [vmem:[%s9374_s24 + $0xd20] ss:$16 sps:$4 sm:$0xff]   ;;  %v8674_v20 = vld [vmem:[%s9374_s24 + $0xd28] ss:$16 sps:$4 sm:$0xff]  }
 0x17f   : > { %5459 = vmatprep.subr.bf16.mxu0 %v8595_v22  ;;  %5992 = vmatprep.subr.bf16.mxu1 %v8598_v23  ;;  %v8679_v22 = vld [vmem:[%s9374_s24 + $0xd44] ss:$16 sps:$4 sm:$0xff]   ;;  %v8682_v23 = vld [vmem:[%s9374_s24 + $0xd4c] ss:$16 sps:$4 sm:$0xff]  }
 0x182   : > { %5460 = vmatpush1.bf16.msra.mxu0 %v8593_v24  ;;  %5993 = vmatpush1.bf16.msra.mxu1 %v8596_v26  ;;  %v8677_v24 = vld [vmem:[%s9374_s24 + $0xd40] ss:$16 sps:$4 sm:$0xff]   ;;  %v8680_v26 = vld [vmem:[%s9374_s24 + $0xd48] ss:$16 sps:$4 sm:$0xff]  }
 0x183   : > { %5461 = vmatprep.subr.bf16.mxu0 %v8601_v27  ;;  %5994 = vmatprep.subr.bf16.mxu1 %v8604_v28  ;;  %v8685_v27 = vld [vmem:[%s9374_s24 + $0xd64] ss:$16 sps:$4 sm:$0xff]   ;;  %v8688_v28 = vld [vmem:[%s9374_s24 + $0xd6c] ss:$16 sps:$4 sm:$0xff]  }
 0x186   : > { %5462 = vmatpush1.bf16.msra.mxu0 %v8599_v29  ;;  %5995 = vmatpush1.bf16.msra.mxu1 %v8602_v30  ;;  %v8683_v29 = vld [vmem:[%s9374_s24 + $0xd60] ss:$16 sps:$4 sm:$0xff]   ;;  %v8686_v30 = vld [vmem:[%s9374_s24 + $0xd68] ss:$16 sps:$4 sm:$0xff]  }
 0x187   : > { %5463 = vmatprep.subr.bf16.mxu0 %v8607_v15  ;;  %5996 = vmatprep.subr.bf16.mxu1 %v8610_v31  ;;  %v8691_v15 = vld [vmem:[%s9374_s24 + $0xd84] ss:$16 sps:$4 sm:$0xff]   ;;  %v8694_v31 = vld [vmem:[%s9374_s24 + $0xd8c] ss:$16 sps:$4 sm:$0xff]  }
 0x18a   : > { %5464 = vmatpush1.bf16.msra.mxu0 %v8605_v25  ;;  %5997 = vmatpush1.bf16.msra.mxu1 %v8608_v34  ;;  %v8697_v25 = vld [vmem:[%s9374_s24 + $0xda4] ss:$16 sps:$4 sm:$0xff]   ;;  %v8700_v34 = vld [vmem:[%s9374_s24 + $0xdac] ss:$16 sps:$4 sm:$0xff]  }
 0x18b   : > { %5465 = vmatprep.subr.bf16.mxu0 %v8613_v36  ;;  %5998 = vmatprep.subr.bf16.mxu1 %v8616_v37  ;;  %v8695_v36 = vld [vmem:[%s9374_s24 + $0xda0] ss:$16 sps:$4 sm:$0xff]   ;;  %v8698_v37 = vld [vmem:[%s9374_s24 + $0xda8] ss:$16 sps:$4 sm:$0xff]  }
 0x18e   : > { %5466 = vmatpush1.bf16.msra.mxu0 %v8611_v39  ;;  %5999 = vmatpush1.bf16.msra.mxu1 %v8614_v40  ;;  %v8703_v39 = vld [vmem:[%s9374_s24 + $0xdc4] ss:$16 sps:$4 sm:$0xff]   ;;  %v8706_v40 = vld [vmem:[%s9374_s24 + $0xdcc] ss:$16 sps:$4 sm:$0xff]  }
 0x18f   : > { %5476 = vmatprep.subr.bf16.mxu0 %v8619_v21  ;;  %6009 = vmatprep.subr.bf16.mxu1 %v8622_v41  ;;  %v8701_v21 = vld [vmem:[%s9374_s24 + $0xdc0] ss:$16 sps:$4 sm:$0xff]   ;;  %v8704_v41 = vld [vmem:[%s9374_s24 + $0xdc8] ss:$16 sps:$4 sm:$0xff]  }
 0x191   : > { %5468 = vmatmul.mubr.bf16.vlgmr.msra.gmra.mrb[0].mxu0 %v1138_v44  ;;  %6001 = vmatmul.mubr.bf16.vlgmr.msra.gmra.mrb[0].mxu1 %v1138_v44  ;;  %v8712_v44 = vld [vmem:[%s9374_s24 + $0xdec] ss:$16 sps:$4 sm:$0xff]  }
 0x192   : > { %5477 = vmatpush1.bf16.msra.mxu0 %v8617_v35  ;;  %6010 = vmatpush1.bf16.msra.mxu1 %v8620_v45  ;;  %v8707_v35 = vld [vmem:[%s9374_s24 + $0xde0] ss:$16 sps:$4 sm:$0xff]   ;;  %v8710_v45 = vld [vmem:[%s9374_s24 + $0xde8] ss:$16 sps:$4 sm:$0xff]  }
 0x193   : > { %5478 = vmatprep.subr.bf16.mxu0 %v8625_v46  ;;  %6011 = vmatprep.subr.bf16.mxu1 %v8628_v47  ;;  %v8716_v46 = vld [vmem:[%s9374_s24 + $0xe04] ss:$16 sps:$4 sm:$0xff]   ;;  %v8719_v47 = vld [vmem:[%s9374_s24 + $0xe0c] ss:$16 sps:$4 sm:$0xff]  }
 0x194   : > { %5508 = vmatprep.mubr.bf16.mxu0 %v9839_v48  ;;  %6041 = vmatprep.mubr.bf16.mxu1 %v9839_v48 }
 0x196   : > { %5479 = vmatpush1.bf16.msra.mxu0 %v8623_v13  ;;  %6012 = vmatpush1.bf16.msra.mxu1 %v8626_v50  ;;  %v9905_v13 = vrot.slane %v9824_v38, %v9429_v49  ;;  %v8714_v50 = vld [vmem:[%s9374_s24 + $0xe00] ss:$16 sps:$4 sm:$0xff]  }
 0x197   : > { %5480 = vmatprep.subr.bf16.mxu0 %v8631_v51  ;;  %6013 = vmatprep.subr.bf16.mxu1 %v8634_v53  ;;  %v8717_v51 = vld [vmem:[%s9374_s24 + $0xe08] ss:$16 sps:$4 sm:$0xff]   ;;  %v8722_v53 = vld [vmem:[%s9374_s24 + $0xe24] ss:$16 sps:$4 sm:$0xff]   ;;  %v8720_v38 = vld [vmem:[%s9374_s24 + $0xe20] ss:$16 sps:$4 sm:$0xff]  }
 0x19a   : > { %5481 = vmatpush1.bf16.msra.mxu0 %v8629_v54  ;;  %6014 = vmatpush1.bf16.msra.mxu1 %v8632_v55  ;;  %v8725_v54 = vld [vmem:[%s9374_s24 + $0xe2c] ss:$16 sps:$4 sm:$0xff]   ;;  %v1141_v55 = vcombine.high %v9839_v48, %v9839_v48  ;;  %v8726_v48 = vld [vmem:[%s9374_s24 + $0xe40] ss:$16 sps:$4 sm:$0xff]  }
 0x19b   : > { %5482 = vmatprep.subr.bf16.mxu0 %v8637_v56  ;;  %6015 = vmatprep.subr.bf16.mxu1 %v8640_v57  ;;  %v8723_v56 = vld [vmem:[%s9374_s24 + $0xe28] ss:$16 sps:$4 sm:$0xff]   ;;  %v8728_v57 = vld [vmem:[%s9374_s24 + $0xe44] ss:$16 sps:$4 sm:$0xff]  }
 0x19e   : > { %5483 = vmatpush1.bf16.msra.mxu0 %v8635_v58  ;;  %6016 = vmatpush1.bf16.msra.mxu1 %v8638_v59  ;;  %v8731_v58 = vld [vmem:[%s9374_s24 + $0xe4c] ss:$16 sps:$4 sm:$0xff]   ;;  %v8729_v59 = vld [vmem:[%s9374_s24 + $0xe48] ss:$16 sps:$4 sm:$0xff]  }
 0x19f   : > { %5484 = vmatprep.subr.bf16.mxu0 %v8643_v60  ;;  %6017 = vmatprep.subr.bf16.mxu1 %v8646_v61  ;;  %v8734_v60 = vld [vmem:[%s9374_s24 + $0xe64] ss:$16 sps:$4 sm:$0xff]   ;;  %v8737_v61 = vld [vmem:[%s9374_s24 + $0xe6c] ss:$16 sps:$4 sm:$0xff]  }
 0x1a2   : > { %5485 = vmatpush1.bf16.msra.mxu0 %v8641_v62  ;;  %6018 = vmatpush1.bf16.msra.mxu1 %v8644_v63  ;;  %v8732_v62 = vld [vmem:[%s9374_s24 + $0xe60] ss:$16 sps:$4 sm:$0xff]   ;;  %v8735_v63 = vld [vmem:[%s9374_s24 + $0xe68] ss:$16 sps:$4 sm:$0xff]  }
 0x1a3   : > { %5486 = vmatprep.subr.bf16.mxu0 %v8649_v0  ;;  %6019 = vmatprep.subr.bf16.mxu1 %v8652_v1  ;;  %v8740_v0 = vld [vmem:[%s9374_s24 + $0xe84] ss:$16 sps:$4 sm:$0xff]   ;;  %v8743_v1 = vld [vmem:[%s9374_s24 + $0xe8c] ss:$16 sps:$4 sm:$0xff]  }
 0x1a6   : > { %5487 = vmatpush1.bf16.msra.mxu0 %v8647_v2  ;;  %6020 = vmatpush1.bf16.msra.mxu1 %v8650_v3  ;;  %v8738_v2 = vld [vmem:[%s9374_s24 + $0xe80] ss:$16 sps:$4 sm:$0xff]   ;;  %v8741_v3 = vld [vmem:[%s9374_s24 + $0xe88] ss:$16 sps:$4 sm:$0xff]  }
 0x1a7   : > { %5488 = vmatprep.subr.bf16.mxu0 %v8655_v4  ;;  %6021 = vmatprep.subr.bf16.mxu1 %v8658_v5  ;;  %v8746_v4 = vld [vmem:[%s9374_s24 + $0xea4] ss:$16 sps:$4 sm:$0xff]   ;;  %v8749_v5 = vld [vmem:[%s9374_s24 + $0xeac] ss:$16 sps:$4 sm:$0xff]  }
 0x1aa   : > { %5489 = vmatpush1.bf16.msra.mxu0 %v8653_v6  ;;  %6022 = vmatpush1.bf16.msra.mxu1 %v8656_v7  ;;  %v8744_v6 = vld [vmem:[%s9374_s24 + $0xea0] ss:$16 sps:$4 sm:$0xff]   ;;  %v8747_v7 = vld [vmem:[%s9374_s24 + $0xea8] ss:$16 sps:$4 sm:$0xff]  }
 0x1ab   : > { %5490 = vmatprep.subr.bf16.mxu0 %v8661_v8  ;;  %6023 = vmatprep.subr.bf16.mxu1 %v8664_v9  ;;  %v8752_v8 = vld [vmem:[%s9374_s24 + $0xec4] ss:$16 sps:$4 sm:$0xff]   ;;  %v8755_v9 = vld [vmem:[%s9374_s24 + $0xecc] ss:$16 sps:$4 sm:$0xff]  }
 0x1ae   : > { %5491 = vmatpush1.bf16.msra.mxu0 %v8659_v10  ;;  %6024 = vmatpush1.bf16.msra.mxu1 %v8662_v11  ;;  %v8750_v10 = vld [vmem:[%s9374_s24 + $0xec0] ss:$16 sps:$4 sm:$0xff]   ;;  %v8753_v11 = vld [vmem:[%s9374_s24 + $0xec8] ss:$16 sps:$4 sm:$0xff]  }
 0x1af   : > { %5492 = vmatprep.subr.bf16.mxu0 %v8667_v12  ;;  %6025 = vmatprep.subr.bf16.mxu1 %v8670_v14  ;;  %v8758_v12 = vld [vmem:[%s9374_s24 + $0xee4] ss:$16 sps:$4 sm:$0xff]   ;;  %v8761_v14 = vld [vmem:[%s9374_s24 + $0xeec] ss:$16 sps:$4 sm:$0xff]  }
 0x1b2   : > { %5493 = vmatpush1.bf16.msra.mxu0 %v8665_v16  ;;  %6026 = vmatpush1.bf16.msra.mxu1 %v8668_v52  ;;  %v8756_v16 = vld [vmem:[%s9374_s24 + $0xee0] ss:$16 sps:$4 sm:$0xff]   ;;  %v8759_v52 = vld [vmem:[%s9374_s24 + $0xee8] ss:$16 sps:$4 sm:$0xff]  }
 0x1b3   : > { %5494 = vmatprep.subr.bf16.mxu0 %v8673_v17  ;;  %6027 = vmatprep.subr.bf16.mxu1 %v8676_v18  ;;  %v8764_v17 = vld [vmem:[%s9374_s24 + $0xf04] ss:$16 sps:$4 sm:$0xff]   ;;  %v8767_v18 = vld [vmem:[%s9374_s24 + $0xf0c] ss:$16 sps:$4 sm:$0xff]  }
 0x1b6   : > { %5495 = vmatpush1.bf16.msra.mxu0 %v8671_v19  ;;  %6028 = vmatpush1.bf16.msra.mxu1 %v8674_v20  ;;  %v8762_v19 = vld [vmem:[%s9374_s24 + $0xf00] ss:$16 sps:$4 sm:$0xff]   ;;  %v8765_v20 = vld [vmem:[%s9374_s24 + $0xf08] ss:$16 sps:$4 sm:$0xff]  }
 0x1b7   : > { %5496 = vmatprep.subr.bf16.mxu0 %v8679_v22  ;;  %6029 = vmatprep.subr.bf16.mxu1 %v8682_v23  ;;  %v8770_v22 = vld [vmem:[%s9374_s24 + $0xf24] ss:$16 sps:$4 sm:$0xff]   ;;  %v8773_v23 = vld [vmem:[%s9374_s24 + $0xf2c] ss:$16 sps:$4 sm:$0xff]  }
 0x1ba   : > { %5497 = vmatpush1.bf16.msra.mxu0 %v8677_v24  ;;  %6030 = vmatpush1.bf16.msra.mxu1 %v8680_v26  ;;  %v8768_v24 = vld [vmem:[%s9374_s24 + $0xf20] ss:$16 sps:$4 sm:$0xff]   ;;  %v8771_v26 = vld [vmem:[%s9374_s24 + $0xf28] ss:$16 sps:$4 sm:$0xff]  }
 0x1bb   : > { %5498 = vmatprep.subr.bf16.mxu0 %v8685_v27  ;;  %6031 = vmatprep.subr.bf16.mxu1 %v8688_v28  ;;  %v8776_v27 = vld [vmem:[%s9374_s24 + $0xf44] ss:$16 sps:$4 sm:$0xff]   ;;  %v8779_v28 = vld [vmem:[%s9374_s24 + $0xf4c] ss:$16 sps:$4 sm:$0xff]  }
 0x1be   : > { %5499 = vmatpush1.bf16.msra.mxu0 %v8683_v29  ;;  %6032 = vmatpush1.bf16.msra.mxu1 %v8686_v30  ;;  %v8774_v29 = vld [vmem:[%s9374_s24 + $0xf40] ss:$16 sps:$4 sm:$0xff]   ;;  %v8777_v30 = vld [vmem:[%s9374_s24 + $0xf48] ss:$16 sps:$4 sm:$0xff]  }
 0x1bf   : > { %5500 = vmatprep.subr.bf16.mxu0 %v8691_v15  ;;  %6033 = vmatprep.subr.bf16.mxu1 %v8694_v31  ;;  %v8782_v15 = vld [vmem:[%s9374_s24 + $0xf64] ss:$16 sps:$4 sm:$0xff]   ;;  %v8785_v31 = vld [vmem:[%s9374_s24 + $0xf6c] ss:$16 sps:$4 sm:$0xff]  }
 0x1c2   : > { %5501 = vmatpush1.bf16.msra.mxu0 %v8689_v32  ;;  %6034 = vmatpush1.bf16.msra.mxu1 %v8692_v33  ;;  %v8780_v32 = vld [vmem:[%s9374_s24 + $0xf60] ss:$16 sps:$4 sm:$0xff]   ;;  %v8783_v33 = vld [vmem:[%s9374_s24 + $0xf68] ss:$16 sps:$4 sm:$0xff]  }
 0x1c3   : > { %5502 = vmatprep.subr.bf16.mxu0 %v8697_v25  ;;  %6035 = vmatprep.subr.bf16.mxu1 %v8700_v34  ;;  %v8788_v25 = vld [vmem:[%s9374_s24 + $0xf84] ss:$16 sps:$4 sm:$0xff]   ;;  %v8791_v34 = vld [vmem:[%s9374_s24 + $0xf8c] ss:$16 sps:$4 sm:$0xff]  }
 0x1c6   : > { %5503 = vmatpush1.bf16.msra.mxu0 %v8695_v36  ;;  %6036 = vmatpush1.bf16.msra.mxu1 %v8698_v37  ;;  %v8786_v36 = vld [vmem:[%s9374_s24 + $0xf80] ss:$16 sps:$4 sm:$0xff]   ;;  %v8789_v37 = vld [vmem:[%s9374_s24 + $0xf88] ss:$16 sps:$4 sm:$0xff]  }
 0x1c7   : > { %5504 = vmatprep.subr.bf16.mxu0 %v8703_v39  ;;  %6037 = vmatprep.subr.bf16.mxu1 %v8706_v40  ;;  %v8794_v39 = vld [vmem:[%s9374_s24 + $0xfa4] ss:$16 sps:$4 sm:$0xff]   ;;  %v8797_v40 = vld [vmem:[%s9374_s24 + $0xfac] ss:$16 sps:$4 sm:$0xff]  }
 0x1ca   : > { %5505 = vmatpush1.bf16.msra.mxu0 %v8701_v21  ;;  %6038 = vmatpush1.bf16.msra.mxu1 %v8704_v41  ;;  %v8792_v21 = vld [vmem:[%s9374_s24 + $0xfa0] ss:$16 sps:$4 sm:$0xff]   ;;  %v8795_v41 = vld [vmem:[%s9374_s24 + $0xfa8] ss:$16 sps:$4 sm:$0xff]  }
 0x1cb   : > { %5506 = vmatprep.subr.bf16.mxu0 %v8709_v42  ;;  %6039 = vmatprep.subr.bf16.mxu1 %v8712_v44  ;;  %v8800_v42 = vld [vmem:[%s9374_s24 + $0xfc4] ss:$16 sps:$4 sm:$0xff]   ;;  %v8803_v44 = vld [vmem:[%s9374_s24 + $0xfcc] ss:$16 sps:$4 sm:$0xff]  }
 0x1ce   : > { %5507 = vmatpush1.bf16.msra.mxu0 %v8707_v35  ;;  %6040 = vmatpush1.bf16.msra.mxu1 %v8710_v45  ;;  %v9968_v35 = vld [vmem:[%s9426_s28 + $0x10] sm:$0xff] }
 0x1cf   : > { %5517 = vmatprep.subr.bf16.mxu0 %v8716_v46  ;;  %6050 = vmatprep.subr.bf16.mxu1 %v8719_v47  ;;  %v8798_v45 = vld [vmem:[%s9374_s24 + $0xfc0] ss:$16 sps:$4 sm:$0xff]   ;;  %v8801_v46 = vld [vmem:[%s9374_s24 + $0xfc8] ss:$16 sps:$4 sm:$0xff]   ;;  %v8806_v47 = vld [vmem:[%s9374_s24 + $0xfe4] ss:$16 sps:$4 sm:$0xff]  }
 0x1d1   : > { %5509 = vmatmul.mubr.bf16.vlgmr.msra.gmra.mrb[0].mxu0 %v9905_v13  ;;  %6042 = vmatmul.mubr.bf16.vlgmr.msra.gmra.mrb[0].mxu1 %v9905_v13 }
 0x1d2   : > { %5518 = vmatpush1.bf16.msra.mxu0 %v8714_v50  ;;  %6051 = vmatpush1.bf16.msra.mxu1 %v8717_v51  ;;  %v8809_v50 = vld [vmem:[%s9374_s24 + $0xfec] ss:$16 sps:$4 sm:$0xff]   ;;  %v9976_v51 = vrot.slane %v9968_v35, %v9429_v49 }
 0x1d3   : > { %5519 = vmatprep.subr.bf16.mxu0 %v8722_v53  ;;  %6052 = vmatprep.subr.bf16.mxu1 %v8725_v54  ;;  %v8804_v53 = vld [vmem:[%s9374_s24 + $0xfe0] ss:$16 sps:$4 sm:$0xff]   ;;  %v8807_v54 = vld [vmem:[%s9374_s24 + $0xfe8] ss:$16 sps:$4 sm:$0xff]  }
 0x1d4   : > { %5549 = vmatprep.mubr.bf16.mxu0 %v1141_v55  ;;  %6082 = vmatprep.mubr.bf16.mxu1 %v1141_v55  ;;  %v8812_v55 = vld [vmem:[%s9374_s24 + $0x1004] ss:$16 sps:$4 sm:$0xff]  }
 0x1d6   : > { %5520 = vmatpush1.bf16.msra.mxu0 %v8720_v38  ;;  %6053 = vmatpush1.bf16.msra.mxu1 %v8723_v56  ;;  %v8815_v38 = vld [vmem:[%s9374_s24 + $0x100c] ss:$16 sps:$4 sm:$0xff]   ;;  %v1157_v56 = vcombine.high %v9976_v51, %v9976_v51 }
 0x1d7   : > { %5521 = vmatprep.subr.bf16.mxu0 %v8728_v57  ;;  %6054 = vmatprep.subr.bf16.mxu1 %v8731_v58  ;;  %v1139_v57 = vcombine.high %v9905_v13, %v9905_v13  ;;  %v8810_v58 = vld [vmem:[%s9374_s24 + $0x1000] ss:$16 sps:$4 sm:$0xff]  }
 0x1d8   : > { %v8816_v13 = vld [vmem:[%s9374_s24 + $0x1020] ss:$16 sps:$4 sm:$0xff]  }
 0x1da   : > { %5522 = vmatpush1.bf16.msra.mxu0 %v8726_v48  ;;  %6055 = vmatpush1.bf16.msra.mxu1 %v8729_v59  ;;  %v8813_v48 = vld [vmem:[%s9374_s24 + $0x1008] ss:$16 sps:$4 sm:$0xff]   ;;  %v8818_v59 = vld [vmem:[%s9374_s24 + $0x1024] ss:$16 sps:$4 sm:$0xff]  }
 0x1db   : > { %5523 = vmatprep.subr.bf16.mxu0 %v8734_v60  ;;  %6056 = vmatprep.subr.bf16.mxu1 %v8737_v61  ;;  %v8821_v60 = vld [vmem:[%s9374_s24 + $0x102c] ss:$16 sps:$4 sm:$0xff]   ;;  %v9991_v61 = vrot.slane %v1157_v56, %v9429_v49  ;;  %v8897_v56 = vld [vmem:[%s9374_s24 + $0x11c8] ss:$16 sps:$4 sm:$0xff]  }
 0x1de   : > { %5524 = vmatpush1.bf16.msra.mxu0 %v8732_v62  ;;  %6057 = vmatpush1.bf16.msra.mxu1 %v8735_v63  ;;  %v8819_v62 = vld [vmem:[%s9374_s24 + $0x1028] ss:$16 sps:$4 sm:$0xff]   ;;  %v8824_v63 = vld [vmem:[%s9374_s24 + $0x1044] ss:$16 sps:$4 sm:$0xff]  }
 0x1df   : > { %5525 = vmatprep.subr.bf16.mxu0 %v8740_v0  ;;  %6058 = vmatprep.subr.bf16.mxu1 %v8743_v1  ;;  %v8827_v0 = vld [vmem:[%s9374_s24 + $0x104c] ss:$16 sps:$4 sm:$0xff]   ;;  %v8822_v1 = vld [vmem:[%s9374_s24 + $0x1040] ss:$16 sps:$4 sm:$0xff]  }
 0x1e2   : > { %5526 = vmatpush1.bf16.msra.mxu0 %v8738_v2  ;;  %6059 = vmatpush1.bf16.msra.mxu1 %v8741_v3  ;;  %v8825_v2 = vld [vmem:[%s9374_s24 + $0x1048] ss:$16 sps:$4 sm:$0xff]   ;;  %v8830_v3 = vld [vmem:[%s9374_s24 + $0x1064] ss:$16 sps:$4 sm:$0xff]  }
 0x1e3   : > { %5527 = vmatprep.subr.bf16.mxu0 %v8746_v4  ;;  %6060 = vmatprep.subr.bf16.mxu1 %v8749_v5  ;;  %v8833_v4 = vld [vmem:[%s9374_s24 + $0x106c] ss:$16 sps:$4 sm:$0xff]   ;;  %v8828_v5 = vld [vmem:[%s9374_s24 + $0x1060] ss:$16 sps:$4 sm:$0xff]  }
 0x1e6   : > { %5528 = vmatpush1.bf16.msra.mxu0 %v8744_v6  ;;  %6061 = vmatpush1.bf16.msra.mxu1 %v8747_v7  ;;  %v8831_v6 = vld [vmem:[%s9374_s24 + $0x1068] ss:$16 sps:$4 sm:$0xff]   ;;  %v8836_v7 = vld [vmem:[%s9374_s24 + $0x1084] ss:$16 sps:$4 sm:$0xff]  }
 0x1e7   : > { %5529 = vmatprep.subr.bf16.mxu0 %v8752_v8  ;;  %6062 = vmatprep.subr.bf16.mxu1 %v8755_v9  ;;  %v8839_v8 = vld [vmem:[%s9374_s24 + $0x108c] ss:$16 sps:$4 sm:$0xff]   ;;  %v8834_v9 = vld [vmem:[%s9374_s24 + $0x1080] ss:$16 sps:$4 sm:$0xff]  }
 0x1ea   : > { %5530 = vmatpush1.bf16.msra.mxu0 %v8750_v10  ;;  %6063 = vmatpush1.bf16.msra.mxu1 %v8753_v11  ;;  %v8837_v10 = vld [vmem:[%s9374_s24 + $0x1088] ss:$16 sps:$4 sm:$0xff]   ;;  %v8842_v11 = vld [vmem:[%s9374_s24 + $0x10a4] ss:$16 sps:$4 sm:$0xff]  }
 0x1eb   : > { %5531 = vmatprep.subr.bf16.mxu0 %v8758_v12  ;;  %6064 = vmatprep.subr.bf16.mxu1 %v8761_v14  ;;  %v8845_v12 = vld [vmem:[%s9374_s24 + $0x10ac] ss:$16 sps:$4 sm:$0xff]   ;;  %v8840_v14 = vld [vmem:[%s9374_s24 + $0x10a0] ss:$16 sps:$4 sm:$0xff]  }
 0x1ee   : > { %5532 = vmatpush1.bf16.msra.mxu0 %v8756_v16  ;;  %6065 = vmatpush1.bf16.msra.mxu1 %v8759_v52  ;;  %v8843_v16 = vld [vmem:[%s9374_s24 + $0x10a8] ss:$16 sps:$4 sm:$0xff]   ;;  %v8848_v52 = vld [vmem:[%s9374_s24 + $0x10c4] ss:$16 sps:$4 sm:$0xff]  }
 0x1ef   : > { %5533 = vmatprep.subr.bf16.mxu0 %v8764_v17  ;;  %6066 = vmatprep.subr.bf16.mxu1 %v8767_v18  ;;  %v8851_v17 = vld [vmem:[%s9374_s24 + $0x10cc] ss:$16 sps:$4 sm:$0xff]   ;;  %v8846_v18 = vld [vmem:[%s9374_s24 + $0x10c0] ss:$16 sps:$4 sm:$0xff]  }
 0x1f2   : > { %5534 = vmatpush1.bf16.msra.mxu0 %v8762_v19  ;;  %6067 = vmatpush1.bf16.msra.mxu1 %v8765_v20  ;;  %v8849_v19 = vld [vmem:[%s9374_s24 + $0x10c8] ss:$16 sps:$4 sm:$0xff]   ;;  %v8854_v20 = vld [vmem:[%s9374_s24 + $0x10e4] ss:$16 sps:$4 sm:$0xff]  }
 0x1f3   : > { %5535 = vmatprep.subr.bf16.mxu0 %v8770_v22  ;;  %6068 = vmatprep.subr.bf16.mxu1 %v8773_v23  ;;  %v8857_v22 = vld [vmem:[%s9374_s24 + $0x10ec] ss:$16 sps:$4 sm:$0xff]   ;;  %v8852_v23 = vld [vmem:[%s9374_s24 + $0x10e0] ss:$16 sps:$4 sm:$0xff]  }
 0x1f6   : > { %5536 = vmatpush1.bf16.msra.mxu0 %v8768_v24  ;;  %6069 = vmatpush1.bf16.msra.mxu1 %v8771_v26  ;;  %v8855_v24 = vld [vmem:[%s9374_s24 + $0x10e8] ss:$16 sps:$4 sm:$0xff]   ;;  %v8860_v26 = vld [vmem:[%s9374_s24 + $0x1104] ss:$16 sps:$4 sm:$0xff]  }
 0x1f7   : > { %5537 = vmatprep.subr.bf16.mxu0 %v8776_v27  ;;  %6070 = vmatprep.subr.bf16.mxu1 %v8779_v28  ;;  %v8863_v27 = vld [vmem:[%s9374_s24 + $0x110c] ss:$16 sps:$4 sm:$0xff]   ;;  %v8858_v28 = vld [vmem:[%s9374_s24 + $0x1100] ss:$16 sps:$4 sm:$0xff]  }
 0x1fa   : > { %5538 = vmatpush1.bf16.msra.mxu0 %v8774_v29  ;;  %6071 = vmatpush1.bf16.msra.mxu1 %v8777_v30  ;;  %v8861_v29 = vld [vmem:[%s9374_s24 + $0x1108] ss:$16 sps:$4 sm:$0xff]   ;;  %v8866_v30 = vld [vmem:[%s9374_s24 + $0x1124] ss:$16 sps:$4 sm:$0xff]  }
 0x1fb   : > { %5539 = vmatprep.subr.bf16.mxu0 %v8782_v15  ;;  %6072 = vmatprep.subr.bf16.mxu1 %v8785_v31  ;;  %v8869_v15 = vld [vmem:[%s9374_s24 + $0x112c] ss:$16 sps:$4 sm:$0xff]   ;;  %v8864_v31 = vld [vmem:[%s9374_s24 + $0x1120] ss:$16 sps:$4 sm:$0xff]  }
 0x1fe   : > { %5540 = vmatpush1.bf16.msra.mxu0 %v8780_v32  ;;  %6073 = vmatpush1.bf16.msra.mxu1 %v8783_v33  ;;  %v8867_v32 = vld [vmem:[%s9374_s24 + $0x1128] ss:$16 sps:$4 sm:$0xff]   ;;  %v8872_v33 = vld [vmem:[%s9374_s24 + $0x1144] ss:$16 sps:$4 sm:$0xff]  }
 0x1ff   : > { %5541 = vmatprep.subr.bf16.mxu0 %v8788_v25  ;;  %6074 = vmatprep.subr.bf16.mxu1 %v8791_v34  ;;  %v8875_v25 = vld [vmem:[%s9374_s24 + $0x114c] ss:$16 sps:$4 sm:$0xff]   ;;  %v8870_v34 = vld [vmem:[%s9374_s24 + $0x1140] ss:$16 sps:$4 sm:$0xff]  }
 0x202   : > { %5542 = vmatpush1.bf16.msra.mxu0 %v8786_v36  ;;  %6075 = vmatpush1.bf16.msra.mxu1 %v8789_v37  ;;  %v8873_v36 = vld [vmem:[%s9374_s24 + $0x1148] ss:$16 sps:$4 sm:$0xff]   ;;  %v8878_v37 = vld [vmem:[%s9374_s24 + $0x1164] ss:$16 sps:$4 sm:$0xff]  }
 0x203   : > { %5543 = vmatprep.subr.bf16.mxu0 %v8794_v39  ;;  %6076 = vmatprep.subr.bf16.mxu1 %v8797_v40  ;;  %v8881_v39 = vld [vmem:[%s9374_s24 + $0x116c] ss:$16 sps:$4 sm:$0xff]   ;;  %v8876_v40 = vld [vmem:[%s9374_s24 + $0x1160] ss:$16 sps:$4 sm:$0xff]  }
 0x206   : > { %5544 = vmatpush1.bf16.msra.mxu0 %v8792_v21  ;;  %6077 = vmatpush1.bf16.msra.mxu1 %v8795_v41  ;;  %v8879_v21 = vld [vmem:[%s9374_s24 + $0x1168] ss:$16 sps:$4 sm:$0xff]   ;;  %v8884_v41 = vld [vmem:[%s9374_s24 + $0x1184] ss:$16 sps:$4 sm:$0xff]  }
 0x207   : > { %5545 = vmatprep.subr.bf16.mxu0 %v8800_v42  ;;  %6078 = vmatprep.subr.bf16.mxu1 %v8803_v44  ;;  %v8887_v42 = vld [vmem:[%s9374_s24 + $0x118c] ss:$16 sps:$4 sm:$0xff]   ;;  %v8882_v44 = vld [vmem:[%s9374_s24 + $0x1180] ss:$16 sps:$4 sm:$0xff]  }
 0x20a   : > { %5546 = vmatpush1.bf16.msra.mxu0 %v8798_v45  ;;  %6079 = vmatpush1.bf16.msra.mxu1 %v8801_v46  ;;  %v8885_v45 = vld [vmem:[%s9374_s24 + $0x1188] ss:$16 sps:$4 sm:$0xff]   ;;  %v8890_v46 = vld [vmem:[%s9374_s24 + $0x11a4] ss:$16 sps:$4 sm:$0xff]  }
 0x20b   : > { %5547 = vmatprep.subr.bf16.mxu0 %v8806_v47  ;;  %6080 = vmatprep.subr.bf16.mxu1 %v8809_v50  ;;  %v8893_v47 = vld [vmem:[%s9374_s24 + $0x11ac] ss:$16 sps:$4 sm:$0xff]   ;;  %v8888_v50 = vld [vmem:[%s9374_s24 + $0x11a0] ss:$16 sps:$4 sm:$0xff]  }
 0x20e   : > { %5548 = vmatpush1.bf16.msra.mxu0 %v8804_v53  ;;  %6081 = vmatpush1.bf16.msra.mxu1 %v8807_v54  ;;  %v8891_v53 = vld [vmem:[%s9374_s24 + $0x11a8] ss:$16 sps:$4 sm:$0xff]   ;;  %v8896_v54 = vld [vmem:[%s9374_s24 + $0x11c4] ss:$16 sps:$4 sm:$0xff]  }
 0x20f   : > { %5558 = vmatprep.subr.bf16.mxu0 %v8812_v55  ;;  %6091 = vmatprep.subr.bf16.mxu1 %v8815_v38  ;;  %v8899_v55 = vld [vmem:[%s9374_s24 + $0x11cc] ss:$16 sps:$4 sm:$0xff]   ;;  %v8894_v38 = vld [vmem:[%s9374_s24 + $0x11c0] ss:$16 sps:$4 sm:$0xff]  }
 0x211   : > { %5550 = vmatmul.mubr.bf16.vlgmr.msra.gmra.mrb[0].mxu0 %v1139_v57  ;;  %6083 = vmatmul.mubr.bf16.vlgmr.msra.gmra.mrb[0].mxu1 %v1139_v57  ;;  %v8902_v57 = vld [vmem:[%s9374_s24 + $0x11e4] ss:$16 sps:$4 sm:$0xff]  }
 0x212   : > { %5559 = vmatpush1.bf16.msra.mxu0 %v8810_v58  ;;  %6092 = vmatpush1.bf16.msra.mxu1 %v8813_v48  ;;  %v8905_v58 = vld [vmem:[%s9374_s24 + $0x11ec] ss:$16 sps:$4 sm:$0xff]   ;;  %v8900_v48 = vld [vmem:[%s9374_s24 + $0x11e0] ss:$16 sps:$4 sm:$0xff]  }
 0x213   : > { %5560 = vmatprep.subr.bf16.mxu0 %v8818_v59  ;;  %6093 = vmatprep.subr.bf16.mxu1 %v8821_v60  ;;  %v8903_v59 = vld [vmem:[%s9374_s24 + $0x11e8] ss:$16 sps:$4 sm:$0xff]   ;;  %v8908_v60 = vld [vmem:[%s9374_s24 + $0x1204] ss:$16 sps:$4 sm:$0xff]  }
 0x214   : > { %5590 = vmatprep.mubr.bf16.mxu0 %v9991_v61  ;;  %6123 = vmatprep.mubr.bf16.mxu1 %v9991_v61 }
 0x216   : > { %5561 = vmatpush1.bf16.msra.mxu0 %v8816_v13  ;;  %6094 = vmatpush1.bf16.msra.mxu1 %v8819_v62  ;;  %v8911_v13 = vld [vmem:[%s9374_s24 + $0x120c] ss:$16 sps:$4 sm:$0xff]   ;;  %v10057_v62 = vrot.slane %v9976_v51, %v9429_v49  ;;  %v8912_v51 = vld [vmem:[%s9374_s24 + $0x1220] ss:$16 sps:$4 sm:$0xff]  }
 0x217   : > { %5562 = vmatprep.subr.bf16.mxu0 %v8824_v63  ;;  %6095 = vmatprep.subr.bf16.mxu1 %v8827_v0  ;;  %v8906_v63 = vld [vmem:[%s9374_s24 + $0x1200] ss:$16 sps:$4 sm:$0xff]   ;;  %v8909_v0 = vld [vmem:[%s9374_s24 + $0x1208] ss:$16 sps:$4 sm:$0xff]  }
 0x21a   : > { %5563 = vmatpush1.bf16.msra.mxu0 %v8822_v1  ;;  %6096 = vmatpush1.bf16.msra.mxu1 %v8825_v2  ;;  %v8914_v1 = vld [vmem:[%s9374_s24 + $0x1224] ss:$16 sps:$4 sm:$0xff]   ;;  %v8917_v2 = vld [vmem:[%s9374_s24 + $0x122c] ss:$16 sps:$4 sm:$0xff]  }
 0x21b   : > { %5564 = vmatprep.subr.bf16.mxu0 %v8830_v3  ;;  %6097 = vmatprep.subr.bf16.mxu1 %v8833_v4  ;;  %v1189_v3 = vcombine.high %v9991_v61, %v9991_v61  ;;  %v8915_v4 = vld [vmem:[%s9374_s24 + $0x1228] ss:$16 sps:$4 sm:$0xff]   ;;  %v8918_v61 = vld [vmem:[%s9374_s24 + $0x1240] ss:$16 sps:$4 sm:$0xff]  }
 0x21e   : > { %5565 = vmatpush1.bf16.msra.mxu0 %v8828_v5  ;;  %6098 = vmatpush1.bf16.msra.mxu1 %v8831_v6  ;;  %v8920_v5 = vld [vmem:[%s9374_s24 + $0x1244] ss:$16 sps:$4 sm:$0xff]   ;;  %v8923_v6 = vld [vmem:[%s9374_s24 + $0x124c] ss:$16 sps:$4 sm:$0xff]  }
 0x21f   : > { %5566 = vmatprep.subr.bf16.mxu0 %v8836_v7  ;;  %6099 = vmatprep.subr.bf16.mxu1 %v8839_v8  ;;  %v8921_v7 = vld [vmem:[%s9374_s24 + $0x1248] ss:$16 sps:$4 sm:$0xff]   ;;  %v8926_v8 = vld [vmem:[%s9374_s24 + $0x1264] ss:$16 sps:$4 sm:$0xff]  }
 0x222   : > { %5567 = vmatpush1.bf16.msra.mxu0 %v8834_v9  ;;  %6100 = vmatpush1.bf16.msra.mxu1 %v8837_v10  ;;  %v8929_v9 = vld [vmem:[%s9374_s24 + $0x126c] ss:$16 sps:$4 sm:$0xff]   ;;  %v8924_v10 = vld [vmem:[%s9374_s24 + $0x1260] ss:$16 sps:$4 sm:$0xff]  }
 0x223   : > { %5568 = vmatprep.subr.bf16.mxu0 %v8842_v11  ;;  %6101 = vmatprep.subr.bf16.mxu1 %v8845_v12  ;;  %v8927_v11 = vld [vmem:[%s9374_s24 + $0x1268] ss:$16 sps:$4 sm:$0xff]   ;;  %v8932_v12 = vld [vmem:[%s9374_s24 + $0x1284] ss:$16 sps:$4 sm:$0xff]  }
 0x226   : > { %5569 = vmatpush1.bf16.msra.mxu0 %v8840_v14  ;;  %6102 = vmatpush1.bf16.msra.mxu1 %v8843_v16  ;;  %v8935_v14 = vld [vmem:[%s9374_s24 + $0x128c] ss:$16 sps:$4 sm:$0xff]   ;;  %v8930_v16 = vld [vmem:[%s9374_s24 + $0x1280] ss:$16 sps:$4 sm:$0xff]  }
 0x227   : > { %5570 = vmatprep.subr.bf16.mxu0 %v8848_v52  ;;  %6103 = vmatprep.subr.bf16.mxu1 %v8851_v17  ;;  %v8933_v52 = vld [vmem:[%s9374_s24 + $0x1288] ss:$16 sps:$4 sm:$0xff]   ;;  %v8938_v17 = vld [vmem:[%s9374_s24 + $0x12a4] ss:$16 sps:$4 sm:$0xff]  }
 0x22a   : > { %5571 = vmatpush1.bf16.msra.mxu0 %v8846_v18  ;;  %6104 = vmatpush1.bf16.msra.mxu1 %v8849_v19  ;;  %v8941_v18 = vld [vmem:[%s9374_s24 + $0x12ac] ss:$16 sps:$4 sm:$0xff]   ;;  %v8936_v19 = vld [vmem:[%s9374_s24 + $0x12a0] ss:$16 sps:$4 sm:$0xff]  }
 0x22b   : > { %5572 = vmatprep.subr.bf16.mxu0 %v8854_v20  ;;  %6105 = vmatprep.subr.bf16.mxu1 %v8857_v22  ;;  %v8939_v20 = vld [vmem:[%s9374_s24 + $0x12a8] ss:$16 sps:$4 sm:$0xff]   ;;  %v8944_v22 = vld [vmem:[%s9374_s24 + $0x12c4] ss:$16 sps:$4 sm:$0xff]  }
 0x22e   : > { %5573 = vmatpush1.bf16.msra.mxu0 %v8852_v23  ;;  %6106 = vmatpush1.bf16.msra.mxu1 %v8855_v24  ;;  %v8947_v23 = vld [vmem:[%s9374_s24 + $0x12cc] ss:$16 sps:$4 sm:$0xff]   ;;  %v8942_v24 = vld [vmem:[%s9374_s24 + $0x12c0] ss:$16 sps:$4 sm:$0xff]  }
 0x22f   : > { %5574 = vmatprep.subr.bf16.mxu0 %v8860_v26  ;;  %6107 = vmatprep.subr.bf16.mxu1 %v8863_v27  ;;  %v8945_v26 = vld [vmem:[%s9374_s24 + $0x12c8] ss:$16 sps:$4 sm:$0xff]   ;;  %v8950_v27 = vld [vmem:[%s9374_s24 + $0x12e4] ss:$16 sps:$4 sm:$0xff]  }
 0x232   : > { %5575 = vmatpush1.bf16.msra.mxu0 %v8858_v28  ;;  %6108 = vmatpush1.bf16.msra.mxu1 %v8861_v29  ;;  %v8953_v28 = vld [vmem:[%s9374_s24 + $0x12ec] ss:$16 sps:$4 sm:$0xff]   ;;  %v8948_v29 = vld [vmem:[%s9374_s24 + $0x12e0] ss:$16 sps:$4 sm:$0xff]  }
 0x233   : > { %5576 = vmatprep.subr.bf16.mxu0 %v8866_v30  ;;  %6109 = vmatprep.subr.bf16.mxu1 %v8869_v15  ;;  %v8951_v30 = vld [vmem:[%s9374_s24 + $0x12e8] ss:$16 sps:$4 sm:$0xff]   ;;  %v8956_v15 = vld [vmem:[%s9374_s24 + $0x1304] ss:$16 sps:$4 sm:$0xff]  }
 0x236   : > { %5577 = vmatpush1.bf16.msra.mxu0 %v8864_v31  ;;  %6110 = vmatpush1.bf16.msra.mxu1 %v8867_v32  ;;  %v8959_v31 = vld [vmem:[%s9374_s24 + $0x130c] ss:$16 sps:$4 sm:$0xff]   ;;  %v8954_v32 = vld [vmem:[%s9374_s24 + $0x1300] ss:$16 sps:$4 sm:$0xff]  }
 0x237   : > { %5578 = vmatprep.subr.bf16.mxu0 %v8872_v33  ;;  %6111 = vmatprep.subr.bf16.mxu1 %v8875_v25  ;;  %v8957_v33 = vld [vmem:[%s9374_s24 + $0x1308] ss:$16 sps:$4 sm:$0xff]   ;;  %v8962_v25 = vld [vmem:[%s9374_s24 + $0x1324] ss:$16 sps:$4 sm:$0xff]  }
 0x23a   : > { %5579 = vmatpush1.bf16.msra.mxu0 %v8870_v34  ;;  %6112 = vmatpush1.bf16.msra.mxu1 %v8873_v36  ;;  %v8965_v34 = vld [vmem:[%s9374_s24 + $0x132c] ss:$16 sps:$4 sm:$0xff]   ;;  %v8960_v36 = vld [vmem:[%s9374_s24 + $0x1320] ss:$16 sps:$4 sm:$0xff]  }
 0x23b   : > { %5580 = vmatprep.subr.bf16.mxu0 %v8878_v37  ;;  %6113 = vmatprep.subr.bf16.mxu1 %v8881_v39  ;;  %v8963_v37 = vld [vmem:[%s9374_s24 + $0x1328] ss:$16 sps:$4 sm:$0xff]   ;;  %v8968_v39 = vld [vmem:[%s9374_s24 + $0x1344] ss:$16 sps:$4 sm:$0xff]  }
 0x23e   : > { %5581 = vmatpush1.bf16.msra.mxu0 %v8876_v40  ;;  %6114 = vmatpush1.bf16.msra.mxu1 %v8879_v21  ;;  %v8971_v40 = vld [vmem:[%s9374_s24 + $0x134c] ss:$16 sps:$4 sm:$0xff]   ;;  %v8966_v21 = vld [vmem:[%s9374_s24 + $0x1340] ss:$16 sps:$4 sm:$0xff]  }
 0x23f   : > { %5582 = vmatprep.subr.bf16.mxu0 %v8884_v41  ;;  %6115 = vmatprep.subr.bf16.mxu1 %v8887_v42  ;;  %v8969_v41 = vld [vmem:[%s9374_s24 + $0x1348] ss:$16 sps:$4 sm:$0xff]   ;;  %v8974_v42 = vld [vmem:[%s9374_s24 + $0x1364] ss:$16 sps:$4 sm:$0xff]  }
 0x242   : > { %5583 = vmatpush1.bf16.msra.mxu0 %v8882_v44  ;;  %6116 = vmatpush1.bf16.msra.mxu1 %v8885_v45  ;;  %v8977_v44 = vld [vmem:[%s9374_s24 + $0x136c] ss:$16 sps:$4 sm:$0xff]   ;;  %v8972_v45 = vld [vmem:[%s9374_s24 + $0x1360] ss:$16 sps:$4 sm:$0xff]  }
 0x243   : > { %5584 = vmatprep.subr.bf16.mxu0 %v8890_v46  ;;  %6117 = vmatprep.subr.bf16.mxu1 %v8893_v47  ;;  %v8975_v46 = vld [vmem:[%s9374_s24 + $0x1368] ss:$16 sps:$4 sm:$0xff]   ;;  %v8980_v47 = vld [vmem:[%s9374_s24 + $0x1384] ss:$16 sps:$4 sm:$0xff]  }
 0x246   : > { %5585 = vmatpush1.bf16.msra.mxu0 %v8888_v50  ;;  %6118 = vmatpush1.bf16.msra.mxu1 %v8891_v53  ;;  %v8983_v50 = vld [vmem:[%s9374_s24 + $0x138c] ss:$16 sps:$4 sm:$0xff]   ;;  %v8978_v53 = vld [vmem:[%s9374_s24 + $0x1380] ss:$16 sps:$4 sm:$0xff]  }
 0x247   : > { %5586 = vmatprep.subr.bf16.mxu0 %v8896_v54  ;;  %6119 = vmatprep.subr.bf16.mxu1 %v8899_v55  ;;  %v8981_v54 = vld [vmem:[%s9374_s24 + $0x1388] ss:$16 sps:$4 sm:$0xff]   ;;  %v8986_v55 = vld [vmem:[%s9374_s24 + $0x13a4] ss:$16 sps:$4 sm:$0xff]  }
 0x24a   : > { %5587 = vmatpush1.bf16.msra.mxu0 %v8894_v38  ;;  %6120 = vmatpush1.bf16.msra.mxu1 %v8897_v56  ;;  %v8989_v38 = vld [vmem:[%s9374_s24 + $0x13ac] ss:$16 sps:$4 sm:$0xff]   ;;  %v8984_v56 = vld [vmem:[%s9374_s24 + $0x13a0] ss:$16 sps:$4 sm:$0xff]  }
 0x24b   : > { %5588 = vmatprep.subr.bf16.mxu0 %v8902_v57  ;;  %6121 = vmatprep.subr.bf16.mxu1 %v8905_v58  ;;  %v8987_v57 = vld [vmem:[%s9374_s24 + $0x13a8] ss:$16 sps:$4 sm:$0xff]   ;;  %v8992_v58 = vld [vmem:[%s9374_s24 + $0x13c4] ss:$16 sps:$4 sm:$0xff]  }
 0x24e   : > { %5589 = vmatpush1.bf16.msra.mxu0 %v8900_v48  ;;  %6122 = vmatpush1.bf16.msra.mxu1 %v8903_v59  ;;  %v8995_v48 = vld [vmem:[%s9374_s24 + $0x13cc] ss:$16 sps:$4 sm:$0xff]   ;;  %v1142_v59 = vcombine.high %v9968_v35, %v9968_v35  ;;  %v8996_v35 = vld [vmem:[%s9374_s24 + $0x13e0] ss:$16 sps:$4 sm:$0xff]  }
 0x24f   : > { %5599 = vmatprep.subr.bf16.mxu0 %v8908_v60  ;;  %6132 = vmatprep.subr.bf16.mxu1 %v8911_v13  ;;  %v8990_v60 = vld [vmem:[%s9374_s24 + $0x13c0] ss:$16 sps:$4 sm:$0xff]   ;;  %v8993_v13 = vld [vmem:[%s9374_s24 + $0x13c8] ss:$16 sps:$4 sm:$0xff]  }
 0x251   : > { %5591 = vmatmul.mubr.bf16.vlgmr.msra.gmra.mrb[0].mxu0 %v10057_v62  ;;  %6124 = vmatmul.mubr.bf16.vlgmr.msra.gmra.mrb[0].mxu1 %v10057_v62 }
 0x252   : > { %5600 = vmatpush1.bf16.msra.mxu0 %v8906_v63  ;;  %6133 = vmatpush1.bf16.msra.mxu1 %v8909_v0  ;;  %v8998_v63 = vld [vmem:[%s9374_s24 + $0x13e4] ss:$16 sps:$4 sm:$0xff]   ;;  %v9001_v0 = vld [vmem:[%s9374_s24 + $0x13ec] ss:$16 sps:$4 sm:$0xff]  }
 0x253   : > { %5601 = vmatprep.subr.bf16.mxu0 %v8914_v1  ;;  %6134 = vmatprep.subr.bf16.mxu1 %v8917_v2  ;;  %v10126_v1 = vrot.slane %v1142_v59, %v9429_v49  ;;  %v8999_v2 = vld [vmem:[%s9374_s24 + $0x13e8] ss:$16 sps:$4 sm:$0xff]  }
 0x254   : > { %5631 = vmatprep.mubr.bf16.mxu0 %v1189_v3  ;;  %6164 = vmatprep.mubr.bf16.mxu1 %v1189_v3  ;;  %v9004_v3 = vld [vmem:[%s9374_s24 + $0x1404] ss:$16 sps:$4 sm:$0xff]   ;;  %v9077_v59 = vld [vmem:[%s9374_s24 + $0x1588] ss:$16 sps:$4 sm:$0xff]  }
 0x256   : > { %5602 = vmatpush1.bf16.msra.mxu0 %v8912_v51  ;;  %6135 = vmatpush1.bf16.msra.mxu1 %v8915_v4  ;;  %v9007_v51 = vld [vmem:[%s9374_s24 + $0x140c] ss:$16 sps:$4 sm:$0xff]   ;;  %v1158_v4 = vcombine.high %v10126_v1, %v10126_v1 }
 0x257   : > { %5603 = vmatprep.subr.bf16.mxu0 %v8920_v5  ;;  %6136 = vmatprep.subr.bf16.mxu1 %v8923_v6  ;;  %v1187_v5 = vcombine.high %v10057_v62, %v10057_v62  ;;  %v9002_v6 = vld [vmem:[%s9374_s24 + $0x1400] ss:$16 sps:$4 sm:$0xff]  }
 0x258   : > { %v9008_v62 = vld [vmem:[%s9374_s24 + $0x1420] ss:$16 sps:$4 sm:$0xff]  }
 0x25a   : > { %5604 = vmatpush1.bf16.msra.mxu0 %v8918_v61  ;;  %6137 = vmatpush1.bf16.msra.mxu1 %v8921_v7  ;;  %v9005_v61 = vld [vmem:[%s9374_s24 + $0x1408] ss:$16 sps:$4 sm:$0xff]   ;;  %v9010_v7 = vld [vmem:[%s9374_s24 + $0x1424] ss:$16 sps:$4 sm:$0xff]  }
 0x25b   : > { %5605 = vmatprep.subr.bf16.mxu0 %v8926_v8  ;;  %6138 = vmatprep.subr.bf16.mxu1 %v8929_v9  ;;  %v9013_v8 = vld [vmem:[%s9374_s24 + $0x142c] ss:$16 sps:$4 sm:$0xff]   ;;  %v10141_v9 = vrot.slane %v1158_v4, %v9429_v49  ;;  %v9094_v4 = vld [vmem:[%s9374_s24 + $0x15e4] ss:$16 sps:$4 sm:$0xff]  }
 0x25e   : > { %5606 = vmatpush1.bf16.msra.mxu0 %v8924_v10  ;;  %6139 = vmatpush1.bf16.msra.mxu1 %v8927_v11  ;;  %v9011_v10 = vld [vmem:[%s9374_s24 + $0x1428] ss:$16 sps:$4 sm:$0xff]   ;;  %v9016_v11 = vld [vmem:[%s9374_s24 + $0x1444] ss:$16 sps:$4 sm:$0xff]  }
 0x25f   : > { %5607 = vmatprep.subr.bf16.mxu0 %v8932_v12  ;;  %6140 = vmatprep.subr.bf16.mxu1 %v8935_v14  ;;  %v9019_v12 = vld [vmem:[%s9374_s24 + $0x144c] ss:$16 sps:$4 sm:$0xff]   ;;  %v9014_v14 = vld [vmem:[%s9374_s24 + $0x1440] ss:$16 sps:$4 sm:$0xff]  }
 0x262   : > { %5608 = vmatpush1.bf16.msra.mxu0 %v8930_v16  ;;  %6141 = vmatpush1.bf16.msra.mxu1 %v8933_v52  ;;  %v9017_v16 = vld [vmem:[%s9374_s24 + $0x1448] ss:$16 sps:$4 sm:$0xff]   ;;  %v9022_v52 = vld [vmem:[%s9374_s24 + $0x1464] ss:$16 sps:$4 sm:$0xff]  }
 0x263   : > { %5609 = vmatprep.subr.bf16.mxu0 %v8938_v17  ;;  %6142 = vmatprep.subr.bf16.mxu1 %v8941_v18  ;;  %v9025_v17 = vld [vmem:[%s9374_s24 + $0x146c] ss:$16 sps:$4 sm:$0xff]   ;;  %v9020_v18 = vld [vmem:[%s9374_s24 + $0x1460] ss:$16 sps:$4 sm:$0xff]  }
 0x266   : > { %5610 = vmatpush1.bf16.msra.mxu0 %v8936_v19  ;;  %6143 = vmatpush1.bf16.msra.mxu1 %v8939_v20  ;;  %v9023_v19 = vld [vmem:[%s9374_s24 + $0x1468] ss:$16 sps:$4 sm:$0xff]   ;;  %v9028_v20 = vld [vmem:[%s9374_s24 + $0x1484] ss:$16 sps:$4 sm:$0xff]  }
 0x267   : > { %5611 = vmatprep.subr.bf16.mxu0 %v8944_v22  ;;  %6144 = vmatprep.subr.bf16.mxu1 %v8947_v23  ;;  %v9031_v22 = vld [vmem:[%s9374_s24 + $0x148c] ss:$16 sps:$4 sm:$0xff]   ;;  %v9026_v23 = vld [vmem:[%s9374_s24 + $0x1480] ss:$16 sps:$4 sm:$0xff]  }
 0x26a   : > { %5612 = vmatpush1.bf16.msra.mxu0 %v8942_v24  ;;  %6145 = vmatpush1.bf16.msra.mxu1 %v8945_v26  ;;  %v9029_v24 = vld [vmem:[%s9374_s24 + $0x1488] ss:$16 sps:$4 sm:$0xff]   ;;  %v9034_v26 = vld [vmem:[%s9374_s24 + $0x14a4] ss:$16 sps:$4 sm:$0xff]  }
 0x26b   : > { %5613 = vmatprep.subr.bf16.mxu0 %v8950_v27  ;;  %6146 = vmatprep.subr.bf16.mxu1 %v8953_v28  ;;  %v9037_v27 = vld [vmem:[%s9374_s24 + $0x14ac] ss:$16 sps:$4 sm:$0xff]   ;;  %v9032_v28 = vld [vmem:[%s9374_s24 + $0x14a0] ss:$16 sps:$4 sm:$0xff]  }
 0x26e   : > { %5614 = vmatpush1.bf16.msra.mxu0 %v8948_v29  ;;  %6147 = vmatpush1.bf16.msra.mxu1 %v8951_v30  ;;  %v9035_v29 = vld [vmem:[%s9374_s24 + $0x14a8] ss:$16 sps:$4 sm:$0xff]   ;;  %v9040_v30 = vld [vmem:[%s9374_s24 + $0x14c4] ss:$16 sps:$4 sm:$0xff]  }
 0x26f   : > { %5615 = vmatprep.subr.bf16.mxu0 %v8956_v15  ;;  %6148 = vmatprep.subr.bf16.mxu1 %v8959_v31  ;;  %v9043_v15 = vld [vmem:[%s9374_s24 + $0x14cc] ss:$16 sps:$4 sm:$0xff]   ;;  %v9038_v31 = vld [vmem:[%s9374_s24 + $0x14c0] ss:$16 sps:$4 sm:$0xff]  }
 0x272   : > { %5616 = vmatpush1.bf16.msra.mxu0 %v8954_v32  ;;  %6149 = vmatpush1.bf16.msra.mxu1 %v8957_v33  ;;  %v9041_v32 = vld [vmem:[%s9374_s24 + $0x14c8] ss:$16 sps:$4 sm:$0xff]   ;;  %v9046_v33 = vld [vmem:[%s9374_s24 + $0x14e4] ss:$16 sps:$4 sm:$0xff]  }
 0x273   : > { %5617 = vmatprep.subr.bf16.mxu0 %v8962_v25  ;;  %6150 = vmatprep.subr.bf16.mxu1 %v8965_v34  ;;  %v9049_v25 = vld [vmem:[%s9374_s24 + $0x14ec] ss:$16 sps:$4 sm:$0xff]   ;;  %v9044_v34 = vld [vmem:[%s9374_s24 + $0x14e0] ss:$16 sps:$4 sm:$0xff]  }
 0x276   : > { %5618 = vmatpush1.bf16.msra.mxu0 %v8960_v36  ;;  %6151 = vmatpush1.bf16.msra.mxu1 %v8963_v37  ;;  %v9047_v36 = vld [vmem:[%s9374_s24 + $0x14e8] ss:$16 sps:$4 sm:$0xff]   ;;  %v9052_v37 = vld [vmem:[%s9374_s24 + $0x1504] ss:$16 sps:$4 sm:$0xff]  }
 0x277   : > { %5619 = vmatprep.subr.bf16.mxu0 %v8968_v39  ;;  %6152 = vmatprep.subr.bf16.mxu1 %v8971_v40  ;;  %v9055_v39 = vld [vmem:[%s9374_s24 + $0x150c] ss:$16 sps:$4 sm:$0xff]   ;;  %v9050_v40 = vld [vmem:[%s9374_s24 + $0x1500] ss:$16 sps:$4 sm:$0xff]  }
 0x27a   : > { %5620 = vmatpush1.bf16.msra.mxu0 %v8966_v21  ;;  %6153 = vmatpush1.bf16.msra.mxu1 %v8969_v41  ;;  %v9053_v21 = vld [vmem:[%s9374_s24 + $0x1508] ss:$16 sps:$4 sm:$0xff]   ;;  %v9058_v41 = vld [vmem:[%s9374_s24 + $0x1524] ss:$16 sps:$4 sm:$0xff]  }
 0x27b   : > { %5621 = vmatprep.subr.bf16.mxu0 %v8974_v42  ;;  %6154 = vmatprep.subr.bf16.mxu1 %v8977_v44  ;;  %v9061_v42 = vld [vmem:[%s9374_s24 + $0x152c] ss:$16 sps:$4 sm:$0xff]   ;;  %v9056_v44 = vld [vmem:[%s9374_s24 + $0x1520] ss:$16 sps:$4 sm:$0xff]  }
 0x27e   : > { %5622 = vmatpush1.bf16.msra.mxu0 %v8972_v45  ;;  %6155 = vmatpush1.bf16.msra.mxu1 %v8975_v46  ;;  %v9059_v45 = vld [vmem:[%s9374_s24 + $0x1528] ss:$16 sps:$4 sm:$0xff]   ;;  %v9064_v46 = vld [vmem:[%s9374_s24 + $0x1544] ss:$16 sps:$4 sm:$0xff]  }
 0x27f   : > { %5623 = vmatprep.subr.bf16.mxu0 %v8980_v47  ;;  %6156 = vmatprep.subr.bf16.mxu1 %v8983_v50  ;;  %v9067_v47 = vld [vmem:[%s9374_s24 + $0x154c] ss:$16 sps:$4 sm:$0xff]   ;;  %v9062_v50 = vld [vmem:[%s9374_s24 + $0x1540] ss:$16 sps:$4 sm:$0xff]  }
 0x282   : > { %5624 = vmatpush1.bf16.msra.mxu0 %v8978_v53  ;;  %6157 = vmatpush1.bf16.msra.mxu1 %v8981_v54  ;;  %v9065_v53 = vld [vmem:[%s9374_s24 + $0x1548] ss:$16 sps:$4 sm:$0xff]   ;;  %v9070_v54 = vld [vmem:[%s9374_s24 + $0x1564] ss:$16 sps:$4 sm:$0xff]  }
 0x283   : > { %5625 = vmatprep.subr.bf16.mxu0 %v8986_v55  ;;  %6158 = vmatprep.subr.bf16.mxu1 %v8989_v38  ;;  %v9073_v55 = vld [vmem:[%s9374_s24 + $0x156c] ss:$16 sps:$4 sm:$0xff]   ;;  %v9068_v38 = vld [vmem:[%s9374_s24 + $0x1560] ss:$16 sps:$4 sm:$0xff]  }
 0x286   : > { %5626 = vmatpush1.bf16.msra.mxu0 %v8984_v56  ;;  %6159 = vmatpush1.bf16.msra.mxu1 %v8987_v57  ;;  %v9071_v56 = vld [vmem:[%s9374_s24 + $0x1568] ss:$16 sps:$4 sm:$0xff]   ;;  %v9076_v57 = vld [vmem:[%s9374_s24 + $0x1584] ss:$16 sps:$4 sm:$0xff]  }
 0x287   : > { %5627 = vmatprep.subr.bf16.mxu0 %v8992_v58  ;;  %6160 = vmatprep.subr.bf16.mxu1 %v8995_v48  ;;  %v9079_v58 = vld [vmem:[%s9374_s24 + $0x158c] ss:$16 sps:$4 sm:$0xff]   ;;  %v9074_v48 = vld [vmem:[%s9374_s24 + $0x1580] ss:$16 sps:$4 sm:$0xff]  }
 0x28a   : > { %5628 = vmatpush1.bf16.msra.mxu0 %v8990_v60  ;;  %6161 = vmatpush1.bf16.msra.mxu1 %v8993_v13  ;;  %v9082_v60 = vld [vmem:[%s9374_s24 + $0x15a4] ss:$16 sps:$4 sm:$0xff]   ;;  %v9085_v13 = vld [vmem:[%s9374_s24 + $0x15ac] ss:$16 sps:$4 sm:$0xff]  }
 0x28b   : > { %5629 = vmatprep.subr.bf16.mxu0 %v8998_v63  ;;  %6162 = vmatprep.subr.bf16.mxu1 %v9001_v0  ;;  %v9080_v63 = vld [vmem:[%s9374_s24 + $0x15a0] ss:$16 sps:$4 sm:$0xff]   ;;  %v9083_v0 = vld [vmem:[%s9374_s24 + $0x15a8] ss:$16 sps:$4 sm:$0xff]  }
 0x28e   : > { %5630 = vmatpush1.bf16.msra.mxu0 %v8996_v35  ;;  %6163 = vmatpush1.bf16.msra.mxu1 %v8999_v2  ;;  %v9088_v35 = vld [vmem:[%s9374_s24 + $0x15c4] ss:$16 sps:$4 sm:$0xff]   ;;  %v9091_v2 = vld [vmem:[%s9374_s24 + $0x15cc] ss:$16 sps:$4 sm:$0xff]  }
 0x28f   : > { %5640 = vmatprep.subr.bf16.mxu0 %v9004_v3  ;;  %6173 = vmatprep.subr.bf16.mxu1 %v9007_v51  ;;  %v9086_v3 = vld [vmem:[%s9374_s24 + $0x15c0] ss:$16 sps:$4 sm:$0xff]   ;;  %v9089_v51 = vld [vmem:[%s9374_s24 + $0x15c8] ss:$16 sps:$4 sm:$0xff]  }
 0x291   : > { %5632 = vmatmul.mubr.bf16.vlgmr.msra.gmra.mrb[0].mxu0 %v1187_v5  ;;  %6165 = vmatmul.mubr.bf16.vlgmr.msra.gmra.mrb[0].mxu1 %v1187_v5  ;;  %v9097_v5 = vld [vmem:[%s9374_s24 + $0x15ec] ss:$16 sps:$4 sm:$0xff]  }
 0x292   : > { %5641 = vmatpush1.bf16.msra.mxu0 %v9002_v6  ;;  %6174 = vmatpush1.bf16.msra.mxu1 %v9005_v61  ;;  %v9092_v6 = vld [vmem:[%s9374_s24 + $0x15e0] ss:$16 sps:$4 sm:$0xff]   ;;  %v9095_v61 = vld [vmem:[%s9374_s24 + $0x15e8] ss:$16 sps:$4 sm:$0xff]  }
 0x293   : > { %5642 = vmatprep.subr.bf16.mxu0 %v9010_v7  ;;  %6175 = vmatprep.subr.bf16.mxu1 %v9013_v8  ;;  %v9101_v7 = vld [vmem:[%s9374_s24 + $0x1604] ss:$16 sps:$4 sm:$0xff]   ;;  %v9104_v8 = vld [vmem:[%s9374_s24 + $0x160c] ss:$16 sps:$4 sm:$0xff]  }
 0x294   : > { %5672 = vmatprep.mubr.bf16.mxu0 %v10141_v9  ;;  %6205 = vmatprep.mubr.bf16.mxu1 %v10141_v9 }
 0x296   : > { %5643 = vmatpush1.bf16.msra.mxu0 %v9008_v62  ;;  %6176 = vmatpush1.bf16.msra.mxu1 %v9011_v10  ;;  %v10207_v62 = vrot.slane %v10126_v1, %v9429_v49  ;;  %v9099_v10 = vld [vmem:[%s9374_s24 + $0x1600] ss:$16 sps:$4 sm:$0xff]  }
 0x297   : > { %5644 = vmatprep.subr.bf16.mxu0 %v9016_v11  ;;  %6177 = vmatprep.subr.bf16.mxu1 %v9019_v12  ;;  %v9102_v11 = vld [vmem:[%s9374_s24 + $0x1608] ss:$16 sps:$4 sm:$0xff]   ;;  %v9107_v12 = vld [vmem:[%s9374_s24 + $0x1624] ss:$16 sps:$4 sm:$0xff]   ;;  %v9105_v1 = vld [vmem:[%s9374_s24 + $0x1620] ss:$16 sps:$4 sm:$0xff]  }
 0x29a   : > { %5645 = vmatpush1.bf16.msra.mxu0 %v9014_v14  ;;  %6178 = vmatpush1.bf16.msra.mxu1 %v9017_v16  ;;  %v9110_v14 = vld [vmem:[%s9374_s24 + $0x162c] ss:$16 sps:$4 sm:$0xff]   ;;  %v1190_v16 = vcombine.high %v10141_v9, %v10141_v9  ;;  %v9111_v9 = vld [vmem:[%s9374_s24 + $0x1640] ss:$16 sps:$4 sm:$0xff]  }
 0x29b   : > { %5646 = vmatprep.subr.bf16.mxu0 %v9022_v52  ;;  %6179 = vmatprep.subr.bf16.mxu1 %v9025_v17  ;;  %v9108_v52 = vld [vmem:[%s9374_s24 + $0x1628] ss:$16 sps:$4 sm:$0xff]   ;;  %v9113_v17 = vld [vmem:[%s9374_s24 + $0x1644] ss:$16 sps:$4 sm:$0xff]  }
 0x29e   : > { %5647 = vmatpush1.bf16.msra.mxu0 %v9020_v18  ;;  %6180 = vmatpush1.bf16.msra.mxu1 %v9023_v19  ;;  %v9116_v18 = vld [vmem:[%s9374_s24 + $0x164c] ss:$16 sps:$4 sm:$0xff]   ;;  %v9114_v19 = vld [vmem:[%s9374_s24 + $0x1648] ss:$16 sps:$4 sm:$0xff]  }
 0x29f   : > { %5648 = vmatprep.subr.bf16.mxu0 %v9028_v20  ;;  %6181 = vmatprep.subr.bf16.mxu1 %v9031_v22  ;;  %v9119_v20 = vld [vmem:[%s9374_s24 + $0x1664] ss:$16 sps:$4 sm:$0xff]   ;;  %v9122_v22 = vld [vmem:[%s9374_s24 + $0x166c] ss:$16 sps:$4 sm:$0xff]  }
 0x2a2   : > { %5649 = vmatpush1.bf16.msra.mxu0 %v9026_v23  ;;  %6182 = vmatpush1.bf16.msra.mxu1 %v9029_v24  ;;  %v9117_v23 = vld [vmem:[%s9374_s24 + $0x1660] ss:$16 sps:$4 sm:$0xff]   ;;  %v9120_v24 = vld [vmem:[%s9374_s24 + $0x1668] ss:$16 sps:$4 sm:$0xff]  }
 0x2a3   : > { %5650 = vmatprep.subr.bf16.mxu0 %v9034_v26  ;;  %6183 = vmatprep.subr.bf16.mxu1 %v9037_v27  ;;  %v9125_v26 = vld [vmem:[%s9374_s24 + $0x1684] ss:$16 sps:$4 sm:$0xff]   ;;  %v9128_v27 = vld [vmem:[%s9374_s24 + $0x168c] ss:$16 sps:$4 sm:$0xff]  }
 0x2a6   : > { %5651 = vmatpush1.bf16.msra.mxu0 %v9032_v28  ;;  %6184 = vmatpush1.bf16.msra.mxu1 %v9035_v29  ;;  %v9123_v28 = vld [vmem:[%s9374_s24 + $0x1680] ss:$16 sps:$4 sm:$0xff]   ;;  %v9126_v29 = vld [vmem:[%s9374_s24 + $0x1688] ss:$16 sps:$4 sm:$0xff]  }
 0x2a7   : > { %5652 = vmatprep.subr.bf16.mxu0 %v9040_v30  ;;  %6185 = vmatprep.subr.bf16.mxu1 %v9043_v15  ;;  %v9131_v30 = vld [vmem:[%s9374_s24 + $0x16a4] ss:$16 sps:$4 sm:$0xff]   ;;  %v9134_v15 = vld [vmem:[%s9374_s24 + $0x16ac] ss:$16 sps:$4 sm:$0xff]  }
 0x2aa   : > { %5653 = vmatpush1.bf16.msra.mxu0 %v9038_v31  ;;  %6186 = vmatpush1.bf16.msra.mxu1 %v9041_v32  ;;  %v9129_v31 = vld [vmem:[%s9374_s24 + $0x16a0] ss:$16 sps:$4 sm:$0xff]   ;;  %v9132_v32 = vld [vmem:[%s9374_s24 + $0x16a8] ss:$16 sps:$4 sm:$0xff]  }
 0x2ab   : > { %5654 = vmatprep.subr.bf16.mxu0 %v9046_v33  ;;  %6187 = vmatprep.subr.bf16.mxu1 %v9049_v25  ;;  %v9137_v33 = vld [vmem:[%s9374_s24 + $0x16c4] ss:$16 sps:$4 sm:$0xff]   ;;  %v9140_v25 = vld [vmem:[%s9374_s24 + $0x16cc] ss:$16 sps:$4 sm:$0xff]  }
 0x2ae   : > { %5655 = vmatpush1.bf16.msra.mxu0 %v9044_v34  ;;  %6188 = vmatpush1.bf16.msra.mxu1 %v9047_v36  ;;  %v9135_v34 = vld [vmem:[%s9374_s24 + $0x16c0] ss:$16 sps:$4 sm:$0xff]   ;;  %v9138_v36 = vld [vmem:[%s9374_s24 + $0x16c8] ss:$16 sps:$4 sm:$0xff]  }
 0x2af   : > { %5656 = vmatprep.subr.bf16.mxu0 %v9052_v37  ;;  %6189 = vmatprep.subr.bf16.mxu1 %v9055_v39  ;;  %v9143_v37 = vld [vmem:[%s9374_s24 + $0x16e4] ss:$16 sps:$4 sm:$0xff]   ;;  %v9146_v39 = vld [vmem:[%s9374_s24 + $0x16ec] ss:$16 sps:$4 sm:$0xff]  }
 0x2b2   : > { %5657 = vmatpush1.bf16.msra.mxu0 %v9050_v40  ;;  %6190 = vmatpush1.bf16.msra.mxu1 %v9053_v21  ;;  %v9141_v40 = vld [vmem:[%s9374_s24 + $0x16e0] ss:$16 sps:$4 sm:$0xff]   ;;  %v9144_v21 = vld [vmem:[%s9374_s24 + $0x16e8] ss:$16 sps:$4 sm:$0xff]  }
 0x2b3   : > { %5658 = vmatprep.subr.bf16.mxu0 %v9058_v41  ;;  %6191 = vmatprep.subr.bf16.mxu1 %v9061_v42  ;;  %v9149_v41 = vld [vmem:[%s9374_s24 + $0x1704] ss:$16 sps:$4 sm:$0xff]   ;;  %v9152_v42 = vld [vmem:[%s9374_s24 + $0x170c] ss:$16 sps:$4 sm:$0xff]  }
 0x2b6   : > { %5659 = vmatpush1.bf16.msra.mxu0 %v9056_v44  ;;  %6192 = vmatpush1.bf16.msra.mxu1 %v9059_v45  ;;  %v9147_v44 = vld [vmem:[%s9374_s24 + $0x1700] ss:$16 sps:$4 sm:$0xff]   ;;  %v9150_v45 = vld [vmem:[%s9374_s24 + $0x1708] ss:$16 sps:$4 sm:$0xff]  }
 0x2b7   : > { %5660 = vmatprep.subr.bf16.mxu0 %v9064_v46  ;;  %6193 = vmatprep.subr.bf16.mxu1 %v9067_v47  ;;  %v9155_v46 = vld [vmem:[%s9374_s24 + $0x1724] ss:$16 sps:$4 sm:$0xff]   ;;  %v9158_v47 = vld [vmem:[%s9374_s24 + $0x172c] ss:$16 sps:$4 sm:$0xff]  }
 0x2ba   : > { %5661 = vmatpush1.bf16.msra.mxu0 %v9062_v50  ;;  %6194 = vmatpush1.bf16.msra.mxu1 %v9065_v53  ;;  %v9153_v50 = vld [vmem:[%s9374_s24 + $0x1720] ss:$16 sps:$4 sm:$0xff]   ;;  %v9156_v53 = vld [vmem:[%s9374_s24 + $0x1728] ss:$16 sps:$4 sm:$0xff]  }
 0x2bb   : > { %5662 = vmatprep.subr.bf16.mxu0 %v9070_v54  ;;  %6195 = vmatprep.subr.bf16.mxu1 %v9073_v55  ;;  %v9161_v54 = vld [vmem:[%s9374_s24 + $0x1744] ss:$16 sps:$4 sm:$0xff]   ;;  %v9164_v55 = vld [vmem:[%s9374_s24 + $0x174c] ss:$16 sps:$4 sm:$0xff]  }
 0x2be   : > { %5663 = vmatpush1.bf16.msra.mxu0 %v9068_v38  ;;  %6196 = vmatpush1.bf16.msra.mxu1 %v9071_v56  ;;  %v9159_v38 = vld [vmem:[%s9374_s24 + $0x1740] ss:$16 sps:$4 sm:$0xff]   ;;  %v9162_v56 = vld [vmem:[%s9374_s24 + $0x1748] ss:$16 sps:$4 sm:$0xff]  }
 0x2bf   : > { %5664 = vmatprep.subr.bf16.mxu0 %v9076_v57  ;;  %6197 = vmatprep.subr.bf16.mxu1 %v9079_v58  ;;  %v9167_v57 = vld [vmem:[%s9374_s24 + $0x1764] ss:$16 sps:$4 sm:$0xff]   ;;  %v9170_v58 = vld [vmem:[%s9374_s24 + $0x176c] ss:$16 sps:$4 sm:$0xff]  }
 0x2c2   : > { %5665 = vmatpush1.bf16.msra.mxu0 %v9074_v48  ;;  %6198 = vmatpush1.bf16.msra.mxu1 %v9077_v59  ;;  %v9165_v48 = vld [vmem:[%s9374_s24 + $0x1760] ss:$16 sps:$4 sm:$0xff]   ;;  %v9168_v59 = vld [vmem:[%s9374_s24 + $0x1768] ss:$16 sps:$4 sm:$0xff]  }
 0x2c3   : > { %5666 = vmatprep.subr.bf16.mxu0 %v9082_v60  ;;  %6199 = vmatprep.subr.bf16.mxu1 %v9085_v13  ;;  %v9173_v60 = vld [vmem:[%s9374_s24 + $0x1784] ss:$16 sps:$4 sm:$0xff]   ;;  %v9176_v13 = vld [vmem:[%s9374_s24 + $0x178c] ss:$16 sps:$4 sm:$0xff]  }
 0x2c6   : > { %5667 = vmatpush1.bf16.msra.mxu0 %v9080_v63  ;;  %6200 = vmatpush1.bf16.msra.mxu1 %v9083_v0  ;;  %v9171_v63 = vld [vmem:[%s9374_s24 + $0x1780] ss:$16 sps:$4 sm:$0xff]   ;;  %v9174_v0 = vld [vmem:[%s9374_s24 + $0x1788] ss:$16 sps:$4 sm:$0xff]  }
 0x2c7   : > { %5668 = vmatprep.subr.bf16.mxu0 %v9088_v35  ;;  %6201 = vmatprep.subr.bf16.mxu1 %v9091_v2  ;;  %v9179_v35 = vld [vmem:[%s9374_s24 + $0x17a4] ss:$16 sps:$4 sm:$0xff]   ;;  %v9182_v2 = vld [vmem:[%s9374_s24 + $0x17ac] ss:$16 sps:$4 sm:$0xff]  }
 0x2ca   : > { %5669 = vmatpush1.bf16.msra.mxu0 %v9086_v3  ;;  %6202 = vmatpush1.bf16.msra.mxu1 %v9089_v51  ;;  %v9177_v3 = vld [vmem:[%s9374_s24 + $0x17a0] ss:$16 sps:$4 sm:$0xff]   ;;  %v9180_v51 = vld [vmem:[%s9374_s24 + $0x17a8] ss:$16 sps:$4 sm:$0xff]  }
 0x2cb   : > { %5670 = vmatprep.subr.bf16.mxu0 %v9094_v4  ;;  %6203 = vmatprep.subr.bf16.mxu1 %v9097_v5  ;;  %v9185_v4 = vld [vmem:[%s9374_s24 + $0x17c4] ss:$16 sps:$4 sm:$0xff]   ;;  %v9188_v5 = vld [vmem:[%s9374_s24 + $0x17cc] ss:$16 sps:$4 sm:$0xff]  }
 0x2ce   : > { %5671 = vmatpush1.bf16.msra.mxu0 %v9092_v6  ;;  %6204 = vmatpush1.bf16.msra.mxu1 %v9095_v61  ;;  %v9183_v6 = vld [vmem:[%s9374_s24 + $0x17c0] ss:$16 sps:$4 sm:$0xff]   ;;  %v9186_v61 = vld [vmem:[%s9374_s24 + $0x17c8] ss:$16 sps:$4 sm:$0xff]  }
 0x2cf   : > { %5681 = vmatprep.subr.bf16.mxu0 %v9101_v7  ;;  %6214 = vmatprep.subr.bf16.mxu1 %v9104_v8  ;;  %v9191_v7 = vld [vmem:[%s9374_s24 + $0x17e4] ss:$16 sps:$4 sm:$0xff]   ;;  %v9194_v8 = vld [vmem:[%s9374_s24 + $0x17ec] ss:$16 sps:$4 sm:$0xff]  }
 0x2d1   : > { %5673 = vmatmul.mubr.bf16.vlgmr.msra.gmra.mrb[0].mxu0 %v10207_v62  ;;  %6206 = vmatmul.mubr.bf16.vlgmr.msra.gmra.mrb[0].mxu1 %v10207_v62 }
 0x2d2   : > { %5682 = vmatpush1.bf16.msra.mxu0 %v9099_v10  ;;  %6215 = vmatpush1.bf16.msra.mxu1 %v9102_v11  ;;  %v9189_v10 = vld [vmem:[%s9374_s24 + $0x17e0] ss:$16 sps:$4 sm:$0xff]   ;;  %v9192_v11 = vld [vmem:[%s9374_s24 + $0x17e8] ss:$16 sps:$4 sm:$0xff]  }
 0x2d3   : > { %5683 = vmatprep.subr.bf16.mxu0 %v9107_v12  ;;  %6216 = vmatprep.subr.bf16.mxu1 %v9110_v14  ;;  %v9197_v12 = vld [vmem:[%s9374_s24 + $0x1804] ss:$16 sps:$4 sm:$0xff]   ;;  %v9200_v14 = vld [vmem:[%s9374_s24 + $0x180c] ss:$16 sps:$4 sm:$0xff]  }
 0x2d4   : > { %5713 = vmatprep.mubr.bf16.mxu0 %v1190_v16  ;;  %6246 = vmatprep.mubr.bf16.mxu1 %v1190_v16  ;;  %v1188_v16 = vcombine.high %v10207_v62, %v10207_v62  ;;  %v9204_v62 = vld [vmem:[%s9374_s24 + $0x1828] ss:$16 sps:$4 sm:$0xff]  }
 0x2d6   : > { %5684 = vmatpush1.bf16.msra.mxu0 %v9105_v1  ;;  %6217 = vmatpush1.bf16.msra.mxu1 %v9108_v52  ;;  %v9195_v1 = vld [vmem:[%s9374_s24 + $0x1800] ss:$16 sps:$4 sm:$0xff]   ;;  %v9198_v52 = vld [vmem:[%s9374_s24 + $0x1808] ss:$16 sps:$4 sm:$0xff]  }
 0x2d7   : > { %5685 = vmatprep.subr.bf16.mxu0 %v9113_v17  ;;  %6218 = vmatprep.subr.bf16.mxu1 %v9116_v18  ;;  %v9203_v17 = vld [vmem:[%s9374_s24 + $0x1824] ss:$16 sps:$4 sm:$0xff]   ;;  %v9206_v18 = vld [vmem:[%s9374_s24 + $0x182c] ss:$16 sps:$4 sm:$0xff]  }
 0x2da   : > { %5686 = vmatpush1.bf16.msra.mxu0 %v9111_v9  ;;  %6219 = vmatpush1.bf16.msra.mxu1 %v9114_v19  ;;  %v9201_v9 = vld [vmem:[%s9374_s24 + $0x1820] ss:$16 sps:$4 sm:$0xff]   ;;  %v9209_v19 = vld [vmem:[%s9374_s24 + $0x1844] ss:$16 sps:$4 sm:$0xff]  }
 0x2db   : > { %5687 = vmatprep.subr.bf16.mxu0 %v9119_v20  ;;  %6220 = vmatprep.subr.bf16.mxu1 %v9122_v22  ;;  %v9212_v20 = vld [vmem:[%s9374_s24 + $0x184c] ss:$16 sps:$4 sm:$0xff]   ;;  %v9325_v22 = vmov 0  }
 0x2de   : > { %5688 = vmatpush1.bf16.msra.mxu0 %v9117_v23  ;;  %6221 = vmatpush1.bf16.msra.mxu1 %v9120_v24  ;;  %v9207_v23 = vld [vmem:[%s9374_s24 + $0x1840] ss:$16 sps:$4 sm:$0xff]   ;;  %v9210_v24 = vld [vmem:[%s9374_s24 + $0x1848] ss:$16 sps:$4 sm:$0xff]  }
 0x2df   : > { %5689 = vmatprep.subr.bf16.mxu0 %v9125_v26  ;;  %6222 = vmatprep.subr.bf16.mxu1 %v9128_v27  ;;  %v9215_v26 = vld [vmem:[%s9374_s24 + $0x1864] ss:$16 sps:$4 sm:$0xff]   ;;  %v9218_v27 = vld [vmem:[%s9374_s24 + $0x186c] ss:$16 sps:$4 sm:$0xff]  }
 0x2e2   : > { %5690 = vmatpush1.bf16.msra.mxu0 %v9123_v28  ;;  %6223 = vmatpush1.bf16.msra.mxu1 %v9126_v29  ;;  %v9213_v28 = vld [vmem:[%s9374_s24 + $0x1860] ss:$16 sps:$4 sm:$0xff]   ;;  %v9216_v29 = vld [vmem:[%s9374_s24 + $0x1868] ss:$16 sps:$4 sm:$0xff]  }
 0x2e3   : > { %5691 = vmatprep.subr.bf16.mxu0 %v9131_v30  ;;  %6224 = vmatprep.subr.bf16.mxu1 %v9134_v15  ;;  %v9221_v30 = vld [vmem:[%s9374_s24 + $0x1884] ss:$16 sps:$4 sm:$0xff]   ;;  %v9224_v15 = vld [vmem:[%s9374_s24 + $0x188c] ss:$16 sps:$4 sm:$0xff]  }
 0x2e6   : > { %5692 = vmatpush1.bf16.msra.mxu0 %v9129_v31  ;;  %6225 = vmatpush1.bf16.msra.mxu1 %v9132_v32  ;;  %v9219_v31 = vld [vmem:[%s9374_s24 + $0x1880] ss:$16 sps:$4 sm:$0xff]   ;;  %v9222_v32 = vld [vmem:[%s9374_s24 + $0x1888] ss:$16 sps:$4 sm:$0xff]  }
 0x2e7   : > { %5693 = vmatprep.subr.bf16.mxu0 %v9137_v33  ;;  %6226 = vmatprep.subr.bf16.mxu1 %v9140_v25  ;;  %v9227_v33 = vld [vmem:[%s9374_s24 + $0x18a4] ss:$16 sps:$4 sm:$0xff]   ;;  %v9230_v25 = vld [vmem:[%s9374_s24 + $0x18ac] ss:$16 sps:$4 sm:$0xff]  }
 0x2ea   : > { %5694 = vmatpush1.bf16.msra.mxu0 %v9135_v34  ;;  %6227 = vmatpush1.bf16.msra.mxu1 %v9138_v36  ;;  %v9225_v34 = vld [vmem:[%s9374_s24 + $0x18a0] ss:$16 sps:$4 sm:$0xff]   ;;  %v9228_v36 = vld [vmem:[%s9374_s24 + $0x18a8] ss:$16 sps:$4 sm:$0xff]  }
 0x2eb   : > { %5695 = vmatprep.subr.bf16.mxu0 %v9143_v37  ;;  %6228 = vmatprep.subr.bf16.mxu1 %v9146_v39  ;;  %v9233_v37 = vld [vmem:[%s9374_s24 + $0x18c4] ss:$16 sps:$4 sm:$0xff]   ;;  %v9236_v39 = vld [vmem:[%s9374_s24 + $0x18cc] ss:$16 sps:$4 sm:$0xff]  }
 0x2ee   : > { %5696 = vmatpush1.bf16.msra.mxu0 %v9141_v40  ;;  %6229 = vmatpush1.bf16.msra.mxu1 %v9144_v21  ;;  %v9231_v40 = vld [vmem:[%s9374_s24 + $0x18c0] ss:$16 sps:$4 sm:$0xff]   ;;  %v9234_v21 = vld [vmem:[%s9374_s24 + $0x18c8] ss:$16 sps:$4 sm:$0xff]  }
 0x2ef   : > { %5697 = vmatprep.subr.bf16.mxu0 %v9149_v41  ;;  %6230 = vmatprep.subr.bf16.mxu1 %v9152_v42  ;;  %v9239_v41 = vld [vmem:[%s9374_s24 + $0x18e4] ss:$16 sps:$4 sm:$0xff]   ;;  %v9242_v42 = vld [vmem:[%s9374_s24 + $0x18ec] ss:$16 sps:$4 sm:$0xff]  }
 0x2f2   : > { %5698 = vmatpush1.bf16.msra.mxu0 %v9147_v44  ;;  %6231 = vmatpush1.bf16.msra.mxu1 %v9150_v45  ;;  %v9237_v44 = vld [vmem:[%s9374_s24 + $0x18e0] ss:$16 sps:$4 sm:$0xff]   ;;  %v9240_v45 = vld [vmem:[%s9374_s24 + $0x18e8] ss:$16 sps:$4 sm:$0xff]  }
 0x2f3   : > { %5699 = vmatprep.subr.bf16.mxu0 %v9155_v46  ;;  %6232 = vmatprep.subr.bf16.mxu1 %v9158_v47  ;;  %v7037_v46 = vld.sshfl [vmem:[%s9426_s28 + $0x18] sm:$0x1 pattern:$0x75316420] }
 0x2f4   : > { %v1204_v47 = vrot.slane %v7037_v46, %v9429_v49 }
 0x2f6   : > { %5700 = vmatpush1.bf16.msra.mxu0 %v9153_v50  ;;  %6233 = vmatpush1.bf16.msra.mxu1 %v9156_v53 }
 0x2f7   : > { %5701 = vmatprep.subr.bf16.mxu0 %v9161_v54  ;;  %6234 = vmatprep.subr.bf16.mxu1 %v9164_v55 }
 0x2fa   : > { %5702 = vmatpush1.bf16.msra.mxu0 %v9159_v38  ;;  %6235 = vmatpush1.bf16.msra.mxu1 %v9162_v56 }
 0x2fb   : > { %5703 = vmatprep.subr.bf16.mxu0 %v9167_v57  ;;  %6236 = vmatprep.subr.bf16.mxu1 %v9170_v58 }
 0x2fe   : > { %5704 = vmatpush1.bf16.msra.mxu0 %v9165_v48  ;;  %6237 = vmatpush1.bf16.msra.mxu1 %v9168_v59  ;;  %v9326_v48 = vmov (!%p7838_p5), 1983009808  }
 0x2ff   : > { %5705 = vmatprep.subr.bf16.mxu0 %v9173_v60  ;;  %6238 = vmatprep.subr.bf16.mxu1 %v9176_v13  ;;  %v6307_v59 = vunpack.c.l.s4 (!%p7838_p5), %v9326_v48 }
 0x302   : > { %5706 = vmatpush1.bf16.msra.mxu0 %v9171_v63  ;;  %6239 = vmatpush1.bf16.msra.mxu1 %v9174_v0  ;;  %v6308_v63 = vunpack.c.0.s8 (!%p7838_p5), %v6307_v59 }
 0x303   : > { %5707 = vmatprep.subr.bf16.mxu0 %v9179_v35  ;;  %6240 = vmatprep.subr.bf16.mxu1 %v9182_v2 }
 0x304   : > { %v6311_v0 = vsub.s32 (!%p7838_p5), %v6308_v63, %v9416_v43 }
 0x306   : > { %5708 = vmatpush1.bf16.msra.mxu0 %v9177_v3  ;;  %6241 = vmatpush1.bf16.msra.mxu1 %v9180_v51 }
 0x307   : > { %5709 = vmatprep.subr.bf16.mxu0 %v9185_v4  ;;  %6242 = vmatprep.subr.bf16.mxu1 %v9188_v5 }
 0x30a   : > { %5710 = vmatpush1.bf16.msra.mxu0 %v9183_v6  ;;  %6243 = vmatpush1.bf16.msra.mxu1 %v9186_v61 }
 0x30b   : > { %5711 = vmatprep.subr.bf16.mxu0 %v9191_v7  ;;  %6244 = vmatprep.subr.bf16.mxu1 %v9194_v8 }
 0x30e   : > { %5712 = vmatpush1.bf16.msra.mxu0 %v9189_v10  ;;  %6245 = vmatpush1.bf16.msra.mxu1 %v9192_v11 }
 0x30f   : > { %5722 = vmatprep.subr.bf16.mxu0 %v9197_v12  ;;  %6255 = vmatprep.subr.bf16.mxu1 %v9200_v14 }
 0x311   : > { %5714 = vmatmul.mubr.bf16.vlgmr.msra.gmra.mrb[0].mxu0 %v1188_v16  ;;  %6247 = vmatmul.mubr.bf16.vlgmr.msra.gmra.mrb[0].mxu1 %v1188_v16 }
 0x312   : > { %5723 = vmatpush1.bf16.msra.mxu0 %v9195_v1  ;;  %6256 = vmatpush1.bf16.msra.mxu1 %v9198_v52 }
 0x313   : > { %5724 = vmatprep.subr.bf16.mxu0 %v9203_v17  ;;  %6257 = vmatprep.subr.bf16.mxu1 %v9206_v18 }
 0x314   : > { %5754 = vmatprep.mubr.bf16.mxu0 %v9325_v22  ;;  %6287 = vmatprep.mubr.bf16.mxu1 %v9325_v22 }
 0x316   : > { %5725 = vmatpush1.bf16.msra.mxu0 %v9201_v9  ;;  %6258 = vmatpush1.bf16.msra.mxu1 %v9204_v62 }
 0x317   : > { %5726 = vmatprep.subr.bf16.mxu0 %v9209_v19  ;;  %6259 = vmatprep.subr.bf16.mxu1 %v9212_v20 }
 0x31a   : > { %5727 = vmatpush1.bf16.msra.mxu0 %v9207_v23  ;;  %6260 = vmatpush1.bf16.msra.mxu1 %v9210_v24 }
 0x31b   : > { %5728 = vmatprep.subr.bf16.mxu0 %v9215_v26  ;;  %6261 = vmatprep.subr.bf16.mxu1 %v9218_v27 }
 0x31e   : > { %5729 = vmatpush1.bf16.msra.mxu0 %v9213_v28  ;;  %6262 = vmatpush1.bf16.msra.mxu1 %v9216_v29 }
 0x31f   : > { %5730 = vmatprep.subr.bf16.mxu0 %v9221_v30  ;;  %6263 = vmatprep.subr.bf16.mxu1 %v9224_v15 }
 0x322   : > { %5731 = vmatpush1.bf16.msra.mxu0 %v9219_v31  ;;  %6264 = vmatpush1.bf16.msra.mxu1 %v9222_v32 }
 0x323   : > { %5732 = vmatprep.subr.bf16.mxu0 %v9227_v33  ;;  %6265 = vmatprep.subr.bf16.mxu1 %v9230_v25 }
 0x326   : > { %5733 = vmatpush1.bf16.msra.mxu0 %v9225_v34  ;;  %6266 = vmatpush1.bf16.msra.mxu1 %v9228_v36 }
 0x327   : > { %5734 = vmatprep.subr.bf16.mxu0 %v9233_v37  ;;  %6267 = vmatprep.subr.bf16.mxu1 %v9236_v39 }
 0x32a   : > { %5735 = vmatpush1.bf16.msra.mxu0 %v9231_v40  ;;  %6268 = vmatpush1.bf16.msra.mxu1 %v9234_v21 }
 0x32b   : > { %5736 = vmatprep.subr.bf16.mxu0 %v9239_v41  ;;  %6269 = vmatprep.subr.bf16.mxu1 %v9242_v42 }
 0x32e   : > { %5737 = vmatpush1.bf16.msra.mxu0 %v9237_v44  ;;  %6270 = vmatpush1.bf16.msra.mxu1 %v9240_v45 }
 0x331   : > { %5755 = vmatmul.mubr.bf16.vlgmr.msra.gmra.mrb[0].mxu0 %v1204_v47  ;;  %6288 = vmatmul.mubr.bf16.vlgmr.msra.gmra.mrb[0].mxu1 %v1204_v47 }
 0x401   : > { %6299 = sbr.rel (%p7838_p5) target bundleno = 1037 (0x40d), region = 44 }
 0x404   : > { %v5756_v50 = vpop.f32.mrb[0].mxu0  ;;  %v6289_v53 = vpop.f32.mrb[0].mxu1 }
 0x405   : > { %v5758_v54 = vpop.f32.mrb[1].mxu0  ;;  %v6291_v55 = vpop.f32.mrb[1].mxu1 }
 0x406   : > { %v5760_v38 = vpop.f32.mrb[2].mxu0  ;;  %v6293_v56 = vpop.f32.mrb[2].mxu1  ;;  %v6304_v60 = vcombine.low (!%p7838_p5), %v5756_v50, %v5758_v54  ;;  %v6305_v13 = vcombine.low (!%p7838_p5), %v6289_v53, %v6291_v55 }
 0x407   : > { %v5761_v57 = vpop.f32.mrb[3].mxu0  ;;  %v6294_v58 = vpop.f32.mrb[3].mxu1 }
 0x408   : > { %v6312_v35 = vrot.slane %v6304_v60, %v6311_v0  ;;  %v6319_v2 = vrot.slane %v6305_v13, %v6311_v0 }
 0x40a   : > { %v6320_v3 = vcombine.low %v6312_v35, %v6319_v2 }
 0x40c   : > { %6322 = vst [vmem:[#allocation2] sm:$0xff] %v6320_v3 }
 0x40d PF: > { %p7839_p6 = scmp.le.s32.totalorder %s9366_s19, 0 }
 0x40e   : > { %v9327_v51 = vmov (!%p7839_p6), 1983009808   ;;  %v6332_v5 = vcombine.low (!%p7839_p6), %v5756_v50, %v5758_v54  ;;  %v6333_v6 = vcombine.low (!%p7839_p6), %v6289_v53, %v6291_v55 }
 0x40f   : > { %6326 = sbr.rel (%p7839_p6) target bundleno = 1052 (0x41c), region = 48  ;;  %v6335_v4 = vunpack.c.l.s4 (!%p7839_p6), %v9327_v51 }
 0x411   : > { %v6336_v61 = vunpack.c.0.s8 (!%p7839_p6), %v6335_v4 }
 0x413   : > { %v6339_v7 = vsub.s32 (!%p7839_p6), %v6336_v61, %v9416_v43  ;;  %v6327_v11 = vld [vmem:[#allocation2] sm:$0xff] (!%p7839_p6) }
 0x415   : > { %v6340_v8 = vrot.slane (!%p7839_p6), %v6332_v5, %v6339_v7  ;;  %v6347_v10 = vrot.slane (!%p7839_p6), %v6333_v6, %v6339_v7 }
 0x417   : > { %v6348_v12 = vcombine.low %v6340_v8, %v6347_v10 }
 0x419   : > { %v6350_v14 = vadd.f32 %v6348_v12, %v6327_v11 }
 0x41b   : > { %6351 = vst [vmem:[#allocation2] sm:$0xff] %v6350_v14 }
 0x41c PF: > { %p7840_p7 = scmp.ne.s32.totalorder %s9366_s19, 1 }
 0x41d   : > { %v9244_v16 = vld [vmem:[%s10485_s3 + $0x40] sm:$0xff] (!%p7840_p7)   ;;  %v9248_v18 = vld [vmem:[%s10485_s3 + $0x48] sm:$0xff] (!%p7840_p7)   ;;  %v9252_v20 = vld [vmem:[%s10485_s3 + $0x50] sm:$0xff] (!%p7840_p7)   ;;  %v9328_v46 = vmov (!%p7840_p7), 1983009808   ;;  %vm6379_vm0 = vcmask (!%p7840_p7), 1041408  }
 0x41e   : > { %6355 = sbr.rel (%p7840_p7) target bundleno = 1378 (0x562), region = 52  ;;  %v9245_v1 = vld [vmem:[%s10485_s3] sm:$0xff] (!%p7840_p7)   ;;  %7880 = vmatprep.subr.bf16.mxu0 (!%p7840_p7), %v9244_v16  ;;  %v9249_v9 = vld [vmem:[%s10485_s3 + $0x8] sm:$0xff] (!%p7840_p7)   ;;  %v9253_v22 = vld [vmem:[%s10485_s3 + $0x10] sm:$0xff] (!%p7840_p7)   ;;  %v6360_v47 = vunpack.c.l.s4 (!%p7840_p7), %v9328_v46  ;;  %vm6974_vm1 = vcmask (!%p7840_p7), 517120  }
 0x41f   : > { %v9246_v52 = vld [vmem:[%s10485_s3 + $0xc0] sm:$0xff] (!%p7840_p7)   ;;  %7881 = vmatpush3.bf16.msra.mxu0 (!%p7840_p7), %v9245_v1  ;;  %v9250_v62 = vld [vmem:[%s10485_s3 + $0xc8] sm:$0xff] (!%p7840_p7)   ;;  %v9254_v23 = vld [vmem:[%s10485_s3 + $0xd0] sm:$0xff] (!%p7840_p7)  }
 0x420   : > { %v9247_v17 = vld [vmem:[%s10485_s3 + $0x80] sm:$0xff] (!%p7840_p7)   ;;  %7902 = vmatprep.subr.bf16.mxu1 (!%p7840_p7), %v9246_v52  ;;  %7882 = vmatprep.subr.bf16.mxu0 (!%p7840_p7), %v9248_v18  ;;  %v9251_v19 = vld [vmem:[%s10485_s3 + $0x88] sm:$0xff] (!%p7840_p7)   ;;  %v9255_v24 = vld [vmem:[%s10485_s3 + $0x90] sm:$0xff] (!%p7840_p7)   ;;  %v6361_v54 = vunpack.c.0.s8 (!%p7840_p7), %v6360_v47 }
 0x421   : > { %7903 = vmatpush3.bf16.msra.mxu1 (!%p7840_p7), %v9247_v17  ;;  %v9256_v26 = vld [vmem:[%s10485_s3 + $0x58] sm:$0xff] (!%p7840_p7)   ;;  %v9260_v30 = vld [vmem:[%s10485_s3 + $0x60] sm:$0xff] (!%p7840_p7)   ;;  %v9264_v33 = vld [vmem:[%s10485_s3 + $0x68] sm:$0xff] (!%p7840_p7)  }
 0x422   : > { %7904 = vmatprep.subr.bf16.mxu1 (!%p7840_p7), %v9250_v62  ;;  %v9257_v27 = vld [vmem:[%s10485_s3 + $0x18] sm:$0xff] (!%p7840_p7)   ;;  %v9261_v15 = vld [vmem:[%s10485_s3 + $0x20] sm:$0xff] (!%p7840_p7)   ;;  %v9265_v25 = vld [vmem:[%s10485_s3 + $0x28] sm:$0xff] (!%p7840_p7)   ;;  %v10413_v55 = vsub.s32 (!%p7840_p7), %v6361_v54, %v9416_v43 }
 0x423   : > { %7883 = vmatpush3.bf16.msra.mxu0 (!%p7840_p7), %v9249_v9  ;;  %v9258_v28 = vld [vmem:[%s10485_s3 + $0xd8] sm:$0xff] (!%p7840_p7)   ;;  %v9262_v31 = vld [vmem:[%s10485_s3 + $0xe0] sm:$0xff] (!%p7840_p7)   ;;  %v9266_v34 = vld [vmem:[%s10485_s3 + $0xe8] sm:$0xff] (!%p7840_p7)  }
 0x424   : > { %7884 = vmatprep.subr.bf16.mxu0 (!%p7840_p7), %v9252_v20  ;;  %v9259_v29 = vld [vmem:[%s10485_s3 + $0x98] sm:$0xff] (!%p7840_p7)   ;;  %v9263_v32 = vld [vmem:[%s10485_s3 + $0xa0] sm:$0xff] (!%p7840_p7)   ;;  %v9267_v36 = vld [vmem:[%s10485_s3 + $0xa8] sm:$0xff] (!%p7840_p7)  }
 0x425   : > { %7905 = vmatpush3.bf16.msra.mxu1 %v9251_v19  ;;  %v9268_v37 = vld [vmem:[%s10485_s3 + $0x70] sm:$0xff]   ;;  %v9272_v41 = vld [vmem:[%s10485_s3 + $0x78] sm:$0xff]   ;;  %v6356_v45 = vld [vmem:[#allocation2] sm:$0xff] }
 0x426   : > { %7906 = vmatprep.subr.bf16.mxu1 %v9254_v23  ;;  %v9269_v39 = vld [vmem:[%s10485_s3 + $0x30] sm:$0xff]   ;;  %v9273_v42 = vld [vmem:[%s10485_s3 + $0x38] sm:$0xff]   ;;  %v6358_v53 = vcombine.high %v6356_v45, %v6356_v45  ;;  %v6365_v38 = vrot.slane %v6356_v45, %v10413_v55 }
 0x427   : > { %7885 = vmatpush3.bf16.msra.mxu0 %v9253_v22  ;;  %v9270_v40 = vld [vmem:[%s10485_s3 + $0xf0] sm:$0xff]   ;;  %v9274_v44 = vld [vmem:[%s10485_s3 + $0xf8] sm:$0xff]  }
 0x428   : > { %7886 = vmatprep.subr.bf16.mxu0 %v9256_v26  ;;  %v9271_v21 = vld [vmem:[%s10485_s3 + $0xb0] sm:$0xff]   ;;  %v9276_v50 = vld [vmem:[%s10485_s3 + $0xb8] sm:$0xff]   ;;  %v6372_v56 = vrot.slane %v6358_v53, %v10413_v55  ;;  %v6373_v57 = vcombine.high %v6365_v38, %v6365_v38  ;;  %v6380_v48 = vsel %vm6379_vm0, %v6365_v38, 0.0 }
 0x429   : > { %7907 = vmatpush3.bf16.msra.mxu1 %v9255_v24  ;;  %v6381_v60 = vrot.slane %v6380_v48, 4 }
 0x42a   : > { %7908 = vmatprep.subr.bf16.mxu1 %v9258_v28  ;;  %v6374_v58 = vcombine.high %v6372_v56, %v6372_v56  ;;  %v6394_v59 = vsel %vm6379_vm0, %v6372_v56, 0.0  ;;  %v6387_v63 = vsel %vm6379_vm0, %v6373_v57, 0.0 }
 0x42b   : > { %7887 = vmatpush3.bf16.msra.mxu0 %v9257_v27  ;;  %v6395_v13 = vrot.slane %v6394_v59, 4  ;;  %v6382_v35 = vadd.f32 %v6381_v60, %v6380_v48  ;;  %v6388_v2 = vrot.slane %v6387_v63, 4 }
 0x42c   : > { %7888 = vmatprep.subr.bf16.mxu0 %v9260_v30  ;;  %v6401_v0 = vsel %vm6379_vm0, %v6374_v58, 0.0 }
 0x42d   : > { %7909 = vmatpush3.bf16.msra.mxu1 %v9259_v29  ;;  %v6396_v3 = vadd.f32 %v6395_v13, %v6394_v59  ;;  %v6402_v51 = vrot.slane %v6401_v0, 4  ;;  %v6383_v4 = vrot.slane %v6382_v35, 2  ;;  %v6389_v5 = vadd.f32 %v6388_v2, %v6387_v63 }
 0x42e   : > { %7910 = vmatprep.subr.bf16.mxu1 %v9262_v31 }
 0x42f   : > { %7889 = vmatpush3.bf16.msra.mxu0 %v9261_v15  ;;  %v6397_v6 = vrot.slane %v6396_v3, 2  ;;  %v6403_v61 = vadd.f32 %v6402_v51, %v6401_v0  ;;  %v6384_v7 = vadd.f32 %v6383_v4, %v6382_v35  ;;  %v6390_v8 = vrot.slane %v6389_v5, 2 }
 0x430   : > { %7890 = vmatprep.subr.bf16.mxu0 %v9264_v33 }
 0x431   : > { %7911 = vmatpush3.bf16.msra.mxu1 %v9263_v32  ;;  %v6398_v10 = vadd.f32 %v6397_v6, %v6396_v3  ;;  %v6404_v11 = vrot.slane %v6403_v61, 2  ;;  %v6385_v12 = vrot.slane %v6384_v7, 1  ;;  %v6391_v14 = vadd.f32 %v6390_v8, %v6389_v5 }
 0x432   : > { %7912 = vmatprep.subr.bf16.mxu1 %v9266_v34 }
 0x433   : > { %7891 = vmatpush3.bf16.msra.mxu0 %v9265_v25  ;;  %v6399_v16 = vrot.slane %v6398_v10, 1  ;;  %v6405_v1 = vadd.f32 %v6404_v11, %v6403_v61  ;;  %v6386_v52 = vadd.f32 %v6385_v12, %v6384_v7  ;;  %v6392_v17 = vrot.slane %v6391_v14, 1 }
 0x434   : > { %7892 = vmatprep.subr.bf16.mxu0 %v9268_v37 }
 0x435   : > { %7913 = vmatpush3.bf16.msra.mxu1 %v9267_v36  ;;  %v6400_v18 = vadd.f32 %v6399_v16, %v6398_v10  ;;  %v6406_v9 = vrot.slane %v6405_v1, 1  ;;  %v6393_v62 = vadd.f32 %v6392_v17, %v6391_v14  ;;  %v6409_v20 = vmul.f32 0.5, %v6386_v52 }
 0x436   : > { %7914 = vmatprep.subr.bf16.mxu1 %v9270_v40 }
 0x437   : > { %7893 = vmatpush3.bf16.msra.mxu0 %v9269_v39  ;;  %v6407_v19 = vadd.f32 %v6406_v9, %v6405_v1  ;;  %v6411_v22 = vmul.f32 0.5, %v6400_v18  ;;  %v6410_v23 = vmul.f32 0.5, %v6393_v62  ;;  %v7841_v62 = vld [vmem:[%s10484_s2 + $0x1] ss:$2 sm:$0xf] }
 0x438   : > { %7894 = vmatprep.subr.bf16.mxu0 %v9272_v41 }
 0x439   : > { %7915 = vmatpush3.bf16.msra.mxu1 %v9271_v21  ;;  %v6412_v24 = vmul.f32 0.5, %v6407_v19  ;;  %v6417_v26 = vcombine.low %v6409_v20, %v6410_v23  ;;  %v6533_v19 = vsub.s32 0, %v9416_v43  ;;  %v6541_v23 = vsub.s32 2, %v9416_v43 }
 0x43a   : > { %7916 = vmatprep.subr.bf16.mxu1 %v9274_v44 }
 0x43b   : > { %7895 = vmatpush3.bf16.msra.mxu0 %v9273_v42  ;;  %v6418_v27 = vcombine.low %v6411_v22, %v6412_v24  ;;  %v6425_v28 = vrot.slane %v6417_v26, %v10413_v55  ;;  %v6537_v22 = vsub.s32 1, %v9416_v43  ;;  %v6545_v24 = vsub.s32 3, %v9416_v43 }
 0x43c   : > { %v6572_v26 = vrot.slane %v7841_v62, %v6533_v19 }
 0x43d   : > { %7917 = vmatpush3.bf16.msra.mxu1 %v9276_v50  ;;  %v6432_v29 = vrot.slane %v6418_v27, %v10413_v55 }
 0x43f   : > { %v6433_v30 = vcombine.low %v6425_v28, %v6432_v29  ;;  %v6576_v28 = vrot.slane %v7841_v62, %v6537_v22  ;;  %v6580_v29 = vrot.slane %v7841_v62, %v6541_v23 }
 0x441   : > { %v10423_v15 = vsub.f32 %v6356_v45, %v6433_v30  ;;  %v6584_v30 = vrot.slane %v7841_v62, %v6545_v24 }
 0x443   : > { %v6436_v31 = vmul.f32 %v10423_v15, %v10423_v15 }
 0x445   : > { %v6438_v32 = vcombine.high %v6436_v31, %v6436_v31  ;;  %v6445_v33 = vrot.slane %v6436_v31, %v10413_v55  ;;  %v6491_v31 = vld [vmem:[%s10484_s2] ss:$2 sm:$0xf] }
 0x447   : > { %v6452_v25 = vrot.slane %v6438_v32, %v10413_v55  ;;  %v6453_v34 = vcombine.high %v6445_v33, %v6445_v33  ;;  %v6459_v36 = vsel %vm6379_vm0, %v6445_v33, 0.0 }
 0x448   : > { %v6460_v37 = vrot.slane %v6459_v36, 4 }
 0x449   : > { %v6454_v39 = vcombine.high %v6452_v25, %v6452_v25  ;;  %v6466_v40 = vsel %vm6379_vm0, %v6453_v34, 0.0  ;;  %v6473_v21 = vsel %vm6379_vm0, %v6452_v25, 0.0  ;;  %v6585_v25 = vcombine.low %v6572_v26, %v6576_v28 }
 0x44a   : > { %v6461_v41 = vadd.f32 %v6460_v37, %v6459_v36  ;;  %v6467_v42 = vrot.slane %v6466_v40, 4  ;;  %v6474_v44 = vrot.slane %v6473_v21, 4  ;;  %v6586_v34 = vcombine.low %v6580_v29, %v6584_v30 }
 0x44b   : > { %v6480_v45 = vsel %vm6379_vm0, %v6454_v39, 0.0 }
 0x44c   : > { %v6462_v46 = vrot.slane %v6461_v41, 2  ;;  %v6468_v47 = vadd.f32 %v6467_v42, %v6466_v40  ;;  %v6475_v50 = vadd.f32 %v6474_v44, %v6473_v21  ;;  %v6481_v53 = vrot.slane %v6480_v45, 4 }
 0x44d   : > { %v6600_v42 = vrot.slane %v6586_v34, %v10413_v55 }
 0x44e   : > { %v6463_v54 = vadd.f32 %v6462_v46, %v6461_v41  ;;  %v6469_v38 = vrot.slane %v6468_v47, 2  ;;  %v6476_v56 = vrot.slane %v6475_v50, 2  ;;  %v6482_v57 = vadd.f32 %v6481_v53, %v6480_v45 }
 0x44f   : > { %v6593_v41 = vrot.slane %v6585_v25, %v10413_v55 }
 0x450   : > { %v6464_v58 = vrot.slane %v6463_v54, 1  ;;  %v6470_v48 = vadd.f32 %v6469_v38, %v6468_v47  ;;  %v6477_v59 = vadd.f32 %v6476_v56, %v6475_v50  ;;  %v6483_v60 = vrot.slane %v6482_v57, 2 }
 0x451   : > { %v6601_v47 = vcombine.low %v6593_v41, %v6600_v42 }
 0x452   : > { %v6465_v13 = vadd.f32 %v6464_v58, %v6463_v54  ;;  %v6471_v63 = vrot.slane %v6470_v48, 1  ;;  %v6478_v0 = vrot.slane %v6477_v59, 1  ;;  %v6484_v35 = vadd.f32 %v6483_v60, %v6482_v57 }
 0x454   : > { %v6472_v2 = vadd.f32 %v6471_v63, %v6470_v48  ;;  %v6479_v3 = vadd.f32 %v6478_v0, %v6477_v59  ;;  %v6485_v51 = vrot.slane %v6484_v35, 1  ;;  %v6487_v4 = vmul.f32 0.5, %v6465_v13 }
 0x456   : > { %v6486_v5 = vadd.f32 %v6485_v51, %v6484_v35  ;;  %v6488_v6 = vmul.f32 0.5, %v6472_v2  ;;  %v6489_v61 = vmul.f32 0.5, %v6479_v3  ;;  %v6492_v7 = vadd.f32 1e-05, %v6487_v4 }
 0x458   : > { %v6490_v8 = vmul.f32 0.5, %v6486_v5  ;;  %v6493_v10 = vadd.f32 1e-05, %v6488_v6  ;;  %v6494_v11 = vadd.f32 1e-05, %v6489_v61  ;;  %9277 = vrsqrt.f32 %v6492_v7 }
 0x45a   : > { %v6495_v12 = vadd.f32 1e-05, %v6490_v8  ;;  %9279 = vrsqrt.f32 %v6493_v10 }
 0x45b   : > { %9281 = vrsqrt.f32 %v6494_v11 }
 0x45c   : > { %9283 = vrsqrt.f32 %v6495_v12 }
 0x462   : > { %v9278_v14 = vpop.eup %9277 }
 0x464   : > { %v9280_v16 = vpop.eup %9279 }
 0x465   : > { %v9282_v1 = vpop.eup %9281  ;;  %v6504_v52 = vcombine.low %v9278_v14, %v9280_v16 }
 0x466   : > { %v9284_v17 = vpop.eup %9283 }
 0x467   : > { %v6505_v18 = vcombine.low %v9282_v1, %v9284_v17  ;;  %v6512_v9 = vrot.slane %v6504_v52, %v9429_v49 }
 0x469   : > { %v6519_v20 = vrot.slane %v6505_v18, %v9429_v49 }
 0x46b   : > { %v6520_v27 = vcombine.low %v6512_v9, %v6519_v20 }
 0x46d   : > { %v6527_v32 = vrot.slane %v6520_v27, %v9429_v49 }
 0x46f   : > { %v6529_v33 = vmul.f32 %v6527_v32, %v6491_v31 }
 0x471   : > { %v6534_v36 = vrot.slane %v6529_v33, %v6533_v19  ;;  %v6538_v37 = vrot.slane %v6529_v33, %v6537_v22  ;;  %v6542_v39 = vrot.slane %v6529_v33, %v6541_v23  ;;  %v6546_v40 = vrot.slane %v6529_v33, %v6545_v24 }
 0x473   : > { %v6547_v21 = vcombine.low %v6534_v36, %v6538_v37  ;;  %v6548_v43 = vcombine.low %v6542_v39, %v6546_v40 }
 0x475   : > { %v6555_v44 = vrot.slane %v6547_v21, %v10413_v55  ;;  %v6562_v45 = vrot.slane %v6548_v43, %v10413_v55 }
 0x477   : > { %v6563_v46 = vcombine.low %v6555_v44, %v6562_v45 }
 0x479   : > { %v6565_v49 = vmul.f32 %v6563_v46, %v10423_v15  ;;  %v7842_v15 = vld [vmem:[%s10486_s4] ss:$0 sm:$0xff] }
 0x47b   : > { %v6603_v50 = vadd.f32 %v6601_v47, %v6565_v49 }
 0x47d   : > { %v6604_v53 = vmax.f32 %v6603_v50, 0.0 }
 0x47f   : > { %v6613_v54 = vrot.slane %v6604_v53, %v10413_v55  ;;  %v6606_v38 = vcombine.high %v6604_v53, %v6604_v53 }
 0x481   : > { %v6621_v56 = vcombine.high %v6613_v54, %v6613_v54  ;;  %v6620_v57 = vrot.slane %v6606_v38, %v10413_v55  ;;  %v6627_v58 = vpack.c.bf16 %v6613_v54, %v6613_v54 }
 0x483   : > { %v6628_v48 = vpack.c.bf16 %v6621_v56, %v6621_v56  ;;  %v6622_v59 = vcombine.high %v6620_v57, %v6620_v57  ;;  %v6629_v60 = vpack.c.bf16 %v6620_v57, %v6620_v57 }
 0x485   : > { %6926 = vmatprep.mubr.bf16.mxu0 %v6628_v48  ;;  %v6630_v13 = vpack.c.bf16 %v6622_v59, %v6622_v59 }
 0x486   : > { %6927 = vmatmul.mubr.bf16.vlgmr.msra.gmra.mrb[0].mxu0 %v6627_v58 }
 0x487   : > { %6966 = vmatprep.mubr.bf16.mxu1 %v6630_v13 }
 0x488   : > { %6967 = vmatmul.mubr.bf16.vlgmr.msra.gmra.mrb[0].mxu1 %v6629_v60 }
 0x559   : > { %v7896_v63 = vpop.f32.mrb[0].mxu0 }
 0x55a   : > { %v7897_v0 = vpop.f32.mrb[1].mxu0 }
 0x55b   : > { %v7898_v35 = vadd.f32 %v7897_v0, %v7896_v63  ;;  %v7899_v2 = vpop.f32.mrb[2].mxu0  ;;  %v7918_v3 = vpop.f32.mrb[0].mxu1 }
 0x55c   : > { %v7900_v51 = vpop.f32.mrb[3].mxu0  ;;  %v7919_v55 = vpop.f32.mrb[1].mxu1 }
 0x55d   : > { %v6929_v4 = vadd.f32 %v7898_v35, %v7842_v15  ;;  %v7920_v5 = vadd.f32 %v7919_v55, %v7918_v3  ;;  %v7921_v6 = vpop.f32.mrb[2].mxu1 }
 0x55e   : > { %v7922_v61 = vpop.f32.mrb[3].mxu1 }
 0x55f   : > { %v6969_v7 = vadd.f32 %v7920_v5, %v6929_v4 }
 0x561   : > { %6975 = vst.msk [vmem:[#allocation3] sm:$0x3] %vm6974_vm1, %v6969_v7 }
 0x562 PF: > { %p8024_p8 = scmp.eq.s32.totalorder %s9366_s19, 1  ;;  %s9329_s30 = smov [#allocation3]  }
 0x563   : > { %s6983_s6 = sshll.u32 %s9329_s30, 4  ;;  %s6984_s6 = int_to_ptr.vmem [resolvable:$true] %s6983_s6 }
 0x564   : > { %s9286_s7 = scalar_lea.vmem %s6984_s6, 32  ;;  %p9293_p12 = scmp.lt.s32.totalorder %s6984_s6, %s6984_s6 }
 0x565   : > { %p9287_p9 = scmp.ne.s32.totalorder %s6984_s6, %s9286_s7  ;;  %p9294_p13 = scmp.lt.s32.totalorder %s9286_s7, %s9286_s7 }
 0x567   : > { %p9288_p10 = pnand %p9287_p9, %p8024_p8  ;;  %p9295_p0 = por %p9294_p13, %p9293_p12 }
 0x569   : > { %p9289_p11 = pneg %p9288_p10 }
 0x56b   : > { %p9296_p1 = pnand %p9295_p0, %p9289_p11 }
 0x56d   : > { %9299 = shalt.err (!%p9296_p1)
}
 0x56e   : > { %s9300_s10 = scalar_lea.hbm %s10487_s5, 32 }
 0x56f   : > { %p9301_p2 = scmp.ne.s32.totalorder %s10487_s5, %s9300_s10  ;;  %p9306_p5 = scmp.lt.u32.totalorder %s9300_s10, %s10487_s5 }
 0x571   : > { %p9302_p3 = pnand %p9301_p2, %p8024_p8 }
 0x573   : > { %p9303_p4 = pneg %p9302_p3 }
 0x575   : > { %p9308_p6 = pnand %p9306_p5, %p9303_p4 }
 0x577   : > { %9311 = shalt.err (!%p9308_p6)
}
 0x578   : > { %8021 = dma.vmem_to_hbm [thread:$0]  (%p8024_p8), %s6984_s6, 32, %s10487_s5, [#allocation4]  }
 0x579   : > { %9317 = dma.done.wait (%p8024_p8), [#allocation4], 32  }
 0x57a   : > { %9319 = vsyncadd (%p8024_p8), [#allocation4], 4294967264 }
 0x57b PF: > { %s16_s18 = sadd.s32 1, %s9322_s18  }
 0x57c   : > { %p13_p7 = scmp.ge.s32.totalorder %s16_s18, 4  }
 0x57e   :  { %15 = sbr.rel (!%p13_p7) target bundleno = 1 (0x1), region = 83 }
 0x585   :  { %6996 = vsyncpa [#allocation4], 1 }
 0x586   :  { %6998 = vsyncpa [#allocation4 + $0x1], 1 }

</bundles_post_ra>
